<compile_context>
chip_gen: v6e
topology: v6e:2x2x1
jax: 0.10.0
libtpu: 0.0.40
codegen_flags: <defaults>
</compile_context>

<pallas_src>
import functools

import jax
import jax.numpy as jnp
import numpy as np
from jax import lax
from jax.experimental import pallas as pl
from jax.experimental.pallas import tpu as pltpu


def _sppf_kernel(x_ref, w1_ref, s1_ref, b1_ref, w2_ref, s2_ref, b2_ref,
                 masks_ref, o_ref, *, H, W):
    L = H * W
    cdt = w2_ref.dtype   # matmul compute dtype (bf16)

    # ---- conv1: 1x1 conv (bf16 MXU, f32 accumulate) + folded BN + SiLU -----
    y = jnp.dot(x_ref[...], w1_ref[...], preferred_element_type=jnp.float32)
    y = y * s1_ref[...] + b1_ref[...]
    y = y * jax.nn.sigmoid(y)                     # SiLU, f32   (L, C1)

    def pool(a):
        # 5x5, stride-1, pad-2 maxpool, separable: W (within-row) pass then
        # H (across-row) pass.  Each neighbour offset d is an in-register
        # pltpu.roll (XLU slot) plus a precomputed additive mask column
        # (0 where the neighbour is in-bounds, -inf where it is not), so the
        # circular wraparound of roll is neutralized and no scratch buffer,
        # stores or per-stage compare/where work is needed.
        def mx(acc, src, d, j):
            rolled = pltpu.roll(src, (-d) % L, axis=0)      # rolled[i] = src[i+d]
            return jnp.maximum(acc, rolled + masks_ref[:, j:j + 1])

        m = a
        m = mx(m, a, 1, 0)            # col +1
        m = mx(m, a, -1, 1)           # col -1
        m = mx(m, a, 2, 2)            # col +2
        m = mx(m, a, -2, 3)           # col -2
        r = m
        r = mx(r, m, W, 4)            # row +1
        r = mx(r, m, -W, 5)           # row -1
        r = mx(r, m, 2 * W, 6)        # row +2
        r = mx(r, m, -2 * W, 7)       # row -2
        return r

    # ---- pooling chain with conv2 folded in: accumulate one partial matmul
    #      per stage so only one (L, C1) activation is live at a time --------
    p = pool(y)
    acc = jnp.dot(p.astype(cdt), w2_ref[0], preferred_element_type=jnp.float32)
    p = pool(p)
    acc += jnp.dot(p.astype(cdt), w2_ref[1], preferred_element_type=jnp.float32)
    p = pool(p)
    acc += jnp.dot(p.astype(cdt), w2_ref[2], preferred_element_type=jnp.float32)
    p = pool(p)
    acc += jnp.dot(p.astype(cdt), w2_ref[3], preferred_element_type=jnp.float32)

    # ---- conv2 epilogue: folded BN + SiLU -----------------------------------
    # NOTE: for real SPPF shapes Cout is a multiple of 128 so the output store
    # is lane-dense; at the tiny test Cout=16 it falls back to masked stores.
    z = acc * s2_ref[...] + b2_ref[...]
    o_ref[...] = z * jax.nn.sigmoid(z)            # SiLU, f32


def sppf_pallas(x_nchw, kparams):
    """x_nchw: (B, Cin, H, W) float32.  Returns (B, Cout, H, W) float32."""
    w1, s1, b1, w2, s2, b2 = kparams              # w1, w2 in bf16; s/b in f32
    B, Cin, H, W = x_nchw.shape
    C1 = w1.shape[1]
    Cout = w2.shape[2]
    L = H * W

    # Glue: NCHW -> flattened NHWC (B, L, C), bf16 for the MXU + half the DMA.
    x_flat = jnp.transpose(x_nchw, (0, 2, 3, 1)).reshape(B, L, Cin)
    x_flat = x_flat.astype(jnp.bfloat16)

    # Precomputed additive boundary masks, one lane-column per neighbour shift:
    # [col+1, col-1, col+2, col-2, row+1, row-1, row+2, row-2].
    col = np.arange(L) % W
    row = np.arange(L) // W
    valid = np.stack([
        col + 1 < W, col - 1 >= 0, col + 2 < W, col - 2 >= 0,
        row + 1 < H, row - 1 >= 0, row + 2 < H, row - 2 >= 0,
    ], axis=1)                                                     # (L, 8)
    masks = jnp.asarray(np.where(valid, 0.0, -np.inf), dtype=jnp.float32)

    kernel = functools.partial(_sppf_kernel, H=H, W=W)

    # TODO(synk): for very large H*W feature maps, add a spatial (row-block)
    # grid axis with an 8-row halo (4 pools x 2-row reach) so each block fits
    # VMEM (v7x: 64 MiB physical) and HBM<->VMEM stays pipelined.
    out_flat = pl.pallas_call(
        kernel,
        out_shape=jax.ShapeDtypeStruct((B, L, Cout), jnp.float32),
        grid_spec=pltpu.PrefetchScalarGridSpec(
            num_scalar_prefetch=0,
            grid=(B,),
            in_specs=[
                pl.BlockSpec((None, L, Cin), lambda b: (b, 0, 0)),   # x (bf16)
                pl.BlockSpec((Cin, C1), lambda b: (0, 0)),           # w1 (bf16, folded)
                pl.BlockSpec((1, C1), lambda b: (0, 0)),             # bn1 scale
                pl.BlockSpec((1, C1), lambda b: (0, 0)),             # bn1 bias
                pl.BlockSpec((4, C1, Cout), lambda b: (0, 0, 0)),    # w2 (bf16, split)
                pl.BlockSpec((1, Cout), lambda b: (0, 0)),           # bn2 scale
                pl.BlockSpec((1, Cout), lambda b: (0, 0)),           # bn2 bias
                pl.BlockSpec((L, 8), lambda b: (0, 0)),              # boundary masks
            ],
            out_specs=pl.BlockSpec((None, L, Cout), lambda b: (b, 0, 0)),
        ),
        compiler_params=pltpu.CompilerParams(
            dimension_semantics=("parallel",)),
    )(x_flat, w1, s1, b1, w2, s2, b2, masks)

    # Glue: back to NCHW.
    return jnp.transpose(out_flat.reshape(B, H, W, Cout), (0, 3, 1, 2))


def make_params(key, in_channels, out_channels):
    """Deterministic synthetic params; BN folded with eval-mode semantics."""
    C1 = out_channels // 2
    eps = 1e-5
    ks = jax.random.split(key, 10)

    w1_full = jax.random.normal(ks[0], (C1, in_channels), jnp.float32) * 0.3
    g1 = 1.0 + 0.1 * jax.random.normal(ks[1], (C1,), jnp.float32)
    be1 = 0.1 * jax.random.normal(ks[2], (C1,), jnp.float32)
    m1 = 0.1 * jax.random.normal(ks[3], (C1,), jnp.float32)
    v1 = jax.random.uniform(ks[4], (C1,), jnp.float32, minval=0.5, maxval=1.5)
    s1 = g1 / jnp.sqrt(v1 + eps)
    b1 = be1 - m1 * s1

    w2_full = jax.random.normal(ks[5], (out_channels, 4 * C1), jnp.float32) * 0.2
    g2 = 1.0 + 0.1 * jax.random.normal(ks[6], (out_channels,), jnp.float32)
    be2 = 0.1 * jax.random.normal(ks[7], (out_channels,), jnp.float32)
    m2 = 0.1 * jax.random.normal(ks[8], (out_channels,), jnp.float32)
    v2 = jax.random.uniform(ks[9], (out_channels,), jnp.float32, minval=0.5, maxval=1.5)
    s2 = g2 / jnp.sqrt(v2 + eps)
    b2 = be2 - m2 * s2

    # Kernel-layout params (matmul weights in bf16; BN scale/bias stay f32).
    w1_k = w1_full.T.astype(jnp.bfloat16)                            # (Cin, C1)
    w2_k = (w2_full.reshape(out_channels, 4, C1)
            .transpose(1, 2, 0).astype(jnp.bfloat16))                # (4, C1, Cout)
    kparams = (w1_k, s1.reshape(1, C1), b1.reshape(1, C1),
               w2_k, s2.reshape(1, out_channels), b2.reshape(1, out_channels))
    ref_params = (w1_full, s1, b1, w2_full, s2, b2)
    return kparams, ref_params


def sppf_reference(x_nchw, ref_params):
    """Pure-JAX f32 reference matching the PyTorch forward (eval-mode BN)."""
    w1, s1, b1, w2, s2, b2 = ref_params

    def conv_bn_silu(x, w, s, b):
        y = jnp.einsum('bchw,oc->bohw', x, w)
        y = y * s[None, :, None, None] + b[None, :, None, None]
        return y * jax.nn.sigmoid(y)

    def maxpool5(x):
        return lax.reduce_window(x, -jnp.inf, lax.max, (1, 1, 5, 5),
                                 (1, 1, 1, 1),
                                 padding=((0, 0), (0, 0), (2, 2), (2, 2)))

    y = conv_bn_silu(x_nchw, w1, s1, b1)
    x1 = maxpool5(y)
    x2 = maxpool5(x1)
    x3 = maxpool5(x2)
    x4 = maxpool5(x3)
    cat = jnp.concatenate([x1, x2, x3, x4], axis=1)
    return conv_bn_silu(cat, w2, s2, b2)


if __name__ == "__main__":
    B, Cin, H, W = 2, 8, 16, 16
    Cout = 16                       # SPPF(in_channels=8, out_channels=16)

    key = jax.random.PRNGKey(0)
    kx, kp = jax.random.split(key)
    x = jax.random.normal(kx, (B, Cin, H, W), jnp.float32)
    kparams, ref_params = make_params(kp, Cin, Cout)

    out = sppf_pallas(x, kparams)
    out = jax.block_until_ready(out)

    ref = sppf_reference(x, ref_params)
    # Kernel matmuls run in bf16 on the MXU (f32 accumulate), so tolerances are
    # bf16-inference level; the f32 reference keeps full precision.
    np.testing.assert_allclose(np.asarray(out), np.asarray(ref),
                               rtol=5e-2, atol=5e-2)
    print("KERNEL_OK")
</pallas_src>

<mosaic_0001>
module attributes {stable_mosaic.version = 11 : i64} {
  func.func @_sppf_kernel(%arg0: i32, %arg1: memref<1x256x8xbf16, #tpu.memory_space<vmem>>, %arg2: memref<8x8xbf16, #tpu.memory_space<vmem>>, %arg3: memref<1x8xf32, #tpu.memory_space<vmem>>, %arg4: memref<1x8xf32, #tpu.memory_space<vmem>>, %arg5: memref<4x8x16xbf16, #tpu.memory_space<vmem>>, %arg6: memref<1x16xf32, #tpu.memory_space<vmem>>, %arg7: memref<1x16xf32, #tpu.memory_space<vmem>>, %arg8: memref<256x8xf32, #tpu.memory_space<vmem>>, %arg9: memref<1x256x16xf32, #tpu.memory_space<vmem>>) attributes {dimension_semantics = [#tpu.dimension_semantics<parallel>], iteration_bounds = array<i64: 2>, scalar_prefetch = 0 : i64, scratch_operands = 0 : i64, tpu.core_type = #tpu.core_type<tc>, window_params = [{transform_indices = @transform_0, window_bounds = array<i64: 1, 256, 8>}, {pipeline_mode = #tpu.pipeline_mode<synchronous>, transform_indices = @transform_1, window_bounds = array<i64: 8, 8>}, {pipeline_mode = #tpu.pipeline_mode<synchronous>, transform_indices = @transform_2, window_bounds = array<i64: 1, 8>}, {pipeline_mode = #tpu.pipeline_mode<synchronous>, transform_indices = @transform_3, window_bounds = array<i64: 1, 8>}, {pipeline_mode = #tpu.pipeline_mode<synchronous>, transform_indices = @transform_4, window_bounds = array<i64: 4, 8, 16>}, {pipeline_mode = #tpu.pipeline_mode<synchronous>, transform_indices = @transform_5, window_bounds = array<i64: 1, 16>}, {pipeline_mode = #tpu.pipeline_mode<synchronous>, transform_indices = @transform_6, window_bounds = array<i64: 1, 16>}, {pipeline_mode = #tpu.pipeline_mode<synchronous>, transform_indices = @transform_7, window_bounds = array<i64: 256, 8>}, {transform_indices = @transform_8, window_bounds = array<i64: 1, 256, 16>}]} {
    %c0 = arith.constant 0 : index
    %c0_0 = arith.constant 0 : index
    %c0_1 = arith.constant 0 : index
    %0 = vector.load %arg1[%c0, %c0_0, %c0_1] : memref<1x256x8xbf16, #tpu.memory_space<vmem>>, vector<1x256x8xbf16>
    %1 = vector.shape_cast %0 : vector<1x256x8xbf16> to vector<256x8xbf16>
    %c0_2 = arith.constant 0 : index
    %c0_3 = arith.constant 0 : index
    %2 = vector.load %arg2[%c0_2, %c0_3] : memref<8x8xbf16, #tpu.memory_space<vmem>>, vector<8x8xbf16>
    %cst = arith.constant dense<0.000000e+00> : vector<256x8xf32>
    %3 = tpu.matmul %1, %2, %cst {dimension_numbers = #tpu.dot_dimension_numbers<[1], [0], [0], [1], [0, 0, 1, 1], [], []>} : vector<256x8xbf16>, vector<8x8xbf16>, vector<256x8xf32> -> vector<256x8xf32>
    %c0_4 = arith.constant 0 : index
    %c0_5 = arith.constant 0 : index
    %4 = vector.load %arg3[%c0_4, %c0_5] : memref<1x8xf32, #tpu.memory_space<vmem>>, vector<1x8xf32>
    %5 = vector.broadcast %4 : vector<1x8xf32> to vector<256x8xf32>
    %6 = arith.mulf %3, %5 : vector<256x8xf32>
    %c0_6 = arith.constant 0 : index
    %c0_7 = arith.constant 0 : index
    %7 = vector.load %arg4[%c0_6, %c0_7] : memref<1x8xf32, #tpu.memory_space<vmem>>, vector<1x8xf32>
    %8 = vector.broadcast %7 : vector<1x8xf32> to vector<256x8xf32>
    %9 = arith.addf %6, %8 : vector<256x8xf32>
    %10 = arith.negf %9 : vector<256x8xf32>
    %11 = math.exp %10 : vector<256x8xf32>
    %cst_8 = arith.constant 1.000000e+00 : f32
    %12 = vector.broadcast %cst_8 : f32 to vector<256x8xf32>
    %13 = arith.addf %12, %11 : vector<256x8xf32>
    %14 = arith.divf %12, %13 : vector<256x8xf32>
    %15 = arith.mulf %9, %14 : vector<256x8xf32>
    %c255_i32 = arith.constant 255 : i32
    %16 = tpu.dynamic_rotate %15 by %c255_i32 dim 0 : vector<256x8xf32>, i32 -> vector<256x8xf32>
    %c0_9 = arith.constant 0 : index
    %c0_10 = arith.constant 0 : index
    %17 = vector.load %arg8[%c0_9, %c0_10] : memref<256x8xf32, #tpu.memory_space<vmem>>, vector<256x1xf32>
    %18 = vector.broadcast %17 : vector<256x1xf32> to vector<256x8xf32>
    %19 = arith.addf %16, %18 : vector<256x8xf32>
    %20 = arith.maximumf %15, %19 : vector<256x8xf32>
    %c1_i32 = arith.constant 1 : i32
    %21 = tpu.dynamic_rotate %15 by %c1_i32 dim 0 : vector<256x8xf32>, i32 -> vector<256x8xf32>
    %c0_11 = arith.constant 0 : index
    %c1 = arith.constant 1 : index
    %22 = vector.load %arg8[%c0_11, %c1] : memref<256x8xf32, #tpu.memory_space<vmem>>, vector<256x1xf32>
    %23 = vector.broadcast %22 : vector<256x1xf32> to vector<256x8xf32>
    %24 = arith.addf %21, %23 : vector<256x8xf32>
    %25 = arith.maximumf %20, %24 : vector<256x8xf32>
    %c254_i32 = arith.constant 254 : i32
    %26 = tpu.dynamic_rotate %15 by %c254_i32 dim 0 : vector<256x8xf32>, i32 -> vector<256x8xf32>
    %c0_12 = arith.constant 0 : index
    %c2 = arith.constant 2 : index
    %27 = vector.load %arg8[%c0_12, %c2] : memref<256x8xf32, #tpu.memory_space<vmem>>, vector<256x1xf32>
    %28 = vector.broadcast %27 : vector<256x1xf32> to vector<256x8xf32>
    %29 = arith.addf %26, %28 : vector<256x8xf32>
    %30 = arith.maximumf %25, %29 : vector<256x8xf32>
    %c2_i32 = arith.constant 2 : i32
    %31 = tpu.dynamic_rotate %15 by %c2_i32 dim 0 : vector<256x8xf32>, i32 -> vector<256x8xf32>
    %c0_13 = arith.constant 0 : index
    %c3 = arith.constant 3 : index
    %32 = vector.load %arg8[%c0_13, %c3] : memref<256x8xf32, #tpu.memory_space<vmem>>, vector<256x1xf32>
    %33 = vector.broadcast %32 : vector<256x1xf32> to vector<256x8xf32>
    %34 = arith.addf %31, %33 : vector<256x8xf32>
    %35 = arith.maximumf %30, %34 : vector<256x8xf32>
    %c240_i32 = arith.constant 240 : i32
    %36 = tpu.dynamic_rotate %35 by %c240_i32 dim 0 : vector<256x8xf32>, i32 -> vector<256x8xf32>
    %c0_14 = arith.constant 0 : index
    %c4 = arith.constant 4 : index
    %37 = vector.load %arg8[%c0_14, %c4] : memref<256x8xf32, #tpu.memory_space<vmem>>, vector<256x1xf32>
    %38 = vector.broadcast %37 : vector<256x1xf32> to vector<256x8xf32>
    %39 = arith.addf %36, %38 : vector<256x8xf32>
    %40 = arith.maximumf %35, %39 : vector<256x8xf32>
    %c16_i32 = arith.constant 16 : i32
    %41 = tpu.dynamic_rotate %35 by %c16_i32 dim 0 : vector<256x8xf32>, i32 -> vector<256x8xf32>
    %c0_15 = arith.constant 0 : index
    %c5 = arith.constant 5 : index
    %42 = vector.load %arg8[%c0_15, %c5] : memref<256x8xf32, #tpu.memory_space<vmem>>, vector<256x1xf32>
    %43 = vector.broadcast %42 : vector<256x1xf32> to vector<256x8xf32>
    %44 = arith.addf %41, %43 : vector<256x8xf32>
    %45 = arith.maximumf %40, %44 : vector<256x8xf32>
    %c224_i32 = arith.constant 224 : i32
    %46 = tpu.dynamic_rotate %35 by %c224_i32 dim 0 : vector<256x8xf32>, i32 -> vector<256x8xf32>
    %c0_16 = arith.constant 0 : index
    %c6 = arith.constant 6 : index
    %47 = vector.load %arg8[%c0_16, %c6] : memref<256x8xf32, #tpu.memory_space<vmem>>, vector<256x1xf32>
    %48 = vector.broadcast %47 : vector<256x1xf32> to vector<256x8xf32>
    %49 = arith.addf %46, %48 : vector<256x8xf32>
    %50 = arith.maximumf %45, %49 : vector<256x8xf32>
    %c32_i32 = arith.constant 32 : i32
    %51 = tpu.dynamic_rotate %35 by %c32_i32 dim 0 : vector<256x8xf32>, i32 -> vector<256x8xf32>
    %c0_17 = arith.constant 0 : index
    %c7 = arith.constant 7 : index
    %52 = vector.load %arg8[%c0_17, %c7] : memref<256x8xf32, #tpu.memory_space<vmem>>, vector<256x1xf32>
    %53 = vector.broadcast %52 : vector<256x1xf32> to vector<256x8xf32>
    %54 = arith.addf %51, %53 : vector<256x8xf32>
    %55 = arith.maximumf %50, %54 : vector<256x8xf32>
    %56 = arith.truncf %55 : vector<256x8xf32> to vector<256x8xbf16>
    %c0_18 = arith.constant 0 : index
    %c0_19 = arith.constant 0 : index
    %c0_20 = arith.constant 0 : index
    %57 = vector.load %arg5[%c0_18, %c0_19, %c0_20] : memref<4x8x16xbf16, #tpu.memory_space<vmem>>, vector<1x8x16xbf16>
    %58 = vector.shape_cast %57 : vector<1x8x16xbf16> to vector<8x16xbf16>
    %cst_21 = arith.constant dense<0.000000e+00> : vector<256x16xf32>
    %59 = tpu.matmul %56, %58, %cst_21 {dimension_numbers = #tpu.dot_dimension_numbers<[1], [0], [0], [1], [0, 0, 1, 1], [], []>} : vector<256x8xbf16>, vector<8x16xbf16>, vector<256x16xf32> -> vector<256x16xf32>
    %c255_i32_22 = arith.constant 255 : i32
    %60 = tpu.dynamic_rotate %55 by %c255_i32_22 dim 0 : vector<256x8xf32>, i32 -> vector<256x8xf32>
    %c0_23 = arith.constant 0 : index
    %c0_24 = arith.constant 0 : index
    %61 = vector.load %arg8[%c0_23, %c0_24] : memref<256x8xf32, #tpu.memory_space<vmem>>, vector<256x1xf32>
    %62 = vector.broadcast %61 : vector<256x1xf32> to vector<256x8xf32>
    %63 = arith.addf %60, %62 : vector<256x8xf32>
    %64 = arith.maximumf %55, %63 : vector<256x8xf32>
    %c1_i32_25 = arith.constant 1 : i32
    %65 = tpu.dynamic_rotate %55 by %c1_i32_25 dim 0 : vector<256x8xf32>, i32 -> vector<256x8xf32>
    %c0_26 = arith.constant 0 : index
    %c1_27 = arith.constant 1 : index
    %66 = vector.load %arg8[%c0_26, %c1_27] : memref<256x8xf32, #tpu.memory_space<vmem>>, vector<256x1xf32>
    %67 = vector.broadcast %66 : vector<256x1xf32> to vector<256x8xf32>
    %68 = arith.addf %65, %67 : vector<256x8xf32>
    %69 = arith.maximumf %64, %68 : vector<256x8xf32>
    %c254_i32_28 = arith.constant 254 : i32
    %70 = tpu.dynamic_rotate %55 by %c254_i32_28 dim 0 : vector<256x8xf32>, i32 -> vector<256x8xf32>
    %c0_29 = arith.constant 0 : index
    %c2_30 = arith.constant 2 : index
    %71 = vector.load %arg8[%c0_29, %c2_30] : memref<256x8xf32, #tpu.memory_space<vmem>>, vector<256x1xf32>
    %72 = vector.broadcast %71 : vector<256x1xf32> to vector<256x8xf32>
    %73 = arith.addf %70, %72 : vector<256x8xf32>
    %74 = arith.maximumf %69, %73 : vector<256x8xf32>
    %c2_i32_31 = arith.constant 2 : i32
    %75 = tpu.dynamic_rotate %55 by %c2_i32_31 dim 0 : vector<256x8xf32>, i32 -> vector<256x8xf32>
    %c0_32 = arith.constant 0 : index
    %c3_33 = arith.constant 3 : index
    %76 = vector.load %arg8[%c0_32, %c3_33] : memref<256x8xf32, #tpu.memory_space<vmem>>, vector<256x1xf32>
    %77 = vector.broadcast %76 : vector<256x1xf32> to vector<256x8xf32>
    %78 = arith.addf %75, %77 : vector<256x8xf32>
    %79 = arith.maximumf %74, %78 : vector<256x8xf32>
    %c240_i32_34 = arith.constant 240 : i32
    %80 = tpu.dynamic_rotate %79 by %c240_i32_34 dim 0 : vector<256x8xf32>, i32 -> vector<256x8xf32>
    %c0_35 = arith.constant 0 : index
    %c4_36 = arith.constant 4 : index
    %81 = vector.load %arg8[%c0_35, %c4_36] : memref<256x8xf32, #tpu.memory_space<vmem>>, vector<256x1xf32>
    %82 = vector.broadcast %81 : vector<256x1xf32> to vector<256x8xf32>
    %83 = arith.addf %80, %82 : vector<256x8xf32>
    %84 = arith.maximumf %79, %83 : vector<256x8xf32>
    %c16_i32_37 = arith.constant 16 : i32
    %85 = tpu.dynamic_rotate %79 by %c16_i32_37 dim 0 : vector<256x8xf32>, i32 -> vector<256x8xf32>
    %c0_38 = arith.constant 0 : index
    %c5_39 = arith.constant 5 : index
    %86 = vector.load %arg8[%c0_38, %c5_39] : memref<256x8xf32, #tpu.memory_space<vmem>>, vector<256x1xf32>
    %87 = vector.broadcast %86 : vector<256x1xf32> to vector<256x8xf32>
    %88 = arith.addf %85, %87 : vector<256x8xf32>
    %89 = arith.maximumf %84, %88 : vector<256x8xf32>
    %c224_i32_40 = arith.constant 224 : i32
    %90 = tpu.dynamic_rotate %79 by %c224_i32_40 dim 0 : vector<256x8xf32>, i32 -> vector<256x8xf32>
    %c0_41 = arith.constant 0 : index
    %c6_42 = arith.constant 6 : index
    %91 = vector.load %arg8[%c0_41, %c6_42] : memref<256x8xf32, #tpu.memory_space<vmem>>, vector<256x1xf32>
    %92 = vector.broadcast %91 : vector<256x1xf32> to vector<256x8xf32>
    %93 = arith.addf %90, %92 : vector<256x8xf32>
    %94 = arith.maximumf %89, %93 : vector<256x8xf32>
    %c32_i32_43 = arith.constant 32 : i32
    %95 = tpu.dynamic_rotate %79 by %c32_i32_43 dim 0 : vector<256x8xf32>, i32 -> vector<256x8xf32>
    %c0_44 = arith.constant 0 : index
    %c7_45 = arith.constant 7 : index
    %96 = vector.load %arg8[%c0_44, %c7_45] : memref<256x8xf32, #tpu.memory_space<vmem>>, vector<256x1xf32>
    %97 = vector.broadcast %96 : vector<256x1xf32> to vector<256x8xf32>
    %98 = arith.addf %95, %97 : vector<256x8xf32>
    %99 = arith.maximumf %94, %98 : vector<256x8xf32>
    %100 = arith.truncf %99 : vector<256x8xf32> to vector<256x8xbf16>
    %c1_46 = arith.constant 1 : index
    %c0_47 = arith.constant 0 : index
    %c0_48 = arith.constant 0 : index
    %101 = vector.load %arg5[%c1_46, %c0_47, %c0_48] : memref<4x8x16xbf16, #tpu.memory_space<vmem>>, vector<1x8x16xbf16>
    %102 = vector.shape_cast %101 : vector<1x8x16xbf16> to vector<8x16xbf16>
    %cst_49 = arith.constant dense<0.000000e+00> : vector<256x16xf32>
    %103 = tpu.matmul %100, %102, %cst_49 {dimension_numbers = #tpu.dot_dimension_numbers<[1], [0], [0], [1], [0, 0, 1, 1], [], []>} : vector<256x8xbf16>, vector<8x16xbf16>, vector<256x16xf32> -> vector<256x16xf32>
    %104 = arith.addf %59, %103 : vector<256x16xf32>
    %c255_i32_50 = arith.constant 255 : i32
    %105 = tpu.dynamic_rotate %99 by %c255_i32_50 dim 0 : vector<256x8xf32>, i32 -> vector<256x8xf32>
    %c0_51 = arith.constant 0 : index
    %c0_52 = arith.constant 0 : index
    %106 = vector.load %arg8[%c0_51, %c0_52] : memref<256x8xf32, #tpu.memory_space<vmem>>, vector<256x1xf32>
    %107 = vector.broadcast %106 : vector<256x1xf32> to vector<256x8xf32>
    %108 = arith.addf %105, %107 : vector<256x8xf32>
    %109 = arith.maximumf %99, %108 : vector<256x8xf32>
    %c1_i32_53 = arith.constant 1 : i32
    %110 = tpu.dynamic_rotate %99 by %c1_i32_53 dim 0 : vector<256x8xf32>, i32 -> vector<256x8xf32>
    %c0_54 = arith.constant 0 : index
    %c1_55 = arith.constant 1 : index
    %111 = vector.load %arg8[%c0_54, %c1_55] : memref<256x8xf32, #tpu.memory_space<vmem>>, vector<256x1xf32>
    %112 = vector.broadcast %111 : vector<256x1xf32> to vector<256x8xf32>
    %113 = arith.addf %110, %112 : vector<256x8xf32>
    %114 = arith.maximumf %109, %113 : vector<256x8xf32>
    %c254_i32_56 = arith.constant 254 : i32
    %115 = tpu.dynamic_rotate %99 by %c254_i32_56 dim 0 : vector<256x8xf32>, i32 -> vector<256x8xf32>
    %c0_57 = arith.constant 0 : index
    %c2_58 = arith.constant 2 : index
    %116 = vector.load %arg8[%c0_57, %c2_58] : memref<256x8xf32, #tpu.memory_space<vmem>>, vector<256x1xf32>
    %117 = vector.broadcast %116 : vector<256x1xf32> to vector<256x8xf32>
    %118 = arith.addf %115, %117 : vector<256x8xf32>
    %119 = arith.maximumf %114, %118 : vector<256x8xf32>
    %c2_i32_59 = arith.constant 2 : i32
    %120 = tpu.dynamic_rotate %99 by %c2_i32_59 dim 0 : vector<256x8xf32>, i32 -> vector<256x8xf32>
    %c0_60 = arith.constant 0 : index
    %c3_61 = arith.constant 3 : index
    %121 = vector.load %arg8[%c0_60, %c3_61] : memref<256x8xf32, #tpu.memory_space<vmem>>, vector<256x1xf32>
    %122 = vector.broadcast %121 : vector<256x1xf32> to vector<256x8xf32>
    %123 = arith.addf %120, %122 : vector<256x8xf32>
    %124 = arith.maximumf %119, %123 : vector<256x8xf32>
    %c240_i32_62 = arith.constant 240 : i32
    %125 = tpu.dynamic_rotate %124 by %c240_i32_62 dim 0 : vector<256x8xf32>, i32 -> vector<256x8xf32>
    %c0_63 = arith.constant 0 : index
    %c4_64 = arith.constant 4 : index
    %126 = vector.load %arg8[%c0_63, %c4_64] : memref<256x8xf32, #tpu.memory_space<vmem>>, vector<256x1xf32>
    %127 = vector.broadcast %126 : vector<256x1xf32> to vector<256x8xf32>
    %128 = arith.addf %125, %127 : vector<256x8xf32>
    %129 = arith.maximumf %124, %128 : vector<256x8xf32>
    %c16_i32_65 = arith.constant 16 : i32
    %130 = tpu.dynamic_rotate %124 by %c16_i32_65 dim 0 : vector<256x8xf32>, i32 -> vector<256x8xf32>
    %c0_66 = arith.constant 0 : index
    %c5_67 = arith.constant 5 : index
    %131 = vector.load %arg8[%c0_66, %c5_67] : memref<256x8xf32, #tpu.memory_space<vmem>>, vector<256x1xf32>
    %132 = vector.broadcast %131 : vector<256x1xf32> to vector<256x8xf32>
    %133 = arith.addf %130, %132 : vector<256x8xf32>
    %134 = arith.maximumf %129, %133 : vector<256x8xf32>
    %c224_i32_68 = arith.constant 224 : i32
    %135 = tpu.dynamic_rotate %124 by %c224_i32_68 dim 0 : vector<256x8xf32>, i32 -> vector<256x8xf32>
    %c0_69 = arith.constant 0 : index
    %c6_70 = arith.constant 6 : index
    %136 = vector.load %arg8[%c0_69, %c6_70] : memref<256x8xf32, #tpu.memory_space<vmem>>, vector<256x1xf32>
    %137 = vector.broadcast %136 : vector<256x1xf32> to vector<256x8xf32>
    %138 = arith.addf %135, %137 : vector<256x8xf32>
    %139 = arith.maximumf %134, %138 : vector<256x8xf32>
    %c32_i32_71 = arith.constant 32 : i32
    %140 = tpu.dynamic_rotate %124 by %c32_i32_71 dim 0 : vector<256x8xf32>, i32 -> vector<256x8xf32>
    %c0_72 = arith.constant 0 : index
    %c7_73 = arith.constant 7 : index
    %141 = vector.load %arg8[%c0_72, %c7_73] : memref<256x8xf32, #tpu.memory_space<vmem>>, vector<256x1xf32>
    %142 = vector.broadcast %141 : vector<256x1xf32> to vector<256x8xf32>
    %143 = arith.addf %140, %142 : vector<256x8xf32>
    %144 = arith.maximumf %139, %143 : vector<256x8xf32>
    %145 = arith.truncf %144 : vector<256x8xf32> to vector<256x8xbf16>
    %c2_74 = arith.constant 2 : index
    %c0_75 = arith.constant 0 : index
    %c0_76 = arith.constant 0 : index
    %146 = vector.load %arg5[%c2_74, %c0_75, %c0_76] : memref<4x8x16xbf16, #tpu.memory_space<vmem>>, vector<1x8x16xbf16>
    %147 = vector.shape_cast %146 : vector<1x8x16xbf16> to vector<8x16xbf16>
    %cst_77 = arith.constant dense<0.000000e+00> : vector<256x16xf32>
    %148 = tpu.matmul %145, %147, %cst_77 {dimension_numbers = #tpu.dot_dimension_numbers<[1], [0], [0], [1], [0, 0, 1, 1], [], []>} : vector<256x8xbf16>, vector<8x16xbf16>, vector<256x16xf32> -> vector<256x16xf32>
    %149 = arith.addf %104, %148 : vector<256x16xf32>
    %c255_i32_78 = arith.constant 255 : i32
    %150 = tpu.dynamic_rotate %144 by %c255_i32_78 dim 0 : vector<256x8xf32>, i32 -> vector<256x8xf32>
    %c0_79 = arith.constant 0 : index
    %c0_80 = arith.constant 0 : index
    %151 = vector.load %arg8[%c0_79, %c0_80] : memref<256x8xf32, #tpu.memory_space<vmem>>, vector<256x1xf32>
    %152 = vector.broadcast %151 : vector<256x1xf32> to vector<256x8xf32>
    %153 = arith.addf %150, %152 : vector<256x8xf32>
    %154 = arith.maximumf %144, %153 : vector<256x8xf32>
    %c1_i32_81 = arith.constant 1 : i32
    %155 = tpu.dynamic_rotate %144 by %c1_i32_81 dim 0 : vector<256x8xf32>, i32 -> vector<256x8xf32>
    %c0_82 = arith.constant 0 : index
    %c1_83 = arith.constant 1 : index
    %156 = vector.load %arg8[%c0_82, %c1_83] : memref<256x8xf32, #tpu.memory_space<vmem>>, vector<256x1xf32>
    %157 = vector.broadcast %156 : vector<256x1xf32> to vector<256x8xf32>
    %158 = arith.addf %155, %157 : vector<256x8xf32>
    %159 = arith.maximumf %154, %158 : vector<256x8xf32>
    %c254_i32_84 = arith.constant 254 : i32
    %160 = tpu.dynamic_rotate %144 by %c254_i32_84 dim 0 : vector<256x8xf32>, i32 -> vector<256x8xf32>
    %c0_85 = arith.constant 0 : index
    %c2_86 = arith.constant 2 : index
    %161 = vector.load %arg8[%c0_85, %c2_86] : memref<256x8xf32, #tpu.memory_space<vmem>>, vector<256x1xf32>
    %162 = vector.broadcast %161 : vector<256x1xf32> to vector<256x8xf32>
    %163 = arith.addf %160, %162 : vector<256x8xf32>
    %164 = arith.maximumf %159, %163 : vector<256x8xf32>
    %c2_i32_87 = arith.constant 2 : i32
    %165 = tpu.dynamic_rotate %144 by %c2_i32_87 dim 0 : vector<256x8xf32>, i32 -> vector<256x8xf32>
    %c0_88 = arith.constant 0 : index
    %c3_89 = arith.constant 3 : index
    %166 = vector.load %arg8[%c0_88, %c3_89] : memref<256x8xf32, #tpu.memory_space<vmem>>, vector<256x1xf32>
    %167 = vector.broadcast %166 : vector<256x1xf32> to vector<256x8xf32>
    %168 = arith.addf %165, %167 : vector<256x8xf32>
    %169 = arith.maximumf %164, %168 : vector<256x8xf32>
    %c240_i32_90 = arith.constant 240 : i32
    %170 = tpu.dynamic_rotate %169 by %c240_i32_90 dim 0 : vector<256x8xf32>, i32 -> vector<256x8xf32>
    %c0_91 = arith.constant 0 : index
    %c4_92 = arith.constant 4 : index
    %171 = vector.load %arg8[%c0_91, %c4_92] : memref<256x8xf32, #tpu.memory_space<vmem>>, vector<256x1xf32>
    %172 = vector.broadcast %171 : vector<256x1xf32> to vector<256x8xf32>
    %173 = arith.addf %170, %172 : vector<256x8xf32>
    %174 = arith.maximumf %169, %173 : vector<256x8xf32>
    %c16_i32_93 = arith.constant 16 : i32
    %175 = tpu.dynamic_rotate %169 by %c16_i32_93 dim 0 : vector<256x8xf32>, i32 -> vector<256x8xf32>
    %c0_94 = arith.constant 0 : index
    %c5_95 = arith.constant 5 : index
    %176 = vector.load %arg8[%c0_94, %c5_95] : memref<256x8xf32, #tpu.memory_space<vmem>>, vector<256x1xf32>
    %177 = vector.broadcast %176 : vector<256x1xf32> to vector<256x8xf32>
    %178 = arith.addf %175, %177 : vector<256x8xf32>
    %179 = arith.maximumf %174, %178 : vector<256x8xf32>
    %c224_i32_96 = arith.constant 224 : i32
    %180 = tpu.dynamic_rotate %169 by %c224_i32_96 dim 0 : vector<256x8xf32>, i32 -> vector<256x8xf32>
    %c0_97 = arith.constant 0 : index
    %c6_98 = arith.constant 6 : index
    %181 = vector.load %arg8[%c0_97, %c6_98] : memref<256x8xf32, #tpu.memory_space<vmem>>, vector<256x1xf32>
    %182 = vector.broadcast %181 : vector<256x1xf32> to vector<256x8xf32>
    %183 = arith.addf %180, %182 : vector<256x8xf32>
    %184 = arith.maximumf %179, %183 : vector<256x8xf32>
    %c32_i32_99 = arith.constant 32 : i32
    %185 = tpu.dynamic_rotate %169 by %c32_i32_99 dim 0 : vector<256x8xf32>, i32 -> vector<256x8xf32>
    %c0_100 = arith.constant 0 : index
    %c7_101 = arith.constant 7 : index
    %186 = vector.load %arg8[%c0_100, %c7_101] : memref<256x8xf32, #tpu.memory_space<vmem>>, vector<256x1xf32>
    %187 = vector.broadcast %186 : vector<256x1xf32> to vector<256x8xf32>
    %188 = arith.addf %185, %187 : vector<256x8xf32>
    %189 = arith.maximumf %184, %188 : vector<256x8xf32>
    %190 = arith.truncf %189 : vector<256x8xf32> to vector<256x8xbf16>
    %c3_102 = arith.constant 3 : index
    %c0_103 = arith.constant 0 : index
    %c0_104 = arith.constant 0 : index
    %191 = vector.load %arg5[%c3_102, %c0_103, %c0_104] : memref<4x8x16xbf16, #tpu.memory_space<vmem>>, vector<1x8x16xbf16>
    %192 = vector.shape_cast %191 : vector<1x8x16xbf16> to vector<8x16xbf16>
    %cst_105 = arith.constant dense<0.000000e+00> : vector<256x16xf32>
    %193 = tpu.matmul %190, %192, %cst_105 {dimension_numbers = #tpu.dot_dimension_numbers<[1], [0], [0], [1], [0, 0, 1, 1], [], []>} : vector<256x8xbf16>, vector<8x16xbf16>, vector<256x16xf32> -> vector<256x16xf32>
    %194 = arith.addf %149, %193 : vector<256x16xf32>
    %c0_106 = arith.constant 0 : index
    %c0_107 = arith.constant 0 : index
    %195 = vector.load %arg6[%c0_106, %c0_107] : memref<1x16xf32, #tpu.memory_space<vmem>>, vector<1x16xf32>
    %196 = vector.broadcast %195 : vector<1x16xf32> to vector<256x16xf32>
    %197 = arith.mulf %194, %196 : vector<256x16xf32>
    %c0_108 = arith.constant 0 : index
    %c0_109 = arith.constant 0 : index
    %198 = vector.load %arg7[%c0_108, %c0_109] : memref<1x16xf32, #tpu.memory_space<vmem>>, vector<1x16xf32>
    %199 = vector.broadcast %198 : vector<1x16xf32> to vector<256x16xf32>
    %200 = arith.addf %197, %199 : vector<256x16xf32>
    %201 = arith.negf %200 : vector<256x16xf32>
    %202 = math.exp %201 : vector<256x16xf32>
    %cst_110 = arith.constant 1.000000e+00 : f32
    %203 = vector.broadcast %cst_110 : f32 to vector<256x16xf32>
    %204 = arith.addf %203, %202 : vector<256x16xf32>
    %205 = arith.divf %203, %204 : vector<256x16xf32>
    %206 = arith.mulf %200, %205 : vector<256x16xf32>
    %c0_111 = arith.constant 0 : index
    %c0_112 = arith.constant 0 : index
    %c0_113 = arith.constant 0 : index
    %207 = vector.load %arg9[%c0_111, %c0_112, %c0_113] : memref<1x256x16xf32, #tpu.memory_space<vmem>>, vector<1x256x16xf32>
    %208 = vector.shape_cast %207 : vector<1x256x16xf32> to vector<256x16xf32>
    %209 = vector.shape_cast %206 : vector<256x16xf32> to vector<1x256x16xf32>
    tpu.vector_store %arg9[%c0_111, %c0_112, %c0_113], %209 {strides = array<i32>} : memref<1x256x16xf32, #tpu.memory_space<vmem>>, vector<1x256x16xf32>,
    return
  }
  func.func @transform_0(%arg0: i32) -> (i32, i32, i32) {
    %c0_i32 = arith.constant 0 : i32
    %c0_i32_0 = arith.constant 0 : i32
    %c0_i32_1 = arith.constant 0 : i32
    return %arg0, %c0_i32, %c0_i32_0 : i32, i32, i32
  }
  func.func @transform_1(%arg0: i32) -> (i32, i32) {
    %c0_i32 = arith.constant 0 : i32
    %c0_i32_0 = arith.constant 0 : i32
    %c0_i32_1 = arith.constant 0 : i32
    return %c0_i32, %c0_i32_0 : i32, i32
  }
  func.func @transform_2(%arg0: i32) -> (i32, i32) {
    %c0_i32 = arith.constant 0 : i32
    %c0_i32_0 = arith.constant 0 : i32
    %c0_i32_1 = arith.constant 0 : i32
    return %c0_i32, %c0_i32_0 : i32, i32
  }
  func.func @transform_3(%arg0: i32) -> (i32, i32) {
    %c0_i32 = arith.constant 0 : i32
    %c0_i32_0 = arith.constant 0 : i32
    %c0_i32_1 = arith.constant 0 : i32
    return %c0_i32, %c0_i32_0 : i32, i32
  }
  func.func @transform_4(%arg0: i32) -> (i32, i32, i32) {
    %c0_i32 = arith.constant 0 : i32
    %c0_i32_0 = arith.constant 0 : i32
    %c0_i32_1 = arith.constant 0 : i32
    %c0_i32_2 = arith.constant 0 : i32
    return %c0_i32, %c0_i32_0, %c0_i32_1 : i32, i32, i32
  }
  func.func @transform_5(%arg0: i32) -> (i32, i32) {
    %c0_i32 = arith.constant 0 : i32
    %c0_i32_0 = arith.constant 0 : i32
    %c0_i32_1 = arith.constant 0 : i32
    return %c0_i32, %c0_i32_0 : i32, i32
  }
  func.func @transform_6(%arg0: i32) -> (i32, i32) {
    %c0_i32 = arith.constant 0 : i32
    %c0_i32_0 = arith.constant 0 : i32
    %c0_i32_1 = arith.constant 0 : i32
    return %c0_i32, %c0_i32_0 : i32, i32
  }
  func.func @transform_7(%arg0: i32) -> (i32, i32) {
    %c0_i32 = arith.constant 0 : i32
    %c0_i32_0 = arith.constant 0 : i32
    %c0_i32_1 = arith.constant 0 : i32
    return %c0_i32, %c0_i32_0 : i32, i32
  }
  func.func @transform_8(%arg0: i32) -> (i32, i32, i32) {
    %c0_i32 = arith.constant 0 : i32
    %c0_i32_0 = arith.constant 0 : i32
    %c0_i32_1 = arith.constant 0 : i32
    return %arg0, %c0_i32, %c0_i32_0 : i32, i32, i32
  }
}

</mosaic_0001>

<bundles_post_ra>
// kernel: tpu_custom_call.1
= control target key start
LH: loop header
LB: loop body
LE: loop exit
PB: predicated region body
PF: predicated region fallthrough
CT: control target
= control target key end

     0   :  { %s7376_s27 = smov 0   ;;  %s15678_s0 = inlined_call_operand.vmem [shape: bf16[2,256,8], index: 0, kind: input, shape index: {}]   ;;  %s15679_s1 = inlined_call_operand.vmem [shape: bf16[8,8], index: 1, kind: input, shape index: {}]   ;;  %s15680_s2 = inlined_call_operand.vmem [shape: f32[1,8], index: 2, kind: input, shape index: {}]   ;;  %s15681_s3 = inlined_call_operand.vmem [shape: f32[1,8], index: 3, kind: input, shape index: {}]   ;;  %s15682_s4 = inlined_call_operand.vmem [shape: bf16[4,8,16], index: 4, kind: input, shape index: {}]   ;;  %s15683_s5 = inlined_call_operand.vmem [shape: f32[1,16], index: 5, kind: input, shape index: {}]   ;;  %s15684_s6 = inlined_call_operand.vmem [shape: f32[1,16], index: 6, kind: input, shape index: {}]   ;;  %s15685_s7 = inlined_call_operand.vmem [shape: f32[256,8], index: 7, kind: input, shape index: {}]   ;;  %s15686_s8 = inlined_call_operand.vmem [shape: f32[2,256,16], index: 8, kind: output, shape index: {}]  }
   0x1 LB: > { %s6475_s28 = sadd.s32 4294967295, %s7321_s27   ;;  %p6479_p0 = scmp.ge.s32.totalorder %s7321_s27, 1  ;;  %s7321_s27 = sphi %s7376_s27, %s18_s27  }
   0x2   : > { %p262_p1 = scmp.lt.s32.totalorder %s7321_s27, 3 }
   0x4   : > { %p263_p2 = pnand %p6479_p0, %p262_p1 }
   0x6   : > { %266 = sbr.rel (%p263_p2) target bundleno = 1524 (0x5f4), region = 52 }
   0xb   : > { %v7387_v0 = vld [vmem:[%s15685_s7 + $0x10] sm:$0xff]  ;;  %v7392_v1 = vld [vmem:[%s15685_s7] sm:$0xff]  ;;  %vm469_vm0 = vcmask 1043456   ;;  %p296_p3 = scmp.lt.s32.totalorder %s6475_s28, 1  ;;  %v7323_v2 = vmov 0   ;;  %v7405_v5 = vld [vmem:[%s15685_s7 + $0x18] sm:$0xff] }
   0xc   : > { %6935 = vset.pattern.permute.xlu1 %v7323_v2  ;;  %6934 = vset.pattern.permute.xlu0 %v7323_v2  ;;  %v339_v3 = vld [vmem:[%s15679_s1] sm:$0xf]  ;;  %v7410_v6 = vld [vmem:[%s15685_s7 + $0x8] sm:$0xff]  ;;  %vm420_vm1 = vcmask 64512   ;;  %v7441_v13 = vld [vmem:[%s15685_s7 + $0x38] sm:$0xff]  ;;  %v7324_v51 = vmov 1  }
   0xd   : > { %1047 = vperm.xlu1 %6935, %v7387_v0   ;;  %1037 = vperm.xlu0 %6934, %v7392_v1   ;;  %v471_v4 = vsel %vm469_vm0, %v339_v3, 0  ;;  %s18649_s28 = smov (!%p296_p3, %s6475_s28), 1  ;;  %v7423_v7 = vld [vmem:[%s15685_s7 + $0x28] sm:$0xff]  ;;  %v7428_v8 = vld [vmem:[%s15685_s7 + $0x20] sm:$0xff]  ;;  %v7446_v14 = vld [vmem:[%s15685_s7 + $0x30] sm:$0xff]  ;;  %v7325_v56 = vmov 2  }
   0xe   : > { %6912 = vmatprep.subr.msk.bf16.mxu0 %vm469_vm0, %v339_v3  ;;  %6913 = vmatprep.subr.msk.bf16.mxu1 %vm469_vm0, %v339_v3  ;;  %s6653_s17 = sshll.u32 %s18649_s28, 7  ;;  %v7459_v17 = vld [vmem:[%s15685_s7 + $0x48] sm:$0xff]  ;;  %v7464_v18 = vld [vmem:[%s15685_s7 + $0x40] sm:$0xff]  ;;  %v7477_v23 = vld [vmem:[%s15685_s7 + $0x58] sm:$0xff]  ;;  %s6654_s24 = sshll.u32 %s18649_s28, 8  ;;  %vm6387_vm6 = vcmask 130048  }
   0xf   : > { %6741 = vmatpush3.bf16.msra.mxu0 %v471_v4  ;;  %6911 = vmatpush3.bf16.msra.mxu1 %v471_v4  ;;  %s7418_s20 = scalar_lea.vmem %s15678_s0, %s6653_s17  ;;  %v7484_v24 = vld [vmem:[%s15685_s7 + $0x50] sm:$0xff]  ;;  %v7493_v25 = vld [vmem:[%s15685_s7 + $0x68] sm:$0xff]  ;;  %v7498_v26 = vld [vmem:[%s15685_s7 + $0x60] sm:$0xff]  ;;  %s15407_s29 = scalar_lea.vmem %s15686_s8, %s6654_s24 }
  0x10   : > { %v6998_v9 = vld [vmem:[%s7418_s20] sm:$0xff]   ;;  %v7000_v11 = vld [vmem:[%s7418_s20 + $0x8] sm:$0xff]   ;;  %v7002_v15 = vld [vmem:[%s7418_s20 + $0x10] sm:$0xff]  }
  0x11   : > { %1052 = vperm.xlu1 %6935, %v7405_v5   ;;  %1042 = vperm.xlu0 %6934, %v7410_v6   ;;  %v6999_v10 = vld [vmem:[%s7418_s20 + $0x40] sm:$0xff]   ;;  %v7001_v12 = vld [vmem:[%s7418_s20 + $0x48] sm:$0xff]   ;;  %v7003_v16 = vld [vmem:[%s7418_s20 + $0x50] sm:$0xff]  }
  0x12   : > { %6742 = vmatprep.mubr.msk.bf16.mxu0 %vm420_vm1, %v6998_v9  ;;  %6758 = vmatprep.mubr.msk.bf16.mxu1 %vm420_vm1, %v6999_v10  ;;  %v7004_v19 = vld [vmem:[%s7418_s20 + $0x18] sm:$0xff]   ;;  %v7006_v21 = vld [vmem:[%s7418_s20 + $0x20] sm:$0xff]   ;;  %v7008_v27 = vld [vmem:[%s7418_s20 + $0x28] sm:$0xff]  }
  0x13   : > { %6743 = vmatmul.mubr.msk.bf16.vlgmr.msra.gmra.mxu0 %vm420_vm1, %v7000_v11  ;;  %6759 = vmatmul.mubr.msk.bf16.vlgmr.msra.gmra.mxu1 %vm420_vm1, %v7001_v12  ;;  %v7005_v20 = vld [vmem:[%s7418_s20 + $0x58] sm:$0xff]   ;;  %v7007_v22 = vld [vmem:[%s7418_s20 + $0x60] sm:$0xff]   ;;  %v7009_v28 = vld [vmem:[%s7418_s20 + $0x68] sm:$0xff]  }
  0x14   : > { %6746 = vmatprep.mubr.msk.bf16.mxu0 %vm420_vm1, %v7002_v15  ;;  %6762 = vmatprep.mubr.msk.bf16.mxu1 %vm420_vm1, %v7003_v16  ;;  %v7010_v29 = vld [vmem:[%s7418_s20 + $0x30] sm:$0xff]   ;;  %v7511_v31 = vld [vmem:[%s15685_s7 + $0x78] sm:$0xff]  ;;  %v7525_v33 = vld [vmem:[%s15685_s7 + $0x88] sm:$0xff] }
  0x15   : > { %1062 = vperm.xlu1 %6935, %v7423_v7   ;;  %1057 = vperm.xlu0 %6934, %v7428_v8   ;;  %v7011_v30 = vld [vmem:[%s7418_s20 + $0x70] sm:$0xff]   ;;  %v7530_v34 = vld [vmem:[%s15685_s7 + $0x80] sm:$0xff]  ;;  %v7012_v35 = vld [vmem:[%s7418_s20 + $0x38] sm:$0xff]  }
  0x16   : > { %v7516_v32 = vld [vmem:[%s15685_s7 + $0x70] sm:$0xff]  ;;  %v7013_v36 = vld [vmem:[%s7418_s20 + $0x78] sm:$0xff]   ;;  %v7553_v39 = vld [vmem:[%s15685_s7 + $0xa8] sm:$0xff] }
  0x17   : > { %v7541_v37 = vld [vmem:[%s15685_s7 + $0x98] sm:$0xff]  ;;  %v7546_v38 = vld [vmem:[%s15685_s7 + $0x90] sm:$0xff]  ;;  %v7558_v40 = vld [vmem:[%s15685_s7 + $0xa0] sm:$0xff] }
  0x18   : > { %v7565_v41 = vld [vmem:[%s15685_s7 + $0xb8] sm:$0xff]  ;;  %v7570_v42 = vld [vmem:[%s15685_s7 + $0xb0] sm:$0xff]  ;;  %v7577_v43 = vld [vmem:[%s15685_s7 + $0xc8] sm:$0xff] }
  0x19   : > { %1072 = vperm.xlu1 %6935, %v7441_v13   ;;  %1067 = vperm.xlu0 %6934, %v7446_v14   ;;  %v7582_v44 = vld [vmem:[%s15685_s7 + $0xc0] sm:$0xff]  ;;  %v7589_v45 = vld [vmem:[%s15685_s7 + $0xd8] sm:$0xff]  ;;  %v7594_v46 = vld [vmem:[%s15685_s7 + $0xd0] sm:$0xff] }
  0x1a   : > { %v7601_v47 = vld [vmem:[%s15685_s7 + $0xe8] sm:$0xff]  ;;  %v7606_v48 = vld [vmem:[%s15685_s7 + $0xe0] sm:$0xff]  ;;  %v7613_v49 = vld [vmem:[%s15685_s7 + $0xf8] sm:$0xff] }
  0x1b   : > { %6747 = vmatmul.mubr.msk.bf16.gmra.mxu0 %vm420_vm1, %v7004_v19  ;;  %6763 = vmatmul.mubr.msk.bf16.gmra.mxu1 %vm420_vm1, %v7005_v20  ;;  %v7618_v50 = vld [vmem:[%s15685_s7 + $0xf0] sm:$0xff] }
  0x1c   : > { %6750 = vmatprep.mubr.msk.bf16.mxu0 %vm420_vm1, %v7006_v21  ;;  %6766 = vmatprep.mubr.msk.bf16.mxu1 %vm420_vm1, %v7007_v22 }
  0x1d   : > { %1082 = vperm.xlu1 %6935, %v7459_v17   ;;  %1077 = vperm.xlu0 %6934, %v7464_v18  }
  0x21   : > { %1092 = vperm.xlu1 %6935, %v7477_v23   ;;  %1087 = vperm.xlu0 %6934, %v7484_v24  }
  0x23   : > { %6751 = vmatmul.mubr.msk.bf16.gmra.mxu0 %vm420_vm1, %v7008_v27  ;;  %6767 = vmatmul.mubr.msk.bf16.gmra.mxu1 %vm420_vm1, %v7009_v28 }
  0x24   : > { %6754 = vmatprep.mubr.msk.bf16.mxu0 %vm420_vm1, %v7010_v29  ;;  %6770 = vmatprep.mubr.msk.bf16.mxu1 %vm420_vm1, %v7011_v30 }
  0x25   : > { %1102 = vperm.xlu1 %6935, %v7493_v25   ;;  %1097 = vperm.xlu0 %6934, %v7498_v26  }
  0x29   : > { %1112 = vperm.xlu1 %6935, %v7511_v31   ;;  %1107 = vperm.xlu0 %6934, %v7516_v32  }
  0x2b   : > { %6755 = vmatmul.mubr.msk.bf16.gmra.mxu0 %vm420_vm1, %v7012_v35  ;;  %6771 = vmatmul.mubr.msk.bf16.gmra.mxu1 %vm420_vm1, %v7013_v36 }
  0x2d   : > { %1122 = vperm.xlu1 %6935, %v7525_v33   ;;  %1117 = vperm.xlu0 %6934, %v7530_v34  }
  0x31   : > { %1132 = vperm.xlu1 %6935, %v7541_v37   ;;  %1127 = vperm.xlu0 %6934, %v7546_v38  }
  0x35   : > { %1142 = vperm.xlu1 %6935, %v7553_v39   ;;  %1137 = vperm.xlu0 %6934, %v7558_v40  }
  0x39   : > { %1152 = vperm.xlu1 %6935, %v7565_v41   ;;  %1147 = vperm.xlu0 %6934, %v7570_v42  }
  0x3d   : > { %1162 = vperm.xlu1 %6935, %v7577_v43   ;;  %1157 = vperm.xlu0 %6934, %v7582_v44  }
  0x41   : > { %1172 = vperm.xlu1 %6935, %v7589_v45   ;;  %1167 = vperm.xlu0 %6934, %v7594_v46  }
  0x45   : > { %1182 = vperm.xlu1 %6935, %v7601_v47   ;;  %1177 = vperm.xlu0 %6934, %v7606_v48  }
  0x49   : > { %1192 = vperm.xlu1 %6935, %v7613_v49   ;;  %1187 = vperm.xlu0 %6934, %v7618_v50  }
  0x4d   : > { %6937 = vset.pattern.permute.xlu1 %v7324_v51  ;;  %6936 = vset.pattern.permute.xlu0 %v7324_v51 }
  0x4e   : > { %1329 = vperm.xlu1 %6937, %v7410_v6   ;;  %1325 = vperm.xlu0 %6936, %v7392_v1  }
  0x52   : > { %1333 = vperm.xlu1 %6937, %v7387_v0   ;;  %1337 = vperm.xlu0 %6936, %v7405_v5  }
  0x56   : > { %1341 = vperm.xlu1 %6937, %v7428_v8   ;;  %1345 = vperm.xlu0 %6936, %v7423_v7  }
  0x5a   : > { %1349 = vperm.xlu1 %6937, %v7446_v14   ;;  %1353 = vperm.xlu0 %6936, %v7441_v13  }
  0x5e   : > { %1357 = vperm.xlu1 %6937, %v7464_v18   ;;  %1361 = vperm.xlu0 %6936, %v7459_v17  }
  0x62   : > { %1365 = vperm.xlu1 %6937, %v7484_v24   ;;  %1369 = vperm.xlu0 %6936, %v7477_v23  }
  0x66   : > { %1373 = vperm.xlu1 %6937, %v7498_v26   ;;  %1377 = vperm.xlu0 %6936, %v7493_v25  }
  0x6a   : > { %1381 = vperm.xlu1 %6937, %v7516_v32   ;;  %1385 = vperm.xlu0 %6936, %v7511_v31  }
  0x6e   : > { %1389 = vperm.xlu1 %6937, %v7530_v34   ;;  %1393 = vperm.xlu0 %6936, %v7525_v33  }
  0x72   : > { %1397 = vperm.xlu1 %6937, %v7546_v38   ;;  %1401 = vperm.xlu0 %6936, %v7541_v37  }
  0x76   : > { %1405 = vperm.xlu1 %6937, %v7558_v40   ;;  %1409 = vperm.xlu0 %6936, %v7553_v39  }
  0x7a   : > { %1413 = vperm.xlu1 %6937, %v7570_v42   ;;  %1417 = vperm.xlu0 %6936, %v7565_v41  }
  0x7e   : > { %1421 = vperm.xlu1 %6937, %v7582_v44   ;;  %1425 = vperm.xlu0 %6936, %v7577_v43  }
  0x82   : > { %1429 = vperm.xlu1 %6937, %v7594_v46   ;;  %1433 = vperm.xlu0 %6936, %v7589_v45  }
  0x86   : > { %1437 = vperm.xlu1 %6937, %v7606_v48   ;;  %1441 = vperm.xlu0 %6936, %v7601_v47  }
  0x88   : > { %v7652_v52 = vpop.permute.xlu1 %1047  ;;  %v7654_v53 = vpop.permute.xlu0 %1037 }
  0x89   : > { %16409 = vst [vmem:[#allocation2_spill] sm:$0xff] %v7652_v52  ;;  %16410 = vst [vmem:[#allocation3_spill] sm:$0xff] %v7654_v53 }
  0x8a   : > { %1445 = vperm.xlu1 %6937, %v7618_v50   ;;  %1449 = vperm.xlu0 %6936, %v7613_v49  }
  0x8c   : > { %v7658_v54 = vpop.permute.xlu1 %1052  ;;  %v7660_v55 = vpop.permute.xlu0 %1042 }
  0x8d   : > { %16411 = vst [vmem:[#allocation4_spill] sm:$0xff] %v7658_v54  ;;  %16412 = vst [vmem:[#allocation5_spill] sm:$0xff] %v7660_v55 }
  0x8e   : > { %6938 = vset.pattern.permute.xlu1 %v7325_v56  ;;  %6939 = vset.pattern.permute.xlu0 %v7325_v56 }
  0x8f   : > { %1582 = vperm.xlu1 %6938, %v7392_v1   ;;  %1586 = vperm.xlu0 %6939, %v7410_v6  }
  0x90   : > { %v7664_v57 = vpop.permute.xlu1 %1062  ;;  %v7666_v58 = vpop.permute.xlu0 %1057 }
  0x91   : > { %16413 = vst [vmem:[#allocation6_spill] sm:$0xff] %v7664_v57  ;;  %16414 = vst [vmem:[#allocation7_spill] sm:$0xff] %v7666_v58 }
  0x93   : > { %1590 = vperm.xlu1 %6938, %v7387_v0   ;;  %1598 = vperm.xlu0 %6939, %v7428_v8  }
  0x94   : > { %v7670_v59 = vpop.permute.xlu1 %1072  ;;  %v7672_v60 = vpop.permute.xlu0 %1067 }
  0x95   : > { %16415 = vst [vmem:[#allocation8_spill] sm:$0xff] %v7670_v59  ;;  %16416 = vst [vmem:[#allocation9_spill] sm:$0xff] %v7672_v60 }
  0x97   : > { %1594 = vperm.xlu1 %6938, %v7405_v5   ;;  %1606 = vperm.xlu0 %6939, %v7446_v14  }
  0x98   : > { %v7676_v61 = vpop.permute.xlu1 %1082  ;;  %v7678_v62 = vpop.permute.xlu0 %1077 }
  0x99   : > { %16417 = vst [vmem:[#allocation10_spill] sm:$0xff] %v7676_v61  ;;  %16418 = vst [vmem:[#allocation11_spill] sm:$0xff] %v7678_v62  ;;  %v7769_v62 = vld [vmem:[%s15680_s2] ss:$0 sm:$0xff] }
  0x9b   : > { %1602 = vperm.xlu1 %6938, %v7423_v7   ;;  %1614 = vperm.xlu0 %6939, %v7464_v18  }
  0x9c   : > { %v7682_v63 = vpop.permute.xlu1 %1092  ;;  %v7684_v2 = vpop.permute.xlu0 %1087 }
  0x9d   : > { %16419 = vst [vmem:[#allocation12_spill] sm:$0xff] %v7682_v63  ;;  %16420 = vst [vmem:[#allocation13_spill] sm:$0xff] %v7684_v2  ;;  %v7326_v63 = vmov 3  }
  0x9f   : > { %1610 = vperm.xlu1 %6938, %v7441_v13   ;;  %1622 = vperm.xlu0 %6939, %v7484_v24  }
  0xa0   : > { %v7688_v3 = vpop.permute.xlu1 %1102  ;;  %v7690_v4 = vpop.permute.xlu0 %1097 }
  0xa1   : > { %16421 = vst [vmem:[#allocation14_spill] sm:$0xff] %v7688_v3  ;;  %16422 = vst [vmem:[#allocation15_spill] sm:$0xff] %v7690_v4 }
  0xa3   : > { %1618 = vperm.xlu1 %6938, %v7459_v17   ;;  %1630 = vperm.xlu0 %6939, %v7498_v26  }
  0xa4   : > { %v7694_v9 = vpop.permute.xlu1 %1112  ;;  %v7696_v10 = vpop.permute.xlu0 %1107 }
  0xa5   : > { %16423 = vst [vmem:[#allocation16_spill] sm:$0xff] %v7694_v9  ;;  %16424 = vst [vmem:[#allocation17_spill] sm:$0xff] %v7696_v10 }
  0xa7   : > { %1626 = vperm.xlu1 %6938, %v7477_v23   ;;  %1638 = vperm.xlu0 %6939, %v7516_v32  }
  0xa8   : > { %v7700_v11 = vpop.permute.xlu1 %1122  ;;  %v7702_v12 = vpop.permute.xlu0 %1117 }
  0xa9   : > { %16425 = vst [vmem:[#allocation18_spill] sm:$0xff] %v7700_v11  ;;  %16426 = vst [vmem:[#allocation19_spill] sm:$0xff] %v7702_v12  ;;  %v968_v12 = vlaneseq }
  0xab   : > { %1634 = vperm.xlu1 %6938, %v7493_v25   ;;  %1646 = vperm.xlu0 %6939, %v7530_v34  }
  0xac   : > { %v7706_v15 = vpop.permute.xlu1 %1132  ;;  %v7708_v16 = vpop.permute.xlu0 %1127 }
  0xad   : > { %16427 = vst [vmem:[#allocation20_spill] sm:$0xff] %v7706_v15  ;;  %16428 = vst [vmem:[#allocation21_spill] sm:$0xff] %v7708_v16 }
  0xaf   : > { %1642 = vperm.xlu1 %6938, %v7511_v31   ;;  %1654 = vperm.xlu0 %6939, %v7546_v38  }
  0xb0   : > { %v7712_v19 = vpop.permute.xlu1 %1142  ;;  %v7714_v20 = vpop.permute.xlu0 %1137 }
  0xb1   : > { %16429 = vst [vmem:[#allocation22_spill] sm:$0xff] %v7712_v19  ;;  %16430 = vst [vmem:[#allocation23_spill] sm:$0xff] %v7714_v20 }
  0xb3   : > { %1650 = vperm.xlu1 %6938, %v7525_v33   ;;  %1662 = vperm.xlu0 %6939, %v7558_v40  }
  0xb4   : > { %v7718_v21 = vpop.permute.xlu1 %1152  ;;  %v7720_v22 = vpop.permute.xlu0 %1147 }
  0xb5   : > { %16431 = vst [vmem:[#allocation24_spill] sm:$0xff] %v7718_v21  ;;  %16432 = vst [vmem:[#allocation25_spill] sm:$0xff] %v7720_v22 }
  0xb7   : > { %1658 = vperm.xlu1 %6938, %v7541_v37   ;;  %1670 = vperm.xlu0 %6939, %v7570_v42  }
  0xb8   : > { %v7724_v27 = vpop.permute.xlu1 %1162  ;;  %v7726_v28 = vpop.permute.xlu0 %1157 }
  0xb9   : > { %16433 = vst [vmem:[#allocation26_spill] sm:$0xff] %v7724_v27  ;;  %16434 = vst [vmem:[#allocation27_spill] sm:$0xff] %v7726_v28 }
  0xbb   : > { %1666 = vperm.xlu1 %6938, %v7553_v39   ;;  %1678 = vperm.xlu0 %6939, %v7582_v44  }
  0xbc   : > { %v7730_v29 = vpop.permute.xlu1 %1172  ;;  %v7732_v30 = vpop.permute.xlu0 %1167 }
  0xbd   : > { %16435 = vst [vmem:[#allocation28_spill] sm:$0xff] %v7730_v29  ;;  %16436 = vst [vmem:[#allocation29_spill] sm:$0xff] %v7732_v30 }
  0xbf   : > { %1674 = vperm.xlu1 %6938, %v7565_v41   ;;  %1686 = vperm.xlu0 %6939, %v7594_v46  }
  0xc0   : > { %v7736_v35 = vpop.permute.xlu1 %1182  ;;  %v7738_v36 = vpop.permute.xlu0 %1177 }
  0xc1   : > { %16437 = vst [vmem:[#allocation30_spill] sm:$0xff] %v7736_v35  ;;  %16438 = vst [vmem:[#allocation31_spill] sm:$0xff] %v7738_v36 }
  0xc3   : > { %1682 = vperm.xlu1 %6938, %v7577_v43   ;;  %1694 = vperm.xlu0 %6939, %v7606_v48  }
  0xc4   : > { %v7742_v51 = vpop.permute.xlu1 %1192  ;;  %v7744_v56 = vpop.permute.xlu0 %1187 }
  0xc5   : > { %16439 = vst [vmem:[#allocation32_spill] sm:$0xff] %v7742_v51  ;;  %16440 = vst [vmem:[#allocation33_spill] sm:$0xff] %v7744_v56 }
  0xc7   : > { %1690 = vperm.xlu1 %6938, %v7589_v45   ;;  %1702 = vperm.xlu0 %6939, %v7618_v50  }
  0xc9   : > { %v7748_v3 = vpop.permute.xlu1 %1329  ;;  %v7750_v10 = vpop.permute.xlu0 %1325 }
  0xca   : > { %16441 = vst [vmem:[#allocation34_spill] sm:$0xff] %v7748_v3  ;;  %16442 = vst [vmem:[#allocation35_spill] sm:$0xff] %v7750_v10 }
  0xcb   : > { %1698 = vperm.xlu1 %6938, %v7601_v47   ;;  %6940 = vset.pattern.permute.xlu0 %v7326_v63 }
  0xcc   : > { %1839 = vperm.xlu0 %6940, %v7392_v1  }
  0xcd   : > { %v7754_v4 = vpop.permute.xlu1 %1333  ;;  %v7756_v61 = vpop.permute.xlu0 %1337 }
  0xce   : > { %16443 = vst [vmem:[#allocation36_spill] sm:$0xff] %v7754_v4  ;;  %16444 = vst [vmem:[#allocation37_spill] sm:$0xff] %v7756_v61 }
  0xcf   : > { %1706 = vperm.xlu1 %6938, %v7613_v49  }
  0xd0   : > { %1851 = vperm.xlu0 %6940, %v7405_v5  }
  0xd1   : > { %v7760_v2 = vpop.permute.xlu1 %1341  ;;  %v7762_v59 = vpop.permute.xlu0 %1345 }
  0xd2   : > { %16445 = vst [vmem:[#allocation38_spill] sm:$0xff] %v7760_v2  ;;  %16446 = vst [vmem:[#allocation39_spill] sm:$0xff] %v7762_v59  ;;  %v7780_v59 = vld [vmem:[%s15681_s3] ss:$0 sm:$0xff] }
  0xd3   : > { %6941 = vset.pattern.permute.xlu1 %v7326_v63  ;;  %v7775_v61 = vpop.f32.mrf.mxu0  ;;  %v6760_v63 = vpop.f32.mrf.mxu1 }
  0xd4   : > { %1843 = vperm.xlu1 %6941, %v7410_v6   ;;  %1859 = vperm.xlu0 %6940, %v7423_v7   ;;  %16449 = vst [vmem:[#allocation42_spill] sm:$0xff] %v7775_v61  ;;  %v659_v54 = vmul.f32 %v6760_v63, %v7769_v62 }
  0xd5   : > { %v7771_v57 = vpop.permute.xlu1 %1349  ;;  %v7773_v60 = vpop.permute.xlu0 %1353 }
  0xd6   : > { %16447 = vst [vmem:[#allocation40_spill] sm:$0xff] %v7771_v57  ;;  %16448 = vst [vmem:[#allocation41_spill] sm:$0xff] %v7773_v60  ;;  %v7783_v10 = vpop.f32.mrf.mxu0  ;;  %v571_v51 = vpop.f32.mrf.mxu1  ;;  %v7788_v57 = vadd.f32 %v7780_v59, %v659_v54 }
  0xd7   : > { %16450 = vst [vmem:[#allocation43_spill] sm:$0xff] %v7783_v10  ;;  %v657_v60 = vmul.f32 %v7769_v62, %v571_v51 }
  0xd8   : > { %1847 = vperm.xlu1 %6941, %v7387_v0   ;;  %1867 = vperm.xlu0 %6940, %v7441_v13   ;;  %v7795_v36 = vpop.f32.mrf.mxu0  ;;  %v6761_v29 = vpop.f32.mrf.mxu1  ;;  %v6536_v63 = vmul.f32 -1.442695, %v7788_v57 }
  0xd9   : > { %v7791_v35 = vpop.permute.xlu1 %1357  ;;  %v7793_v56 = vpop.permute.xlu0 %1361  ;;  %16453 = vst [vmem:[#allocation46_spill] sm:$0xff] %v7795_v36  ;;  %v7799_v2 = vadd.f32 %v7780_v59, %v657_v60  ;;  %v660_v58 = vmul.f32 %v6761_v29, %v7769_v62 }
  0xda   : > { %16451 = vst [vmem:[#allocation44_spill] sm:$0xff] %v7791_v35  ;;  %16452 = vst [vmem:[#allocation45_spill] sm:$0xff] %v7793_v56  ;;  %v7802_v4 = vpop.f32.mrf.mxu0  ;;  %v574_v54 = vpop.f32.mrf.mxu1  ;;  %7014 = vpow2.f32 %v6536_v63 }
  0xdb   : > { %16454 = vst [vmem:[#allocation47_spill] sm:$0xff] %v7802_v4  ;;  %v6534_v51 = vmul.f32 -1.442695, %v7799_v2  ;;  %v7812_v3 = vadd.f32 %v7780_v59, %v660_v58  ;;  %v658_v60 = vmul.f32 %v7769_v62, %v574_v54 }
  0xdc   : > { %1855 = vperm.xlu1 %6941, %v7428_v8   ;;  %1875 = vperm.xlu0 %6940, %v7459_v17   ;;  %v7815_v29 = vpop.f32.mrf.mxu0  ;;  %v6764_v52 = vpop.f32.mrf.mxu1 }
  0xdd   : > { %v7807_v56 = vpop.permute.xlu1 %1365  ;;  %v7809_v35 = vpop.permute.xlu0 %1369  ;;  %16457 = vst [vmem:[#allocation50_spill] sm:$0xff] %v7815_v29  ;;  %v663_v30 = vmul.f32 %v6764_v52, %v7769_v62  ;;  %7016 = vpow2.f32 %v6534_v51  ;;  %v6537_v27 = vmul.f32 -1.442695, %v7812_v3  ;;  %v7820_v55 = vadd.f32 %v7780_v59, %v658_v60 }
  0xde   : > { %16455 = vst [vmem:[#allocation48_spill] sm:$0xff] %v7807_v56  ;;  %16456 = vst [vmem:[#allocation49_spill] sm:$0xff] %v7809_v35  ;;  %v7822_v56 = vpop.f32.mrf.mxu0  ;;  %v587_v35 = vpop.f32.mrf.mxu1 }
  0xdf   : > { %16458 = vst [vmem:[#allocation51_spill] sm:$0xff] %v7822_v56  ;;  %v7827_v58 = vadd.f32 %v7780_v59, %v663_v30  ;;  %v6535_v52 = vmul.f32 -1.442695, %v7820_v55  ;;  %v661_v51 = vmul.f32 %v7769_v62, %v587_v35  ;;  %7018 = vpow2.f32 %v6537_v27 }
  0xe0   : > { %1863 = vperm.xlu1 %6941, %v7446_v14   ;;  %1883 = vperm.xlu0 %6940, %v7477_v23   ;;  %v7835_v60 = vpop.f32.mrf.mxu0  ;;  %v6765_v28 = vpop.f32.mrf.mxu1 }
  0xe1   : > { %v7829_v63 = vpop.permute.xlu1 %1373  ;;  %v7831_v54 = vpop.permute.xlu0 %1377  ;;  %16461 = vst [vmem:[#allocation54_spill] sm:$0xff] %v7835_v60  ;;  %v6540_v21 = vmul.f32 -1.442695, %v7827_v58  ;;  %v7839_v53 = vadd.f32 %v7780_v59, %v661_v51  ;;  %v664_v30 = vmul.f32 %v6765_v28, %v7769_v62  ;;  %7020 = vpow2.f32 %v6535_v52 }
  0xe2   : > { %16459 = vst [vmem:[#allocation52_spill] sm:$0xff] %v7829_v63  ;;  %16460 = vst [vmem:[#allocation53_spill] sm:$0xff] %v7831_v54  ;;  %v7842_v56 = vpop.f32.mrf.mxu0  ;;  %v590_v63 = vpop.f32.mrf.mxu1 }
  0xe3   : > { %16462 = vst [vmem:[#allocation55_spill] sm:$0xff] %v7842_v56  ;;  %v662_v35 = vmul.f32 %v7769_v62, %v590_v63  ;;  %v6538_v60 = vmul.f32 -1.442695, %v7839_v53  ;;  %v7853_v51 = vadd.f32 %v7780_v59, %v664_v30  ;;  %7022 = vpow2.f32 %v6540_v21 }
  0xe4   : > { %1871 = vperm.xlu1 %6941, %v7464_v18   ;;  %1891 = vperm.xlu0 %6940, %v7493_v25   ;;  %v7855_v28 = vpop.f32.mrf.mxu0 }
  0xe5   : > { %v7847_v54 = vpop.permute.xlu1 %1381  ;;  %v7849_v27 = vpop.permute.xlu0 %1385  ;;  %16465 = vst [vmem:[#allocation58_spill] sm:$0xff] %v7855_v28  ;;  %v7858_v56 = vadd.f32 %v7780_v59, %v662_v35  ;;  %v6541_v29 = vmul.f32 -1.442695, %v7853_v51  ;;  %7024 = vpow2.f32 %v6538_v60 }
  0xe6   : > { %16463 = vst [vmem:[#allocation56_spill] sm:$0xff] %v7847_v54  ;;  %16464 = vst [vmem:[#allocation57_spill] sm:$0xff] %v7849_v27  ;;  %v7861_v52 = vpop.f32.mrf.mxu0 }
  0xe7   : > { %16466 = vst [vmem:[#allocation59_spill] sm:$0xff] %v7861_v52  ;;  %v7015_v28 = vpop.eup %7014  ;;  %7026 = vpow2.f32 %v6541_v29  ;;  %v6539_v52 = vmul.f32 -1.442695, %v7858_v56 }
  0xe8   : > { %1879 = vperm.xlu1 %6941, %v7484_v24   ;;  %1899 = vperm.xlu0 %6940, %v7511_v31   ;;  %v7869_v30 = vpop.f32.mrf.mxu0  ;;  %v826_v35 = vadd.f32 1.0, %v7015_v28 }
  0xe9   : > { %v7865_v63 = vpop.permute.xlu1 %1389  ;;  %v7867_v54 = vpop.permute.xlu0 %1393  ;;  %16469 = vst [vmem:[#allocation62_spill] sm:$0xff] %v7869_v30 }
  0xea   : > { %16467 = vst [vmem:[#allocation60_spill] sm:$0xff] %v7865_v63  ;;  %16468 = vst [vmem:[#allocation61_spill] sm:$0xff] %v7867_v54  ;;  %v7871_v4 = vpop.f32.mrf.mxu0  ;;  %v7017_v21 = vpop.eup %7016  ;;  %7028 = vrcp.f32 %v826_v35 }
  0xeb   : > { %16470 = vst [vmem:[#allocation63_spill] sm:$0xff] %v7871_v4  ;;  %v824_v36 = vadd.f32 1.0, %v7017_v21 }
  0xec   : > { %1887 = vperm.xlu1 %6941, %v7498_v26   ;;  %1907 = vperm.xlu0 %6940, %v7525_v33   ;;  %v7880_v10 = vpop.f32.mrf.mxu0  ;;  %v7019_v30 = vpop.eup %7018 }
  0xed   : > { %v7876_v31 = vpop.permute.xlu1 %1397  ;;  %v7878_v60 = vpop.permute.xlu0 %1401  ;;  %7030 = vrcp.f32 %v824_v36  ;;  %v827_v33 = vadd.f32 1.0, %v7019_v30 }
  0xee   : > { %16471 = vst [vmem:[#allocation64_spill] sm:$0xff] %v7876_v31  ;;  %16472 = vst [vmem:[#allocation65_spill] sm:$0xff] %v7878_v60  ;;  %v7882_v29 = vpop.f32.mrf.mxu0  ;;  %7032 = vpow2.f32 %v6539_v52  ;;  %v7021_v61 = vpop.eup %7020 }
  0xef   : > { %16473 = vst [vmem:[#allocation66_spill] sm:$0xff] %v7882_v29  ;;  %7034 = vrcp.f32 %v827_v33  ;;  %v825_v35 = vadd.f32 1.0, %v7021_v61 }
  0xf0   : > { %1895 = vperm.xlu1 %6941, %v7516_v32   ;;  %1915 = vperm.xlu0 %6940, %v7541_v37   ;;  %v6757_v21 = vpop.f32.mrf.mxu0  ;;  %v7023_v36 = vpop.eup %7022 }
  0xf1   : > { %v7886_v28 = vpop.permute.xlu1 %1405  ;;  %v7888_v4 = vpop.permute.xlu0 %1409  ;;  %7036 = vrcp.f32 %v825_v35  ;;  %v656_v27 = vmul.f32 %v6757_v21, %v7769_v62  ;;  %v830_v61 = vadd.f32 1.0, %v7023_v36 }
  0xf2   : > { %16474 = vst [vmem:[#allocation67_spill] sm:$0xff] %v7886_v28  ;;  %16475 = vst [vmem:[#allocation68_spill] sm:$0xff] %v7888_v4  ;;  %v7025_v30 = vpop.eup %7024 }
  0xf3   : > { %v828_v52 = vadd.f32 1.0, %v7025_v30  ;;  %v7900_v33 = vadd.f32 %v7780_v59, %v656_v27 }
  0xf4   : > { %1903 = vperm.xlu1 %6941, %v7530_v34   ;;  %1923 = vperm.xlu0 %6940, %v7553_v39   ;;  %v7027_v9 = vpop.eup %7026 }
  0xf5   : > { %v7892_v29 = vpop.permute.xlu1 %1413  ;;  %v7894_v32 = vpop.permute.xlu0 %1417  ;;  %7038 = vrcp.f32 %v828_v52  ;;  %v831_v63 = vadd.f32 1.0, %v7027_v9 }
  0xf6   : > { %16476 = vst [vmem:[#allocation69_spill] sm:$0xff] %v7892_v29  ;;  %16477 = vst [vmem:[#allocation70_spill] sm:$0xff] %v7894_v32  ;;  %7040 = vrcp.f32 %v830_v61 }
  0xf7   : > { %v7029_v32 = vpop.eup %7028  ;;  %7042 = vrcp.f32 %v831_v63 }
  0xf8   : > { %1911 = vperm.xlu1 %6941, %v7546_v38   ;;  %1931 = vperm.xlu0 %6940, %v7565_v41   ;;  %v7913_v27 = vmul.f32 %v7029_v32, %v7788_v57 }
  0xf9   : > { %v7902_v39 = vpop.permute.xlu1 %1421  ;;  %v7904_v35 = vpop.permute.xlu0 %1425 }
  0xfa   : > { %16478 = vst [vmem:[#allocation71_spill] sm:$0xff] %v7902_v39  ;;  %16479 = vst [vmem:[#allocation72_spill] sm:$0xff] %v7904_v35  ;;  %v7031_v21 = vpop.eup %7030  ;;  %v7918_v35 = vshrl.u32 %v968_v12, 7 }
  0xfb   : > { %v7033_v30 = vpop.eup %7032  ;;  %v7916_v52 = vmul.f32 %v7031_v21, %v7799_v2  ;;  %v954_v2 = vrot.slane %v7913_v27, 1 }
  0xfc   : > { %1919 = vperm.xlu1 %6941, %v7558_v40   ;;  %1939 = vperm.xlu0 %6940, %v7577_v43   ;;  %v829_v9 = vadd.f32 1.0, %v7033_v30  ;;  %16482 = vst [vmem:[#allocation75_spill] sm:$0xff] %v7918_v35  ;;  %v7035_v40 = vpop.eup %7034  ;;  %vm970_vm2 = vcmp.lt.s32.totalorder %v7918_v35, 7  ;;  %vm1291_vm3 = vcmp.lt.s32.totalorder %v7918_v35, 1  ;;  %vm1548_vm4 = vcmp.lt.s32.totalorder %v7918_v35, 6 }
  0xfd   : > { %v7908_v38 = vpop.permute.xlu1 %1429  ;;  %v7910_v36 = vpop.permute.xlu0 %1433  ;;  %v7923_v43 = vmul.f32 %v7035_v40, %v7812_v3  ;;  %vm1805_vm5 = vcmp.lt.s32.totalorder %v7918_v35, 2 }
  0xfe   : > { %16480 = vst [vmem:[#allocation73_spill] sm:$0xff] %v7908_v38  ;;  %16481 = vst [vmem:[#allocation74_spill] sm:$0xff] %v7910_v36  ;;  %7044 = vrcp.f32 %v829_v9  ;;  %v7037_v63 = vpop.eup %7036 }
  0xff   : > { %v955_v32 = vrot.slane %v7923_v43, 1  ;;  %v7932_v12 = vmul.f32 %v7037_v63, %v7820_v55  ;;  %v1278_v39 = vrot.slane %v7923_v43, 7 }
 0x100   : > { %1927 = vperm.xlu1 %6941, %v7570_v42   ;;  %1947 = vperm.xlu0 %6940, %v7589_v45   ;;  %v15738_v42 = vrot.slane %v7916_v52, 7 }
 0x101   : > { %v7925_v61 = vpop.permute.xlu1 %1437  ;;  %v7927_v57 = vpop.permute.xlu0 %1441  ;;  %v15736_v3 = vrot.slane %v7932_v12, 1  ;;  %v1276_v21 = vrot.slane %v7932_v12, 7  ;;  %v983_v55 = vsel %vm970_vm2, %v954_v2, %v955_v32 }
 0x102   : > { %16483 = vst [vmem:[#allocation76_spill] sm:$0xff] %v7925_v61  ;;  %16484 = vst [vmem:[#allocation77_spill] sm:$0xff] %v7927_v57  ;;  %v7039_v40 = vpop.eup %7038 }
 0x103   : > { %v7948_v63 = vmul.f32 %v7039_v40, %v7839_v53  ;;  %v1306_v61 = vsel %vm1291_vm3, %v15738_v42, %v1276_v21 }
 0x104   : > { %1935 = vperm.xlu1 %6941, %v7582_v44   ;;  %1955 = vperm.xlu0 %6940, %v7601_v47   ;;  %v984_v44 = vsel %vm970_vm2, %v15736_v3, %v954_v2  ;;  %v1469_v40 = vadd.f32 %v7867_v54, %v1306_v61  ;;  %v7041_v2 = vpop.eup %7040  ;;  %v15743_v61 = vmov 4  }
 0x105   : > { %v7940_v30 = vpop.permute.xlu1 %1445  ;;  %v7942_v9 = vpop.permute.xlu0 %1449  ;;  %v1212_v57 = vadd.f32 %v7700_v11, %v984_v44  ;;  %v956_v53 = vrot.slane %v7948_v63, 1 }
 0x106   : > { %16485 = vst [vmem:[#allocation78_spill] sm:$0xff] %v7940_v30  ;;  %16486 = vst [vmem:[#allocation79_spill] sm:$0xff] %v7942_v9  ;;  %v1277_v9 = vrot.slane %v7913_v27, 7  ;;  %v1213_v30 = vadd.f32 %v7708_v16, %v983_v55  ;;  %v7043_v38 = vpop.eup %7042 }
 0x107   : > { %v1244_v3 = vmax.f32 %v7932_v12, %v1212_v57  ;;  %v7979_v57 = vmul.f32 %v7041_v2, %v7827_v58 }
 0x108   : > { %1943 = vperm.xlu1 %6941, %v7594_v46   ;;  %1963 = vperm.xlu0 %6940, %v7613_v49   ;;  %v1245_v44 = vmax.f32 %v7913_v27, %v1213_v30  ;;  %v1305_v46 = vsel %vm1291_vm3, %v1276_v21, %v1277_v9  ;;  %v982_v30 = vsel %vm970_vm2, %v955_v32, %v956_v53 }
 0x109   : > { %v7973_v11 = vmax.f32 %v1244_v3, %v1469_v40  ;;  %16489 = vst [vmem:[#allocation82_spill] sm:$0xff] %v7979_v57  ;;  %v1470_v55 = vadd.f32 %v7876_v31, %v1305_v46  ;;  %v7986_v3 = vmul.f32 %v7043_v38, %v7853_v51  ;;  %v1214_v40 = vadd.f32 %v7706_v15, %v982_v30 }
 0x10a   : > { %v7966_v36 = vpop.permute.xlu1 %1582  ;;  %v7968_v42 = vpop.permute.xlu0 %1586  ;;  %v1279_v51 = vrot.slane %v7948_v63, 7  ;;  %v958_v38 = vrot.slane %v7979_v57, 1 }
 0x10b   : > { %16487 = vst [vmem:[#allocation80_spill] sm:$0xff] %v7966_v36  ;;  %16488 = vst [vmem:[#allocation81_spill] sm:$0xff] %v7968_v42  ;;  %v7045_v21 = vpop.eup %7044  ;;  %v7998_v46 = vmax.f32 %v1245_v44, %v1470_v55  ;;  %v1246_v32 = vmax.f32 %v7923_v43, %v1214_v40  ;;  %v16496_v15 = vrot.slane %v7986_v3, 1 }
 0x10c   : > { %1951 = vperm.xlu1 %6941, %v7606_v48   ;;  %6943 = vset.pattern.permute.xlu0 %v15743_v61  ;;  %16490 = vst [vmem:[#allocation83_spill] sm:$0xff] %v7986_v3  ;;  %v1304_v48 = vsel %vm1291_vm3, %v1277_v9, %v1278_v39  ;;  %v7996_v2 = vmul.f32 %v7045_v21, %v7858_v56 }
 0x10d   : > { %2035 = vperm.xlu0 %6943, %v7410_v6   ;;  %v1471_v6 = vadd.f32 %v7878_v60, %v1304_v48  ;;  %v1303_v44 = vsel %vm1291_vm3, %v1278_v39, %v1279_v51 }
 0x10e   : > { %v7991_v61 = vpop.permute.xlu1 %1590  ;;  %v7993_v58 = vpop.permute.xlu0 %1598  ;;  %v957_v9 = vrot.slane %v7996_v2, 1  ;;  %v1280_v55 = vrot.slane %v7996_v2, 7 }
 0x10f   : > { %16491 = vst [vmem:[#allocation84_spill] sm:$0xff] %v7991_v61  ;;  %16492 = vst [vmem:[#allocation85_spill] sm:$0xff] %v7993_v58  ;;  %v8008_v56 = vmax.f32 %v1246_v32, %v1471_v6  ;;  %v16495_v32 = vmov 4  }
 0x110   : > { %1959 = vperm.xlu1 %6941, %v7618_v50   ;;  %v981_v48 = vsel %vm970_vm2, %v956_v53, %v957_v9  ;;  %v1302_v6 = vsel %vm1291_vm3, %v1279_v51, %v1280_v55 }
 0x111   : > { %2047 = vperm.xlu0 %6943, %v7428_v8   ;;  %v1215_v60 = vadd.f32 %v7714_v20, %v981_v48  ;;  %v980_v8 = vsel %vm970_vm2, %v957_v9, %v958_v38  ;;  %v1473_v30 = vadd.f32 %v7888_v4, %v1302_v6  ;;  %v1472_v48 = vadd.f32 %v7886_v28, %v1303_v44 }
 0x112   : > { %v8013_v21 = vpop.permute.xlu1 %1594  ;;  %v8015_v40 = vpop.permute.xlu0 %1606  ;;  %v1216_v39 = vadd.f32 %v7712_v19, %v980_v8  ;;  %v979_v9 = vsel %vm970_vm2, %v958_v38, %v16496_v15 }
 0x113   : > { %16493 = vst [vmem:[#allocation86_spill] sm:$0xff] %v8013_v21  ;;  %16494 = vst [vmem:[#allocation87_spill] sm:$0xff] %v8015_v40  ;;  %v1247_v53 = vmax.f32 %v7948_v63, %v1215_v60  ;;  %v1217_v6 = vadd.f32 %v7720_v22, %v979_v9  ;;  %v8349_v40 = vld [vmem:[%s15685_s7 + $0x58] sm:$0xff] }
 0x114   : > { %6942 = vset.pattern.permute.xlu1 %v16495_v32  ;;  %v1248_v8 = vmax.f32 %v7996_v2, %v1216_v39 }
 0x115   : > { %2031 = vperm.xlu1 %6942, %v7392_v1   ;;  %2055 = vperm.xlu0 %6943, %v7446_v14   ;;  %v15751_v1 = vrot.slane %v7979_v57, 7  ;;  %v8042_v14 = vmax.f32 %v1247_v53, %v1472_v48  ;;  %v1249_v44 = vmax.f32 %v7979_v57, %v1217_v6 }
 0x116   : > { %v8035_v51 = vpop.permute.xlu1 %1602  ;;  %v8037_v16 = vpop.permute.xlu0 %1614  ;;  %v8044_v60 = vmax.f32 %v1248_v8, %v1473_v30  ;;  %v6533_v8 = vmul.f32 -1.442695, %v7900_v33 }
 0x117   : > { %16497 = vst [vmem:[#allocation88_spill] sm:$0xff] %v8035_v51  ;;  %16498 = vst [vmem:[#allocation89_spill] sm:$0xff] %v8037_v16  ;;  %v1301_v15 = vsel %vm1291_vm3, %v1280_v55, %v15751_v1  ;;  %v16561_v16 = vld [vmem:[#allocation50_spill] sm:$0xff] }
 0x118   : > { %v1474_v38 = vadd.f32 %v7892_v29, %v1301_v15  ;;  %7046 = vpow2.f32 %v6533_v8  ;;  %v647_v51 = vmul.f32 %v16561_v16, %v7769_v62  ;;  %16562 = vst [vmem:[#allocation50_spill] sm:$0xff] %v8349_v40 }
 0x119   : > { %2039 = vperm.xlu1 %6942, %v7387_v0   ;;  %2063 = vperm.xlu0 %6943, %v7464_v18  }
 0x11a   : > { %v8054_v39 = vpop.permute.xlu1 %1610  ;;  %v8056_v9 = vpop.permute.xlu0 %1622  ;;  %v8058_v53 = vmax.f32 %v1249_v44, %v1474_v38  ;;  %v8373_v61 = vadd.f32 %v7780_v59, %v647_v51 }
 0x11b   : > { %16499 = vst [vmem:[#allocation90_spill] sm:$0xff] %v8054_v39  ;;  %16500 = vst [vmem:[#allocation91_spill] sm:$0xff] %v8056_v9 }
 0x11d   : > { %2043 = vperm.xlu1 %6942, %v7405_v5   ;;  %2071 = vperm.xlu0 %6943, %v7484_v24  }
 0x11e   : > { %v8062_v30 = vpop.permute.xlu1 %1618  ;;  %v8064_v48 = vpop.permute.xlu0 %1630 }
 0x11f   : > { %16501 = vst [vmem:[#allocation92_spill] sm:$0xff] %v8062_v30  ;;  %16502 = vst [vmem:[#allocation93_spill] sm:$0xff] %v8064_v48  ;;  %v16559_v48 = vld [vmem:[#allocation47_spill] sm:$0xff] }
 0x120   : > { %v642_v30 = vmul.f32 %v7769_v62, %v16559_v48  ;;  %v1789_v48 = vrot.slane %v7916_v52, 6 }
 0x121   : > { %2051 = vperm.xlu1 %6942, %v7423_v7   ;;  %2079 = vperm.xlu0 %6943, %v7498_v26   ;;  %v655_v7 = vmul.f32 %v7880_v10, %v7769_v62 }
 0x122   : > { %v8068_v0 = vpop.permute.xlu1 %1626  ;;  %v8070_v18 = vpop.permute.xlu0 %1638 }
 0x123   : > { %16503 = vst [vmem:[#allocation94_spill] sm:$0xff] %v8068_v0  ;;  %16504 = vst [vmem:[#allocation95_spill] sm:$0xff] %v8070_v18  ;;  %v8322_v18 = vld [vmem:[%s15685_s7 + $0x8] sm:$0xff] }
 0x125   : > { %2059 = vperm.xlu1 %6942, %v7441_v13   ;;  %2151 = vperm.xlu0 %6943, %v7618_v50   ;;  %v694_v13 = vadd.f32 %v7780_v59, %v655_v7  ;;  %v7047_v8 = vpop.eup %7046 }
 0x126   : > { %v8074_v55 = vpop.permute.xlu1 %1634  ;;  %v8076_v5 = vpop.permute.xlu0 %1646  ;;  %v823_v1 = vadd.f32 1.0, %v7047_v8 }
 0x127   : > { %16505 = vst [vmem:[#allocation96_spill] sm:$0xff] %v8074_v55  ;;  %16506 = vst [vmem:[#allocation97_spill] sm:$0xff] %v8076_v5  ;;  %v6532_v44 = vmul.f32 -1.442695, %v694_v13 }
 0x129   : > { %2067 = vperm.xlu1 %6942, %v7459_v17   ;;  %2147 = vperm.xlu0 %6943, %v7601_v47   ;;  %7048 = vpow2.f32 %v6532_v44 }
 0x12a   : > { %v8082_v24 = vpop.permute.xlu1 %1642  ;;  %v8084_v26 = vpop.permute.xlu0 %1654  ;;  %7050 = vrcp.f32 %v823_v1 }
 0x12b   : > { %16507 = vst [vmem:[#allocation98_spill] sm:$0xff] %v8082_v24  ;;  %16508 = vst [vmem:[#allocation99_spill] sm:$0xff] %v8084_v26 }
 0x12d   : > { %2075 = vperm.xlu1 %6942, %v7477_v23   ;;  %2139 = vperm.xlu0 %6943, %v7589_v45  }
 0x12e   : > { %v8090_v6 = vpop.permute.xlu1 %1650  ;;  %v8092_v17 = vpop.permute.xlu0 %1662 }
 0x12f   : > { %16509 = vst [vmem:[#allocation100_spill] sm:$0xff] %v8090_v6  ;;  %16510 = vst [vmem:[#allocation101_spill] sm:$0xff] %v8092_v17 }
 0x131   : > { %2083 = vperm.xlu1 %6942, %v7493_v25   ;;  %2095 = vperm.xlu0 %6943, %v7530_v34  }
 0x132   : > { %v8096_v10 = vpop.permute.xlu1 %1658  ;;  %v8098_v15 = vpop.permute.xlu0 %1670 }
 0x133   : > { %16511 = vst [vmem:[#allocation102_spill] sm:$0xff] %v8096_v10  ;;  %16512 = vst [vmem:[#allocation103_spill] sm:$0xff] %v8098_v15 }
 0x135   : > { %2155 = vperm.xlu1 %6942, %v7613_v49   ;;  %2107 = vperm.xlu0 %6943, %v7541_v37  }
 0x136   : > { %v8102_v23 = vpop.permute.xlu1 %1666  ;;  %v8104_v45 = vpop.permute.xlu0 %1678 }
 0x137   : > { %16513 = vst [vmem:[#allocation104_spill] sm:$0xff] %v8102_v23  ;;  %16514 = vst [vmem:[#allocation105_spill] sm:$0xff] %v8104_v45  ;;  %v7049_v37 = vpop.eup %7048 }
 0x138   : > { %v822_v22 = vadd.f32 1.0, %v7049_v37  ;;  %v7051_v8 = vpop.eup %7050 }
 0x139   : > { %2123 = vperm.xlu0 %6943, %v7565_v41   ;;  %v8136_v1 = vmul.f32 %v7051_v8, %v7900_v33  ;;  %v16535_v33 = vrot.slane %v7932_v12, 1 }
 0x13a   : > { %v8107_v25 = vpop.permute.xlu1 %1674  ;;  %v8109_v38 = vpop.permute.xlu0 %1686  ;;  %7052 = vrcp.f32 %v822_v22 }
 0x13b   : > { %16515 = vst [vmem:[#allocation106_spill] sm:$0xff] %v8107_v25  ;;  %16516 = vst [vmem:[#allocation107_spill] sm:$0xff] %v8109_v38 }
 0x13c   : > { %16529 = vst [vmem:[#allocation120_spill] sm:$0xff] %v8136_v1 }
 0x13e   : > { %v8111_v34 = vpop.permute.xlu1 %1682  ;;  %v8113_v7 = vpop.permute.xlu0 %1694 }
 0x13f   : > { %16517 = vst [vmem:[#allocation108_spill] sm:$0xff] %v8111_v34  ;;  %16518 = vst [vmem:[#allocation109_spill] sm:$0xff] %v8113_v7  ;;  %v16539_v7 = vrot.slane %v8136_v1, 1  ;;  %v16541_v34 = vld [vmem:[#allocation16_spill] sm:$0xff] }
 0x142   : > { %v8115_v29 = vpop.permute.xlu1 %1690  ;;  %v8117_v44 = vpop.permute.xlu0 %1702 }
 0x143   : > { %16519 = vst [vmem:[#allocation110_spill] sm:$0xff] %v8115_v29  ;;  %16520 = vst [vmem:[#allocation111_spill] sm:$0xff] %v8117_v44 }
 0x146   : > { %v8119_v19 = vpop.permute.xlu1 %1698 }
 0x147   : > { %16521 = vst [vmem:[#allocation112_spill] sm:$0xff] %v8119_v19  ;;  %v8121_v41 = vpop.permute.xlu0 %1839  ;;  %v7053_v37 = vpop.eup %7052 }
 0x148   : > { %16522 = vst [vmem:[#allocation113_spill] sm:$0xff] %v8121_v41 }
 0x14a   : > { %v8123_v28 = vpop.permute.xlu1 %1706 }
 0x14b   : > { %16523 = vst [vmem:[#allocation114_spill] sm:$0xff] %v8123_v28  ;;  %v8125_v4 = vpop.permute.xlu0 %1851  ;;  %v952_v28 = vrot.slane %v7916_v52, 1 }
 0x14c   : > { %16524 = vst [vmem:[#allocation115_spill] sm:$0xff] %v8125_v4  ;;  %v8143_v4 = vmul.f32 %v7053_v37, %v694_v13  ;;  %v16537_v13 = vrot.slane %v7916_v52, 7 }
 0x14d   : > { %v985_v8 = vsel %vm970_vm2, %v952_v28, %v16535_v33  ;;  %v986_v33 = vsel %vm970_vm2, %v16539_v7, %v952_v28  ;;  %v16544_v28 = vrot.slane %v8136_v1, 2 }
 0x14e   : > { %16532 = vst [vmem:[#allocation123_spill] sm:$0xff] %v8143_v4  ;;  %v1210_v38 = vadd.f32 %v16541_v34, %v986_v33  ;;  %v16542_v25 = vrot.slane %v8143_v4, 7  ;;  %v1534_v34 = vrot.slane %v7913_v27, 2  ;;  %v16564_v21 = vrot.slane %v8143_v4, 6 }
 0x14f   : > { %v8127_v20 = vpop.permute.xlu1 %1843  ;;  %v8129_v31 = vpop.permute.xlu0 %1859  ;;  %v15831_v4 = vmov 6  }
 0x150   : > { %16525 = vst [vmem:[#allocation116_spill] sm:$0xff] %v8127_v20  ;;  %16526 = vst [vmem:[#allocation117_spill] sm:$0xff] %v8129_v31  ;;  %v1274_v20 = vrot.slane %v8136_v1, 7  ;;  %v1532_v31 = vrot.slane %v7916_v52, 2 }
 0x152   : > { %v1307_v37 = vsel %vm1291_vm3, %v1274_v20, %v16537_v13 }
 0x153   : > { %v8131_v54 = vpop.permute.xlu1 %1847  ;;  %v8133_v44 = vpop.permute.xlu0 %1867 }
 0x154   : > { %16527 = vst [vmem:[#allocation118_spill] sm:$0xff] %v8131_v54  ;;  %16528 = vst [vmem:[#allocation119_spill] sm:$0xff] %v8133_v44  ;;  %v1308_v44 = vsel %vm1291_vm3, %v16542_v25, %v1274_v20  ;;  %v1535_v25 = vrot.slane %v7923_v43, 2 }
 0x157   : > { %v8138_v19 = vpop.permute.xlu1 %1855  ;;  %v8140_v22 = vpop.permute.xlu0 %1875 }
 0x158   : > { %16530 = vst [vmem:[#allocation121_spill] sm:$0xff] %v8138_v19  ;;  %16531 = vst [vmem:[#allocation122_spill] sm:$0xff] %v8140_v22  ;;  %v16536_v22 = vld [vmem:[#allocation19_spill] sm:$0xff] }
 0x159   : > { %v1211_v19 = vadd.f32 %v16536_v22, %v985_v8 }
 0x15b   : > { %v8147_v41 = vpop.permute.xlu1 %1863  ;;  %v8150_v54 = vpop.permute.xlu0 %1883  ;;  %v1243_v22 = vmax.f32 %v7916_v52, %v1211_v19  ;;  %v1564_v19 = vsel %vm1548_vm4, %v16544_v28, %v1532_v31  ;;  %v15793_v28 = vrot.slane %v7986_v3, 2  ;;  %v1791_v52 = vrot.slane %v7913_v27, 6 }
 0x15c   : > { %16533 = vst [vmem:[#allocation124_spill] sm:$0xff] %v8147_v41  ;;  %16534 = vst [vmem:[#allocation125_spill] sm:$0xff] %v8150_v54  ;;  %v1533_v41 = vrot.slane %v7932_v12, 2  ;;  %v16538_v54 = vld [vmem:[#allocation60_spill] sm:$0xff]  ;;  %v8192_v33 = vadd.f32 %v8082_v24, %v1564_v19  ;;  %v1561_v19 = vsel %vm1548_vm4, %v1534_v34, %v1535_v25 }
 0x15d   : > { %v1468_v29 = vadd.f32 %v16538_v54, %v1307_v37  ;;  %v16543_v54 = vld [vmem:[#allocation57_spill] sm:$0xff] }
 0x15e   : > { %v1563_v13 = vsel %vm1548_vm4, %v1532_v31, %v1533_v41  ;;  %v1467_v45 = vadd.f32 %v16543_v54, %v1308_v44  ;;  %v1536_v44 = vrot.slane %v7948_v63, 2 }
 0x15f   : > { %v8170_v8 = vpop.permute.xlu1 %1871  ;;  %v8181_v37 = vadd.f32 %v8076_v5, %v1563_v13  ;;  %v8188_v7 = vmax.f32 %v1243_v22, %v1468_v29  ;;  %v8195_v20 = vpop.permute.xlu0 %1891  ;;  %v1537_v13 = vrot.slane %v7996_v2, 2  ;;  %v1538_v5 = vrot.slane %v7979_v57, 2 }
 0x160   : > { %16540 = vst [vmem:[#allocation126_spill] sm:$0xff] %v8170_v8  ;;  %v1242_v8 = vmax.f32 %v8136_v1, %v1210_v38  ;;  %16545 = vst [vmem:[#allocation127_spill] sm:$0xff] %v8195_v20  ;;  %v1562_v22 = vsel %vm1548_vm4, %v1533_v41, %v1534_v34 }
 0x161   : > { %v8213_v24 = vadd.f32 %v8090_v6, %v1562_v22  ;;  %v1559_v54 = vsel %vm1548_vm4, %v1536_v44, %v1537_v13 }
 0x162   : > { %v8205_v38 = vmax.f32 %v1242_v8, %v1467_v45  ;;  %v8222_v8 = vadd.f32 %v8084_v26, %v1561_v19  ;;  %v8225_v41 = vadd.f32 %v8092_v17, %v1559_v54  ;;  %v8283_v54 = vld [vmem:[%s15685_s7 + $0x28] sm:$0xff]  ;;  %v8304_v17 = vld [vmem:[%s15685_s7] sm:$0xff] }
 0x163   : > { %v8201_v31 = vpop.permute.xlu1 %1879  ;;  %v8247_v22 = vpop.permute.xlu0 %1899 }
 0x164   : > { %16546 = vst [vmem:[#allocation128_spill] sm:$0xff] %v8201_v31  ;;  %v1560_v31 = vsel %vm1548_vm4, %v1535_v25, %v1536_v44  ;;  %v1557_v25 = vsel %vm1548_vm4, %v1538_v5, %v15793_v28  ;;  %v1558_v44 = vsel %vm1548_vm4, %v1537_v13, %v1538_v5  ;;  %16547 = vst [vmem:[#allocation129_spill] sm:$0xff] %v8247_v22  ;;  %v15794_v13 = vmov 5  }
 0x165   : > { %v8228_v34 = vadd.f32 %v8096_v10, %v1560_v31  ;;  %v8245_v29 = vadd.f32 %v8098_v15, %v1557_v25  ;;  %v8250_v45 = vadd.f32 %v8102_v23, %v1558_v44  ;;  %6944 = vset.pattern.permute.xlu1 %v15794_v13  ;;  %6983 = vset.pattern.permute.xlu0 %v15794_v13  ;;  %v8263_v25 = vld [vmem:[%s15685_s7 + $0x18] sm:$0xff]  ;;  %v8269_v44 = vld [vmem:[%s15685_s7 + $0x10] sm:$0xff]  ;;  %v8277_v13 = vld [vmem:[%s15685_s7 + $0x20] sm:$0xff] }
 0x166   : > { %2235 = vperm.xlu1 %6944, %v8263_v25   ;;  %2231 = vperm.xlu0 %6983, %v8269_v44   ;;  %v8291_v31 = vld [vmem:[%s15685_s7 + $0x30] sm:$0xff]  ;;  %v16551_v15 = vld [vmem:[#allocation42_spill] sm:$0xff]  ;;  %v16568_v36 = vmax.f32 %v8205_v38, %v8192_v33 }
 0x167   : > { %v8252_v28 = vpop.permute.xlu1 %1887  ;;  %v8272_v5 = vpop.permute.xlu0 %1907  ;;  %v643_v23 = vmul.f32 %v16551_v15, %v7769_v62 }
 0x168   : > { %16548 = vst [vmem:[#allocation130_spill] sm:$0xff] %v8252_v28  ;;  %16549 = vst [vmem:[#allocation131_spill] sm:$0xff] %v8272_v5  ;;  %v8313_v15 = vpop.f32.mrf.mxu1  ;;  %v16555_v28 = vld [vmem:[#allocation46_spill] sm:$0xff] }
 0x169   : > { %v8309_v6 = vadd.f32 %v7780_v59, %v643_v23  ;;  %v644_v20 = vmul.f32 %v16555_v28, %v7769_v62 }
 0x16a   : > { %2239 = vperm.xlu1 %6944, %v8277_v13   ;;  %2243 = vperm.xlu0 %6983, %v8283_v54   ;;  %v603_v0 = vpop.f32.mrf.mxu1 }
 0x16b   : > { %v8286_v19 = vpop.permute.xlu1 %1895  ;;  %v8297_v10 = vpop.permute.xlu0 %1915  ;;  %v6520_v28 = vmul.f32 -1.442695, %v8309_v6  ;;  %v8341_v39 = vadd.f32 %v7780_v59, %v644_v20 }
 0x16c   : > { %16550 = vst [vmem:[#allocation132_spill] sm:$0xff] %v8286_v19  ;;  %16552 = vst [vmem:[#allocation42_spill] sm:$0xff] %v8297_v10  ;;  %v8355_v9 = vpop.f32.mrf.mxu1 }
 0x16d   : > { %16560 = vst [vmem:[#allocation47_spill] sm:$0xff] %v8341_v39  ;;  %7054 = vpow2.f32 %v6520_v28  ;;  %v6521_v58 = vmul.f32 -1.442695, %v8341_v39 }
 0x16e   : > { %2247 = vperm.xlu1 %6944, %v8291_v31   ;;  %2343 = vperm.xlu0 %6983, %v7618_v50   ;;  %v16554_v50 = vld [vmem:[#allocation43_spill] sm:$0xff] }
 0x16f   : > { %v8299_v26 = vpop.permute.xlu1 %1903  ;;  %v641_v19 = vmul.f32 %v7769_v62, %v16554_v50  ;;  %v8317_v55 = vpop.permute.xlu0 %1923 }
 0x170   : > { %16553 = vst [vmem:[#allocation133_spill] sm:$0xff] %v8299_v26  ;;  %16556 = vst [vmem:[#allocation43_spill] sm:$0xff] %v8317_v55 }
 0x171   : > { %v8335_v50 = vadd.f32 %v7780_v59, %v641_v19  ;;  %v1788_v19 = vrot.slane %v8136_v1, 6  ;;  %v1790_v1 = vrot.slane %v7932_v12, 6  ;;  %v8382_v12 = vld [vmem:[%s15685_s7 + $0x78] sm:$0xff] }
 0x172   : > { %2223 = vperm.xlu1 %6944, %v8304_v17   ;;  %2339 = vperm.xlu0 %6983, %v7601_v47   ;;  %v8328_v47 = vld [vmem:[%s15685_s7 + $0x40] sm:$0xff] }
 0x173   : > { %v8331_v23 = vpop.permute.xlu1 %1911  ;;  %16558 = vst [vmem:[#allocation134_spill] sm:$0xff] %v8335_v50  ;;  %v6518_v20 = vmul.f32 -1.442695, %v8335_v50  ;;  %v8358_v16 = vpop.permute.xlu0 %1931  ;;  %v1820_v27 = vsel %vm1805_vm5, %v1789_v48, %v1790_v1  ;;  %v1821_v51 = vsel %vm1805_vm5, %v1788_v19, %v1789_v48  ;;  %v665_v50 = vmul.f32 %v7769_v62, %v603_v0 }
 0x174   : > { %16557 = vst [vmem:[#allocation46_spill] sm:$0xff] %v8331_v23  ;;  %16563 = vst [vmem:[#allocation135_spill] sm:$0xff] %v8358_v16  ;;  %v16566_v16 = vld [vmem:[#allocation51_spill] sm:$0xff]  ;;  %v1983_v39 = vadd.f32 %v8272_v5, %v1820_v27  ;;  %v1819_v48 = vsel %vm1805_vm5, %v1790_v1, %v1791_v52 }
 0x175   : > { %v1984_v0 = vadd.f32 %v8331_v23, %v1819_v48  ;;  %v7280_v1 = vld [vmem:[%s15685_s7 + $0x88] sm:$0xff]  ;;  %v16582_v48 = vmax.f32 %v8042_v14, %v8225_v41  ;;  %7056 = vpow2.f32 %v6518_v20 }
 0x176   : > { %2227 = vperm.xlu1 %6944, %v8322_v18   ;;  %2255 = vperm.xlu0 %6983, %v8328_v47   ;;  %7058 = vpow2.f32 %v6521_v58 }
 0x177   : > { %v8369_v28 = vpop.permute.xlu1 %1919  ;;  %v8419_v27 = vpop.permute.xlu0 %1939 }
 0x178   : > { %16565 = vst [vmem:[#allocation136_spill] sm:$0xff] %v8369_v28  ;;  %16574 = vst [vmem:[#allocation138_spill] sm:$0xff] %v8419_v27 }
 0x17a   : > { %2347 = vperm.xlu1 %6944, %v7613_v49   ;;  %2267 = vperm.xlu0 %6983, %v8349_v40   ;;  %v8361_v49 = vadd.f32 %v7780_v59, %v642_v30  ;;  %v1822_v40 = vsel %vm1805_vm5, %v16564_v21, %v1788_v19  ;;  %v645_v30 = vmul.f32 %v7769_v62, %v16566_v16  ;;  %v1792_v21 = vrot.slane %v7923_v43, 6  ;;  %v16567_v16 = vld [vmem:[#allocation54_spill] sm:$0xff]  ;;  %v7055_v20 = vpop.eup %7054 }
 0x17b   : > { %v1981_v42 = vadd.f32 %v8247_v22, %v1822_v40  ;;  %v1793_v40 = vrot.slane %v7948_v63, 6  ;;  %v606_v22 = vpop.f32.mrf.mxu1  ;;  %v1982_v43 = vadd.f32 %v8299_v26, %v1821_v51  ;;  %v1794_v19 = vrot.slane %v7996_v2, 6 }
 0x17c   : > { %v1818_v63 = vsel %vm1805_vm5, %v1791_v52, %v1792_v21  ;;  %v666_v2 = vmul.f32 %v7769_v62, %v606_v22  ;;  %v16578_v51 = vmax.f32 %v7998_v46, %v8222_v8  ;;  %v16580_v46 = vmax.f32 %v8044_v60, %v8250_v45 }
 0x17d   : > { %v8397_v3 = vmax.f32 %v16568_v36, %v1981_v42  ;;  %v1985_v36 = vadd.f32 %v8297_v10, %v1818_v63  ;;  %v16572_v42 = vmax.f32 %v8188_v7, %v8181_v37  ;;  %v8430_v37 = vpop.permute.xlu1 %1927  ;;  %v16576_v7 = vmax.f32 %v8008_v56, %v8228_v34 }
 0x17e   : > { %6945 = vset.pattern.permute.xlu1 %v15831_v4  ;;  %2283 = vperm.xlu0 %6983, %v8382_v12   ;;  %v648_v4 = vmul.f32 %v16567_v16, %v7769_v62  ;;  %v16570_v16 = vmax.f32 %v7973_v11, %v8213_v24  ;;  %v1816_v11 = vsel %vm1805_vm5, %v1793_v40, %v1794_v19  ;;  %v6524_v60 = vmul.f32 -1.442695, %v8373_v61 }
 0x17f   : > { %2423 = vperm.xlu1 %6945, %v8269_v44   ;;  %16569 = vst [vmem:[#allocation51_spill] sm:$0xff] %v8397_v3  ;;  %v8416_v38 = vmax.f32 %v16572_v42, %v1982_v43  ;;  %v1817_v24 = vsel %vm1805_vm5, %v1792_v21, %v1793_v40  ;;  %16575 = vst [vmem:[#allocation139_spill] sm:$0xff] %v8430_v37  ;;  %v8436_v22 = vmax.f32 %v16576_v7, %v1985_v36  ;;  %v16588_v42 = vld [vmem:[#allocation55_spill] sm:$0xff] }
 0x180   : > { %v8410_v33 = vmax.f32 %v16570_v16, %v1983_v39  ;;  %v15840_v39 = vrot.slane %v7979_v57, 6  ;;  %v1987_v52 = vadd.f32 %v8317_v55, %v1816_v11  ;;  %v8442_v43 = vmax.f32 %v16578_v51, %v1984_v0  ;;  %v8513_v51 = vld [vmem:[%s15685_s7 + $0xe0] sm:$0xff] }
 0x181   : > { %16573 = vst [vmem:[#allocation137_spill] sm:$0xff] %v8416_v38  ;;  %16577 = vst [vmem:[#allocation140_spill] sm:$0xff] %v8436_v22  ;;  %v1986_v63 = vadd.f32 %v8369_v28, %v1817_v24  ;;  %v6519_v21 = vmul.f32 -1.442695, %v8361_v49  ;;  %v8447_v40 = vadd.f32 %v7780_v59, %v645_v30  ;;  %v8454_v34 = vadd.f32 %v7780_v59, %v648_v4  ;;  %v8473_v4 = vld [vmem:[%s15685_s7 + $0xa0] sm:$0xff]  ;;  %v558_v38 = vpop.f32.mrf.mxu0 }
 0x182   : > { %16571 = vst [vmem:[#allocation54_spill] sm:$0xff] %v8410_v33  ;;  %2291 = vperm.xlu0 %6983, %v7280_v1   ;;  %16579 = vst [vmem:[#allocation141_spill] sm:$0xff] %v8442_v43  ;;  %v1815_v56 = vsel %vm1805_vm5, %v1794_v19, %v15840_v39  ;;  %v8459_v8 = vmax.f32 %v16580_v46, %v1987_v52  ;;  %v8468_v36 = vadd.f32 %v7780_v59, %v665_v50  ;;  %v8486_v50 = vpop.permute.xlu0 %1947  ;;  %v6772_v52 = vpop.f32.mrf.mxu1 }
 0x183   : > { %2431 = vperm.xlu1 %6945, %v8277_v13   ;;  %v8464_v16 = vmax.f32 %v16582_v48, %v1986_v63  ;;  %v1988_v30 = vadd.f32 %v8430_v37, %v1815_v56  ;;  %16584 = vst [vmem:[#allocation144_spill] sm:$0xff] %v8473_v4  ;;  %v8478_v14 = vadd.f32 %v7780_v59, %v666_v2  ;;  %16587 = vst [vmem:[#allocation146_spill] sm:$0xff] %v8486_v50  ;;  %v16589_v2 = vld [vmem:[#allocation58_spill] sm:$0xff] }
 0x184   : > { %16581 = vst [vmem:[#allocation142_spill] sm:$0xff] %v8459_v8  ;;  %v16585_v45 = vmax.f32 %v8058_v53, %v8245_v29  ;;  %7060 = vpow2.f32 %v6519_v21  ;;  %v6522_v19 = vmul.f32 -1.442695, %v8447_v40  ;;  %v646_v58 = vmul.f32 %v7769_v62, %v16588_v42  ;;  %v8500_v29 = vld [vmem:[%s15685_s7 + $0xa8] sm:$0xff] }
 0x185   : > { %16583 = vst [vmem:[#allocation143_spill] sm:$0xff] %v8464_v16  ;;  %v6525_v0 = vmul.f32 -1.442695, %v8454_v34  ;;  %v651_v1 = vmul.f32 %v16589_v2, %v7769_v62  ;;  %v667_v11 = vmul.f32 %v8313_v15, %v7769_v62  ;;  %v6542_v53 = vmul.f32 -1.442695, %v8468_v36  ;;  %16590 = vst [vmem:[#allocation55_spill] sm:$0xff] %v8500_v29 }
 0x186   : > { %2303 = vperm.xlu0 %6983, %v8473_v4   ;;  %v8484_v41 = vmax.f32 %v16585_v45, %v1988_v30  ;;  %7062 = vpow2.f32 %v6524_v60  ;;  %v6543_v24 = vmul.f32 -1.442695, %v8478_v14  ;;  %v8506_v7 = vadd.f32 %v7780_v59, %v646_v58  ;;  %v16591_v21 = vld [vmem:[#allocation59_spill] sm:$0xff]  ;;  %v8521_v46 = vpop.permute.xlu0 %1955  ;;  %v619_v45 = vpop.f32.mrf.mxu1  ;;  %v16594_v58 = vld [vmem:[#allocation62_spill] sm:$0xff] }
 0x187   : > { %2435 = vperm.xlu1 %6945, %v8283_v54   ;;  %7064 = vpow2.f32 %v6522_v19  ;;  %v668_v15 = vmul.f32 %v8355_v9, %v7769_v62  ;;  %v8517_v63 = vadd.f32 %v7780_v59, %v651_v1  ;;  %v649_v56 = vmul.f32 %v7769_v62, %v16591_v21  ;;  %16592 = vst [vmem:[#allocation58_spill] sm:$0xff] %v8521_v46  ;;  %v16595_v1 = vld [vmem:[#allocation63_spill] sm:$0xff] }
 0x188   : > { %16586 = vst [vmem:[#allocation145_spill] sm:$0xff] %v8484_v41  ;;  %7066 = vpow2.f32 %v6525_v0  ;;  %v8524_v48 = vadd.f32 %v7780_v59, %v667_v11  ;;  %v16593_v9 = vmov 6   ;;  %v6523_v30 = vmul.f32 -1.442695, %v8506_v7 }
 0x189   : > { %7068 = vpow2.f32 %v6542_v53  ;;  %v8530_v60 = vadd.f32 %v7780_v59, %v668_v15  ;;  %v6528_v19 = vmul.f32 -1.442695, %v8517_v63  ;;  %v8535_v42 = vadd.f32 %v7780_v59, %v649_v56  ;;  %v7057_v53 = vpop.eup %7056  ;;  %v8544_v15 = vpop.permute.xlu1 %1935 }
 0x18a   : > { %2307 = vperm.xlu0 %6983, %v8500_v29   ;;  %7070 = vpow2.f32 %v6543_v24  ;;  %v652_v0 = vmul.f32 %v16594_v58, %v7769_v62  ;;  %v6544_v2 = vmul.f32 -1.442695, %v8524_v48  ;;  %v650_v11 = vmul.f32 %v7769_v62, %v16595_v1  ;;  %16596 = vst [vmem:[#allocation59_spill] sm:$0xff] %v8544_v15  ;;  %v8546_v21 = vpop.permute.xlu0 %1963  ;;  %v7059_v56 = vpop.eup %7058  ;;  %v16626_v15 = vld [vmem:[#allocation70_spill] sm:$0xff] }
 0x18b   : > { %6946 = vset.pattern.permute.xlu1 %v16495_v32  ;;  %v810_v24 = vadd.f32 1.0, %v7055_v20  ;;  %16597 = vst [vmem:[#allocation62_spill] sm:$0xff] %v8546_v21  ;;  %7072 = vpow2.f32 %v6523_v30  ;;  %v6545_v39 = vmul.f32 -1.442695, %v8530_v60  ;;  %v6773_v58 = vpop.f32.mrf.mxu1  ;;  %v6526_v10 = vmul.f32 -1.442695, %v8535_v42 }
 0x18c   : > { %2143 = vperm.xlu1 %6946, %v8513_v51   ;;  %7074 = vpow2.f32 %v6528_v19  ;;  %v8551_v28 = vadd.f32 %v7780_v59, %v652_v0  ;;  %v808_v20 = vadd.f32 1.0, %v7057_v53  ;;  %v8555_v1 = vadd.f32 %v7780_v59, %v650_v11  ;;  %v8560_v30 = vld [vmem:[%s15685_s7 + $0xf0] sm:$0xff]  ;;  %v8569_v11 = vld [vmem:[%s15685_s7 + $0xf8] sm:$0xff] }
 0x18d   : > { %7076 = vpow2.f32 %v6544_v2  ;;  %v811_v55 = vadd.f32 1.0, %v7059_v56  ;;  %v671_v0 = vmul.f32 %v6772_v52, %v7769_v62  ;;  %v622_v5 = vpop.f32.mrf.mxu1  ;;  %v669_v2 = vmul.f32 %v7769_v62, %v619_v45 }
 0x18e   : > { %6990 = vset.pattern.permute.xlu0 %v16593_v9  ;;  %7078 = vrcp.f32 %v810_v24  ;;  %v6529_v59 = vmul.f32 -1.442695, %v8551_v28  ;;  %v8572_v24 = vpop.permute.xlu1 %1943  ;;  %v6527_v52 = vmul.f32 -1.442695, %v8555_v1 }
 0x18f   : > { %2427 = vperm.xlu0 %6990, %v8263_v25   ;;  %7080 = vpow2.f32 %v6545_v39  ;;  %16598 = vst [vmem:[#allocation63_spill] sm:$0xff] %v8572_v24 }
 0x190   : > { %6947 = vset.pattern.permute.xlu1 %v16593_v9  ;;  %7082 = vpow2.f32 %v6526_v10  ;;  %v8580_v10 = vld [vmem:[%s15680_s2] ss:$0 sm:$0xff] }
 0x191   : > { %2415 = vperm.xlu1 %6947, %v8304_v17   ;;  %v7061_v37 = vpop.eup %7060  ;;  %7084 = vrcp.f32 %v808_v20  ;;  %v672_v62 = vmul.f32 %v8580_v10, %v6773_v58  ;;  %v670_v26 = vmul.f32 %v8580_v10, %v622_v5  ;;  %v8588_v20 = vld [vmem:[%s15681_s3] ss:$0 sm:$0xff]  ;;  %v15859_v58 = vmov 7  }
 0x192   : > { %v809_v23 = vadd.f32 1.0, %v7061_v37  ;;  %v8574_v37 = vpop.permute.xlu0 %2035  ;;  %7086 = vrcp.f32 %v811_v55  ;;  %v8591_v41 = vadd.f32 %v8588_v20, %v671_v0  ;;  %v8594_v55 = vadd.f32 %v8588_v20, %v669_v2 }
 0x193   : > { %2439 = vperm.xlu0 %6990, %v8291_v31   ;;  %v7063_v19 = vpop.eup %7062  ;;  %16599 = vst [vmem:[#allocation147_spill] sm:$0xff] %v8574_v37  ;;  %v8602_v0 = vadd.f32 %v8588_v20, %v670_v26  ;;  %v16607_v37 = vmov 7  }
 0x194   : > { %v7065_v53 = vpop.eup %7064  ;;  %v814_v56 = vadd.f32 1.0, %v7063_v19  ;;  %7088 = vrcp.f32 %v809_v23  ;;  %v8598_v23 = vadd.f32 %v8588_v20, %v672_v62 }
 0x195   : > { %2419 = vperm.xlu1 %6947, %v8322_v18   ;;  %v7067_v39 = vpop.eup %7066  ;;  %v812_v33 = vadd.f32 1.0, %v7065_v53  ;;  %7090 = vpow2.f32 %v6529_v59  ;;  %v8607_v53 = vld [vmem:[%s15685_s7 + $0xd8] sm:$0xff]  ;;  %v8610_v59 = vpop.permute.xlu1 %1951 }
 0x196   : > { %v7069_v45 = vpop.eup %7068  ;;  %v815_v22 = vadd.f32 1.0, %v7067_v39  ;;  %7092 = vpow2.f32 %v6527_v52  ;;  %16600 = vst [vmem:[#allocation148_spill] sm:$0xff] %v8610_v59  ;;  %v8612_v2 = vpop.permute.xlu0 %2047  ;;  %v6548_v39 = vmul.f32 -1.442695, %v8591_v41  ;;  %v16602_v52 = vld [vmem:[#allocation66_spill] sm:$0xff]  ;;  %v16605_v59 = vmov 5  }
 0x197   : > { %2535 = vperm.xlu0 %6990, %v8560_v30   ;;  %v7071_v16 = vpop.eup %7070  ;;  %v832_v5 = vadd.f32 1.0, %v7069_v45  ;;  %7094 = vrcp.f32 %v814_v56  ;;  %16601 = vst [vmem:[#allocation149_spill] sm:$0xff] %v8612_v2  ;;  %v653_v62 = vmul.f32 %v8580_v10, %v16602_v52  ;;  %v6549_v45 = vmul.f32 -1.442695, %v8598_v23 }
 0x198   : > { %v833_v19 = vadd.f32 1.0, %v7071_v16  ;;  %7096 = vrcp.f32 %v812_v33  ;;  %v6546_v16 = vmul.f32 -1.442695, %v8594_v55  ;;  %v8624_v33 = vld [vmem:[%s15685_s7 + $0x50] sm:$0xff] }
 0x199   : > { %2539 = vperm.xlu1 %6947, %v8569_v11   ;;  %7098 = vrcp.f32 %v815_v22  ;;  %v8627_v43 = vpop.permute.xlu1 %1959  ;;  %v8632_v2 = vadd.f32 %v8588_v20, %v653_v62  ;;  %v654_v62 = vmul.f32 %v8580_v10, %v558_v38 }
 0x19a   : > { %7100 = vrcp.f32 %v832_v5  ;;  %16603 = vst [vmem:[#allocation66_spill] sm:$0xff] %v8627_v43 }
 0x19b   : > { %2447 = vperm.xlu0 %6990, %v8328_v47   ;;  %7102 = vrcp.f32 %v833_v19  ;;  %v8656_v38 = vadd.f32 %v8588_v20, %v654_v62  ;;  %v7292_v20 = vld [vmem:[%s15685_s7 + $0x90] sm:$0xff] }
 0x19d   : > { %6948 = vset.pattern.permute.xlu1 %v15859_v58  ;;  %v6547_v58 = vmul.f32 -1.442695, %v8602_v0  ;;  %v8651_v24 = vpop.permute.xlu1 %2031 }
 0x19e   : > { %2615 = vperm.xlu1 %6948, %v8269_v44   ;;  %v7073_v44 = vpop.eup %7072  ;;  %7104 = vpow2.f32 %v6548_v39  ;;  %v8638_v39 = vld [vmem:[%s15685_s7 + $0x38] sm:$0xff]  ;;  %16608 = vst [vmem:[#allocation152_spill] sm:$0xff] %v8651_v24  ;;  %v16610_v24 = vld [vmem:[#allocation134_spill] sm:$0xff] }
 0x19f   : > { %2523 = vperm.xlu0 %6990, %v8607_v53   ;;  %v7075_v26 = vpop.eup %7074  ;;  %v813_v5 = vadd.f32 1.0, %v7073_v44  ;;  %7106 = vpow2.f32 %v6546_v16  ;;  %v8644_v44 = vld [vmem:[%s15685_s7 + $0x60] sm:$0xff] }
 0x1a0   : > { %v7077_v56 = vpop.eup %7076  ;;  %v818_v8 = vadd.f32 1.0, %v7075_v26  ;;  %7108 = vpow2.f32 %v6549_v45  ;;  %16606 = vst [vmem:[#allocation151_spill] sm:$0xff] %v8644_v44 }
 0x1a1   : > { %v7079_v22 = vpop.eup %7078  ;;  %v834_v3 = vadd.f32 1.0, %v7077_v56  ;;  %7110 = vpow2.f32 %v6547_v58 }
 0x1a2   : > { %2623 = vperm.xlu1 %6948, %v8277_v13   ;;  %v7081_v52 = vpop.eup %7080  ;;  %v8629_v13 = vpop.permute.xlu0 %2055  ;;  %7112 = vrcp.f32 %v813_v5 }
 0x1a3   : > { %2455 = vperm.xlu0 %6990, %v8624_v33   ;;  %16604 = vst [vmem:[#allocation150_spill] sm:$0xff] %v8629_v13  ;;  %v7083_v19 = vpop.eup %7082  ;;  %v835_v26 = vadd.f32 1.0, %v7081_v52  ;;  %7114 = vrcp.f32 %v818_v8  ;;  %v6530_v13 = vmul.f32 -1.442695, %v8632_v2  ;;  %v8660_v52 = vmul.f32 %v7079_v22, %v8309_v6 }
 0x1a4   : > { %v7085_v21 = vpop.eup %7084  ;;  %v816_v45 = vadd.f32 1.0, %v7083_v19  ;;  %7116 = vrcp.f32 %v834_v3 }
 0x1a5   : > { %v7087_v16 = vpop.eup %7086  ;;  %7118 = vrcp.f32 %v835_v26  ;;  %v8663_v50 = vmul.f32 %v7085_v21, %v16610_v24  ;;  %v8693_v24 = vld [vmem:[%s15685_s7 + $0xd0] sm:$0xff] }
 0x1a6   : > { %6949 = vset.pattern.permute.xlu1 %v16605_v59  ;;  %v7089_v58 = vpop.eup %7088  ;;  %v8653_v46 = vpop.permute.xlu0 %2063  ;;  %7120 = vrcp.f32 %v816_v45  ;;  %v6531_v45 = vmul.f32 -1.442695, %v8656_v38  ;;  %16615 = vst [vmem:[#allocation155_spill] sm:$0xff] %v8693_v24 }
 0x1a7   : > { %2251 = vperm.xlu1 %6949, %v8638_v39   ;;  %2463 = vperm.xlu0 %6990, %v8644_v44   ;;  %v7091_v56 = vpop.eup %7090  ;;  %16609 = vst [vmem:[#allocation153_spill] sm:$0xff] %v8653_v46  ;;  %7122 = vpow2.f32 %v6530_v13  ;;  %v8679_v13 = vmul.f32 %v7089_v58, %v8361_v49 }
 0x1a8   : > { %v7093_v43 = vpop.eup %7092  ;;  %v819_v3 = vadd.f32 1.0, %v7091_v56 }
 0x1a9   : > { %v7095_v5 = vpop.eup %7094  ;;  %v817_v19 = vadd.f32 1.0, %v7093_v43  ;;  %v8673_v43 = vpop.permute.xlu1 %2039  ;;  %16614 = vst [vmem:[#allocation154_spill] sm:$0xff] %v8679_v13 }
 0x1aa   : > { %v7097_v8 = vpop.eup %7096  ;;  %7124 = vrcp.f32 %v819_v3  ;;  %16612 = vst [vmem:[#allocation134_spill] sm:$0xff] %v8673_v43  ;;  %v8675_v22 = vpop.permute.xlu0 %2071  ;;  %v8682_v56 = vmul.f32 %v7095_v5, %v8373_v61 }
 0x1ab   : > { %6950 = vset.pattern.permute.xlu1 %v16607_v37  ;;  %2475 = vperm.xlu0 %6990, %v8382_v12   ;;  %v7099_v10 = vpop.eup %7098  ;;  %7126 = vrcp.f32 %v817_v19 }
 0x1ac   : > { %2627 = vperm.xlu1 %6950, %v8283_v54   ;;  %v7101_v12 = vpop.eup %7100  ;;  %v16611_v54 = vld [vmem:[#allocation47_spill] sm:$0xff]  ;;  %7128 = vpow2.f32 %v6531_v45 }
 0x1ad   : > { %v7103_v26 = vpop.eup %7102  ;;  %v8669_v62 = vmul.f32 %v7087_v16, %v16611_v54  ;;  %16613 = vst [vmem:[#allocation47_spill] sm:$0xff] %v8675_v22  ;;  %v8688_v54 = vmul.f32 %v7097_v8, %v8447_v40  ;;  %v8698_v58 = vmul.f32 %v7101_v12, %v8468_v36  ;;  %v8703_v8 = vmul.f32 %v7099_v10, %v8454_v34  ;;  %v16619_v40 = vld [vmem:[#allocation83_spill] sm:$0xff] }
 0x1ae   : > { %v7105_v6 = vpop.eup %7104  ;;  %v937_v36 = vrot.slane %v8679_v13, 1  ;;  %v8720_v22 = vpop.permute.xlu0 %2079  ;;  %v1282_v34 = vrot.slane %v16619_v40, 7  ;;  %v16624_v46 = vrot.slane %v16619_v40, 1 }
 0x1af   : > { %2487 = vperm.xlu0 %6990, %v7292_v20   ;;  %v7107_v21 = vpop.eup %7106  ;;  %16616 = vst [vmem:[#allocation156_spill] sm:$0xff] %v8698_v58  ;;  %v838_v5 = vadd.f32 1.0, %v7105_v6  ;;  %v8706_v20 = vmul.f32 %v7103_v26, %v8478_v14  ;;  %v7294_v26 = vld [vmem:[%s15685_s7 + $0x98] sm:$0xff]  ;;  %16618 = vst [vmem:[#allocation158_spill] sm:$0xff] %v8720_v22  ;;  %v8747_v22 = vld [vmem:[%s15685_s7 + $0xe8] sm:$0xff] }
 0x1b0   : > { %2631 = vperm.xlu1 %6950, %v8291_v31   ;;  %v7109_v16 = vpop.eup %7108  ;;  %v836_v3 = vadd.f32 1.0, %v7107_v21  ;;  %v8718_v21 = vpop.permute.xlu1 %2043 }
 0x1b1   : > { %v7111_v61 = vpop.eup %7110  ;;  %v839_v6 = vadd.f32 1.0, %v7109_v16  ;;  %16617 = vst [vmem:[#allocation157_spill] sm:$0xff] %v8718_v21  ;;  %v960_v16 = vrot.slane %v8698_v58, 1  ;;  %7130 = vrcp.f32 %v838_v5  ;;  %v961_v10 = vrot.slane %v8706_v20, 1 }
 0x1b2   : > { %v7113_v19 = vpop.eup %7112  ;;  %v837_v14 = vadd.f32 1.0, %v7111_v61  ;;  %7132 = vrcp.f32 %v836_v3  ;;  %v16622_v61 = vrot.slane %v7979_v57, 7 }
 0x1b3   : > { %2519 = vperm.xlu0 %6990, %v8693_v24   ;;  %v7115_v49 = vpop.eup %7114  ;;  %v8723_v45 = vmul.f32 %v7113_v19, %v8506_v7  ;;  %7134 = vrcp.f32 %v839_v6  ;;  %v977_v6 = vsel %vm970_vm2, %v960_v16, %v961_v10  ;;  %v16648_v24 = vrot.slane %v8679_v13, 7 }
 0x1b4   : > { %6951 = vset.pattern.permute.xlu1 %v16605_v59  ;;  %v7117_v31 = vpop.eup %7116  ;;  %v8735_v19 = vmul.f32 %v7115_v49, %v8517_v63  ;;  %v1300_v3 = vsel %vm1291_vm3, %v16622_v61, %v1282_v34  ;;  %7136 = vrcp.f32 %v837_v14  ;;  %v7296_v49 = vld [vmem:[%s15685_s7 + $0xc0] sm:$0xff]  ;;  %v978_v63 = vsel %vm970_vm2, %v16624_v46, %v960_v16  ;;  %v16625_v14 = vld [vmem:[#allocation3_spill] sm:$0xff] }
 0x1b5   : > { %2335 = vperm.xlu1 %6951, %v8513_v51   ;;  %v7119_v12 = vpop.eup %7118  ;;  %v8738_v5 = vmul.f32 %v7117_v31, %v8524_v48  ;;  %v16630_v16 = vrot.slane %v8679_v13, 2  ;;  %v16632_v46 = vrot.slane %v8660_v52, 1 }
 0x1b6   : > { %v7121_v7 = vpop.eup %7120  ;;  %v8758_v61 = vmul.f32 %v7119_v12, %v8530_v60  ;;  %v8774_v60 = vpop.permute.xlu1 %2051 }
 0x1b7   : > { %2491 = vperm.xlu0 %6990, %v7294_v26   ;;  %v16620_v26 = vrot.slane %v8663_v50, 1  ;;  %16621 = vst [vmem:[#allocation159_spill] sm:$0xff] %v8738_v5  ;;  %v8769_v31 = vmul.f32 %v7121_v7, %v8535_v42  ;;  %16627 = vst [vmem:[#allocation161_spill] sm:$0xff] %v8774_v60  ;;  %v8776_v12 = vpop.permute.xlu0 %2151  ;;  %v16629_v7 = vld [vmem:[#allocation24_spill] sm:$0xff]  ;;  %v16631_v60 = vrot.slane %v8663_v50, 2 }
 0x1b8   : > { %16623 = vst [vmem:[#allocation160_spill] sm:$0xff] %v8758_v61  ;;  %16628 = vst [vmem:[#allocation162_spill] sm:$0xff] %v8776_v12 }
 0x1b9   : > { %v1001_v21 = vsel %vm970_vm2, %v16620_v26, %v937_v36  ;;  %6952 = vset.pattern.permute.xlu1 %v16593_v9  ;;  %v7123_v26 = vpop.eup %7122  ;;  %v1579_v12 = vsel %vm1548_vm4, %v16631_v60, %v16630_v16 }
 0x1ba   : > { %2531 = vperm.xlu1 %6952, %v8747_v22   ;;  %v8765_v43 = vadd.f32 %v16625_v14, %v1001_v21  ;;  %v7125_v27 = vpop.eup %7124  ;;  %v962_v14 = vrot.slane %v8738_v5, 1  ;;  %v820_v48 = vadd.f32 1.0, %v7123_v26  ;;  %v1000_v21 = vsel %vm970_vm2, %v937_v36, %v16632_v46 }
 0x1bb   : > { %2511 = vperm.xlu0 %6990, %v7296_v49   ;;  %v1475_v49 = vadd.f32 %v16626_v15, %v1300_v3  ;;  %v7127_v42 = vpop.eup %7126  ;;  %v1218_v3 = vadd.f32 %v16629_v7, %v978_v63  ;;  %v1283_v15 = vrot.slane %v8698_v58, 7  ;;  %v16633_v63 = vld [vmem:[#allocation27_spill] sm:$0xff]  ;;  %v8804_v44 = vmul.f32 %v7125_v27, %v8551_v28  ;;  %v16636_v27 = vld [vmem:[#allocation26_spill] sm:$0xff] }
 0x1bc   : > { %v1219_v7 = vadd.f32 %v16633_v63, %v977_v6  ;;  %v976_v57 = vsel %vm970_vm2, %v961_v10, %v962_v14  ;;  %v7129_v60 = vpop.eup %7128  ;;  %v1285_v36 = vrot.slane %v8738_v5, 7  ;;  %v8809_v46 = vmul.f32 %v7127_v42, %v8555_v1  ;;  %v16634_v6 = vld [vmem:[#allocation80_spill] sm:$0xff]  ;;  %v16635_v10 = vld [vmem:[#allocation5_spill] sm:$0xff]  ;;  %v8824_v1 = vpop.permute.xlu1 %2059 }
 0x1bd   : > { %7138 = vrcp.f32 %v820_v48  ;;  %v8812_v26 = vadd.f32 %v16634_v6, %v1579_v12  ;;  %v8815_v63 = vadd.f32 %v16635_v10, %v1000_v21  ;;  %v1250_v16 = vmax.f32 %v16619_v40, %v1218_v3  ;;  %16637 = vst [vmem:[#allocation163_spill] sm:$0xff] %v8824_v1  ;;  %v8826_v48 = vpop.permute.xlu0 %2147  ;;  %v16640_v6 = vld [vmem:[#allocation71_spill] sm:$0xff]  ;;  %v16644_v1 = vld [vmem:[#allocation72_spill] sm:$0xff] }
 0x1be   : > { %6953 = vset.pattern.permute.xlu1 %v16607_v37  ;;  %v1299_v28 = vsel %vm1291_vm3, %v1282_v34, %v1283_v15  ;;  %16638 = vst [vmem:[#allocation164_spill] sm:$0xff] %v8826_v48  ;;  %v821_v12 = vadd.f32 1.0, %v7129_v60  ;;  %v1251_v21 = vmax.f32 %v8698_v58, %v1219_v7  ;;  %v16639_v3 = vrot.slane %v8758_v61, 1  ;;  %v16645_v58 = vld [vmem:[#allocation29_spill] sm:$0xff] }
 0x1bf   : > { %2611 = vperm.xlu1 %6953, %v8322_v18   ;;  %2499 = vperm.xlu0 %6990, %v8500_v29   ;;  %v1284_v18 = vrot.slane %v8706_v20, 7  ;;  %v1220_v29 = vadd.f32 %v16636_v27, %v976_v57  ;;  %v7131_v57 = vpop.eup %7130  ;;  %v1518_v7 = vrot.slane %v8660_v52, 2  ;;  %v1476_v10 = vadd.f32 %v16640_v6, %v1299_v28  ;;  %v16647_v6 = vld [vmem:[#allocation73_spill] sm:$0xff] }
 0x1c0   : > { %v975_v34 = vsel %vm970_vm2, %v962_v14, %v16639_v3  ;;  %v7133_v27 = vpop.eup %7132  ;;  %v16641_v14 = vrot.slane %v8669_v62, 1  ;;  %7140 = vrcp.f32 %v821_v12 }
 0x1c1   : > { %v1298_v42 = vsel %vm1291_vm3, %v1283_v15, %v1284_v18  ;;  %v1297_v60 = vsel %vm1291_vm3, %v1284_v18, %v1285_v36  ;;  %v7135_v32 = vpop.eup %7134  ;;  %v1252_v18 = vmax.f32 %v8706_v20, %v1220_v29  ;;  %v1221_v15 = vadd.f32 %v16645_v58, %v975_v34 }
 0x1c2   : > { %v1477_v40 = vadd.f32 %v16644_v1, %v1298_v42  ;;  %v7137_v28 = vpop.eup %7136  ;;  %v8856_v48 = vmax.f32 %v1251_v21, %v1476_v10  ;;  %v1478_v4 = vadd.f32 %v16647_v6, %v1297_v60  ;;  %v16650_v29 = vrot.slane %v8679_v13, 2  ;;  %v16651_v10 = vld [vmem:[#allocation2_spill] sm:$0xff]  ;;  %v8879_v60 = vpop.permute.xlu1 %2067 }
 0x1c3   : > { %2727 = vperm.xlu1 %6953, %v8560_v30   ;;  %6995 = vset.pattern.permute.xlu0 %v16607_v37  ;;  %v8850_v30 = vmax.f32 %v1250_v16, %v1475_v49  ;;  %v16652_v21 = vrot.slane %v8660_v52, 7  ;;  %v16653_v42 = vmov %v16648_v24  ;;  %16654 = vst [vmem:[#allocation167_spill] sm:$0xff] %v8879_v60  ;;  %v16657_v1 = vrot.slane %v8723_v45, 1  ;;  %v16662_v60 = vld [vmem:[#allocation36_spill] sm:$0xff] }
 0x1c4   : > { %2619 = vperm.xlu0 %6995, %v8263_v25   ;;  %v16642_v25 = vrot.slane %v8660_v52, 1  ;;  %16646 = vst [vmem:[#allocation166_spill] sm:$0xff] %v8856_v48  ;;  %v1578_v16 = vsel %vm1548_vm4, %v16650_v29, %v1518_v7  ;;  %v1228_v29 = vmax.f32 %v8679_v13, %v8815_v63  ;;  %v8899_v6 = vmul.f32 %v7131_v57, %v8591_v41 }
 0x1c5   : > { %16643 = vst [vmem:[#allocation165_spill] sm:$0xff] %v8850_v30  ;;  %v1321_v34 = vsel %vm1291_vm3, %v16653_v42, %v16652_v21  ;;  %v16658_v21 = vrot.slane %v8688_v54, 1  ;;  %v16664_v57 = vrot.slane %v8688_v54, 7  ;;  %v16699_v30 = vld [vmem:[#allocation77_spill] sm:$0xff] }
 0x1c6   : > { %v999_v3 = vsel %vm970_vm2, %v16642_v25, %v16641_v14  ;;  %v16649_v14 = vrot.slane %v8663_v50, 7  ;;  %v8881_v25 = vpop.permute.xlu0 %2139 }
 0x1c7   : > { %6954 = vset.pattern.permute.xlu1 %v16593_v9  ;;  %v1197_v12 = vadd.f32 %v16651_v10, %v999_v3  ;;  %16655 = vst [vmem:[#allocation168_spill] sm:$0xff] %v8881_v25  ;;  %v997_v42 = vsel %vm970_vm2, %v16658_v21, %v16657_v1  ;;  %v16660_v10 = vld [vmem:[#allocation81_spill] sm:$0xff]  ;;  %v1454_v1 = vadd.f32 %v16662_v60, %v1321_v34  ;;  %v966_v21 = vrot.slane %v8899_v6, 1 }
 0x1c8   : > { %v1322_v49 = vsel %vm1291_vm3, %v16649_v14, %v16648_v24  ;;  %2443 = vperm.xlu1 %6954, %v8638_v39   ;;  %2607 = vperm.xlu0 %6995, %v8304_v17   ;;  %v1519_v24 = vrot.slane %v8669_v62, 2  ;;  %v8884_v17 = vmul.f32 %v7133_v27, %v8594_v55  ;;  %v16656_v14 = vrot.slane %v8758_v61, 7 }
 0x1c9   : > { %v8902_v55 = vmul.f32 %v7135_v32, %v8598_v23  ;;  %v8905_v27 = vmul.f32 %v7137_v28, %v8602_v0  ;;  %v8911_v25 = vadd.f32 %v16660_v10, %v1578_v16  ;;  %v1229_v32 = vmax.f32 %v8660_v52, %v1197_v12  ;;  %v16663_v23 = vld [vmem:[#allocation7_spill] sm:$0xff]  ;;  %v16667_v16 = vld [vmem:[#allocation74_spill] sm:$0xff] }
 0x1ca   : > { %v1296_v3 = vsel %vm1291_vm3, %v1285_v36, %v16656_v14  ;;  %v1253_v36 = vmax.f32 %v8738_v5, %v1221_v15  ;;  %v16659_v14 = vld [vmem:[#allocation34_spill] sm:$0xff]  ;;  %v1577_v41 = vsel %vm1548_vm4, %v1518_v7, %v1519_v24  ;;  %v8920_v0 = vadd.f32 %v16663_v23, %v997_v42  ;;  %v7139_v34 = vpop.eup %7138 }
 0x1cb   : > { %v1453_v58 = vadd.f32 %v16659_v14, %v1322_v49  ;;  %16661 = vst [vmem:[#allocation169_spill] sm:$0xff] %v8911_v25  ;;  %v16665_v15 = vrot.slane %v8669_v62, 7  ;;  %v964_v49 = vrot.slane %v8884_v17, 1  ;;  %v8933_v12 = vadd.f32 %v16667_v16, %v1296_v3  ;;  %v16675_v16 = vld [vmem:[#allocation38_spill] sm:$0xff] }
 0x1cc   : > { %6955 = vset.pattern.permute.xlu1 %v16605_v59  ;;  %2731 = vperm.xlu0 %6995, %v8569_v11   ;;  %v8930_v11 = vmax.f32 %v1252_v18, %v1477_v40  ;;  %v967_v42 = vrot.slane %v8902_v55, 1  ;;  %v965_v63 = vrot.slane %v8905_v27, 1  ;;  %v8940_v14 = vmax.f32 %v1253_v36, %v1478_v4  ;;  %v16672_v40 = vld [vmem:[#allocation123_spill] sm:$0xff] }
 0x1cd   : > { %v1319_v28 = vsel %vm1291_vm3, %v16665_v15, %v16664_v57  ;;  %2331 = vperm.xlu1 %6955, %v8607_v53   ;;  %v8935_v7 = vmax.f32 %v1228_v29, %v1453_v58  ;;  %v8942_v57 = vpop.permute.xlu1 %2075  ;;  %v8944_v15 = vpop.permute.xlu0 %2095  ;;  %v16673_v58 = vld [vmem:[#allocation84_spill] sm:$0xff]  ;;  %v8954_v60 = vmax.f32 %v1229_v32, %v1454_v1  ;;  %v1231_v4 = vmax.f32 %v8688_v54, %v8920_v0 }
 0x1ce   : > { %16666 = vst [vmem:[#allocation170_spill] sm:$0xff] %v8930_v11  ;;  %16669 = vst [vmem:[#allocation172_spill] sm:$0xff] %v8940_v14  ;;  %v8950_v29 = vadd.f32 %v16673_v58, %v1577_v41  ;;  %v1456_v10 = vadd.f32 %v16675_v16, %v1319_v28  ;;  %v1520_v36 = vrot.slane %v8688_v54, 2  ;;  %v8962_v3 = vmul.f32 %v7139_v34, %v8632_v2 }
 0x1cf   : > { %16668 = vst [vmem:[#allocation171_spill] sm:$0xff] %v8935_v7  ;;  %16670 = vst [vmem:[#allocation173_spill] sm:$0xff] %v8942_v57  ;;  %v16677_v41 = vrot.slane %v8758_v61, 1  ;;  %v16678_v1 = vrot.slane %v8688_v54, 1  ;;  %v16679_v32 = vrot.slane %v8669_v62, 1  ;;  %v973_v2 = vsel %vm970_vm2, %v964_v49, %v965_v63  ;;  %v7141_v57 = vpop.eup %7140 }
 0x1d0   : > { %16671 = vst [vmem:[#allocation174_spill] sm:$0xff] %v8944_v15  ;;  %16674 = vst [vmem:[#allocation123_spill] sm:$0xff] %v8950_v29  ;;  %2723 = vperm.xlu0 %6995, %v8747_v22   ;;  %v1290_v22 = vrot.slane %v8902_v55, 7  ;;  %v1288_v34 = vrot.slane %v8905_v27, 7  ;;  %v971_v18 = vsel %vm970_vm2, %v966_v21, %v967_v42  ;;  %v972_v23 = vsel %vm970_vm2, %v965_v63, %v966_v21  ;;  %v16683_v63 = vld [vmem:[#allocation28_spill] sm:$0xff] }
 0x1d1   : > { %16676 = vst [vmem:[#allocation175_spill] sm:$0xff] %v8954_v60  ;;  %6956 = vset.pattern.permute.xlu1 %v16593_v9  ;;  %v974_v28 = vsel %vm970_vm2, %v16677_v41, %v964_v49  ;;  %v998_v0 = vsel %vm970_vm2, %v16679_v32, %v16678_v1  ;;  %v1289_v41 = vrot.slane %v8899_v6, 7  ;;  %v16680_v16 = vrot.slane %v8663_v50, 1 }
 0x1d2   : > { %2527 = vperm.xlu1 %6956, %v8513_v51   ;;  %v16681_v32 = vrot.slane %v8669_v62, 7  ;;  %v16682_v58 = vrot.slane %v8660_v52, 7  ;;  %v8996_v15 = vsel %vm1548_vm4, %v1519_v24, %v1520_v36  ;;  %v1222_v21 = vadd.f32 %v16683_v63, %v974_v28  ;;  %v16687_v24 = vld [vmem:[#allocation31_spill] sm:$0xff]  ;;  %v16688_v63 = vld [vmem:[#allocation33_spill] sm:$0xff] }
 0x1d3   : > { %v1002_v1 = vsel %vm970_vm2, %v967_v42, %v16680_v16  ;;  %v1287_v25 = vrot.slane %v8884_v17, 7  ;;  %v16684_v42 = vrot.slane %v8723_v45, 2  ;;  %v1223_v28 = vadd.f32 %v16687_v24, %v973_v2  ;;  %v16691_v24 = vld [vmem:[#allocation32_spill] sm:$0xff] }
 0x1d4   : > { %v1320_v49 = vsel %vm1291_vm3, %v16682_v58, %v16681_v32  ;;  %2635 = vperm.xlu0 %6995, %v8638_v39   ;;  %v9007_v58 = vpop.permute.xlu1 %2083  ;;  %v9009_v32 = vpop.permute.xlu0 %2107  ;;  %v2814_v39 = vld [vmem:[%s15682_s4] sm:$0xf]  ;;  %v1225_v11 = vadd.f32 %v16688_v63, %v971_v18  ;;  %v16689_v14 = vrot.slane %v8663_v50, 7  ;;  %v1293_v2 = vsel %vm1291_vm3, %v1288_v34, %v1289_v41  ;;  %v9031_v63 = vld [vmem:[%s15685_s7 + $0x48] sm:$0xff] }
 0x1d5   : > { %v1575_v7 = vsel %vm1548_vm4, %v1520_v36, %v16684_v42  ;;  %16685 = vst [vmem:[#allocation176_spill] sm:$0xff] %v9007_v58  ;;  %16686 = vst [vmem:[#allocation177_spill] sm:$0xff] %v9009_v32  ;;  %6915 = vmatprep.subr.msk.bf16.mxu0 %vm469_vm0, %v2814_v39  ;;  %v3862_v36 = vsel %vm469_vm0, %v2814_v39, 0  ;;  %v16690_v32 = vld [vmem:[#allocation30_spill] sm:$0xff]  ;;  %v1226_v18 = vadd.f32 %v16691_v24, %v1002_v1  ;;  %v16694_v24 = vld [vmem:[#allocation35_spill] sm:$0xff] }
 0x1d6   : > { %v1323_v16 = vsel %vm1291_vm3, %v1290_v22, %v16689_v14  ;;  %6957 = vset.pattern.permute.xlu1 %v16605_v59  ;;  %v1224_v58 = vadd.f32 %v16690_v32, %v972_v23  ;;  %6809 = vmatpush3.bf16.msra.mxu0 %v3862_v36  ;;  %v9035_v14 = vmul.f32 %v7141_v57, %v8656_v38  ;;  %v16693_v32 = vrot.slane %v8758_v61, 7  ;;  %v16695_v57 = vld [vmem:[#allocation4_spill] sm:$0xff] }
 0x1d7   : > { %2259 = vperm.xlu1 %6957, %v9031_v63   ;;  %v1294_v39 = vsel %vm1291_vm3, %v1287_v25, %v1288_v34  ;;  %v1292_v23 = vsel %vm1291_vm3, %v1289_v41, %v1290_v22  ;;  %v9041_v42 = vmax.f32 %v1231_v4, %v1456_v10  ;;  %v1254_v1 = vmax.f32 %v8758_v61, %v1222_v21  ;;  %v16696_v22 = vld [vmem:[#allocation78_spill] sm:$0xff]  ;;  %v16697_v4 = vld [vmem:[#allocation85_spill] sm:$0xff] }
 0x1d8   : > { %2647 = vperm.xlu0 %6995, %v8624_v33   ;;  %v1295_v36 = vsel %vm1291_vm3, %v16693_v32, %v1287_v25  ;;  %v1452_v38 = vadd.f32 %v16694_v24, %v1323_v16  ;;  %v1198_v29 = vadd.f32 %v16695_v57, %v998_v0  ;;  %v1255_v34 = vmax.f32 %v8884_v17, %v1223_v28  ;;  %v16700_v25 = vld [vmem:[#allocation79_spill] sm:$0xff]  ;;  %v9062_v0 = vpop.permute.xlu1 %2155  ;;  %v9064_v16 = vpop.permute.xlu0 %2123 }
 0x1d9   : > { %16692 = vst [vmem:[#allocation178_spill] sm:$0xff] %v9041_v42  ;;  %v1257_v60 = vmax.f32 %v8899_v6, %v1225_v11  ;;  %v1482_v10 = vadd.f32 %v16696_v22, %v1293_v2  ;;  %v9055_v41 = vadd.f32 %v16697_v4, %v1575_v7  ;;  %v1256_v21 = vmax.f32 %v8905_v27, %v1224_v58  ;;  %v16703_v7 = vld [vmem:[#allocation76_spill] sm:$0xff] }
 0x1da   : > { %v1481_v48 = vadd.f32 %v16699_v30, %v1294_v39  ;;  %v1258_v13 = vmax.f32 %v8902_v55, %v1226_v18  ;;  %v1483_v32 = vadd.f32 %v16700_v25, %v1292_v23  ;;  %16701 = vst [vmem:[#allocation180_spill] sm:$0xff] %v9062_v0  ;;  %16702 = vst [vmem:[#allocation181_spill] sm:$0xff] %v9064_v16  ;;  %v16704_v58 = vrot.slane %v8703_v8, 1  ;;  %v16706_v23 = vld [vmem:[#allocation50_spill] sm:$0xff] }
 0x1db   : > { %16698 = vst [vmem:[#allocation179_spill] sm:$0xff] %v9055_v41  ;;  %2263 = vperm.xlu1 %6957, %v8624_v33   ;;  %v1480_v2 = vadd.f32 %v16703_v7, %v1295_v36  ;;  %v16705_v39 = vrot.slane %v8682_v56, 1  ;;  %v9077_v33 = vmax.f32 %v1254_v1, %v8933_v12  ;;  %v16707_v30 = vmax.f32 %v8663_v50, %v8765_v43  ;;  %v16708_v36 = vld [vmem:[#allocation37_spill] sm:$0xff]  ;;  %v16749_v41 = vld [vmem:[#allocation10_spill] sm:$0xff] }
 0x1dc   : > { %2651 = vperm.xlu0 %6995, %v16706_v23   ;;  %v1230_v28 = vmax.f32 %v8669_v62, %v1198_v29  ;;  %v1455_v7 = vadd.f32 %v16708_v36, %v1320_v49  ;;  %v9088_v24 = vmax.f32 %v1257_v60, %v1482_v10  ;;  %v16710_v12 = vrot.slane %v8723_v45, 1  ;;  %v16713_v29 = vld [vmem:[#allocation9_spill] sm:$0xff] }
 0x1dd   : > { %v995_v18 = vsel %vm970_vm2, %v16705_v39, %v16704_v58  ;;  %v9082_v11 = vmax.f32 %v16707_v30, %v1452_v38  ;;  %v9086_v22 = vmax.f32 %v1255_v34, %v1480_v2  ;;  %v9098_v30 = vmax.f32 %v1256_v21, %v1481_v48 }
 0x1de   : > { %v996_v43 = vsel %vm970_vm2, %v16710_v12, %v16705_v39  ;;  %v9100_v1 = vmax.f32 %v1258_v13, %v1483_v32  ;;  %v1201_v49 = vadd.f32 %v16713_v29, %v995_v18  ;;  %v16714_v38 = vrot.slane %v8809_v46, 1  ;;  %v9128_v39 = vld [vmem:[%s15685_s7 + $0x70] sm:$0xff]  ;;  %v16728_v12 = vld [vmem:[#allocation11_spill] sm:$0xff] }
 0x1df   : > { %16709 = vst [vmem:[#allocation50_spill] sm:$0xff] %v9086_v22  ;;  %16711 = vst [vmem:[#allocation182_spill] sm:$0xff] %v9098_v30  ;;  %v16715_v60 = vrot.slane %v8769_v31, 1  ;;  %6958 = vset.pattern.permute.xlu1 %v16607_v37  ;;  %v16716_v10 = vrot.slane %v8682_v56, 7  ;;  %v16717_v2 = vrot.slane %v8723_v45, 7  ;;  %v1522_v13 = vrot.slane %v8682_v56, 2 }
 0x1e0   : > { %16712 = vst [vmem:[#allocation183_spill] sm:$0xff] %v9100_v1  ;;  %v1523_v21 = vrot.slane %v8703_v8, 2  ;;  %v16719_v18 = vmov %v16704_v58  ;;  %2639 = vperm.xlu1 %6958, %v8328_v47   ;;  %16720 = vst [vmem:[#allocation184_spill] sm:$0xff] %v9128_v39  ;;  %2663 = vperm.xlu0 %6995, %v9128_v39   ;;  %v16726_v58 = vrot.slane %v8723_v45, 7  ;;  %v16727_v29 = vrot.slane %v8688_v54, 7  ;;  %v16745_v1 = vld [vmem:[#allocation41_spill] sm:$0xff] }
 0x1e1   : > { %v993_v34 = vsel %vm970_vm2, %v16715_v60, %v16714_v38  ;;  %v1317_v48 = vsel %vm1291_vm3, %v16717_v2, %v16716_v10  ;;  %v16718_v32 = vmov %v16715_v60  ;;  %v9133_v38 = vmax.f32 %v1230_v28, %v1455_v7  ;;  %v16721_v60 = vld [vmem:[#allocation86_spill] sm:$0xff]  ;;  %v9142_v47 = vpop.permute.xlu0 %2231  ;;  %v16848_v22 = vld [vmem:[#allocation121_spill] sm:$0xff] }
 0x1e2   : > { %v994_v23 = vsel %vm970_vm2, %v16719_v18, %v16718_v32  ;;  %v9137_v10 = vadd.f32 %v16721_v60, %v8996_v15  ;;  %v16723_v2 = vld [vmem:[#allocation6_spill] sm:$0xff]  ;;  %v9140_v18 = vpop.permute.xlu1 %2235  ;;  %16725 = vst [vmem:[#allocation187_spill] sm:$0xff] %v9142_v47  ;;  %v1318_v25 = vsel %vm1291_vm3, %v16727_v29, %v16726_v58  ;;  %v1203_v28 = vadd.f32 %v16728_v12, %v993_v34  ;;  %v16732_v47 = vld [vmem:[#allocation8_spill] sm:$0xff] }
 0x1e3   : > { %v1200_v32 = vadd.f32 %v16723_v2, %v996_v43  ;;  %16724 = vst [vmem:[#allocation186_spill] sm:$0xff] %v9140_v18  ;;  %v1524_v7 = vrot.slane %v8769_v31, 2  ;;  %v1525_v15 = vrot.slane %v8809_v46, 2  ;;  %v1233_v60 = vmax.f32 %v8682_v56, %v1201_v49  ;;  %v16729_v43 = vld [vmem:[#allocation40_spill] sm:$0xff] }
 0x1e4   : > { %16722 = vst [vmem:[#allocation185_spill] sm:$0xff] %v9137_v10  ;;  %v1458_v36 = vadd.f32 %v16729_v43, %v1317_v48  ;;  %v16730_v57 = vrot.slane %v8769_v31, 7  ;;  %v16731_v4 = vrot.slane %v8703_v8, 7  ;;  %v1202_v18 = vadd.f32 %v16732_v47, %v994_v23  ;;  %2719 = vperm.xlu1 %6958, %v8513_v51  }
 0x1e5   : > { %v1573_v29 = vsel %vm1548_vm4, %v1522_v13, %v1523_v21  ;;  %v16734_v49 = vrot.slane %v8682_v56, 7  ;;  %v16735_v12 = vrot.slane %v8804_v44, 1  ;;  %v16736_v43 = vrot.slane %v8735_v19, 1 }
 0x1e6   : > { %v1315_v2 = vsel %vm1291_vm3, %v16731_v4, %v16730_v57  ;;  %v16733_v34 = vmov %v16731_v4  ;;  %v9181_v4 = vld [vmem:[%s15685_s7 + $0x80] sm:$0xff]  ;;  %v16739_v58 = vrot.slane %v8723_v45, 2  ;;  %v16741_v51 = vrot.slane %v8809_v46, 1  ;;  %v9197_v16 = vpop.permute.xlu1 %2239 }
 0x1e7   : > { %v1316_v48 = vsel %vm1291_vm3, %v16734_v49, %v16733_v34  ;;  %v991_v57 = vsel %vm970_vm2, %v16736_v43, %v16735_v12  ;;  %16737 = vst [vmem:[#allocation188_spill] sm:$0xff] %v9181_v4  ;;  %2671 = vperm.xlu0 %6995, %v9181_v4   ;;  %v16738_v34 = vld [vmem:[#allocation39_spill] sm:$0xff]  ;;  %v16740_v12 = vmov %v16736_v43  ;;  %16742 = vst [vmem:[#allocation189_spill] sm:$0xff] %v9197_v16  ;;  %v9199_v4 = vpop.permute.xlu0 %2243 }
 0x1e8   : > { %v1457_v49 = vadd.f32 %v16738_v34, %v1318_v25  ;;  %v1574_v47 = vsel %vm1548_vm4, %v16739_v58, %v1522_v13  ;;  %v992_v43 = vsel %vm970_vm2, %v16741_v51, %v16740_v12  ;;  %16743 = vst [vmem:[#allocation190_spill] sm:$0xff] %v9199_v4  ;;  %v1232_v23 = vmax.f32 %v8723_v45, %v1200_v32  ;;  %v16744_v34 = vld [vmem:[#allocation44_spill] sm:$0xff]  ;;  %v16746_v51 = vld [vmem:[#allocation13_spill] sm:$0xff] }
 0x1e9   : > { %v1235_v25 = vmax.f32 %v8769_v31, %v1203_v28  ;;  %v1460_v0 = vadd.f32 %v16744_v34, %v1315_v2  ;;  %v1571_v13 = vsel %vm1548_vm4, %v1524_v7, %v1525_v15  ;;  %v1234_v58 = vmax.f32 %v8703_v8, %v1202_v18  ;;  %6959 = vset.pattern.permute.xlu1 %v16593_v9 }
 0x1ea   : > { %v1459_v30 = vadd.f32 %v16745_v1, %v1316_v48  ;;  %v1572_v12 = vsel %vm1548_vm4, %v1523_v21, %v1524_v7  ;;  %v1205_v16 = vadd.f32 %v16746_v51, %v991_v57  ;;  %v16747_v4 = vrot.slane %v8735_v19, 7  ;;  %v16750_v48 = vld [vmem:[#allocation155_spill] sm:$0xff]  ;;  %v16754_v51 = vld [vmem:[#allocation88_spill] sm:$0xff]  ;;  %2451 = vperm.xlu1 %6959, %v9031_v63  }
 0x1eb   : > { %v16748_v32 = vrot.slane %v8809_v46, 7  ;;  %v1526_v2 = vrot.slane %v8735_v19, 2  ;;  %v1527_v34 = vrot.slane %v8804_v44, 2  ;;  %v1204_v18 = vadd.f32 %v16749_v41, %v992_v43  ;;  %2711 = vperm.xlu0 %6995, %v16750_v48   ;;  %v16752_v7 = vld [vmem:[#allocation87_spill] sm:$0xff]  ;;  %v9237_v43 = vpop.permute.xlu1 %2247  ;;  %v9239_v48 = vpop.permute.xlu0 %2343 }
 0x1ec   : > { %v9222_v21 = vmax.f32 %v1233_v60, %v1458_v36  ;;  %v9225_v57 = vadd.f32 %v16752_v7, %v1573_v29  ;;  %v9228_v1 = vadd.f32 %v16754_v51, %v1574_v47  ;;  %16758 = vst [vmem:[#allocation193_spill] sm:$0xff] %v9237_v43  ;;  %16759 = vst [vmem:[#allocation194_spill] sm:$0xff] %v9239_v48  ;;  %v16762_v29 = vld [vmem:[#allocation89_spill] sm:$0xff]  ;;  %v16764_v41 = vrot.slane %v9035_v14, 1  ;;  %v16767_v51 = vld [vmem:[#allocation90_spill] sm:$0xff] }
 0x1ed   : > { %v1313_v28 = vsel %vm1291_vm3, %v16748_v32, %v16747_v4  ;;  %v16756_v4 = vmov %v16748_v32  ;;  %v16757_v32 = vrot.slane %v8769_v31, 7  ;;  %v9241_v36 = vmax.f32 %v1232_v23, %v1457_v49  ;;  %v16769_v48 = vld [vmem:[#allocation48_spill] sm:$0xff] }
 0x1ee   : > { %16751 = vst [vmem:[#allocation155_spill] sm:$0xff] %v9222_v21  ;;  %16753 = vst [vmem:[#allocation191_spill] sm:$0xff] %v9225_v57  ;;  %v9243_v60 = vmax.f32 %v1235_v25, %v1460_v0  ;;  %v9246_v47 = vadd.f32 %v16762_v29, %v1571_v13  ;;  %v16765_v7 = vrot.slane %v8962_v3, 1  ;;  %v9257_v43 = vadd.f32 %v16767_v51, %v1572_v12  ;;  %v16773_v12 = vld [vmem:[#allocation144_spill] sm:$0xff] }
 0x1ef   : > { %16755 = vst [vmem:[#allocation192_spill] sm:$0xff] %v9228_v1  ;;  %v1314_v42 = vsel %vm1291_vm3, %v16757_v32, %v16756_v4  ;;  %16760 = vst [vmem:[#allocation195_spill] sm:$0xff] %v9241_v36  ;;  %v9254_v32 = vmax.f32 %v1234_v58, %v1459_v30  ;;  %v1462_v23 = vadd.f32 %v16769_v48, %v1313_v28  ;;  %v16771_v49 = vrot.slane %v8804_v44, 1  ;;  %v16772_v30 = vld [vmem:[#allocation45_spill] sm:$0xff]  ;;  %v16803_v36 = vld [vmem:[#allocation94_spill] sm:$0xff] }
 0x1f0   : > { %16761 = vst [vmem:[#allocation196_spill] sm:$0xff] %v9243_v60  ;;  %16763 = vst [vmem:[#allocation197_spill] sm:$0xff] %v9246_v47  ;;  %v989_v4 = vsel %vm970_vm2, %v16765_v7, %v16764_v41  ;;  %v16770_v0 = vmov %v16765_v7  ;;  %v1237_v13 = vmax.f32 %v8735_v19, %v1205_v16  ;;  %v1569_v29 = vsel %vm1548_vm4, %v1526_v2, %v1527_v34  ;;  %v16774_v7 = vld [vmem:[#allocation15_spill] sm:$0xff]  ;;  %v9278_v16 = vpop.permute.xlu1 %2223 }
 0x1f1   : > { %16766 = vst [vmem:[#allocation198_spill] sm:$0xff] %v9254_v32  ;;  %16768 = vst [vmem:[#allocation199_spill] sm:$0xff] %v9257_v43  ;;  %v990_v25 = vsel %vm970_vm2, %v16771_v49, %v16770_v0  ;;  %v1236_v41 = vmax.f32 %v8809_v46, %v1204_v18  ;;  %v1461_v58 = vadd.f32 %v16772_v30, %v1314_v42  ;;  %2687 = vperm.xlu0 %6995, %v16773_v12   ;;  %v9280_v49 = vpop.permute.xlu0 %2339  ;;  %v16796_v43 = vld [vmem:[#allocation52_spill] sm:$0xff] }
 0x1f2   : > { %v1570_v28 = vsel %vm1548_vm4, %v1525_v15, %v1526_v2  ;;  %v1207_v48 = vadd.f32 %v16774_v7, %v989_v4  ;;  %v1528_v51 = vrot.slane %v8962_v3, 2  ;;  %v1529_v0 = vrot.slane %v9035_v14, 2  ;;  %6960 = vset.pattern.permute.xlu1 %v16607_v37  ;;  %16775 = vst [vmem:[#allocation144_spill] sm:$0xff] %v9278_v16  ;;  %16776 = vst [vmem:[#allocation200_spill] sm:$0xff] %v9280_v49  ;;  %v16777_v2 = vld [vmem:[#allocation12_spill] sm:$0xff]  ;;  %v16778_v7 = vld [vmem:[#allocation91_spill] sm:$0xff] }
 0x1f3   : > { %v1206_v4 = vadd.f32 %v16777_v2, %v990_v25  ;;  %2715 = vperm.xlu1 %6960, %v8607_v53   ;;  %v9293_v30 = vadd.f32 %v16778_v7, %v1569_v29  ;;  %v16780_v49 = vrot.slane %v8804_v44, 7  ;;  %v16781_v42 = vrot.slane %v8735_v19, 7  ;;  %v16782_v16 = vld [vmem:[#allocation120_spill] sm:$0xff] }
 0x1f4   : > { %v16783_v57 = vrot.slane %v16782_v16, 1  ;;  %v16784_v15 = vrot.slane %v16672_v40, 1  ;;  %v9307_v25 = vmax.f32 %v1237_v13, %v1462_v23  ;;  %v9309_v12 = vmax.f32 %v1236_v41, %v1461_v58  ;;  %v16786_v29 = vld [vmem:[#allocation92_spill] sm:$0xff] }
 0x1f5   : > { %16779 = vst [vmem:[#allocation201_spill] sm:$0xff] %v9293_v30  ;;  %v1312_v18 = vsel %vm1291_vm3, %v16781_v42, %v16780_v49  ;;  %v9312_v2 = vadd.f32 %v16786_v29, %v1570_v28  ;;  %v16787_v7 = vrot.slane %v8962_v3, 7  ;;  %v16788_v47 = vmov %v16780_v49  ;;  %v16789_v42 = vld [vmem:[#allocation55_spill] sm:$0xff]  ;;  %v9331_v28 = vpop.permute.xlu1 %2227  ;;  %v16795_v29 = vld [vmem:[#allocation17_spill] sm:$0xff] }
 0x1f6   : > { %v987_v53 = vsel %vm970_vm2, %v16784_v15, %v16783_v57  ;;  %16785 = vst [vmem:[#allocation120_spill] sm:$0xff] %v9307_v25  ;;  %2691 = vperm.xlu0 %6995, %v16789_v42   ;;  %v1239_v60 = vmax.f32 %v8962_v3, %v1207_v48  ;;  %v1567_v57 = vsel %vm1548_vm4, %v1528_v51, %v1529_v0  ;;  %v1530_v23 = vrot.slane %v16672_v40, 2  ;;  %v16821_v25 = vld [vmem:[#allocation107_spill] sm:$0xff] }
 0x1f7   : > { %v1311_v49 = vsel %vm1291_vm3, %v16788_v47, %v16787_v7  ;;  %v16790_v13 = vmov %v16784_v15  ;;  %v16791_v41 = vrot.slane %v9035_v14, 1  ;;  %16792 = vst [vmem:[#allocation55_spill] sm:$0xff] %v9331_v28  ;;  %v9333_v15 = vpop.permute.xlu0 %2255  ;;  %v1238_v47 = vmax.f32 %v8804_v44, %v1206_v4  ;;  %v16794_v7 = vld [vmem:[#allocation49_spill] sm:$0xff]  ;;  %6961 = vset.pattern.permute.xlu1 %v16605_v59 }
 0x1f8   : > { %16793 = vst [vmem:[#allocation202_spill] sm:$0xff] %v9333_v15  ;;  %v1463_v48 = vadd.f32 %v16794_v7, %v1312_v18  ;;  %v1568_v42 = vsel %vm1548_vm4, %v1527_v34, %v1528_v51  ;;  %v1209_v21 = vadd.f32 %v16795_v29, %v987_v53  ;;  %v1464_v32 = vadd.f32 %v16796_v43, %v1311_v49  ;;  %v16799_v15 = vld [vmem:[#allocation156_spill] sm:$0xff]  ;;  %v16800_v7 = vld [vmem:[#allocation151_spill] sm:$0xff]  ;;  %v16801_v34 = vld [vmem:[#allocation93_spill] sm:$0xff] }
 0x1f9   : > { %v988_v58 = vsel %vm970_vm2, %v16791_v41, %v16790_v13  ;;  %v16797_v1 = vrot.slane %v16672_v40, 7  ;;  %v16798_v13 = vrot.slane %v9035_v14, 7  ;;  %v1540_v4 = vrot.slane %v16799_v15, 2  ;;  %2271 = vperm.xlu1 %6961, %v16800_v7   ;;  %v16802_v53 = vld [vmem:[#allocation14_spill] sm:$0xff] }
 0x1fa   : > { %v1541_v18 = vrot.slane %v8706_v20, 2  ;;  %v9352_v51 = vadd.f32 %v16801_v34, %v1567_v57  ;;  %v1208_v29 = vadd.f32 %v16802_v53, %v988_v58  ;;  %v1542_v49 = vrot.slane %v8738_v5, 2  ;;  %v9372_v34 = vpop.permute.xlu1 %2347 }
 0x1fb   : > { %v1309_v41 = vsel %vm1291_vm3, %v16798_v13, %v16797_v1  ;;  %v1543_v43 = vrot.slane %v8758_v61, 2  ;;  %v9357_v28 = vmax.f32 %v1239_v60, %v1464_v32  ;;  %v9360_v10 = vadd.f32 %v16803_v36, %v1568_v42  ;;  %16807 = vst [vmem:[#allocation156_spill] sm:$0xff] %v9372_v34  ;;  %v9374_v53 = vpop.permute.xlu0 %2267  ;;  %v16809_v42 = vld [vmem:[#allocation56_spill] sm:$0xff]  ;;  %v16810_v61 = vld [vmem:[#allocation83_spill] sm:$0xff] }
 0x1fc   : > { %v16804_v1 = vrot.slane %v16782_v16, 2  ;;  %v16805_v7 = vrot.slane %v9035_v14, 7  ;;  %v16806_v57 = vrot.slane %v8962_v3, 7  ;;  %16808 = vst [vmem:[#allocation151_spill] sm:$0xff] %v9374_v53  ;;  %v9376_v60 = vmax.f32 %v1238_v47, %v1463_v48 }
 0x1fd   : > { %v1241_v32 = vmax.f32 %v16672_v40, %v1209_v21  ;;  %v1466_v16 = vadd.f32 %v16809_v42, %v1309_v41  ;;  %v1555_v36 = vsel %vm1548_vm4, %v1540_v4, %v1541_v18  ;;  %v16811_v5 = vrot.slane %v16810_v61, 2  ;;  %6962 = vset.pattern.permute.xlu1 %v16607_v37  ;;  %v16812_v21 = vld [vmem:[#allocation95_spill] sm:$0xff] }
 0x1fe   : > { %v1565_v13 = vsel %vm1548_vm4, %v1530_v23, %v16804_v1  ;;  %v1310_v58 = vsel %vm1291_vm3, %v16806_v57, %v16805_v7  ;;  %v1566_v1 = vsel %vm1548_vm4, %v1529_v0, %v1530_v23  ;;  %v1544_v57 = vrot.slane %v8884_v17, 2  ;;  %v16814_v0 = vld [vmem:[#allocation53_spill] sm:$0xff]  ;;  %2643 = vperm.xlu1 %6962, %v9031_v63  }
 0x1ff   : > { %v1556_v7 = vsel %vm1548_vm4, %v16811_v5, %v1540_v4  ;;  %v1545_v47 = vrot.slane %v8905_v27, 2  ;;  %v9392_v48 = vadd.f32 %v16812_v21, %v1565_v13  ;;  %v1240_v41 = vmax.f32 %v9035_v14, %v1208_v29  ;;  %v9407_v29 = vpop.permute.xlu0 %2283  ;;  %v16817_v21 = vld [vmem:[#allocation96_spill] sm:$0xff]  ;;  %v16818_v63 = vld [vmem:[#allocation105_spill] sm:$0xff]  ;;  %v16819_v5 = vld [vmem:[#allocation106_spill] sm:$0xff]  ;;  %v9420_v4 = vpop.permute.xlu1 %2423 }
 0x200   : > { %v1465_v23 = vadd.f32 %v16814_v0, %v1310_v58  ;;  %v1553_v42 = vsel %vm1548_vm4, %v1542_v49, %v1543_v43  ;;  %16815 = vst [vmem:[#allocation203_spill] sm:$0xff] %v9407_v29  ;;  %v9409_v58 = vmax.f32 %v1241_v32, %v1466_v16  ;;  %v9412_v0 = vadd.f32 %v16817_v21, %v1566_v1  ;;  %v16828_v21 = vld [vmem:[#allocation110_spill] sm:$0xff] }
 0x201   : > { %16813 = vst [vmem:[#allocation83_spill] sm:$0xff] %v9392_v48  ;;  %v9415_v34 = vadd.f32 %v16818_v63, %v1555_v36  ;;  %v9418_v30 = vadd.f32 %v16819_v5, %v1556_v7  ;;  %16820 = vst [vmem:[#allocation205_spill] sm:$0xff] %v9420_v4  ;;  %v9423_v53 = vadd.f32 %v16821_v25, %v1553_v42  ;;  %v1546_v7 = vrot.slane %v8899_v6, 2  ;;  %v16830_v4 = vld [vmem:[#allocation154_spill] sm:$0xff] }
 0x202   : > { %16816 = vst [vmem:[#allocation204_spill] sm:$0xff] %v9409_v58  ;;  %v1554_v13 = vsel %vm1548_vm4, %v1541_v18, %v1542_v49  ;;  %v1551_v32 = vsel %vm1548_vm4, %v1544_v57, %v1545_v47  ;;  %v1552_v16 = vsel %vm1548_vm4, %v1543_v43, %v1544_v57  ;;  %v9433_v1 = vmax.f32 %v1240_v41, %v1465_v23  ;;  %v16825_v57 = vld [vmem:[#allocation108_spill] sm:$0xff]  ;;  %v16826_v23 = vld [vmem:[#allocation109_spill] sm:$0xff] }
 0x203   : > { %16822 = vst [vmem:[#allocation206_spill] sm:$0xff] %v9423_v53  ;;  %v1547_v5 = vrot.slane %v8902_v55, 2  ;;  %v16823_v42 = vmov 4   ;;  %v1773_v63 = vrot.slane %v8663_v50, 6  ;;  %v1775_v49 = vrot.slane %v8660_v52, 6  ;;  %v9443_v43 = vpop.permute.xlu0 %2291  ;;  %v9455_v18 = vpop.permute.xlu1 %2431 }
 0x204   : > { %6963 = vset.pattern.permute.xlu1 %v16823_v42  ;;  %v1776_v25 = vrot.slane %v8669_v62, 6  ;;  %16824 = vst [vmem:[#allocation207_spill] sm:$0xff] %v9443_v43  ;;  %v9446_v41 = vadd.f32 %v16825_v57, %v1554_v13  ;;  %v9449_v36 = vadd.f32 %v16826_v23, %v1551_v32  ;;  %v9452_v29 = vadd.f32 %v16828_v21, %v1552_v16  ;;  %v16832_v62 = vld [vmem:[#allocation166_spill] sm:$0xff]  ;;  %v16833_v43 = vld [vmem:[#allocation165_spill] sm:$0xff] }
 0x205   : > { %2087 = vperm.xlu1 %6963, %v9128_v39   ;;  %v1774_v48 = vrot.slane %v16830_v4, 6  ;;  %16831 = vst [vmem:[#allocation154_spill] sm:$0xff] %v9455_v18  ;;  %v1549_v16 = vsel %vm1548_vm4, %v1546_v7, %v1547_v5  ;;  %v1550_v4 = vsel %vm1548_vm4, %v1545_v47, %v1546_v7  ;;  %v1777_v21 = vrot.slane %v8688_v54, 6  ;;  %v16837_v54 = vld [vmem:[#allocation170_spill] sm:$0xff]  ;;  %v16840_v47 = vld [vmem:[#allocation112_spill] sm:$0xff] }
 0x206   : > { %16827 = vst [vmem:[#allocation208_spill] sm:$0xff] %v9449_v36  ;;  %16829 = vst [vmem:[#allocation209_spill] sm:$0xff] %v9452_v29  ;;  %v1778_v23 = vrot.slane %v8723_v45, 6  ;;  %v16835_v52 = vrot.slane %v8902_v55, 6  ;;  %v1834_v13 = vsel %vm1805_vm5, %v1775_v49, %v1776_v25  ;;  %v1779_v32 = vrot.slane %v8682_v56, 6  ;;  %v7300_v56 = vld [vmem:[%s15685_s7 + $0x58] sm:$0xff] }
 0x207   : > { %v1780_v18 = vrot.slane %v8703_v8, 6  ;;  %v9480_v53 = vpop.permute.xlu0 %2303  ;;  %v9493_v8 = vpop.permute.xlu1 %2435  ;;  %v16841_v45 = vrot.slane %v8663_v50, 2  ;;  %v1833_v50 = vsel %vm1805_vm5, %v1776_v25, %v1777_v21  ;;  %v1783_v25 = vrot.slane %v8735_v19, 6 }
 0x208   : > { %v1837_v58 = vsel %vm1805_vm5, %v16835_v52, %v1773_v63  ;;  %16836 = vst [vmem:[#allocation166_spill] sm:$0xff] %v9480_v53  ;;  %v1836_v52 = vsel %vm1805_vm5, %v1773_v63, %v1774_v48  ;;  %16838 = vst [vmem:[#allocation165_spill] sm:$0xff] %v9493_v8  ;;  %v16839_v53 = vld [vmem:[#allocation111_spill] sm:$0xff]  ;;  %v1835_v63 = vsel %vm1805_vm5, %v1774_v48, %v1775_v49  ;;  %v16842_v8 = vld [vmem:[#allocation113_spill] sm:$0xff] }
 0x209   : > { %6964 = vset.pattern.permute.xlu1 %v16593_v9  ;;  %v9496_v57 = vadd.f32 %v16839_v53, %v1549_v16  ;;  %v9499_v9 = vadd.f32 %v16840_v47, %v1550_v4  ;;  %v1580_v7 = vsel %vm1548_vm4, %v1547_v5, %v16841_v45  ;;  %v1966_v36 = vadd.f32 %v16842_v8, %v1837_v58  ;;  %v16843_v16 = vld [vmem:[#allocation115_spill] sm:$0xff]  ;;  %v16844_v5 = vld [vmem:[#allocation116_spill] sm:$0xff] }
 0x20a   : > { %2459 = vperm.xlu1 %6964, %v7300_v56   ;;  %v9510_v56 = vld [vmem:[%s15682_s4 + $0x4] sm:$0xf]  ;;  %v1969_v53 = vadd.f32 %v16843_v16, %v1834_v13  ;;  %v1832_v4 = vsel %vm1805_vm5, %v1777_v21, %v1778_v23  ;;  %v1967_v48 = vadd.f32 %v16844_v5, %v1836_v52  ;;  %v1830_v49 = vsel %vm1805_vm5, %v1779_v32, %v1780_v18  ;;  %v16847_v52 = vld [vmem:[#allocation117_spill] sm:$0xff] }
 0x20b   : > { %6914 = vmatprep.subr.msk.bf16.mxu1 %vm469_vm0, %v9510_v56  ;;  %v1781_v45 = vrot.slane %v8769_v31, 6  ;;  %v1782_v58 = vrot.slane %v8809_v46, 6  ;;  %v9525_v47 = vpop.permute.xlu0 %2307  ;;  %v16846_v13 = vld [vmem:[#allocation118_spill] sm:$0xff]  ;;  %v1831_v8 = vsel %vm1805_vm5, %v1778_v23, %v1779_v32  ;;  %v1784_v21 = vrot.slane %v8804_v44, 6  ;;  %v9543_v19 = vpop.permute.xlu1 %2143 }
 0x20c   : > { %16845 = vst [vmem:[#allocation170_spill] sm:$0xff] %v9525_v47  ;;  %v1968_v16 = vadd.f32 %v16846_v13, %v1835_v63  ;;  %v1971_v5 = vadd.f32 %v16847_v52, %v1832_v4  ;;  %v1970_v29 = vadd.f32 %v16848_v22, %v1833_v50  ;;  %v1785_v31 = vrot.slane %v8962_v3, 6  ;;  %v9540_v63 = vld [vmem:[%s15685_s7 + $0x68] sm:$0xff]  ;;  %16850 = vst [vmem:[#allocation211_spill] sm:$0xff] %v9543_v19  ;;  %v16852_v3 = vld [vmem:[#allocation114_spill] sm:$0xff] }
 0x20d   : > { %v1786_v46 = vrot.slane %v9035_v14, 6  ;;  %16849 = vst [vmem:[#allocation210_spill] sm:$0xff] %v9540_v63  ;;  %v16851_v23 = vmax.f32 %v9082_v11, %v8812_v26  ;;  %v9553_v4 = vadd.f32 %v16852_v3, %v1580_v7  ;;  %v16853_v14 = vld [vmem:[#allocation119_spill] sm:$0xff]  ;;  %v16854_v22 = vld [vmem:[#allocation185_spill] sm:$0xff]  ;;  %v1828_v26 = vsel %vm1805_vm5, %v1781_v45, %v1782_v58  ;;  %v16859_v11 = vld [vmem:[#allocation124_spill] sm:$0xff] }
 0x20e   : > { %6965 = vset.pattern.permute.xlu1 %v16605_v59  ;;  %v1973_v50 = vadd.f32 %v16853_v14, %v1830_v49  ;;  %v16855_v13 = vmax.f32 %v9133_v38, %v16854_v22  ;;  %v16856_v47 = vld [vmem:[#allocation171_spill] sm:$0xff]  ;;  %v16857_v19 = vld [vmem:[#allocation169_spill] sm:$0xff]  ;;  %v1826_v22 = vsel %vm1805_vm5, %v1783_v25, %v1784_v21  ;;  %v1829_v38 = vsel %vm1805_vm5, %v1780_v18, %v1781_v45 }
 0x20f   : > { %2275 = vperm.xlu1 %6965, %v9540_v63   ;;  %v9550_v32 = vmax.f32 %v16851_v23, %v1966_v36  ;;  %v16858_v59 = vmax.f32 %v16856_v47, %v16857_v19  ;;  %v1972_v36 = vadd.f32 %v16859_v11, %v1831_v8  ;;  %v16860_v23 = vld [vmem:[#allocation175_spill] sm:$0xff]  ;;  %v16868_v8 = vld [vmem:[#allocation178_spill] sm:$0xff]  ;;  %v1827_v18 = vsel %vm1805_vm5, %v1782_v58, %v1783_v25  ;;  %v16880_v58 = vld [vmem:[#allocation125_spill] sm:$0xff] }
 0x210   : > { %v9559_v52 = vmax.f32 %v16855_v13, %v1969_v53  ;;  %v16861_v7 = vld [vmem:[#allocation123_spill] sm:$0xff]  ;;  %v1796_v53 = vrot.slane %v16810_v61, 6  ;;  %v16871_v61 = vld [vmem:[#allocation198_spill] sm:$0xff]  ;;  %v1977_v25 = vadd.f32 %v16880_v58, %v1826_v22 }
 0x211   : > { %v9564_v63 = vmax.f32 %v16858_v59, %v1967_v48  ;;  %v16862_v44 = vmax.f32 %v16860_v23, %v16861_v7  ;;  %v9579_v59 = vpop.permute.xlu0 %2427  ;;  %v16864_v47 = vld [vmem:[#allocation195_spill] sm:$0xff]  ;;  %v16865_v48 = vld [vmem:[#allocation192_spill] sm:$0xff] }
 0x212   : > { %16863 = vst [vmem:[#allocation185_spill] sm:$0xff] %v9579_v59  ;;  %v16866_v49 = vmax.f32 %v16864_v47, %v16865_v48  ;;  %v16869_v19 = vld [vmem:[#allocation179_spill] sm:$0xff]  ;;  %v1797_v48 = vrot.slane %v16799_v15, 6  ;;  %v16881_v59 = vld [vmem:[#allocation126_spill] sm:$0xff] }
 0x213   : > { %v9572_v3 = vmax.f32 %v16862_v44, %v1968_v16  ;;  %v16870_v23 = vmax.f32 %v16868_v8, %v16869_v19  ;;  %v1824_v44 = vsel %vm1805_vm5, %v1785_v31, %v1786_v46  ;;  %2279 = vperm.xlu1 %6965, %v9128_v39   ;;  %v16872_v45 = vld [vmem:[#allocation199_spill] sm:$0xff]  ;;  %v1974_v39 = vadd.f32 %v16881_v59, %v1829_v38 }
 0x214   : > { %v9584_v13 = vmax.f32 %v16866_v49, %v1971_v5  ;;  %v16873_v7 = vmax.f32 %v16871_v61, %v16872_v45  ;;  %v16874_v5 = vld [vmem:[#allocation122_spill] sm:$0xff]  ;;  %v9604_v49 = vpop.permute.xlu1 %2415  ;;  %v16876_v8 = vld [vmem:[#allocation155_spill] sm:$0xff]  ;;  %v16883_v45 = vld [vmem:[#allocation128_spill] sm:$0xff] }
 0x215   : > { %v9589_v16 = vmax.f32 %v16870_v23, %v1970_v29  ;;  %v1975_v47 = vadd.f32 %v16874_v5, %v1828_v26  ;;  %v1798_v29 = vrot.slane %v8706_v20, 6  ;;  %16875 = vst [vmem:[#allocation169_spill] sm:$0xff] %v9604_v49  ;;  %v16877_v19 = vld [vmem:[#allocation191_spill] sm:$0xff]  ;;  %v1976_v15 = vadd.f32 %v16883_v45, %v1827_v18  ;;  %v16885_v5 = vld [vmem:[#allocation82_spill] sm:$0xff]  ;;  %v9625_v22 = vpop.permute.xlu0 %2439 }
 0x216   : > { %16867 = vst [vmem:[#allocation171_spill] sm:$0xff] %v9584_v13  ;;  %v9599_v14 = vmax.f32 %v16873_v7, %v1973_v50  ;;  %v16878_v23 = vmax.f32 %v16876_v8, %v16877_v19  ;;  %v1825_v50 = vsel %vm1805_vm5, %v1784_v21, %v1785_v31  ;;  %v16882_v61 = vld [vmem:[#allocation127_spill] sm:$0xff]  ;;  %v16884_v20 = vrot.slane %v16672_v40, 6  ;;  %16887 = vst [vmem:[#allocation123_spill] sm:$0xff] %v9625_v22  ;;  %v16892_v18 = vld [vmem:[#allocation130_spill] sm:$0xff] }
 0x217   : > { %v1979_v26 = vadd.f32 %v16882_v61, %v1824_v44  ;;  %v16886_v8 = vrot.slane %v16885_v5, 6  ;;  %v16888_v38 = vld [vmem:[#allocation159_spill] sm:$0xff]  ;;  %v1801_v31 = vrot.slane %v8884_v17, 6  ;;  %v1802_v44 = vrot.slane %v8905_v27, 6  ;;  %6966 = vset.pattern.permute.xlu1 %v16607_v37  ;;  %v7302_v17 = vld [vmem:[%s15685_s7 + $0x60] sm:$0xff] }
 0x218   : > { %v9609_v11 = vmax.f32 %v16878_v23, %v1972_v36  ;;  %v1823_v7 = vsel %vm1805_vm5, %v1786_v46, %v16884_v20  ;;  %v1799_v19 = vrot.slane %v16888_v38, 6  ;;  %v16889_v23 = vld [vmem:[#allocation160_spill] sm:$0xff]  ;;  %v16890_v40 = vmax.f32 %v9309_v12, %v9312_v2  ;;  %2655 = vperm.xlu1 %6966, %v7302_v17   ;;  %v9644_v27 = vpop.permute.xlu1 %2419 }
 0x219   : > { %v1814_v36 = vsel %vm1805_vm5, %v16886_v8, %v1796_v53  ;;  %v1800_v21 = vrot.slane %v16889_v23, 6  ;;  %v1978_v5 = vadd.f32 %v16892_v18, %v1825_v50  ;;  %v1812_v20 = vsel %vm1805_vm5, %v1797_v48, %v1798_v29  ;;  %16893 = vst [vmem:[#allocation192_spill] sm:$0xff] %v9644_v27  ;;  %v16894_v38 = vld [vmem:[#allocation196_spill] sm:$0xff]  ;;  %v16895_v23 = vld [vmem:[#allocation197_spill] sm:$0xff]  ;;  %v16898_v50 = vld [vmem:[#allocation135_spill] sm:$0xff] }
 0x21a   : > { %16879 = vst [vmem:[#allocation175_spill] sm:$0xff] %v9609_v11  ;;  %v9635_v46 = vmax.f32 %v16890_v40, %v1975_v47  ;;  %v1803_v8 = vrot.slane %v8899_v6, 6  ;;  %v16896_v61 = vmax.f32 %v16894_v38, %v16895_v23  ;;  %v16897_v12 = vld [vmem:[#allocation132_spill] sm:$0xff]  ;;  %v1989_v40 = vadd.f32 %v16898_v50, %v1814_v36  ;;  %v9672_v36 = vpop.permute.xlu0 %2535 }
 0x21b   : > { %v1980_v47 = vadd.f32 %v16897_v12, %v1823_v7  ;;  %v3650_v18 = vsel %vm469_vm0, %v9510_v56, 0  ;;  %v16899_v6 = vmax.f32 %v9376_v60, %v9360_v10  ;;  %v16901_v17 = vmax.f32 %v9433_v1, %v9412_v0  ;;  %v16903_v38 = vld [vmem:[#allocation120_spill] sm:$0xff]  ;;  %16907 = vst [vmem:[#allocation199_spill] sm:$0xff] %v9672_v36  ;;  %v16908_v56 = vld [vmem:[#allocation138_spill] sm:$0xff] }
 0x21c   : > { %16891 = vst [vmem:[#allocation195_spill] sm:$0xff] %v9635_v46  ;;  %v9649_v2 = vmax.f32 %v16896_v61, %v1974_v39  ;;  %v16904_v39 = vld [vmem:[#allocation201_spill] sm:$0xff]  ;;  %v1813_v7 = vsel %vm1805_vm5, %v1796_v53, %v1797_v48  ;;  %6775 = vmatpush3.bf16.msra.mxu1 %v3650_v18  ;;  %v1991_v10 = vadd.f32 %v16908_v56, %v1812_v20  ;;  %v16911_v53 = vrot.slane %v8902_v55, 6  ;;  %v9695_v20 = vpop.permute.xlu1 %2539 }
 0x21d   : > { %v9658_v59 = vmax.f32 %v16899_v6, %v1977_v25  ;;  %v9663_v58 = vmax.f32 %v16901_v17, %v1979_v26  ;;  %v16905_v61 = vmax.f32 %v16903_v38, %v16904_v39  ;;  %v1810_v60 = vsel %vm1805_vm5, %v1799_v19, %v1800_v21  ;;  %6967 = vset.pattern.permute.xlu1 %v16823_v42  ;;  %v16919_v6 = vld [vmem:[#allocation59_spill] sm:$0xff]  ;;  %v16923_v38 = vld [vmem:[#allocation58_spill] sm:$0xff] }
 0x21e   : > { %v1808_v0 = vsel %vm1805_vm5, %v1801_v31, %v1802_v44  ;;  %v1811_v1 = vsel %vm1805_vm5, %v1798_v29, %v1799_v19  ;;  %v16909_v25 = vmax.f32 %v9357_v28, %v9352_v51  ;;  %v1806_v48 = vsel %vm1805_vm5, %v1803_v8, %v16911_v53  ;;  %16912 = vst [vmem:[#allocation191_spill] sm:$0xff] %v9695_v20  ;;  %v16913_v29 = vld [vmem:[#allocation204_spill] sm:$0xff]  ;;  %v16914_v19 = vld [vmem:[#allocation83_spill] sm:$0xff]  ;;  %v16929_v53 = vld [vmem:[#allocation62_spill] sm:$0xff] }
 0x21f   : > { %16900 = vst [vmem:[#allocation178_spill] sm:$0xff] %v9658_v59  ;;  %16902 = vst [vmem:[#allocation179_spill] sm:$0xff] %v9663_v58  ;;  %v9668_v23 = vmax.f32 %v16905_v61, %v1976_v15  ;;  %v1809_v15 = vsel %vm1805_vm5, %v1800_v21, %v1801_v31  ;;  %v1807_v18 = vsel %vm1805_vm5, %v1802_v44, %v1803_v8  ;;  %v16920_v21 = vld [vmem:[#allocation182_spill] sm:$0xff]  ;;  %v9713_v44 = vld [vmem:[%s15685_s7 + $0x78] sm:$0xff] }
 0x220   : > { %v9684_v26 = vmax.f32 %v16909_v25, %v1978_v5  ;;  %v16915_v28 = vmax.f32 %v16913_v29, %v16914_v19  ;;  %v16917_v55 = vmax.f32 %v16833_v43, %v9418_v30  ;;  %v1990_v17 = vadd.f32 %v16919_v6, %v1813_v7  ;;  %16921 = vst [vmem:[#allocation160_spill] sm:$0xff] %v9713_v44  ;;  %v16922_v8 = vld [vmem:[#allocation146_spill] sm:$0xff]  ;;  %v16924_v61 = vld [vmem:[#allocation63_spill] sm:$0xff]  ;;  %v9723_v7 = vpop.permute.xlu0 %2447  ;;  %v16930_v19 = vld [vmem:[#allocation148_spill] sm:$0xff]  ;;  %v9761_v45 = vpop.permute.xlu1 %2615 }
 0x221   : > { %16906 = vst [vmem:[#allocation198_spill] sm:$0xff] %v9668_v23  ;;  %v1770_v31 = vmax.f32 %v16920_v21, %v9499_v9  ;;  %2091 = vperm.xlu1 %6967, %v9713_v44   ;;  %v1995_v39 = vadd.f32 %v16923_v38, %v1808_v0  ;;  %v1992_v30 = vadd.f32 %v16924_v61, %v1811_v1  ;;  %v16925_v43 = vld [vmem:[#allocation147_spill] sm:$0xff]  ;;  %16926 = vst [vmem:[#allocation196_spill] sm:$0xff] %v9723_v7  ;;  %v16932_v0 = vld [vmem:[#allocation149_spill] sm:$0xff] }
 0x222   : > { %16910 = vst [vmem:[#allocation155_spill] sm:$0xff] %v9684_v26  ;;  %v9700_v51 = vmax.f32 %v16915_v28, %v1980_v47  ;;  %v9705_v5 = vmax.f32 %v16917_v55, %v1989_v40  ;;  %v1993_v47 = vadd.f32 %v16922_v8, %v1810_v60  ;;  %v9721_v40 = vadd.f32 %v16925_v43, %v9559_v52  ;;  %v16931_v60 = vld [vmem:[#allocation66_spill] sm:$0xff]  ;;  %v16933_v21 = vld [vmem:[#allocation152_spill] sm:$0xff]  ;;  %v16940_v8 = vld [vmem:[#allocation157_spill] sm:$0xff] }
 0x223   : > { %v16927_v9 = vmax.f32 %v16837_v54, %v9446_v41  ;;  %v1997_v29 = vadd.f32 %v16929_v53, %v1806_v48  ;;  %v1994_v28 = vadd.f32 %v16930_v19, %v1809_v15  ;;  %v1996_v55 = vadd.f32 %v16931_v60, %v1807_v18  ;;  %v16934_v6 = vld [vmem:[#allocation150_spill] sm:$0xff]  ;;  %v16938_v15 = vld [vmem:[#allocation183_spill] sm:$0xff]  ;;  %16942 = vst [vmem:[#allocation201_spill] sm:$0xff] %v9761_v45  ;;  %v16943_v19 = vld [vmem:[#allocation209_spill] sm:$0xff] }
 0x224   : > { %16916 = vst [vmem:[#allocation82_spill] sm:$0xff] %v9700_v51  ;;  %16918 = vst [vmem:[#allocation159_spill] sm:$0xff] %v9705_v5  ;;  %v9735_v1 = vadd.f32 %v16932_v0, %v9609_v11  ;;  %v9739_v50 = vadd.f32 %v16933_v21, %v9572_v3  ;;  %v9743_v56 = vadd.f32 %v16934_v6, %v9649_v2  ;;  %v16935_v41 = vld [vmem:[#allocation134_spill] sm:$0xff]  ;;  %v16941_v6 = vmov 6  }
 0x225   : > { %v9728_v25 = vmax.f32 %v16927_v9, %v1991_v10  ;;  %v2160_v54 = vadd.f32 %v16935_v41, %v9589_v16  ;;  %v16936_v10 = vmax.f32 %v16832_v62, %v9415_v34  ;;  %v1772_v18 = vmax.f32 %v16938_v15, %v9553_v4  ;;  %v16939_v9 = vld [vmem:[#allocation153_spill] sm:$0xff]  ;;  %6968 = vset.pattern.permute.xlu1 %v16941_v6  ;;  %v16948_v4 = vld [vmem:[#allocation206_spill] sm:$0xff]  ;;  %v9778_v41 = vpop.permute.xlu0 %2523 }
 0x226   : > { %v9756_v61 = vadd.f32 %v16939_v9, %v9668_v23  ;;  %v2161_v12 = vadd.f32 %v16940_v8, %v9584_v13  ;;  %v16944_v21 = vmax.f32 %v9077_v33, %v16943_v19  ;;  %v9768_v62 = vmax.f32 %v1770_v31, %v1995_v39  ;;  %v16951_v38 = vld [vmem:[#allocation210_spill] sm:$0xff]  ;;  %16952 = vst [vmem:[#allocation183_spill] sm:$0xff] %v9778_v41  ;;  %v16954_v33 = vld [vmem:[#allocation208_spill] sm:$0xff] }
 0x227   : > { %16928 = vst [vmem:[#allocation197_spill] sm:$0xff] %v9728_v25  ;;  %v9750_v48 = vmax.f32 %v16936_v10, %v1990_v17  ;;  %v16947_v17 = vld [vmem:[#allocation172_spill] sm:$0xff]  ;;  %2467 = vperm.xlu1 %6968, %v16951_v38   ;;  %v9780_v0 = vmax.f32 %v1772_v18, %v1997_v29  ;;  %v16953_v43 = vld [vmem:[#allocation50_spill] sm:$0xff]  ;;  %v16957_v31 = vmax.f32 %v9088_v24, %v9496_v57  ;;  %v16967_v24 = vld [vmem:[#allocation167_spill] sm:$0xff] }
 0x228   : > { %v9766_v34 = vmax.f32 %v16944_v21, %v1993_v47  ;;  %16946 = vst [vmem:[#allocation83_spill] sm:$0xff] %v9768_v62  ;;  %v16949_v10 = vmax.f32 %v16947_v17, %v16948_v4  ;;  %v16955_v47 = vmax.f32 %v16953_v43, %v16954_v33  ;;  %v2193_v57 = vmax.f32 %v9559_v52, %v2161_v12  ;;  %v16961_v4 = vld [vmem:[#allocation158_spill] sm:$0xff]  ;;  %v9812_v33 = vpop.permute.xlu1 %2623  ;;  %v16969_v12 = vld [vmem:[#allocation164_spill] sm:$0xff] }
 0x229   : > { %16937 = vst [vmem:[#allocation120_spill] sm:$0xff] %v9750_v48  ;;  %v9790_v39 = vmax.f32 %v16957_v31, %v1996_v55  ;;  %v16960_v55 = vld [vmem:[#allocation161_spill] sm:$0xff]  ;;  %16963 = vst [vmem:[#allocation210_spill] sm:$0xff] %v9812_v33  ;;  %v9822_v43 = vadd.f32 %v16967_v24, %v9658_v59  ;;  %v2187_v29 = vadd.f32 %v16969_v12, %v9780_v0  ;;  %v16970_v17 = vld [vmem:[#allocation184_spill] sm:$0xff] }
 0x22a   : > { %16945 = vst [vmem:[#allocation204_spill] sm:$0xff] %v9766_v34  ;;  %v9773_v15 = vmax.f32 %v16949_v10, %v1992_v30  ;;  %v9785_v19 = vmax.f32 %v16955_v47, %v1994_v28  ;;  %v16958_v30 = vld [vmem:[#allocation47_spill] sm:$0xff]  ;;  %v2192_v28 = vmax.f32 %v9572_v3, %v2160_v54  ;;  %v2163_v18 = vadd.f32 %v16960_v55, %v9599_v14  ;;  %v16966_v54 = vld [vmem:[#allocation162_spill] sm:$0xff]  ;;  %v16973_v48 = vld [vmem:[#allocation168_spill] sm:$0xff] }
 0x22b   : > { %v9794_v21 = vadd.f32 %v16958_v30, %v9684_v26  ;;  %v9810_v10 = vadd.f32 %v16961_v4, %v9700_v51  ;;  %v16964_v47 = vld [vmem:[#allocation163_spill] sm:$0xff]  ;;  %v2188_v9 = vadd.f32 %v16966_v54, %v9550_v32  ;;  %16968 = vst [vmem:[#allocation208_spill] sm:$0xff] %v9822_v43  ;;  %2471 = vperm.xlu1 %6968, %v16970_v17   ;;  %v9827_v4 = vpop.permute.xlu0 %2455  ;;  %v16976_v54 = vld [vmem:[#allocation176_spill] sm:$0xff]  ;;  %v16978_v12 = vld [vmem:[#allocation141_spill] sm:$0xff] }
 0x22c   : > { %16950 = vst [vmem:[#allocation182_spill] sm:$0xff] %v9773_v15  ;;  %16956 = vst [vmem:[#allocation209_spill] sm:$0xff] %v9785_v19  ;;  %v9816_v31 = vadd.f32 %v16964_v47, %v9635_v46  ;;  %v16972_v47 = vld [vmem:[#allocation173_spill] sm:$0xff]  ;;  %v9837_v60 = vadd.f32 %v16973_v48, %v9768_v62  ;;  %v16975_v24 = vld [vmem:[#allocation51_spill] sm:$0xff]  ;;  %v2195_v35 = vmax.f32 %v9584_v13, %v2163_v18 }
 0x22d   : > { %16959 = vst [vmem:[#allocation172_spill] sm:$0xff] %v9794_v21  ;;  %16962 = vst [vmem:[#allocation206_spill] sm:$0xff] %v9810_v10  ;;  %v9833_v55 = vadd.f32 %v16972_v47, %v9663_v58  ;;  %v9841_v53 = vadd.f32 %v16976_v54, %v16975_v24  ;;  %v16979_v44 = vld [vmem:[#allocation174_spill] sm:$0xff]  ;;  %v16981_v8 = vld [vmem:[#allocation180_spill] sm:$0xff] }
 0x22e   : > { %16965 = vst [vmem:[#allocation50_spill] sm:$0xff] %v9816_v31  ;;  %16971 = vst [vmem:[#allocation184_spill] sm:$0xff] %v9827_v4  ;;  %v9845_v17 = vadd.f32 %v16979_v44, %v16978_v12  ;;  %v2189_v15 = vadd.f32 %v16981_v8, %v9564_v63  ;;  %v16982_v30 = vld [vmem:[#allocation142_spill] sm:$0xff]  ;;  %v16983_v21 = vld [vmem:[#allocation177_spill] sm:$0xff] }
 0x22f   : > { %16974 = vst [vmem:[#allocation212_spill] sm:$0xff] %v9837_v60  ;;  %16977 = vst [vmem:[#allocation213_spill] sm:$0xff] %v9841_v53  ;;  %v9851_v4 = vadd.f32 %v16983_v21, %v16982_v30  ;;  %v16985_v47 = vld [vmem:[#allocation181_spill] sm:$0xff]  ;;  %v16987_v54 = vld [vmem:[#allocation186_spill] sm:$0xff]  ;;  %v2220_v21 = vmax.f32 %v9790_v39, %v2188_v9  ;;  %v2219_v30 = vmax.f32 %v9768_v62, %v2187_v29  ;;  %v9871_v48 = vpop.permute.xlu0 %2463 }
 0x230   : > { %16980 = vst [vmem:[#allocation214_spill] sm:$0xff] %v9845_v17  ;;  %v9855_v51 = vadd.f32 %v16985_v47, %v9728_v25  ;;  %v2353_v6 = vadd.f32 %v16987_v54, %v9564_v63  ;;  %v16988_v44 = vld [vmem:[#allocation187_spill] sm:$0xff]  ;;  %v16989_v47 = vmov 5   ;;  %v9869_v25 = vpop.permute.xlu1 %2251  ;;  %16991 = vst [vmem:[#allocation218_spill] sm:$0xff] %v9871_v48  ;;  %v16992_v18 = vld [vmem:[#allocation190_spill] sm:$0xff]  ;;  %v2201_v9 = vmax.f32 %v9658_v59, %v9833_v55 }
 0x231   : > { %16984 = vst [vmem:[#allocation215_spill] sm:$0xff] %v9851_v4  ;;  %v2352_v41 = vadd.f32 %v16988_v44, %v9550_v32  ;;  %6969 = vset.pattern.permute.xlu1 %v16989_v47  ;;  %16990 = vst [vmem:[#allocation217_spill] sm:$0xff] %v9869_v25  ;;  %v2355_v44 = vadd.f32 %v16992_v18, %v9559_v52  ;;  %v16993_v8 = vld [vmem:[#allocation188_spill] sm:$0xff]  ;;  %v16994_v47 = vld [vmem:[#allocation137_spill] sm:$0xff]  ;;  %v2221_v48 = vmax.f32 %v9780_v0, %v2189_v15 }
 0x232   : > { %16986 = vst [vmem:[#allocation216_spill] sm:$0xff] %v9855_v51  ;;  %2287 = vperm.xlu1 %6969, %v16993_v8   ;;  %v16995_v54 = vld [vmem:[#allocation140_spill] sm:$0xff]  ;;  %v16996_v18 = vld [vmem:[#allocation189_spill] sm:$0xff]  ;;  %v9895_v8 = vmax.f32 %v2193_v57, %v2353_v6  ;;  %v17000_v43 = vld [vmem:[#allocation194_spill] sm:$0xff] }
 0x233   : > { %v2354_v60 = vadd.f32 %v16996_v18, %v9572_v3  ;;  %v2384_v55 = vmax.f32 %v2192_v28, %v2352_v41  ;;  %v16997_v59 = vld [vmem:[#allocation165_spill] sm:$0xff]  ;;  %v16999_v15 = vld [vmem:[#allocation144_spill] sm:$0xff]  ;;  %v2380_v4 = vadd.f32 %v17000_v43, %v9785_v19  ;;  %v9905_v53 = vpop.permute.xlu0 %2475  ;;  %v2387_v41 = vmax.f32 %v2195_v35, %v2355_v44  ;;  %v17003_v28 = vld [vmem:[#allocation55_spill] sm:$0xff] }
 0x234   : > { %v2547_v25 = vadd.f32 %v16997_v59, %v9635_v46  ;;  %v16998_v29 = vld [vmem:[#allocation193_spill] sm:$0xff]  ;;  %v2350_v17 = vadd.f32 %v16999_v15, %v9790_v39  ;;  %v17001_v10 = vld [vmem:[#allocation200_spill] sm:$0xff]  ;;  %17002 = vst [vmem:[#allocation219_spill] sm:$0xff] %v9905_v53  ;;  %v2351_v59 = vadd.f32 %v17003_v28, %v9780_v0  ;;  %v17004_v6 = vld [vmem:[#allocation202_spill] sm:$0xff]  ;;  %v9914_v15 = vpop.permute.xlu1 %2627  ;;  %v2548_v35 = vadd.f32 %v9625_v22, %v9668_v23 }
 0x235   : > { %v2356_v31 = vadd.f32 %v16998_v29, %v9589_v16  ;;  %v2379_v51 = vadd.f32 %v17001_v10, %v9766_v34  ;;  %v2358_v57 = vadd.f32 %v17004_v6, %v9609_v11  ;;  %v17005_v18 = vld [vmem:[#allocation154_spill] sm:$0xff]  ;;  %17006 = vst [vmem:[#allocation220_spill] sm:$0xff] %v9914_v15  ;;  %v17007_v43 = vld [vmem:[#allocation156_spill] sm:$0xff]  ;;  %v17008_v10 = vld [vmem:[#allocation151_spill] sm:$0xff]  ;;  %v2739_v44 = vadd.f32 %v9914_v15, %v9564_v63 }
 0x236   : > { %v2546_v29 = vadd.f32 %v17005_v18, %v9649_v2  ;;  %6970 = vset.pattern.permute.xlu1 %v16607_v37  ;;  %v2381_v5 = vadd.f32 %v17007_v43, %v9768_v62  ;;  %v2361_v34 = vadd.f32 %v17008_v10, %v9635_v46  ;;  %v17009_v18 = vmax.f32 %v9589_v16, %v9735_v1  ;;  %v17010_v6 = vld [vmem:[#allocation205_spill] sm:$0xff] }
 0x237   : > { %2659 = vperm.xlu1 %6970, %v16951_v38   ;;  %v2544_v37 = vadd.f32 %v17010_v6, %v9609_v11  ;;  %v2579_v53 = vmax.f32 %v2387_v41, %v2547_v25  ;;  %v2738_v43 = vadd.f32 %v9812_v33, %v9550_v32  ;;  %v17011_v10 = vmax.f32 %v9550_v32, %v9739_v50  ;;  %v9944_v1 = vpop.permute.xlu0 %2487  ;;  %v17039_v33 = vld [vmem:[#allocation183_spill] sm:$0xff] }
 0x238   : > { %v2386_v28 = vmax.f32 %v17009_v18, %v2354_v60  ;;  %v9937_v23 = vmax.f32 %v2220_v21, %v2380_v4  ;;  %v9939_v15 = vmax.f32 %v2219_v30, %v2379_v51  ;;  %v17012_v38 = vmax.f32 %v9609_v11, %v9743_v56  ;;  %17013 = vst [vmem:[#allocation221_spill] sm:$0xff] %v9944_v1  ;;  %v9958_v51 = vpop.permute.xlu1 %2631  ;;  %v17051_v6 = vld [vmem:[#allocation7_spill] sm:$0xff]  ;;  %v17139_v11 = vld [vmem:[#allocation33_spill] sm:$0xff] }
 0x239   : > { %v9935_v22 = vmax.f32 %v17011_v10, %v2350_v17  ;;  %v17014_v25 = vmax.f32 %v9564_v63, %v9721_v40  ;;  %v17015_v50 = vmax.f32 %v9649_v2, %v9756_v61  ;;  %v9956_v4 = vmax.f32 %v2579_v53, %v2739_v44  ;;  %17017 = vst [vmem:[#allocation223_spill] sm:$0xff] %v9958_v51  ;;  %v17019_v61 = vld [vmem:[#allocation203_spill] sm:$0xff] }
 0x23a   : > { %v2388_v60 = vmax.f32 %v17012_v38, %v2356_v31  ;;  %v2578_v21 = vmax.f32 %v2386_v28, %v2546_v29  ;;  %v9960_v30 = vmax.f32 %v2221_v48, %v2381_v5  ;;  %v9962_v56 = vmax.f32 %v2201_v9, %v2361_v34  ;;  %v9978_v5 = vld [vmem:[%s15685_s7 + $0x88] sm:$0xff] }
 0x23b   : > { %v9949_v18 = vmax.f32 %v17014_v25, %v2351_v59  ;;  %v9954_v10 = vmax.f32 %v17015_v50, %v2358_v57  ;;  %v2740_v40 = vadd.f32 %v9958_v51, %v9572_v3  ;;  %6971 = vset.pattern.permute.xlu1 %v16823_v42  ;;  %v2576_v59 = vmax.f32 %v2384_v55, %v2544_v37  ;;  %v17021_v48 = vld [vmem:[#allocation207_spill] sm:$0xff]  ;;  %v17024_v55 = vld [vmem:[#allocation185_spill] sm:$0xff]  ;;  %v9995_v28 = vpop.permute.xlu0 %2519  ;;  %v17026_v57 = vld [vmem:[#allocation166_spill] sm:$0xff] }
 0x23c   : > { %17018 = vst [vmem:[#allocation224_spill] sm:$0xff] %v9962_v56  ;;  %v2580_v31 = vmax.f32 %v2388_v60, %v2548_v35  ;;  %v9969_v17 = vadd.f32 %v17019_v61, %v9663_v58  ;;  %v2736_v53 = vadd.f32 %v9761_v45, %v9790_v39  ;;  %v9973_v29 = vmax.f32 %v2578_v21, %v2738_v43  ;;  %v17023_v37 = vld [vmem:[#allocation211_spill] sm:$0xff]  ;;  %v17044_v45 = vld [vmem:[#allocation188_spill] sm:$0xff] }
 0x23d   : > { %17016 = vst [vmem:[#allocation222_spill] sm:$0xff] %v9954_v10  ;;  %2099 = vperm.xlu1 %6971, %v9978_v5   ;;  %v9983_v34 = vadd.f32 %v17021_v48, %v16975_v24  ;;  %v9987_v9 = vadd.f32 %v17023_v37, %v9790_v39  ;;  %v9991_v41 = vadd.f32 %v17024_v55, %v9599_v14  ;;  %17025 = vst [vmem:[#allocation227_spill] sm:$0xff] %v9995_v28 }
 0x23e   : > { %17020 = vst [vmem:[#allocation225_spill] sm:$0xff] %v9969_v17  ;;  %v9993_v43 = vmax.f32 %v2580_v31, %v2740_v40  ;;  %v9999_v35 = vadd.f32 %v17026_v57, %v16978_v12  ;;  %v10003_v44 = vadd.f32 %v9604_v49, %v9589_v16  ;;  %v10007_v38 = vadd.f32 %v9644_v27, %v9584_v13  ;;  %v10020_v40 = vpop.permute.xlu1 %2335  ;;  %v17029_v57 = vld [vmem:[#allocation170_spill] sm:$0xff] }
 0x23f   : > { %17022 = vst [vmem:[#allocation226_spill] sm:$0xff] %v9983_v34  ;;  %v10012_v25 = vadd.f32 %v9695_v20, %v9559_v52  ;;  %v10016_v50 = vadd.f32 %v9672_v36, %v9572_v3  ;;  %v2820_v21 = vrot.slane %v9956_v4, 1  ;;  %17028 = vst [vmem:[#allocation229_spill] sm:$0xff] %v10020_v40  ;;  %v10024_v37 = vadd.f32 %v17029_v57, %v16995_v54  ;;  %v10036_v3 = vld [vmem:[%s15685_s7 + $0x90] sm:$0xff] }
 0x240   : > { %17027 = vst [vmem:[#allocation228_spill] sm:$0xff] %v9999_v35  ;;  %v10026_v35 = vmax.f32 %v2576_v59, %v2736_v53  ;;  %v10030_v60 = vadd.f32 %v9723_v7, %v9684_v26  ;;  %17032 = vst [vmem:[#allocation232_spill] sm:$0xff] %v10036_v3  ;;  %v2218_v31 = vmax.f32 %v9785_v19, %v9987_v9  ;;  %v10043_v53 = vpop.permute.xlu0 %2491  ;;  %v17034_v36 = vrot.slane %v9993_v43, 1  ;;  %v17050_v26 = vld [vmem:[#allocation184_spill] sm:$0xff] }
 0x241   : > { %17030 = vst [vmem:[#allocation230_spill] sm:$0xff] %v10024_v37  ;;  %2103 = vperm.xlu1 %6971, %v10036_v3   ;;  %17033 = vst [vmem:[#allocation233_spill] sm:$0xff] %v10043_v53  ;;  %v2575_v34 = vmax.f32 %v9949_v18, %v10007_v38  ;;  %v17036_v7 = vrot.slane %v9956_v4, 7  ;;  %v17037_v59 = vrot.slane %v9973_v29, 7  ;;  %v3076_v18 = vrot.slane %v9956_v4, 2  ;;  %v17038_v38 = vld [vmem:[#allocation6_spill] sm:$0xff] }
 0x242   : > { %17031 = vst [vmem:[#allocation231_spill] sm:$0xff] %v10030_v60  ;;  %v2872_v37 = vsel %vm970_vm2, %v2820_v21, %v17034_v36  ;;  %v10072_v12 = vadd.f32 %v17039_v33, %v9780_v0  ;;  %v17043_v51 = vrot.slane %v9973_v29, 1  ;;  %v3204_v17 = vrot.slane %v9956_v4, 6  ;;  %v17055_v60 = vld [vmem:[#allocation88_spill] sm:$0xff] }
 0x243   : > { %v3001_v57 = vsel %vm1291_vm3, %v17037_v59, %v17036_v7  ;;  %v2884_v61 = vadd.f32 %v2872_v37, %v17038_v38  ;;  %v17041_v7 = vmov 6   ;;  %v10075_v59 = vpop.permute.xlu1 %2531  ;;  %v17046_v38 = vld [vmem:[#allocation39_spill] sm:$0xff]  ;;  %v17047_v56 = vrot.slane %v9993_v43, 2 }
 0x244   : > { %17040 = vst [vmem:[#allocation75_spill] sm:$0xff] %v10072_v12  ;;  %17042 = vst [vmem:[#allocation234_spill] sm:$0xff] %v10075_v59  ;;  %v2873_v36 = vsel %vm970_vm2, %v17043_v51, %v2820_v21  ;;  %v10082_v37 = vpop.permute.xlu0 %2511  ;;  %v3012_v49 = vadd.f32 %v3001_v57, %v17046_v38  ;;  %v17048_v51 = vld [vmem:[#allocation217_spill] sm:$0xff]  ;;  %v17049_v21 = vld [vmem:[#allocation82_spill] sm:$0xff]  ;;  %v16022_v38 = vrot.slane %v9973_v29, 6 }
 0x245   : > { %6972 = vset.pattern.permute.xlu1 %v17041_v7  ;;  %17045 = vst [vmem:[#allocation188_spill] sm:$0xff] %v10082_v37  ;;  %v2916_v9 = vmax.f32 %v9956_v4, %v2884_v61  ;;  %v3128_v24 = vsel %vm1548_vm4, %v3076_v18, %v17047_v56  ;;  %v10097_v58 = vadd.f32 %v17050_v26, %v17049_v21  ;;  %v17053_v56 = vld [vmem:[#allocation218_spill] sm:$0xff] }
 0x246   : > { %2479 = vperm.xlu1 %6972, %v17044_v45   ;;  %v2357_v45 = vadd.f32 %v17048_v51, %v9584_v13  ;;  %v10101_v57 = vadd.f32 %v2873_v36, %v17051_v6  ;;  %v10106_v55 = vadd.f32 %v17053_v56, %v16994_v47  ;;  %v3140_v10 = vadd.f32 %v3128_v24, %v17055_v60  ;;  %v17056_v26 = vld [vmem:[#allocation182_spill] sm:$0xff]  ;;  %v17062_v56 = vld [vmem:[#allocation219_spill] sm:$0xff] }
 0x247   : > { %v3044_v20 = vmax.f32 %v2916_v9, %v3012_v49  ;;  %v2378_v21 = vadd.f32 %v10020_v40, %v17056_v26  ;;  %v10114_v36 = vpop.permute.xlu1 %2611  ;;  %v17059_v9 = vrot.slane %v9973_v29, 2  ;;  %v3257_v24 = vsel %vm1805_vm5, %v16022_v38, %v3204_v17  ;;  %v17060_v13 = vld [vmem:[#allocation50_spill] sm:$0xff]  ;;  %v17064_v38 = vld [vmem:[#allocation145_spill] sm:$0xff] }
 0x248   : > { %17052 = vst [vmem:[#allocation235_spill] sm:$0xff] %v10101_v57  ;;  %17054 = vst [vmem:[#allocation236_spill] sm:$0xff] %v10106_v55  ;;  %v10116_v61 = vpop.permute.xlu0 %2499  ;;  %v17061_v60 = vmax.f32 %v9599_v14, %v17060_v13  ;;  %v10134_v6 = vadd.f32 %v17062_v56, %v16995_v54  ;;  %v2735_v49 = vadd.f32 %v10114_v36, %v9768_v62  ;;  %v17075_v54 = vrot.slane %v9993_v43, 6  ;;  %v17131_v57 = vld [vmem:[#allocation3_spill] sm:$0xff] }
 0x249   : > { %17057 = vst [vmem:[#allocation237_spill] sm:$0xff] %v10114_v36  ;;  %17058 = vst [vmem:[#allocation238_spill] sm:$0xff] %v10116_v61  ;;  %v3129_v12 = vsel %vm1548_vm4, %v17059_v9, %v3076_v18  ;;  %v10141_v18 = vld [vmem:[%s15685_s7 + $0xd0] sm:$0xff]  ;;  %v3172_v9 = vmax.f32 %v3044_v20, %v3140_v10  ;;  %v10146_v13 = vadd.f32 %v9944_v1, %v17064_v38  ;;  %v17068_v20 = vrot.slane %v9956_v4, 7  ;;  %v17069_v1 = vld [vmem:[#allocation85_spill] sm:$0xff] }
 0x24a   : > { %6973 = vset.pattern.permute.xlu1 %v16823_v42  ;;  %v10130_v40 = vmax.f32 %v17061_v60, %v2357_v45  ;;  %17063 = vst [vmem:[#allocation50_spill] sm:$0xff] %v10134_v6  ;;  %v10150_v60 = vadd.f32 %v9995_v28, %v9790_v39  ;;  %v10156_v62 = vmax.f32 %v2575_v34, %v2735_v49  ;;  %v17067_v6 = vrot.slane %v9993_v43, 7  ;;  %v17071_v39 = vld [vmem:[#allocation117_spill] sm:$0xff] }
 0x24b   : > { %2135 = vperm.xlu1 %6973, %v10141_v18   ;;  %17065 = vst [vmem:[#allocation239_spill] sm:$0xff] %v10146_v13  ;;  %v10165_v13 = vadd.f32 %v3129_v12, %v17069_v1  ;;  %v3268_v28 = vadd.f32 %v3257_v24, %v17071_v39  ;;  %v10170_v45 = vadd.f32 %v10075_v59, %v9564_v63  ;;  %v10176_v49 = vpop.permute.xlu1 %2727  ;;  %v17107_v55 = vrot.slane %v10026_v35, 1 }
 0x24c   : > { %17066 = vst [vmem:[#allocation240_spill] sm:$0xff] %v10150_v60  ;;  %v3000_v10 = vsel %vm1291_vm3, %v17068_v20, %v17067_v6  ;;  %v17072_v60 = vld [vmem:[#allocation159_spill] sm:$0xff]  ;;  %17074 = vst [vmem:[#allocation243_spill] sm:$0xff] %v10176_v49  ;;  %v10178_v56 = vmax.f32 %v2218_v31, %v2378_v21  ;;  %v3256_v12 = vsel %vm1805_vm5, %v3204_v17, %v17075_v54  ;;  %v2944_v24 = vrot.slane %v10156_v62, 7  ;;  %v10189_v39 = vpop.permute.xlu0 %2619  ;;  %v17079_v21 = vld [vmem:[#allocation40_spill] sm:$0xff] }
 0x24d   : > { %17070 = vst [vmem:[#allocation241_spill] sm:$0xff] %v10165_v13  ;;  %v10174_v34 = vadd.f32 %v10043_v53, %v17072_v60  ;;  %v2764_v63 = vadd.f32 %v10176_v49, %v17056_v26  ;;  %v17076_v20 = vmov 5   ;;  %17077 = vst [vmem:[#allocation244_spill] sm:$0xff] %v10189_v39  ;;  %v10191_v1 = vmax.f32 %v3172_v9, %v3268_v28  ;;  %v17086_v17 = vld [vmem:[#allocation124_spill] sm:$0xff]  ;;  %v17089_v26 = vld [vmem:[#allocation197_spill] sm:$0xff] }
 0x24e   : > { %v2737_v54 = vadd.f32 %v10189_v39, %v9780_v0  ;;  %v10199_v6 = vadd.f32 %v3000_v10, %v17079_v21  ;;  %v17081_v53 = vrot.slane %v10026_v35, 1  ;;  %v17082_v49 = vrot.slane %v10156_v62, 1  ;;  %v17124_v60 = vld [vmem:[#allocation34_spill] sm:$0xff] }
 0x24f   : > { %17073 = vst [vmem:[#allocation242_spill] sm:$0xff] %v10174_v34  ;;  %6974 = vset.pattern.permute.xlu1 %v17076_v20  ;;  %17078 = vst [vmem:[#allocation245_spill] sm:$0xff] %v10191_v1  ;;  %v17083_v9 = vrot.slane %v10026_v35, 7  ;;  %v17084_v0 = vmax.f32 %v9937_v23, %v10016_v50  ;;  %v10217_v10 = vadd.f32 %v3256_v12, %v17086_v17  ;;  %v17092_v50 = vld [vmem:[#allocation5_spill] sm:$0xff]  ;;  %v10237_v12 = vpop.permute.xlu1 %2443  ;;  %v17101_v23 = vrot.slane %v10026_v35, 2  ;;  %v17105_v17 = vld [vmem:[#allocation178_spill] sm:$0xff] }
 0x250   : > { %2295 = vperm.xlu1 %6974, %v10036_v3   ;;  %17080 = vst [vmem:[#allocation246_spill] sm:$0xff] %v10199_v6  ;;  %v2876_v28 = vsel %vm970_vm2, %v17082_v49, %v17081_v53  ;;  %v10221_v34 = vadd.f32 %v10082_v37, %v9785_v19  ;;  %v10225_v53 = vadd.f32 %v10116_v61, %v17089_v26  ;;  %17093 = vst [vmem:[#allocation251_spill] sm:$0xff] %v10237_v12  ;;  %v17095_v37 = vld [vmem:[#allocation157_spill] sm:$0xff] }
 0x251   : > { %v3004_v31 = vsel %vm1291_vm3, %v2944_v24, %v17083_v9  ;;  %v10214_v59 = vmax.f32 %v17084_v0, %v2764_v63  ;;  %17087 = vst [vmem:[#allocation248_spill] sm:$0xff] %v10217_v10  ;;  %v17091_v49 = vmax.f32 %v9895_v8, %v9991_v41  ;;  %v10235_v63 = vadd.f32 %v2876_v28, %v17092_v50  ;;  %v10239_v0 = vpop.permute.xlu0 %2607  ;;  %v17099_v41 = vld [vmem:[#allocation36_spill] sm:$0xff] }
 0x252   : > { %17088 = vst [vmem:[#allocation249_spill] sm:$0xff] %v10221_v34  ;;  %17090 = vst [vmem:[#allocation250_spill] sm:$0xff] %v10225_v53  ;;  %v10243_v34 = vadd.f32 %v10191_v1, %v17095_v37  ;;  %v10247_v61 = vadd.f32 %v10191_v1, %v17048_v51  ;;  %v10251_v8 = vadd.f32 %v10191_v1, %v9644_v27  ;;  %v17102_v50 = vrot.slane %v10156_v62, 2 }
 0x253   : > { %17085 = vst [vmem:[#allocation247_spill] sm:$0xff] %v10214_v59  ;;  %v10230_v9 = vmax.f32 %v17091_v49, %v2737_v54  ;;  %17094 = vst [vmem:[#allocation252_spill] sm:$0xff] %v10239_v0  ;;  %v3009_v54 = vadd.f32 %v3004_v31, %v17099_v41  ;;  %v17100_v49 = vmov 7   ;;  %v17103_v51 = vrot.slane %v10026_v35, 6 }
 0x254   : > { %17096 = vst [vmem:[#allocation253_spill] sm:$0xff] %v10243_v34  ;;  %17097 = vst [vmem:[#allocation254_spill] sm:$0xff] %v10247_v61  ;;  %6975 = vset.pattern.permute.xlu1 %v17100_v49  ;;  %v3132_v37 = vsel %vm1548_vm4, %v17102_v50, %v17101_v23  ;;  %v17104_v53 = vrot.slane %v10156_v62, 6  ;;  %v10274_v21 = vadd.f32 %v10237_v12, %v17105_v17  ;;  %v17106_v61 = vld [vmem:[#allocation160_spill] sm:$0xff]  ;;  %v17115_v12 = vrot.slane %v10026_v35, 2 }
 0x255   : > { %17098 = vst [vmem:[#allocation255_spill] sm:$0xff] %v10251_v8  ;;  %v2818_v28 = vrot.slane %v10230_v9, 1  ;;  %2667 = vperm.xlu1 %6975, %v17106_v61   ;;  %v2734_v23 = vadd.f32 %v10239_v0, %v9785_v19  ;;  %v3074_v41 = vrot.slane %v10230_v9, 2  ;;  %v2912_v31 = vmax.f32 %v10156_v62, %v10235_v63  ;;  %v17108_v61 = vld [vmem:[#allocation2_spill] sm:$0xff]  ;;  %v10295_v39 = vpop.permute.xlu0 %2731  ;;  %v10297_v8 = vpop.permute.xlu1 %2331  ;;  %v17113_v0 = vld [vmem:[#allocation81_spill] sm:$0xff] }
 0x256   : > { %v10268_v27 = vsel %vm1805_vm5, %v17104_v53, %v17103_v51  ;;  %v17109_v19 = vmax.f32 %v9935_v22, %v10003_v44  ;;  %17110 = vst [vmem:[#allocation160_spill] sm:$0xff] %v10295_v39  ;;  %17111 = vst [vmem:[#allocation256_spill] sm:$0xff] %v10297_v8  ;;  %v10302_v36 = vadd.f32 %v3132_v37, %v17113_v0  ;;  %v17120_v1 = vrot.slane %v10026_v35, 7 }
 0x257   : > { %v2875_v51 = vsel %vm970_vm2, %v17107_v55, %v2818_v28  ;;  %v17112_v55 = vld [vmem:[#allocation204_spill] sm:$0xff]  ;;  %v2799_v63 = vpack.c.bf16 %v10230_v9, %v10026_v35  ;;  %v3131_v0 = vsel %vm1548_vm4, %v17115_v12, %v3074_v41  ;;  %v17121_v38 = vrot.slane %v10156_v62, 1 }
 0x258   : > { %v2881_v17 = vadd.f32 %v2875_v51, %v17108_v61  ;;  %v10293_v50 = vmax.f32 %v17109_v19, %v2734_v23  ;;  %v2765_v53 = vadd.f32 %v10295_v39, %v17112_v55  ;;  %v17114_v51 = vrot.slane %v9973_v29, 1 }
 0x259   : > { %6976 = vset.pattern.permute.xlu1 %v16823_v42  ;;  %v17119_v61 = vrot.slane %v10230_v9, 7  ;;  %v10361_v13 = vpop.permute.xlu1 %2527 }
 0x25a   : > { %v2874_v22 = vsel %vm970_vm2, %v2818_v28, %v17114_v51  ;;  %v2815_v19 = vrot.slane %v10293_v50, 1  ;;  %v2943_v44 = vrot.slane %v10293_v50, 7  ;;  %v3071_v23 = vrot.slane %v10293_v50, 2  ;;  %v10323_v28 = vld [vmem:[%s15685_s7 + $0xc8] sm:$0xff]  ;;  %17126 = vst [vmem:[#allocation260_spill] sm:$0xff] %v10361_v13 }
 0x25b   : > { %17116 = vst [vmem:[#allocation257_spill] sm:$0xff] %v10323_v28  ;;  %2131 = vperm.xlu1 %6976, %v10323_v28   ;;  %v17117_v51 = vmax.f32 %v9960_v30, %v10012_v25  ;;  %v2798_v37 = vpack.c.bf16 %v10156_v62, %v10293_v50  ;;  %v3003_v12 = vsel %vm1291_vm3, %v17120_v1, %v17119_v61  ;;  %v10346_v25 = vpop.permute.xlu0 %2723  ;;  %v3199_v28 = vrot.slane %v10293_v50, 6 }
 0x25c   : > { %v2913_v34 = vmax.f32 %v10026_v35, %v2881_v17  ;;  %v3005_v47 = vsel %vm1291_vm3, %v2943_v44, %v2944_v24  ;;  %v2877_v30 = vsel %vm970_vm2, %v2815_v19, %v17121_v38  ;;  %17122 = vst [vmem:[#allocation259_spill] sm:$0xff] %v10346_v25  ;;  %v2377_v1 = vadd.f32 %v10297_v8, %v17089_v26  ;;  %v17125_v24 = vld [vmem:[#allocation84_spill] sm:$0xff]  ;;  %v17128_v8 = vld [vmem:[#allocation37_spill] sm:$0xff] }
 0x25d   : > { %v10329_v39 = vmax.f32 %v17117_v51, %v2765_v53  ;;  %v17123_v53 = vld [vmem:[#allocation4_spill] sm:$0xff]  ;;  %v3008_v3 = vadd.f32 %v3005_v47, %v17124_v60  ;;  %6810 = vmatprep.mubr.msk.bf16.mxu0 %vm420_vm1, %v2798_v37  ;;  %v10358_v49 = vadd.f32 %v3131_v0, %v17125_v24  ;;  %v17129_v60 = vrot.slane %v10214_v59, 1 }
 0x25e   : > { %v10349_v51 = vadd.f32 %v2874_v22, %v17123_v53  ;;  %v17127_v22 = vrot.slane %v10156_v62, 2  ;;  %6811 = vmatmul.mubr.msk.bf16.vlgmr.msra.gmra.mxu0 %vm420_vm1, %v2799_v63  ;;  %v10369_v53 = vadd.f32 %v3003_v12, %v17128_v8  ;;  %v17130_v24 = vrot.slane %v10214_v59, 7  ;;  %v17132_v12 = vld [vmem:[#allocation32_spill] sm:$0xff] }
 0x25f   : > { %17118 = vst [vmem:[#allocation258_spill] sm:$0xff] %v10329_v39  ;;  %v2846_v17 = vrot.slane %v10329_v39, 1  ;;  %v2974_v61 = vrot.slane %v10329_v39, 7  ;;  %v3102_v38 = vrot.slane %v10329_v39, 2  ;;  %6977 = vset.pattern.permute.xlu1 %v17076_v20  ;;  %v10383_v63 = vmax.f32 %v2913_v34, %v3009_v54 }
 0x260   : > { %v3133_v47 = vsel %vm1548_vm4, %v3071_v23, %v17127_v22  ;;  %v2879_v22 = vadd.f32 %v2877_v30, %v17131_v57  ;;  %2327 = vperm.xlu1 %6977, %v10141_v18   ;;  %v17135_v30 = vld [vmem:[#allocation212_spill] sm:$0xff]  ;;  %v17138_v18 = vpack.c.bf16 %v9956_v4, %v9973_v29  ;;  %v17142_v4 = vld [vmem:[#allocation35_spill] sm:$0xff] }
 0x261   : > { %v2847_v0 = vsel %vm970_vm2, %v17129_v60, %v2846_v17  ;;  %v2878_v37 = vsel %vm970_vm2, %v2846_v17, %v2815_v19  ;;  %v2975_v10 = vsel %vm1291_vm3, %v17130_v24, %v2974_v61  ;;  %v10388_v60 = vpop.permute.xlu0 %2635  ;;  %v17134_v19 = vrot.slane %v9973_v29, 2 }
 0x262   : > { %v2910_v8 = vadd.f32 %v2878_v37, %v17132_v12  ;;  %17133 = vst [vmem:[#allocation261_spill] sm:$0xff] %v10388_v60  ;;  %v3040_v24 = vmax.f32 %v2912_v31, %v3008_v3  ;;  %v17136_v57 = vmax.f32 %v17112_v55, %v17135_v30  ;;  %v3134_v54 = vsel %vm1548_vm4, %v3102_v38, %v3071_v23  ;;  %v17137_v37 = vld [vmem:[#allocation80_spill] sm:$0xff]  ;;  %v17203_v55 = vld [vmem:[#allocation235_spill] sm:$0xff] }
 0x263   : > { %v10394_v17 = vsel %vm1548_vm4, %v3074_v41, %v17134_v19  ;;  %v3135_v12 = vadd.f32 %v3133_v47, %v17137_v37  ;;  %6814 = vmatprep.mubr.msk.bf16.mxu0 %vm420_vm1, %v17138_v18  ;;  %v10409_v6 = vadd.f32 %v2847_v0, %v17139_v11  ;;  %v17140_v41 = vld [vmem:[#allocation79_spill] sm:$0xff]  ;;  %v2911_v47 = vmax.f32 %v10293_v50, %v2879_v22  ;;  %v10422_v0 = vpop.permute.xlu1 %2259 }
 0x264   : > { %v10399_v34 = vmax.f32 %v17136_v57, %v2377_v1  ;;  %v2942_v3 = vmax.f32 %v10329_v39, %v2910_v8  ;;  %v3038_v31 = vadd.f32 %v2975_v10, %v17140_v41  ;;  %v3006_v57 = vsel %vm1291_vm3, %v2974_v61, %v2943_v44  ;;  %17143 = vst [vmem:[#allocation212_spill] sm:$0xff] %v10422_v0  ;;  %v17144_v8 = vld [vmem:[#allocation114_spill] sm:$0xff]  ;;  %v17151_v41 = vld [vmem:[#allocation113_spill] sm:$0xff] }
 0x265   : > { %v17141_v1 = vrot.slane %v10214_v59, 2  ;;  %v3007_v19 = vadd.f32 %v3006_v57, %v17142_v4  ;;  %v3230_v30 = vrot.slane %v10329_v39, 6  ;;  %v3166_v11 = vadd.f32 %v3134_v54, %v17144_v8  ;;  %6978 = vset.pattern.permute.xlu1 %v16823_v42  ;;  %v10432_v61 = vpop.permute.xlu0 %2647  ;;  %v17187_v8 = vld [vmem:[#allocation118_spill] sm:$0xff] }
 0x266   : > { %v3070_v18 = vmax.f32 %v2942_v3, %v3038_v31  ;;  %v10427_v10 = vadd.f32 %v10361_v13, %v9550_v32  ;;  %v2763_v44 = vadd.f32 %v10346_v25, %v17089_v26  ;;  %17145 = vst [vmem:[#allocation262_spill] sm:$0xff] %v10432_v61  ;;  %v17147_v3 = vrot.slane %v10156_v62, 6  ;;  %v10447_v31 = vld [vmem:[%s15685_s7 + $0xa0] sm:$0xff] }
 0x267   : > { %v3103_v23 = vsel %vm1548_vm4, %v17141_v1, %v3102_v38  ;;  %v3039_v50 = vmax.f32 %v2911_v47, %v3007_v19  ;;  %v17146_v38 = vrot.slane %v10214_v59, 6  ;;  %v3262_v32 = vsel %vm1805_vm5, %v3230_v30, %v3199_v28  ;;  %2111 = vperm.xlu1 %6978, %v10447_v31   ;;  %v17148_v47 = vld [vmem:[#allocation62_spill] sm:$0xff]  ;;  %v10462_v39 = vpop.permute.xlu1 %2263 }
 0x268   : > { %v3261_v54 = vsel %vm1805_vm5, %v3199_v28, %v17147_v3  ;;  %v3198_v57 = vmax.f32 %v3070_v18, %v3166_v11  ;;  %v3168_v1 = vmax.f32 %v3040_v24, %v10302_v36  ;;  %v17149_v62 = vmax.f32 %v9939_v15, %v10170_v45  ;;  %17152 = vst [vmem:[#allocation264_spill] sm:$0xff] %v10462_v39  ;;  %v17153_v11 = vld [vmem:[#allocation116_spill] sm:$0xff] }
 0x269   : > { %v3231_v22 = vsel %vm1805_vm5, %v17146_v38, %v3230_v30  ;;  %v3167_v3 = vmax.f32 %v3039_v50, %v3135_v12  ;;  %v3263_v28 = vadd.f32 %v3262_v32, %v17151_v41  ;;  %v2359_v30 = vadd.f32 %v10422_v0, %v9599_v14  ;;  %v10469_v45 = vpop.permute.xlu0 %2651  ;;  %v17157_v32 = vld [vmem:[#allocation111_spill] sm:$0xff] }
 0x26a   : > { %v3294_v19 = vadd.f32 %v3231_v22, %v17148_v47  ;;  %v10455_v38 = vmax.f32 %v17149_v62, %v2763_v44  ;;  %v2741_v25 = vadd.f32 %v10388_v60, %v9559_v52  ;;  %v3264_v36 = vadd.f32 %v3261_v54, %v17153_v11  ;;  %17155 = vst [vmem:[#allocation266_spill] sm:$0xff] %v10469_v45  ;;  %v17170_v11 = vld [vmem:[#allocation86_spill] sm:$0xff] }
 0x26b   : > { %v10471_v12 = vmax.f32 %v3167_v3, %v3263_v28  ;;  %v17156_v50 = vmax.f32 %v10130_v40, %v10274_v21  ;;  %v2914_v22 = vmax.f32 %v10230_v9, %v10349_v51  ;;  %6979 = vset.pattern.permute.xlu1 %v17041_v7  ;;  %v3169_v54 = vmax.f32 %v10383_v63, %v10358_v49  ;;  %v17169_v51 = vld [vmem:[#allocation187_spill] sm:$0xff] }
 0x26c   : > { %17150 = vst [vmem:[#allocation263_spill] sm:$0xff] %v10455_v38  ;;  %v10465_v24 = vmax.f32 %v3198_v57, %v3294_v19  ;;  %v16072_v18 = vrot.slane %v10455_v38, 1  ;;  %v16071_v15 = vrot.slane %v10455_v38, 7  ;;  %v16074_v44 = vrot.slane %v10455_v38, 2  ;;  %2483 = vperm.xlu1 %6979, %v9978_v5  }
 0x26d   : > { %v10477_v52 = vmax.f32 %v17156_v50, %v2741_v25  ;;  %v10485_v57 = vadd.f32 %v3103_v23, %v17157_v32  ;;  %v17158_v19 = vrot.slane %v10214_v59, 1  ;;  %v17159_v21 = vrot.slane %v10214_v59, 7  ;;  %v17160_v23 = vld [vmem:[#allocation208_spill] sm:$0xff]  ;;  %v17163_v50 = vld [vmem:[#allocation78_spill] sm:$0xff] }
 0x26e   : > { %17154 = vst [vmem:[#allocation265_spill] sm:$0xff] %v10465_v24  ;;  %v2941_v49 = vmax.f32 %v10214_v59, %v10409_v6  ;;  %v10504_v63 = vmax.f32 %v3168_v1, %v3264_v36  ;;  %v17161_v62 = vmax.f32 %v9635_v46, %v17160_v23  ;;  %v10513_v28 = vadd.f32 %v10465_v24, %v17039_v33  ;;  %v17167_v36 = vld [vmem:[#allocation30_spill] sm:$0xff] }
 0x26f   : > { %v2848_v40 = vsel %vm970_vm2, %v16072_v18, %v17158_v19  ;;  %v2976_v25 = vsel %vm1291_vm3, %v16071_v15, %v17159_v21  ;;  %v10518_v15 = vpop.permute.xlu1 %2639  ;;  %v17165_v18 = vld [vmem:[#allocation162_spill] sm:$0xff]  ;;  %v10536_v21 = vadd.f32 %v10471_v12, %v17169_v51  ;;  %v3138_v33 = vadd.f32 %v10394_v17, %v17170_v11 }
 0x270   : > { %v10509_v3 = vmax.f32 %v17161_v62, %v2359_v30  ;;  %17162 = vst [vmem:[#allocation208_spill] sm:$0xff] %v10513_v28  ;;  %v3037_v19 = vadd.f32 %v2976_v25, %v17163_v50  ;;  %17164 = vst [vmem:[#allocation267_spill] sm:$0xff] %v10518_v15  ;;  %v10522_v1 = vadd.f32 %v10471_v12, %v17165_v18  ;;  %v17168_v30 = vrot.slane %v10214_v59, 2  ;;  %v10543_v28 = vpop.permute.xlu0 %2663  ;;  %v10560_v51 = vld [vmem:[%s15685_s7 + $0xc0] sm:$0xff]  ;;  %v17178_v50 = vld [vmem:[#allocation9_spill] sm:$0xff] }
 0x271   : > { %v10525_v23 = vadd.f32 %v2848_v40, %v17167_v36  ;;  %v3042_v62 = vmax.f32 %v2914_v22, %v10369_v53  ;;  %v3202_v40 = vrot.slane %v10230_v9, 6  ;;  %6980 = vset.pattern.permute.xlu1 %v16823_v42  ;;  %17171 = vst [vmem:[#allocation269_spill] sm:$0xff] %v10543_v28  ;;  %v2360_v22 = vadd.f32 %v10462_v39, %v9649_v2  ;;  %v17247_v39 = vld [vmem:[#allocation31_spill] sm:$0xff] }
 0x272   : > { %17166 = vst [vmem:[#allocation268_spill] sm:$0xff] %v10522_v1  ;;  %v3104_v25 = vsel %vm1548_vm4, %v16074_v44, %v17168_v30  ;;  %v10547_v30 = vadd.f32 %v10471_v12, %v10361_v13  ;;  %v3069_v53 = vmax.f32 %v2941_v49, %v3037_v19  ;;  %v17173_v44 = vrot.slane %v10477_v52, 1  ;;  %17175 = vst [vmem:[#allocation271_spill] sm:$0xff] %v10560_v51  ;;  %v17176_v13 = vld [vmem:[#allocation112_spill] sm:$0xff] }
 0x273   : > { %v17174_v6 = vrot.slane %v9993_v43, 1  ;;  %2127 = vperm.xlu1 %6980, %v10560_v51   ;;  %v10564_v47 = vadd.f32 %v3104_v25, %v17176_v13  ;;  %v3170_v49 = vmax.f32 %v3042_v62, %v3138_v33  ;;  %v17177_v19 = vrot.slane %v10026_v35, 6  ;;  %v17182_v33 = vld [vmem:[#allocation198_spill] sm:$0xff]  ;;  %v17183_v62 = vld [vmem:[#allocation172_spill] sm:$0xff] }
 0x274   : > { %17172 = vst [vmem:[#allocation270_spill] sm:$0xff] %v10547_v30  ;;  %v10571_v30 = vpop.permute.xlu1 %2719  ;;  %v17181_v18 = vrot.slane %v10455_v38, 6  ;;  %v17184_v35 = vmax.f32 %v17182_v33, %v17183_v62  ;;  %v2742_v62 = vadd.f32 %v10518_v15, %v9589_v16  ;;  %v10613_v16 = vpop.permute.xlu0 %2671 }
 0x275   : > { %v2871_v17 = vsel %vm970_vm2, %v17174_v6, %v17173_v44  ;;  %v3259_v32 = vsel %vm1805_vm5, %v17177_v19, %v3202_v40  ;;  %17179 = vst [vmem:[#allocation272_spill] sm:$0xff] %v10571_v30  ;;  %v17180_v6 = vrot.slane %v10214_v59, 6  ;;  %v17185_v19 = vrot.slane %v10477_v52, 2  ;;  %v17188_v59 = vld [vmem:[#allocation115_spill] sm:$0xff]  ;;  %17194 = vst [vmem:[#allocation198_spill] sm:$0xff] %v10613_v16 }
 0x276   : > { %v2885_v36 = vadd.f32 %v2871_v17, %v17178_v50  ;;  %v2392_v13 = vmax.f32 %v17184_v35, %v2360_v22  ;;  %v17186_v17 = vrot.slane %v9993_v43, 2  ;;  %v3265_v44 = vadd.f32 %v10268_v27, %v17187_v8 }
 0x277   : > { %v3232_v25 = vsel %vm1805_vm5, %v17181_v18, %v17180_v6  ;;  %v3266_v4 = vadd.f32 %v3259_v32, %v17188_v59  ;;  %v2801_v18 = vpack.c.bf16 %v10477_v52, %v9993_v43  ;;  %v3197_v6 = vmax.f32 %v3069_v53, %v10485_v57  ;;  %6981 = vset.pattern.permute.xlu1 %v17076_v20  ;;  %v17192_v59 = vld [vmem:[#allocation87_spill] sm:$0xff]  ;;  %v17195_v53 = vld [vmem:[#allocation66_spill] sm:$0xff] }
 0x278   : > { %v3127_v41 = vsel %vm1548_vm4, %v17186_v17, %v17185_v19  ;;  %v2917_v1 = vmax.f32 %v9993_v43, %v2885_v36  ;;  %v2584_v22 = vmax.f32 %v2392_v13, %v10097_v58  ;;  %v17189_v35 = vrot.slane %v9973_v29, 7  ;;  %v17191_v36 = vld [vmem:[#allocation246_spill] sm:$0xff] }
 0x279   : > { %v17190_v19 = vrot.slane %v10230_v9, 7  ;;  %v10607_v32 = vmax.f32 %v3170_v49, %v3266_v4  ;;  %v3141_v57 = vadd.f32 %v3127_v41, %v17192_v59  ;;  %6815 = vmatmul.mubr.msk.bf16.gmra.mxu0 %vm420_vm1, %v2801_v18  ;;  %v17193_v58 = vld [vmem:[#allocation38_spill] sm:$0xff]  ;;  %v3293_v8 = vadd.f32 %v3232_v25, %v17195_v53  ;;  %v17198_v49 = vld [vmem:[#allocation257_spill] sm:$0xff]  ;;  %v17201_v18 = vld [vmem:[#allocation231_spill] sm:$0xff] }
 0x27a   : > { %v3045_v17 = vmax.f32 %v2917_v1, %v17191_v36  ;;  %v10617_v26 = vmax.f32 %v3169_v54, %v3265_v44  ;;  %2323 = vperm.xlu1 %6981, %v17198_v49   ;;  %v10622_v1 = vpop.permute.xlu1 %2451  ;;  %v17204_v25 = vmax.f32 %v9973_v29, %v17203_v55  ;;  %v17205_v54 = vrot.slane %v9973_v29, 6  ;;  %v17230_v59 = vld [vmem:[#allocation149_spill] sm:$0xff] }
 0x27b   : > { %v3002_v27 = vsel %vm1291_vm3, %v17190_v19, %v17189_v35  ;;  %v17197_v35 = vld [vmem:[#allocation175_spill] sm:$0xff]  ;;  %17199 = vst [vmem:[#allocation246_spill] sm:$0xff] %v10622_v1  ;;  %v17200_v19 = vld [vmem:[#allocation222_spill] sm:$0xff] }
 0x27c   : > { %v3011_v13 = vadd.f32 %v3002_v27, %v17193_v58  ;;  %17196 = vst [vmem:[#allocation172_spill] sm:$0xff] %v10617_v26  ;;  %v2744_v4 = vadd.f32 %v10432_v61, %v17197_v35  ;;  %v3173_v41 = vmax.f32 %v3045_v17, %v3141_v57  ;;  %v17202_v36 = vmax.f32 %v17200_v19, %v17201_v18  ;;  %v17207_v57 = vld [vmem:[#allocation120_spill] sm:$0xff]  ;;  %v17208_v19 = vld [vmem:[#allocation147_spill] sm:$0xff] }
 0x27d   : > { %v3258_v44 = vsel %vm1805_vm5, %v3202_v40, %v17205_v54  ;;  %v10636_v35 = vmax.f32 %v3197_v6, %v3293_v8  ;;  %v10642_v17 = vadd.f32 %v10469_v45, %v9599_v14  ;;  %v10648_v55 = vadd.f32 %v10607_v32, %v17208_v19  ;;  %v17210_v40 = vld [vmem:[#allocation191_spill] sm:$0xff] }
 0x27e   : > { %v10627_v27 = vmax.f32 %v17202_v36, %v2742_v62  ;;  %v3043_v53 = vmax.f32 %v17204_v25, %v3011_v13  ;;  %v10638_v9 = vmax.f32 %v2584_v22, %v2744_v4  ;;  %v2762_v62 = vadd.f32 %v10571_v30, %v17207_v57  ;;  %v17209_v13 = vld [vmem:[#allocation190_spill] sm:$0xff]  ;;  %v17213_v22 = vld [vmem:[#allocation121_spill] sm:$0xff]  ;;  %v10689_v54 = vpop.permute.xlu1 %2715  ;;  %v17226_v30 = vld [vmem:[#allocation8_spill] sm:$0xff] }
 0x27f   : > { %17206 = vst [vmem:[#allocation175_spill] sm:$0xff] %v10636_v35  ;;  %v10652_v29 = vadd.f32 %v10607_v32, %v17209_v13  ;;  %v10656_v8 = vadd.f32 %v10607_v32, %v17210_v40  ;;  %v10660_v6 = vadd.f32 %v10607_v32, %v10388_v60  ;;  %v3267_v4 = vadd.f32 %v3258_v44, %v17213_v22  ;;  %v10674_v40 = vld [vmem:[%s15685_s7 + $0x98] sm:$0xff]  ;;  %v17217_v13 = vld [vmem:[#allocation248_spill] sm:$0xff] }
 0x280   : > { %v17214_v18 = vrot.slane %v10477_v52, 7  ;;  %v17215_v36 = vrot.slane %v9993_v43, 7  ;;  %17216 = vst [vmem:[#allocation231_spill] sm:$0xff] %v10674_v40  ;;  %2299 = vperm.xlu1 %6981, %v10674_v40   ;;  %v10678_v14 = vmax.f32 %v3173_v41, %v17217_v13  ;;  %v17218_v60 = vld [vmem:[#allocation241_spill] sm:$0xff]  ;;  %v17219_v22 = vmax.f32 %v10178_v56, %v10427_v10 }
 0x281   : > { %17211 = vst [vmem:[#allocation257_spill] sm:$0xff] %v10656_v8  ;;  %17212 = vst [vmem:[#allocation222_spill] sm:$0xff] %v10660_v6  ;;  %v3171_v19 = vmax.f32 %v3043_v53, %v17218_v60  ;;  %v17223_v56 = vrot.slane %v10627_v27, 1  ;;  %v17224_v10 = vrot.slane %v10477_v52, 1  ;;  %v17227_v8 = vrot.slane %v10477_v52, 6 }
 0x282   : > { %v2999_v25 = vsel %vm1291_vm3, %v17215_v36, %v17214_v18  ;;  %v10685_v18 = vmax.f32 %v17219_v22, %v2762_v62  ;;  %v10687_v36 = vpop.permute.xlu0 %2711  ;;  %17222 = vst [vmem:[#allocation241_spill] sm:$0xff] %v10689_v54  ;;  %v17225_v62 = vld [vmem:[#allocation41_spill] sm:$0xff]  ;;  %v17228_v41 = vrot.slane %v9993_v43, 6  ;;  %v17229_v44 = vmov 7  }
 0x283   : > { %17221 = vst [vmem:[#allocation248_spill] sm:$0xff] %v10687_v36  ;;  %v10696_v60 = vmax.f32 %v3171_v19, %v3267_v4  ;;  %v2870_v53 = vsel %vm970_vm2, %v17224_v10, %v17223_v56  ;;  %v3014_v22 = vadd.f32 %v2999_v25, %v17225_v62  ;;  %v10717_v56 = vadd.f32 %v10678_v14, %v17230_v59  ;;  %v17231_v25 = vld [vmem:[#allocation202_spill] sm:$0xff] }
 0x284   : > { %17220 = vst [vmem:[#allocation235_spill] sm:$0xff] %v10685_v18  ;;  %v2886_v57 = vadd.f32 %v2870_v53, %v17226_v30  ;;  %v3255_v13 = vsel %vm1805_vm5, %v17228_v41, %v17227_v8  ;;  %6982 = vset.pattern.permute.xlu1 %v17229_v44  ;;  %v10721_v10 = vadd.f32 %v10678_v14, %v17231_v25  ;;  %v17233_v53 = vld [vmem:[#allocation134_spill] sm:$0xff]  ;;  %v17234_v30 = vrot.slane %v10627_v27, 2 }
 0x285   : > { %v3329_v43 = vadd.f32 %v10696_v60, %v17233_v53  ;;  %v17235_v8 = vrot.slane %v10477_v52, 2  ;;  %2675 = vperm.xlu1 %6982, %v9978_v5   ;;  %v17236_v19 = vrot.slane %v10455_v38, 1  ;;  %v17237_v59 = vrot.slane %v10685_v18, 1  ;;  %v17241_v5 = vld [vmem:[#allocation205_spill] sm:$0xff] }
 0x286   : > { %17232 = vst [vmem:[#allocation273_spill] sm:$0xff] %v10721_v10  ;;  %v2918_v4 = vmax.f32 %v10477_v52, %v2886_v57  ;;  %v17238_v53 = vrot.slane %v10455_v38, 7  ;;  %v17239_v62 = vrot.slane %v10685_v18, 7  ;;  %v10750_v57 = vadd.f32 %v10678_v14, %v17241_v5  ;;  %v10758_v11 = vpop.permute.xlu0 %2687 }
 0x287   : > { %v3126_v41 = vsel %vm1548_vm4, %v17235_v8, %v17234_v30  ;;  %v2849_v25 = vsel %vm970_vm2, %v17237_v59, %v17236_v19  ;;  %v10746_v8 = vpop.permute.xlu1 %2271  ;;  %v10754_v10 = vadd.f32 %v10678_v14, %v10432_v61  ;;  %v17243_v59 = vld [vmem:[#allocation77_spill] sm:$0xff]  ;;  %v3227_v6 = vrot.slane %v10685_v18, 6  ;;  %17244 = vst [vmem:[#allocation276_spill] sm:$0xff] %v10758_v11  ;;  %v17246_v30 = vld [vmem:[#allocation119_spill] sm:$0xff] }
 0x288   : > { %v2977_v50 = vsel %vm1291_vm3, %v17239_v62, %v17238_v53  ;;  %17240 = vst [vmem:[#allocation274_spill] sm:$0xff] %v10746_v8  ;;  %v3046_v58 = vmax.f32 %v2918_v4, %v3014_v22  ;;  %v17245_v62 = vld [vmem:[#allocation90_spill] sm:$0xff]  ;;  %v3270_v46 = vadd.f32 %v3255_v13, %v17246_v30  ;;  %v10763_v40 = vadd.f32 %v2849_v25, %v17247_v39  ;;  %v17250_v4 = vld [vmem:[#allocation232_spill] sm:$0xff] }
 0x289   : > { %17242 = vst [vmem:[#allocation275_spill] sm:$0xff] %v10754_v10  ;;  %v3036_v19 = vadd.f32 %v2977_v50, %v17243_v59  ;;  %v3142_v53 = vadd.f32 %v3126_v41, %v17245_v62  ;;  %v3361_v5 = vmax.f32 %v10617_v26, %v3329_v43  ;;  %v17248_v10 = vld [vmem:[#allocation193_spill] sm:$0xff]  ;;  %v17249_v59 = vmax.f32 %v10455_v38, %v10525_v23 }
 0x28a   : > { %v10770_v50 = vadd.f32 %v10696_v60, %v17248_v10  ;;  %2679 = vperm.xlu1 %6982, %v17250_v4   ;;  %v10778_v13 = vadd.f32 %v10696_v60, %v10518_v15  ;;  %v17252_v43 = vrot.slane %v10455_v38, 2  ;;  %v17253_v41 = vrot.slane %v10685_v18, 2  ;;  %v17254_v10 = vld [vmem:[#allocation179_spill] sm:$0xff] }
 0x28b   : > { %v3068_v22 = vmax.f32 %v17249_v59, %v3036_v19  ;;  %v3174_v25 = vmax.f32 %v3046_v58, %v3142_v53  ;;  %v2551_v39 = vadd.f32 %v10622_v1, %v17254_v10  ;;  %v10789_v23 = vmax.f32 %v3361_v5, %v10536_v21  ;;  %v17256_v53 = vld [vmem:[#allocation155_spill] sm:$0xff] }
 0x28c   : > { %17251 = vst [vmem:[#allocation232_spill] sm:$0xff] %v10778_v13  ;;  %v3105_v61 = vsel %vm1548_vm4, %v17253_v41, %v17252_v43  ;;  %v17255_v59 = vrot.slane %v10455_v38, 6  ;;  %v10797_v58 = vadd.f32 %v10543_v28, %v17182_v33  ;;  %v10801_v4 = vadd.f32 %v10613_v16, %v17256_v53  ;;  %v10803_v43 = vpop.permute.xlu1 %2643  ;;  %v17259_v15 = vld [vmem:[#allocation159_spill] sm:$0xff]  ;;  %v10817_v13 = vpop.permute.xlu0 %2691 }
 0x28d   : > { %17258 = vst [vmem:[#allocation155_spill] sm:$0xff] %v10803_v43  ;;  %v10805_v41 = vmax.f32 %v3174_v25, %v3270_v46  ;;  %v2939_v21 = vmax.f32 %v10685_v18, %v10763_v40  ;;  %v3196_v5 = vmax.f32 %v3068_v22, %v10564_v47  ;;  %v2583_v38 = vmax.f32 %v10509_v3, %v2551_v39  ;;  %v17260_v28 = vld [vmem:[#allocation75_spill] sm:$0xff]  ;;  %v17263_v40 = vld [vmem:[#allocation109_spill] sm:$0xff] }
 0x28e   : > { %v3233_v19 = vsel %vm1805_vm5, %v3227_v6, %v17255_v59  ;;  %17257 = vst [vmem:[#allocation179_spill] sm:$0xff] %v10801_v4  ;;  %v2761_v59 = vadd.f32 %v10689_v54, %v17259_v15  ;;  %v2601_v62 = vmax.f32 %v10399_v34, %v17260_v28  ;;  %v2362_v16 = vadd.f32 %v10746_v8, %v17182_v33  ;;  %v17262_v46 = vld [vmem:[#allocation171_spill] sm:$0xff]  ;;  %v17264_v54 = vld [vmem:[#allocation58_spill] sm:$0xff]  ;;  %v17265_v3 = vld [vmem:[#allocation145_spill] sm:$0xff] }
 0x28f   : > { %17261 = vst [vmem:[#allocation75_spill] sm:$0xff] %v10817_v13  ;;  %v2743_v25 = vadd.f32 %v10803_v43, %v17262_v46  ;;  %6984 = vset.pattern.permute.xlu1 %v17076_v20  ;;  %v3163_v22 = vadd.f32 %v3105_v61, %v17263_v40  ;;  %v3292_v39 = vadd.f32 %v3233_v19, %v17264_v54  ;;  %v17267_v28 = vld [vmem:[#allocation161_spill] sm:$0xff] }
 0x290   : > { %v10828_v34 = vadd.f32 %v10687_v36, %v17265_v3  ;;  %2319 = vperm.xlu1 %6984, %v10560_v51   ;;  %v10833_v33 = vadd.f32 %v10805_v41, %v17267_v28  ;;  %v10835_v46 = vmax.f32 %v2601_v62, %v2761_v59  ;;  %v17269_v15 = vld [vmem:[#allocation137_spill] sm:$0xff]  ;;  %v10845_v61 = vadd.f32 %v10805_v41, %v10422_v0  ;;  %v17274_v28 = vld [vmem:[#allocation54_spill] sm:$0xff]  ;;  %v10857_v59 = vpop.permute.xlu1 %2087 }
 0x291   : > { %v10839_v8 = vadd.f32 %v10758_v11, %v17269_v15  ;;  %v10841_v47 = vmax.f32 %v2583_v38, %v2743_v25  ;;  %v17272_v19 = vld [vmem:[#allocation185_spill] sm:$0xff]  ;;  %v10851_v40 = vmax.f32 %v3196_v5, %v3292_v39  ;;  %v10855_v62 = vadd.f32 %v10817_v13, %v17274_v28  ;;  %17276 = vst [vmem:[#allocation280_spill] sm:$0xff] %v10857_v59  ;;  %v17278_v36 = vld [vmem:[#allocation206_spill] sm:$0xff] }
 0x292   : > { %17266 = vst [vmem:[#allocation171_spill] sm:$0xff] %v10828_v34  ;;  %17268 = vst [vmem:[#allocation277_spill] sm:$0xff] %v10835_v46  ;;  %v10849_v54 = vadd.f32 %v10805_v41, %v17272_v19  ;;  %v10861_v38 = vadd.f32 %v10805_v41, %v10469_v45  ;;  %v17279_v19 = vmax.f32 %v17256_v53, %v17278_v36  ;;  %v17280_v13 = vld [vmem:[#allocation253_spill] sm:$0xff]  ;;  %v17282_v25 = vrot.slane %v10685_v18, 7  ;;  %v17290_v36 = vld [vmem:[#allocation152_spill] sm:$0xff] }
 0x293   : > { %17270 = vst [vmem:[#allocation137_spill] sm:$0xff] %v10839_v8  ;;  %17271 = vst [vmem:[#allocation278_spill] sm:$0xff] %v10845_v61  ;;  %v2952_v39 = vrot.slane %v10841_v47, 7  ;;  %v3362_v8 = vmax.f32 %v10607_v32, %v17280_v13  ;;  %v17283_v0 = vrot.slane %v10835_v46, 7  ;;  %v17286_v13 = vld [vmem:[#allocation76_spill] sm:$0xff]  ;;  %v17287_v18 = vrot.slane %v10835_v46, 6 }
 0x294   : > { %17273 = vst [vmem:[#allocation279_spill] sm:$0xff] %v10851_v40  ;;  %17275 = vst [vmem:[#allocation54_spill] sm:$0xff] %v10855_v62  ;;  %v10868_v11 = vmax.f32 %v17279_v19, %v2362_v16  ;;  %v17281_v62 = vld [vmem:[#allocation186_spill] sm:$0xff]  ;;  %6985 = vset.pattern.permute.xlu1 %v17041_v7  ;;  %v17284_v19 = vld [vmem:[#allocation245_spill] sm:$0xff]  ;;  %v17303_v46 = vrot.slane %v10638_v9, 6 }
 0x295   : > { %17277 = vst [vmem:[#allocation281_spill] sm:$0xff] %v10861_v38  ;;  %v3394_v45 = vadd.f32 %v10504_v63, %v17281_v62  ;;  %v2978_v16 = vsel %vm1291_vm3, %v17283_v0, %v17282_v25  ;;  %v10888_v32 = vadd.f32 %v17284_v19, %v10803_v43  ;;  %2515 = vperm.xlu1 %6985, %v17198_v49   ;;  %v17288_v0 = vrot.slane %v10638_v9, 1  ;;  %v17294_v38 = vld [vmem:[#allocation148_spill] sm:$0xff] }
 0x296   : > { %v3035_v62 = vadd.f32 %v2978_v16, %v17286_v13  ;;  %v3234_v34 = vsel %vm1805_vm5, %v17287_v18, %v3227_v6  ;;  %v17289_v25 = vrot.slane %v10841_v47, 1  ;;  %v3327_v43 = vadd.f32 %v10617_v26, %v17290_v36  ;;  %v17291_v16 = vld [vmem:[#allocation10_spill] sm:$0xff]  ;;  %v10911_v18 = vpop.permute.xlu1 %2459 }
 0x297   : > { %17285 = vst [vmem:[#allocation206_spill] sm:$0xff] %v10888_v32  ;;  %v17292_v32 = vrot.slane %v10627_v27, 7  ;;  %17293 = vst [vmem:[#allocation253_spill] sm:$0xff] %v10911_v18  ;;  %v3291_v36 = vadd.f32 %v3234_v34, %v17294_v38  ;;  %v2802_v34 = vpack.c.bf16 %v10841_v47, %v10627_v27 }
 0x298   : > { %v2868_v5 = vsel %vm970_vm2, %v17289_v25, %v17288_v0  ;;  %v3067_v61 = vmax.f32 %v2939_v21, %v3035_v62  ;;  %v3426_v0 = vmax.f32 %v3362_v8, %v3394_v45  ;;  %v10916_v25 = vadd.f32 %v10857_v59, %v17269_v15  ;;  %v17298_v62 = vld [vmem:[#allocation45_spill] sm:$0xff] }
 0x299   : > { %v2888_v13 = vadd.f32 %v2868_v5, %v17291_v16  ;;  %v2997_v6 = vsel %vm1291_vm3, %v17292_v32, %v2952_v39  ;;  %v17295_v5 = vrot.slane %v10638_v9, 7  ;;  %v17296_v32 = vrot.slane %v10638_v9, 2  ;;  %6986 = vset.pattern.permute.xlu1 %v16823_v42  ;;  %v17300_v42 = vld [vmem:[#allocation144_spill] sm:$0xff]  ;;  %6818 = vmatprep.mubr.msk.bf16.mxu0 %vm420_vm1, %v2802_v34 }
 0x29a   : > { %v17297_v21 = vrot.slane %v10841_v47, 2  ;;  %v3195_v8 = vmax.f32 %v3067_v61, %v3163_v22  ;;  %v3016_v30 = vadd.f32 %v2997_v6, %v17298_v62  ;;  %v3391_v22 = vadd.f32 %v10636_v35, %v17300_v42  ;;  %v17301_v61 = vld [vmem:[#allocation55_spill] sm:$0xff]  ;;  %v10958_v62 = vpop.permute.xlu1 %2275  ;;  %v10974_v34 = vld [vmem:[%s15685_s7 + $0xb0] sm:$0xff] }
 0x29b   : > { %v2920_v3 = vmax.f32 %v10841_v47, %v2888_v13  ;;  %v2996_v16 = vsel %vm1291_vm3, %v2952_v39, %v17295_v5  ;;  %v17299_v13 = vld [vmem:[#allocation51_spill] sm:$0xff]  ;;  %v3359_v5 = vmax.f32 %v10471_v12, %v3327_v43  ;;  %v3392_v6 = vadd.f32 %v10465_v24, %v17301_v61  ;;  %v17307_v61 = vld [vmem:[#allocation169_spill] sm:$0xff] }
 0x29c   : > { %v3124_v45 = vsel %vm1548_vm4, %v17297_v21, %v17296_v32  ;;  %v2553_v38 = vadd.f32 %v10911_v18, %v17299_v13  ;;  %v7311_v39 = vld [vmem:[%s15685_s7 + $0xa8] sm:$0xff]  ;;  %v3360_v32 = vmax.f32 %v10504_v63, %v10648_v55  ;;  %v10946_v21 = vmax.f32 %v3195_v8, %v3291_v36  ;;  %v17305_v55 = vld [vmem:[#allocation224_spill] sm:$0xff] }
 0x29d   : > { %2115 = vperm.xlu1 %6986, %v7311_v39   ;;  %v10948_v59 = vmax.f32 %v2920_v3, %v3016_v30  ;;  %v17304_v18 = vrot.slane %v10841_v47, 6  ;;  %17306 = vst [vmem:[#allocation224_spill] sm:$0xff] %v10958_v62  ;;  %v3423_v42 = vmax.f32 %v3359_v5, %v3391_v22  ;;  %v3455_v36 = vadd.f32 %v10696_v60, %v17307_v61  ;;  %v17308_v30 = vld [vmem:[#allocation237_spill] sm:$0xff]  ;;  %v17309_v8 = vld [vmem:[#allocation48_spill] sm:$0xff] }
 0x29e   : > { %17302 = vst [vmem:[#allocation245_spill] sm:$0xff] %v10946_v21  ;;  %v2585_v39 = vmax.f32 %v17305_v55, %v2553_v38  ;;  %v3424_v1 = vmax.f32 %v3360_v32, %v3392_v6  ;;  %v3520_v3 = vadd.f32 %v10851_v40, %v17308_v30  ;;  %v3017_v4 = vadd.f32 %v2996_v16, %v17309_v8  ;;  %v17311_v5 = vld [vmem:[#allocation92_spill] sm:$0xff]  ;;  %v17314_v6 = vld [vmem:[#allocation82_spill] sm:$0xff]  ;;  %v10990_v40 = vpop.permute.xlu1 %2279 }
 0x29f   : > { %v3252_v43 = vsel %vm1805_vm5, %v17304_v18, %v17303_v46  ;;  %v3490_v51 = vmax.f32 %v3426_v0, %v10849_v54  ;;  %v17310_v18 = vld [vmem:[#allocation252_spill] sm:$0xff]  ;;  %v10978_v32 = vadd.f32 %v3124_v45, %v17311_v5  ;;  %v3487_v54 = vmax.f32 %v3423_v42, %v3455_v36  ;;  %v17313_v0 = vld [vmem:[#allocation255_spill] sm:$0xff]  ;;  %v17327_v30 = vld [vmem:[#allocation178_spill] sm:$0xff] }
 0x2a0   : > { %v10967_v46 = vmax.f32 %v2585_v39, %v10642_v17  ;;  %v3519_v38 = vadd.f32 %v10946_v21, %v17310_v18  ;;  %v17312_v22 = vld [vmem:[#allocation128_spill] sm:$0xff]  ;;  %v3488_v17 = vmax.f32 %v3424_v1, %v17313_v0  ;;  %17316 = vst [vmem:[#allocation255_spill] sm:$0xff] %v10990_v40  ;;  %v17319_v1 = vld [vmem:[#allocation201_spill] sm:$0xff]  ;;  %v17320_v0 = vrot.slane %v10638_v9, 1 }
 0x2a1   : > { %2119 = vperm.xlu1 %6986, %v10974_v34   ;;  %v10981_v16 = vadd.f32 %v3252_v43, %v17312_v22  ;;  %v17315_v18 = vld [vmem:[#allocation244_spill] sm:$0xff]  ;;  %v3521_v36 = vadd.f32 %v10636_v35, %v17319_v1  ;;  %v17330_v1 = vrot.slane %v10638_v9, 7 }
 0x2a2   : > { %v16130_v39 = vrot.slane %v10967_v46, 1  ;;  %v3522_v61 = vadd.f32 %v10465_v24, %v17315_v18  ;;  %v10994_v43 = vmax.f32 %v3487_v54, %v3519_v38  ;;  %v10996_v42 = vmax.f32 %v3488_v17, %v3520_v3  ;;  %v17322_v3 = vld [vmem:[#allocation13_spill] sm:$0xff] }
 0x2a3   : > { %v17323_v54 = vrot.slane %v10967_v46, 2  ;;  %v17324_v17 = vrot.slane %v10638_v9, 2  ;;  %v17331_v18 = vrot.slane %v10967_v46, 6 }
 0x2a4   : > { %17317 = vst [vmem:[#allocation82_spill] sm:$0xff] %v10994_v43  ;;  %17318 = vst [vmem:[#allocation282_spill] sm:$0xff] %v10996_v42  ;;  %v2867_v55 = vsel %vm970_vm2, %v17320_v0, %v16130_v39  ;;  %v11008_v22 = vmax.f32 %v3490_v51, %v3522_v61  ;;  %v17325_v0 = vmax.f32 %v10789_v23, %v10750_v57  ;;  %v4154_v57 = vrot.slane %v10996_v42, 7 }
 0x2a5   : > { %6987 = vset.pattern.permute.xlu1 %v17041_v7  ;;  %v2889_v38 = vadd.f32 %v2867_v55, %v17322_v3  ;;  %v3123_v45 = vsel %vm1548_vm4, %v17324_v17, %v17323_v54  ;;  %v11025_v51 = vadd.f32 %v10958_v62, %v17327_v30  ;;  %v3583_v61 = vpack.c.bf16 %v10996_v42, %v10994_v43  ;;  %v17343_v62 = vld [vmem:[#allocation125_spill] sm:$0xff] }
 0x2a6   : > { %17321 = vst [vmem:[#allocation283_spill] sm:$0xff] %v11008_v22  ;;  %v11021_v39 = vmax.f32 %v17325_v0, %v3521_v36  ;;  %2495 = vperm.xlu1 %6987, %v10447_v31   ;;  %v11037_v0 = vpop.permute.xlu1 %2655  ;;  %v17329_v31 = vrot.slane %v10967_v46, 7  ;;  %v17332_v54 = vrot.slane %v10638_v9, 6  ;;  %v17333_v23 = vrot.slane %v10996_v42, 1 }
 0x2a7   : > { %v2921_v17 = vmax.f32 %v10638_v9, %v2889_v38  ;;  %17328 = vst [vmem:[#allocation285_spill] sm:$0xff] %v11037_v0  ;;  %6776 = vmatprep.mubr.msk.bf16.mxu1 %vm420_vm1, %v3583_v61  ;;  %v17334_v36 = vrot.slane %v10994_v43, 1  ;;  %v17337_v8 = vrot.slane %v10994_v43, 7  ;;  %v17338_v61 = vrot.slane %v10996_v42, 2 }
 0x2a8   : > { %17326 = vst [vmem:[#allocation284_spill] sm:$0xff] %v11021_v39  ;;  %v2995_v55 = vsel %vm1291_vm3, %v17330_v1, %v17329_v31  ;;  %v3251_v38 = vsel %vm1805_vm5, %v17332_v54, %v17331_v18  ;;  %v3584_v24 = vpack.c.bf16 %v11008_v22, %v11021_v39  ;;  %v17335_v31 = vld [vmem:[#allocation3_spill] sm:$0xff]  ;;  %v17339_v54 = vrot.slane %v10994_v43, 2 }
 0x2a9   : > { %v4087_v35 = vsel %vm970_vm2, %v17334_v36, %v17333_v23  ;;  %v3049_v1 = vmax.f32 %v2921_v17, %v3017_v4  ;;  %v4215_v18 = vsel %vm1291_vm3, %v17337_v8, %v4154_v57  ;;  %v17340_v23 = vld [vmem:[#allocation91_spill] sm:$0xff]  ;;  %v17341_v17 = vld [vmem:[#allocation236_spill] sm:$0xff]  ;;  %v17358_v42 = vrot.slane %v10841_v47, 2 }
 0x2aa   : > { %v11061_v5 = vadd.f32 %v4087_v35, %v17335_v31  ;;  %v4343_v3 = vsel %vm1548_vm4, %v17339_v54, %v17338_v61  ;;  %6988 = vset.pattern.permute.xlu1 %v17076_v20  ;;  %v3145_v36 = vadd.f32 %v3123_v45, %v17340_v23  ;;  %6777 = vmatmul.mubr.msk.bf16.vlgmr.msra.gmra.mxu1 %vm420_vm1, %v3584_v24  ;;  %v11083_v31 = vld [vmem:[%s15685_s7 + $0xb8] sm:$0xff]  ;;  %v17344_v23 = vld [vmem:[#allocation34_spill] sm:$0xff]  ;;  %v11099_v21 = vpop.permute.xlu1 %2091 }
 0x2ab   : > { %v2586_v8 = vmax.f32 %v10868_v11, %v17341_v17  ;;  %2315 = vperm.xlu1 %6988, %v11083_v31   ;;  %v17342_v61 = vld [vmem:[#allocation49_spill] sm:$0xff]  ;;  %v11088_v45 = vadd.f32 %v3251_v38, %v17343_v62  ;;  %v11093_v30 = vadd.f32 %v4215_v18, %v17344_v23  ;;  %v11096_v11 = vadd.f32 %v4343_v3, %v17137_v37 }
 0x2ac   : > { %17336 = vst [vmem:[#allocation286_spill] sm:$0xff] %v11061_v5  ;;  %v3018_v54 = vadd.f32 %v2995_v55, %v17342_v61  ;;  %v3177_v4 = vmax.f32 %v3049_v1, %v3145_v36  ;;  %17347 = vst [vmem:[#allocation288_spill] sm:$0xff] %v11099_v21  ;;  %v2803_v24 = vpack.c.bf16 %v10967_v46, %v10638_v9  ;;  %v17348_v18 = vrot.slane %v11008_v22, 1 }
 0x2ad   : > { %17345 = vst [vmem:[#allocation236_spill] sm:$0xff] %v11093_v30  ;;  %17346 = vst [vmem:[#allocation287_spill] sm:$0xff] %v11096_v11  ;;  %v2746_v1 = vadd.f32 %v11037_v0, %v9649_v2  ;;  %v17349_v3 = vrot.slane %v11021_v39, 1  ;;  %v17350_v17 = vrot.slane %v10841_v47, 1  ;;  %v17351_v55 = vrot.slane %v10627_v27, 1 }
 0x2ae   : > { %v17352_v9 = vrot.slane %v10627_v27, 7  ;;  %v17353_v2 = vrot.slane %v10477_v52, 7  ;;  %v2364_v35 = vadd.f32 %v10990_v40, %v17256_v53  ;;  %6819 = vmatmul.mubr.msk.bf16.gmra.mxu0 %vm420_vm1, %v2803_v24  ;;  %v11141_v30 = vmax.f32 %v3177_v4, %v10981_v16 }
 0x2af   : > { %v4085_v36 = vsel %vm970_vm2, %v17349_v3, %v17348_v18  ;;  %v2869_v38 = vsel %vm970_vm2, %v17351_v55, %v17350_v17  ;;  %6989 = vset.pattern.permute.xlu1 %v17229_v44  ;;  %v17354_v18 = vrot.slane %v11021_v39, 7  ;;  %v11137_v17 = vmax.f32 %v2586_v8, %v2746_v1  ;;  %v17356_v55 = vld [vmem:[#allocation11_spill] sm:$0xff] }
 0x2b0   : > { %v2998_v37 = vsel %vm1291_vm3, %v17353_v2, %v17352_v9  ;;  %v2887_v23 = vadd.f32 %v2869_v38, %v17356_v55  ;;  %v17357_v9 = vld [vmem:[#allocation44_spill] sm:$0xff]  ;;  %v17359_v11 = vrot.slane %v10627_v27, 2  ;;  %v3207_v53 = vrot.slane %v10627_v27, 6  ;;  %2707 = vperm.xlu1 %6989, %v17198_v49   ;;  %v17361_v38 = vld [vmem:[#allocation2_spill] sm:$0xff] }
 0x2b1   : > { %v11132_v3 = vsel %vm1291_vm3, %v4154_v57, %v17354_v18  ;;  %v3015_v2 = vadd.f32 %v2998_v37, %v17357_v9  ;;  %v16145_v8 = vrot.slane %v11137_v17, 1  ;;  %v11156_v37 = vpop.permute.xlu1 %2467  ;;  %v11159_v1 = vadd.f32 %v4085_v36, %v17361_v38 }
 0x2b2   : > { %17355 = vst [vmem:[#allocation289_spill] sm:$0xff] %v11132_v3  ;;  %v3125_v57 = vsel %vm1548_vm4, %v17359_v11, %v17358_v42  ;;  %v2919_v24 = vmax.f32 %v10627_v27, %v2887_v23  ;;  %17360 = vst [vmem:[#allocation290_spill] sm:$0xff] %v11156_v37  ;;  %v17363_v42 = vrot.slane %v10841_v47, 6  ;;  %v17364_v11 = vrot.slane %v10477_v52, 6  ;;  %v17365_v23 = vld [vmem:[#allocation213_spill] sm:$0xff] }
 0x2b3   : > { %17362 = vst [vmem:[#allocation291_spill] sm:$0xff] %v11159_v1  ;;  %v17366_v4 = vmax.f32 %v17254_v10, %v17365_v23  ;;  %v17367_v36 = vrot.slane %v10967_v46, 1  ;;  %v17369_v52 = vmax.f32 %v17314_v6, %v10916_v25  ;;  %v17371_v23 = vrot.slane %v11137_v17, 7  ;;  %v17373_v3 = vld [vmem:[#allocation189_spill] sm:$0xff] }
 0x2b4   : > { %v3253_v49 = vsel %vm1805_vm5, %v3207_v53, %v17363_v42  ;;  %v3254_v27 = vsel %vm1805_vm5, %v17364_v11, %v3207_v53  ;;  %v3047_v18 = vmax.f32 %v2919_v24, %v3015_v2  ;;  %v17368_v42 = vld [vmem:[#allocation89_spill] sm:$0xff]  ;;  %v17370_v11 = vld [vmem:[#allocation12_spill] sm:$0xff]  ;;  %v3395_v43 = vadd.f32 %v10617_v26, %v17373_v3  ;;  %6991 = vset.pattern.permute.xlu1 %v17076_v20  ;;  %v17376_v24 = vld [vmem:[#allocation126_spill] sm:$0xff] }
 0x2b5   : > { %v11174_v16 = vmax.f32 %v17366_v4, %v11025_v51  ;;  %v2866_v47 = vsel %vm970_vm2, %v17367_v36, %v16145_v8  ;;  %v3143_v38 = vadd.f32 %v3125_v57, %v17368_v42  ;;  %v2396_v53 = vmax.f32 %v17369_v52, %v2364_v35  ;;  %2311 = vperm.xlu1 %6991, %v10974_v34  }
 0x2b6   : > { %v2890_v5 = vadd.f32 %v2866_v47, %v17370_v11  ;;  %v17372_v51 = vrot.slane %v10967_v46, 7  ;;  %v17374_v2 = vrot.slane %v11137_v17, 2  ;;  %v17375_v57 = vrot.slane %v10967_v46, 2  ;;  %v17377_v47 = vld [vmem:[#allocation122_spill] sm:$0xff]  ;;  %v17386_v11 = vld [vmem:[#allocation141_spill] sm:$0xff] }
 0x2b7   : > { %v3175_v35 = vmax.f32 %v3047_v18, %v3143_v38  ;;  %v3271_v36 = vadd.f32 %v3254_v27, %v17376_v24  ;;  %v3272_v52 = vadd.f32 %v3253_v49, %v17377_v47  ;;  %v17379_v8 = vrot.slane %v11137_v17, 6  ;;  %v17381_v18 = vld [vmem:[#allocation153_spill] sm:$0xff]  ;;  %v17382_v49 = vld [vmem:[#allocation52_spill] sm:$0xff] }
 0x2b8   : > { %v2994_v4 = vsel %vm1291_vm3, %v17372_v51, %v17371_v23  ;;  %v3122_v25 = vsel %vm1548_vm4, %v17375_v57, %v17374_v2  ;;  %v11205_v23 = vpop.permute.xlu1 %2471  ;;  %v2922_v20 = vmax.f32 %v10967_v46, %v2890_v5  ;;  %v17380_v3 = vrot.slane %v10967_v46, 6 }
 0x2b9   : > { %17378 = vst [vmem:[#allocation213_spill] sm:$0xff] %v11205_v23  ;;  %v11218_v27 = vadd.f32 %v11141_v30, %v17381_v18  ;;  %v11221_v2 = vadd.f32 %v2994_v4, %v17382_v49  ;;  %v11223_v57 = vmax.f32 %v3175_v35, %v3271_v36  ;;  %v17383_v51 = vmax.f32 %v10948_v59, %v10978_v32  ;;  %v17387_v35 = vld [vmem:[#allocation130_spill] sm:$0xff] }
 0x2ba   : > { %v3250_v38 = vsel %vm1805_vm5, %v17380_v3, %v17379_v8  ;;  %v17384_v46 = vmax.f32 %v10696_v60, %v10717_v56  ;;  %v3050_v39 = vmax.f32 %v2922_v20, %v3018_v54  ;;  %v17385_v3 = vld [vmem:[#allocation94_spill] sm:$0xff]  ;;  %v2173_v18 = vadd.f32 %v11099_v21, %v17274_v28  ;;  %v17390_v56 = vld [vmem:[#allocation220_spill] sm:$0xff]  ;;  %6992 = vset.pattern.permute.xlu1 %v17229_v44  ;;  %v17392_v20 = vld [vmem:[#allocation165_spill] sm:$0xff] }
 0x2bb   : > { %v11228_v5 = vmax.f32 %v17383_v51, %v3272_v52  ;;  %v3146_v8 = vadd.f32 %v3122_v25, %v17385_v3  ;;  %v2556_v4 = vadd.f32 %v11205_v23, %v17386_v11  ;;  %v11239_v36 = vadd.f32 %v3250_v38, %v17387_v35  ;;  %v17389_v52 = vld [vmem:[#allocation210_spill] sm:$0xff]  ;;  %v17396_v35 = vld [vmem:[#allocation264_spill] sm:$0xff] }
 0x2bc   : > { %v3427_v1 = vmax.f32 %v17384_v46, %v3395_v43  ;;  %v17388_v59 = vmax.f32 %v17284_v19, %v10833_v33  ;;  %v3523_v60 = vadd.f32 %v10471_v12, %v17389_v52  ;;  %v3524_v43 = vadd.f32 %v10504_v63, %v17390_v56  ;;  %v17391_v25 = vld [vmem:[#allocation154_spill] sm:$0xff]  ;;  %v17393_v33 = vld [vmem:[#allocation231_spill] sm:$0xff] }
 0x2bd   : > { %v3178_v54 = vmax.f32 %v3050_v39, %v3146_v8  ;;  %v3459_v51 = vadd.f32 %v11223_v57, %v17391_v25  ;;  %v3460_v38 = vadd.f32 %v11228_v5, %v17392_v20  ;;  %v2555_v46 = vadd.f32 %v11156_v37, %v17274_v28  ;;  %2683 = vperm.xlu1 %6992, %v17393_v33   ;;  %v17395_v12 = vld [vmem:[#allocation150_spill] sm:$0xff]  ;;  %v17502_v37 = vld [vmem:[#allocation16_spill] sm:$0xff] }
 0x2be   : > { %v3428_v32 = vmax.f32 %v17388_v59, %v10652_v29  ;;  %v11257_v29 = vpop.permute.xlu1 %2287  ;;  %v3333_v19 = vadd.f32 %v11223_v57, %v17395_v12  ;;  %v2205_v59 = vmax.f32 %v17299_v13, %v2173_v18  ;;  %v2588_v56 = vmax.f32 %v2396_v53, %v2556_v4  ;;  %v17397_v53 = vld [vmem:[#allocation163_spill] sm:$0xff]  ;;  %v17401_v33 = vld [vmem:[#allocation214_spill] sm:$0xff] }
 0x2bf   : > { %17394 = vst [vmem:[#allocation231_spill] sm:$0xff] %v11257_v29  ;;  %v2366_v39 = vadd.f32 %v11257_v29, %v17314_v6  ;;  %v3491_v8 = vmax.f32 %v3427_v1, %v3459_v51  ;;  %v11267_v23 = vmax.f32 %v3178_v54, %v11088_v45  ;;  %v11273_v12 = vadd.f32 %v11223_v57, %v17396_v35  ;;  %v17400_v54 = vld [vmem:[#allocation225_spill] sm:$0xff]  ;;  %v17417_v13 = vld [vmem:[#allocation38_spill] sm:$0xff] }
 0x2c0   : > { %v3492_v52 = vmax.f32 %v3428_v32, %v3460_v38  ;;  %v3334_v18 = vadd.f32 %v11228_v5, %v17397_v53  ;;  %v11279_v1 = vadd.f32 %v11223_v57, %v11037_v0  ;;  %v11286_v45 = vmax.f32 %v2588_v56, %v10797_v58 }
 0x2c1   : > { %v11281_v4 = vmax.f32 %v3491_v8, %v3523_v60  ;;  %6993 = vset.pattern.permute.xlu1 %v17041_v7  ;;  %v11290_v51 = vmax.f32 %v2205_v59, %v17400_v54  ;;  %v2587_v38 = vmax.f32 %v11174_v16, %v2555_v46  ;;  %v17402_v25 = vmax.f32 %v17269_v15, %v17401_v33  ;;  %v17404_v59 = vld [vmem:[#allocation123_spill] sm:$0xff] }
 0x2c2   : > { %v11283_v32 = vmax.f32 %v3492_v52, %v3524_v43  ;;  %2507 = vperm.xlu1 %6993, %v11083_v31   ;;  %v11299_v60 = vpop.permute.xlu1 %2659  ;;  %v3365_v52 = vmax.f32 %v10678_v14, %v3333_v19  ;;  %v17405_v8 = vld [vmem:[#allocation251_spill] sm:$0xff]  ;;  %v17406_v19 = vrot.slane %v11008_v22, 1  ;;  %v17408_v35 = vrot.slane %v11008_v22, 7 }
 0x2c3   : > { %17398 = vst [vmem:[#allocation292_spill] sm:$0xff] %v11281_v4  ;;  %v11296_v20 = vmax.f32 %v17402_v25, %v2366_v39  ;;  %17403 = vst [vmem:[#allocation225_spill] sm:$0xff] %v11299_v60  ;;  %v4029_v56 = vrot.slane %v11281_v4, 1  ;;  %v4157_v16 = vrot.slane %v11281_v4, 7  ;;  %v3366_v25 = vmax.f32 %v10805_v41, %v3334_v18  ;;  %v17407_v46 = vld [vmem:[#allocation7_spill] sm:$0xff] }
 0x2c4   : > { %17399 = vst [vmem:[#allocation293_spill] sm:$0xff] %v11283_v32  ;;  %v3585_v58 = vpack.c.bf16 %v11283_v32, %v11281_v4  ;;  %v16153_v43 = vrot.slane %v11283_v32, 1  ;;  %v3461_v39 = vadd.f32 %v11141_v30, %v17404_v59  ;;  %v3462_v33 = vadd.f32 %v11267_v23, %v17405_v8  ;;  %v17409_v8 = vld [vmem:[#allocation4_spill] sm:$0xff]  ;;  %v17412_v41 = vld [vmem:[#allocation271_spill] sm:$0xff] }
 0x2c5   : > { %v4084_v54 = vsel %vm970_vm2, %v17406_v19, %v4029_v56  ;;  %v17411_v19 = vld [vmem:[#allocation195_spill] sm:$0xff] }
 0x2c6   : > { %6780 = vmatprep.mubr.msk.bf16.mxu1 %vm420_vm1, %v3585_v58  ;;  %v4083_v14 = vsel %vm970_vm2, %v4029_v56, %v16153_v43  ;;  %v4212_v58 = vsel %vm1291_vm3, %v17408_v35, %v4157_v16  ;;  %6994 = vset.pattern.permute.xlu1 %v17229_v44  ;;  %v11333_v53 = vadd.f32 %v4084_v54, %v17409_v8  ;;  %v17414_v35 = vrot.slane %v11283_v32, 7  ;;  %v17416_v56 = vld [vmem:[#allocation254_spill] sm:$0xff] }
 0x2c7   : > { %v4093_v0 = vadd.f32 %v4083_v14, %v17407_v46  ;;  %v2747_v18 = vadd.f32 %v11299_v60, %v17411_v19  ;;  %v3429_v14 = vmax.f32 %v3365_v52, %v10770_v50  ;;  %2703 = vperm.xlu1 %6994, %v17412_v41   ;;  %v11340_v46 = vpop.permute.xlu1 %2099  ;;  %v3430_v8 = vmax.f32 %v3366_v25, %v17416_v56  ;;  %v17421_v25 = vld [vmem:[#allocation223_spill] sm:$0xff] }
 0x2c8   : > { %17410 = vst [vmem:[#allocation214_spill] sm:$0xff] %v11333_v53  ;;  %17413 = vst [vmem:[#allocation195_spill] sm:$0xff] %v11340_v46  ;;  %v11346_v59 = vsel %vm1291_vm3, %v4157_v16, %v17414_v35  ;;  %v4221_v19 = vadd.f32 %v4212_v58, %v17417_v13  ;;  %v17418_v50 = vrot.slane %v11281_v4, 2  ;;  %v17419_v52 = vrot.slane %v11008_v22, 2  ;;  %v17432_v53 = vld [vmem:[#allocation15_spill] sm:$0xff] }
 0x2c9   : > { %17415 = vst [vmem:[#allocation271_spill] sm:$0xff] %v11346_v59  ;;  %v11358_v49 = vmax.f32 %v2587_v38, %v2747_v18  ;;  %v3493_v3 = vmax.f32 %v3429_v14, %v3461_v39  ;;  %v4125_v16 = vmax.f32 %v11281_v4, %v4093_v0  ;;  %v11363_v35 = vadd.f32 %v11228_v5, %v11299_v60  ;;  %v17423_v39 = vld [vmem:[#allocation86_spill] sm:$0xff] }
 0x2ca   : > { %v4340_v41 = vsel %vm1548_vm4, %v17419_v52, %v17418_v50  ;;  %v3494_v54 = vmax.f32 %v3430_v8, %v3462_v33  ;;  %v3525_v58 = vadd.f32 %v10617_v26, %v17421_v25  ;;  %v17426_v33 = vld [vmem:[#allocation140_spill] sm:$0xff]  ;;  %v17427_v56 = vrot.slane %v11286_v45, 1  ;;  %v17433_v4 = vld [vmem:[#allocation14_spill] sm:$0xff] }
 0x2cb   : > { %17420 = vst [vmem:[#allocation254_spill] sm:$0xff] %v11363_v35  ;;  %v2828_v43 = vrot.slane %v11358_v49, 1  ;;  %v2956_v50 = vrot.slane %v11358_v49, 7  ;;  %v3084_v38 = vrot.slane %v11358_v49, 2  ;;  %6996 = vset.pattern.permute.xlu1 %v17041_v7  ;;  %v11373_v0 = vpop.permute.xlu1 %2103  ;;  %v11376_v18 = vadd.f32 %v4340_v41, %v17423_v39  ;;  %v17430_v39 = vld [vmem:[#allocation222_spill] sm:$0xff] }
 0x2cc   : > { %17422 = vst [vmem:[#allocation294_spill] sm:$0xff] %v11373_v0  ;;  %v11378_v8 = vmax.f32 %v3493_v3, %v3525_v58  ;;  %v11382_v14 = vadd.f32 %v11340_v46, %v17426_v33  ;;  %v2804_v52 = vpack.c.bf16 %v11358_v49, %v11137_v17  ;;  %2503 = vperm.xlu1 %6996, %v10974_v34   ;;  %v17428_v13 = vrot.slane %v11137_v17, 1 }
 0x2cd   : > { %17424 = vst [vmem:[#allocation295_spill] sm:$0xff] %v11376_v18  ;;  %v2864_v7 = vsel %vm970_vm2, %v2828_v43, %v17427_v56  ;;  %v17429_v41 = vrot.slane %v11137_v17, 7  ;;  %v11400_v25 = vmax.f32 %v3494_v54, %v17430_v39  ;;  %v11402_v18 = vmax.f32 %v4125_v16, %v4221_v19  ;;  %v17434_v56 = vld [vmem:[#allocation167_spill] sm:$0xff]  ;;  %v17437_v39 = vld [vmem:[#allocation273_spill] sm:$0xff] }
 0x2ce   : > { %17425 = vst [vmem:[#allocation296_spill] sm:$0xff] %v11378_v8  ;;  %v2865_v3 = vsel %vm970_vm2, %v17428_v13, %v2828_v43  ;;  %v2892_v60 = vadd.f32 %v2864_v7, %v17433_v4  ;;  %6822 = vmatprep.mubr.msk.bf16.mxu0 %vm420_vm1, %v2804_v52  ;;  %v11409_v46 = vadd.f32 %v11267_v23, %v17434_v56  ;;  %v17435_v13 = vrot.slane %v11286_v45, 2 }
 0x2cf   : > { %v2993_v58 = vsel %vm1291_vm3, %v17429_v41, %v2956_v50  ;;  %17431 = vst [vmem:[#allocation222_spill] sm:$0xff] %v11402_v18  ;;  %v2891_v59 = vadd.f32 %v2865_v3, %v17432_v53  ;;  %v17436_v54 = vrot.slane %v11137_v17, 2  ;;  %v3212_v16 = vrot.slane %v11358_v49, 6  ;;  %v17440_v18 = vld [vmem:[#allocation53_spill] sm:$0xff] }
 0x2d0   : > { %v3120_v43 = vsel %vm1548_vm4, %v3084_v38, %v17435_v13  ;;  %v17438_v52 = vmax.f32 %v11223_v57, %v11218_v27  ;;  %v2924_v41 = vmax.f32 %v11358_v49, %v2892_v60  ;;  %v17439_v56 = vrot.slane %v11286_v45, 7  ;;  %6997 = vset.pattern.permute.xlu1 %v17229_v44  ;;  %v17443_v27 = vld [vmem:[#allocation96_spill] sm:$0xff] }
 0x2d1   : > { %v3121_v19 = vsel %vm1548_vm4, %v17436_v54, %v3084_v38  ;;  %v2923_v3 = vmax.f32 %v11137_v17, %v2891_v59  ;;  %v3020_v4 = vadd.f32 %v2993_v58, %v17440_v18  ;;  %v11434_v38 = vpop.permute.xlu1 %2479  ;;  %v17442_v54 = vld [vmem:[#allocation93_spill] sm:$0xff]  ;;  %v3148_v57 = vadd.f32 %v3120_v43, %v17443_v27  ;;  %2699 = vperm.xlu1 %6997, %v11083_v31  }
 0x2d2   : > { %v11424_v7 = vmax.f32 %v17438_v52, %v17437_v39  ;;  %v2992_v13 = vsel %vm1291_vm3, %v2956_v50, %v17439_v56  ;;  %17441 = vst [vmem:[#allocation273_spill] sm:$0xff] %v11434_v38  ;;  %v3147_v22 = vadd.f32 %v3121_v19, %v17442_v54  ;;  %v3586_v59 = vpack.c.bf16 %v11400_v25, %v11378_v8 }
 0x2d3   : > { %v4031_v49 = vrot.slane %v11378_v8, 1  ;;  %v3051_v60 = vmax.f32 %v2923_v3, %v11221_v2  ;;  %v3052_v50 = vmax.f32 %v2924_v41, %v3020_v4  ;;  %v16165_v58 = vrot.slane %v11400_v25, 1  ;;  %v17445_v3 = vld [vmem:[#allocation9_spill] sm:$0xff] }
 0x2d4   : > { %v4159_v44 = vrot.slane %v11378_v8, 7  ;;  %v17444_v56 = vrot.slane %v11137_v17, 6  ;;  %6781 = vmatmul.mubr.msk.bf16.gmra.mxu1 %vm420_vm1, %v3586_v59  ;;  %v16164_v43 = vrot.slane %v11400_v25, 7  ;;  %v16166_v39 = vrot.slane %v11378_v8, 2 }
 0x2d5   : > { %v16167_v31 = vrot.slane %v11400_v25, 2  ;;  %v3179_v52 = vmax.f32 %v3051_v60, %v3147_v22  ;;  %v3180_v2 = vmax.f32 %v3052_v50, %v3148_v57  ;;  %v4081_v4 = vsel %vm970_vm2, %v4031_v49, %v16165_v58  ;;  %2695 = vperm.xlu1 %6997, %v10974_v34   ;;  %v17448_v60 = vld [vmem:[#allocation56_spill] sm:$0xff] }
 0x2d6   : > { %v3249_v19 = vsel %vm1805_vm5, %v17444_v56, %v3212_v16  ;;  %v2207_v17 = vmax.f32 %v17274_v28, %v11382_v14  ;;  %v4095_v41 = vadd.f32 %v4081_v4, %v17445_v3  ;;  %v4209_v59 = vsel %vm1291_vm3, %v4159_v44, %v16164_v43  ;;  %v11475_v14 = vpop.permute.xlu1 %2135  ;;  %v17452_v34 = vld [vmem:[#allocation40_spill] sm:$0xff] }
 0x2d7   : > { %v17446_v56 = vrot.slane %v11283_v32, 7  ;;  %v4337_v57 = vsel %vm1548_vm4, %v16166_v39, %v16167_v31  ;;  %17447 = vst [vmem:[#allocation297_spill] sm:$0xff] %v11475_v14  ;;  %v11478_v50 = vadd.f32 %v2992_v13, %v17448_v60  ;;  %v17449_v4 = vrot.slane %v11286_v45, 6 }
 0x2d8   : > { %v17451_v58 = vrot.slane %v11283_v32, 1  ;;  %v4127_v39 = vmax.f32 %v11378_v8, %v4095_v41  ;;  %v4415_v27 = vrot.slane %v11378_v8, 6  ;;  %v16169_v13 = vrot.slane %v11400_v25, 6 }
 0x2d9   : > { %v4210_v22 = vsel %vm1291_vm3, %v17446_v56, %v4159_v44  ;;  %v3248_v43 = vsel %vm1805_vm5, %v3212_v16, %v17449_v4  ;;  %v17450_v44 = vld [vmem:[#allocation127_spill] sm:$0xff]  ;;  %v11494_v60 = vmax.f32 %v3179_v52, %v11239_v36  ;;  %v17456_v52 = vld [vmem:[#allocation132_spill] sm:$0xff]  ;;  %v17490_v54 = vrot.slane %v11400_v25, 2 }
 0x2da   : > { %v3276_v56 = vadd.f32 %v3249_v19, %v17450_v44  ;;  %v4082_v3 = vsel %vm970_vm2, %v17451_v58, %v4031_v49  ;;  %v4223_v31 = vadd.f32 %v4210_v22, %v17452_v34  ;;  %v17453_v16 = vld [vmem:[#allocation143_spill] sm:$0xff]  ;;  %v4465_v22 = vsel %vm1805_vm5, %v4415_v27, %v16169_v13  ;;  %v17461_v13 = vld [vmem:[#allocation41_spill] sm:$0xff] }
 0x2db   : > { %v2176_v19 = vadd.f32 %v11373_v0, %v17453_v16  ;;  %v2558_v4 = vadd.f32 %v11434_v38, %v17453_v16  ;;  %v17454_v58 = vld [vmem:[#allocation87_spill] sm:$0xff]  ;;  %v17455_v34 = vrot.slane %v11283_v32, 6  ;;  %v11525_v0 = vadd.f32 %v4209_v59, %v17461_v13  ;;  %v17462_v38 = vld [vmem:[#allocation124_spill] sm:$0xff]  ;;  %v17471_v13 = vld [vmem:[#allocation245_spill] sm:$0xff] }
 0x2dc   : > { %v11496_v18 = vmax.f32 %v3180_v2, %v3276_v56  ;;  %v4255_v49 = vmax.f32 %v4127_v39, %v4223_v31  ;;  %v4351_v41 = vadd.f32 %v4337_v57, %v17454_v58  ;;  %v11512_v2 = vadd.f32 %v3248_v43, %v17456_v52  ;;  %v17457_v56 = vld [vmem:[#allocation6_spill] sm:$0xff]  ;;  %v17459_v31 = vld [vmem:[#allocation209_spill] sm:$0xff]  ;;  %v11522_v58 = vpop.permute.xlu1 %2295 }
 0x2dd   : > { %v4466_v36 = vsel %vm1805_vm5, %v17455_v34, %v4415_v27  ;;  %v11515_v8 = vadd.f32 %v4082_v3, %v17457_v56  ;;  %v2590_v39 = vmax.f32 %v11296_v20, %v2558_v4  ;;  %v11520_v57 = vadd.f32 %v11475_v14, %v17459_v31  ;;  %17460 = vst [vmem:[#allocation209_spill] sm:$0xff] %v11522_v58  ;;  %v17463_v34 = vld [vmem:[#allocation179_spill] sm:$0xff]  ;;  %v17464_v4 = vld [vmem:[#allocation196_spill] sm:$0xff]  ;;  %v17475_v52 = vld [vmem:[#allocation50_spill] sm:$0xff] }
 0x2de   : > { %v4383_v32 = vmax.f32 %v4255_v49, %v4351_v41  ;;  %v4479_v27 = vadd.f32 %v4466_v36, %v17462_v38  ;;  %v2368_v43 = vadd.f32 %v11522_v58, %v17269_v15  ;;  %v2208_v3 = vmax.f32 %v17386_v11, %v2176_v19  ;;  %v17465_v49 = vld [vmem:[#allocation203_spill] sm:$0xff]  ;;  %v17468_v19 = vld [vmem:[#allocation246_spill] sm:$0xff] }
 0x2df   : > { %17458 = vst [vmem:[#allocation298_spill] sm:$0xff] %v11515_v8  ;;  %v11532_v56 = vmax.f32 %v2590_v39, %v17463_v34  ;;  %v3368_v20 = vmax.f32 %v11228_v5, %v11409_v46  ;;  %v3463_v31 = vadd.f32 %v11494_v60, %v17464_v4  ;;  %v11540_v59 = vadd.f32 %v11494_v60, %v10990_v40  ;;  %v17469_v39 = vld [vmem:[#allocation119_spill] sm:$0xff]  ;;  %v17470_v46 = vld [vmem:[#allocation182_spill] sm:$0xff]  ;;  %v17483_v40 = vld [vmem:[#allocation173_spill] sm:$0xff] }
 0x2e0   : > { %v11544_v41 = vadd.f32 %v11496_v18, %v17465_v49  ;;  %v11546_v15 = vmax.f32 %v4383_v32, %v4479_v27  ;;  %v3464_v36 = vadd.f32 %v11496_v18, %v17468_v19  ;;  %v11551_v34 = vadd.f32 %v4465_v22, %v17469_v39  ;;  %v17473_v11 = vld [vmem:[#allocation278_spill] sm:$0xff]  ;;  %v11563_v27 = vpop.permute.xlu1 %2667 }
 0x2e1   : > { %v11557_v8 = vadd.f32 %v17471_v13, %v11475_v14  ;;  %v11559_v4 = vmax.f32 %v2208_v3, %v2368_v43  ;;  %v3432_v49 = vmax.f32 %v3368_v20, %v17473_v11  ;;  %v3495_v32 = vmax.f32 %v11424_v7, %v3463_v31  ;;  %17474 = vst [vmem:[#allocation278_spill] sm:$0xff] %v11563_v27  ;;  %v17476_v22 = vld [vmem:[#allocation226_spill] sm:$0xff]  ;;  %v17478_v3 = vld [vmem:[#allocation47_spill] sm:$0xff]  ;;  %v17501_v13 = vld [vmem:[#allocation17_spill] sm:$0xff] }
 0x2e2   : > { %17466 = vst [vmem:[#allocation179_spill] sm:$0xff] %v11544_v41  ;;  %17467 = vst [vmem:[#allocation299_spill] sm:$0xff] %v11546_v15  ;;  %v2589_v19 = vmax.f32 %v11290_v51, %v17475_v52  ;;  %v11568_v39 = vmax.f32 %v2207_v17, %v17476_v22  ;;  %v17477_v14 = vld [vmem:[#allocation178_spill] sm:$0xff]  ;;  %v11576_v11 = vadd.f32 %v11494_v60, %v17478_v3  ;;  %v17479_v51 = vld [vmem:[#allocation232_spill] sm:$0xff]  ;;  %v17489_v44 = vrot.slane %v11400_v25, 7 }
 0x2e3   : > { %17472 = vst [vmem:[#allocation300_spill] sm:$0xff] %v11557_v8  ;;  %v2749_v43 = vadd.f32 %v11563_v27, %v17477_v14  ;;  %v3496_v31 = vmax.f32 %v3432_v49, %v3464_v36  ;;  %v3559_v52 = vmax.f32 %v3495_v32, %v17479_v51  ;;  %v17480_v17 = vld [vmem:[#allocation202_spill] sm:$0xff]  ;;  %v11589_v14 = vadd.f32 %v11267_v23, %v11563_v27 }
 0x2e4   : > { %v11583_v22 = vadd.f32 %v11546_v15, %v17480_v17  ;;  %v11593_v8 = vadd.f32 %v11496_v18, %v17483_v40  ;;  %v17484_v7 = vld [vmem:[#allocation206_spill] sm:$0xff]  ;;  %v11599_v17 = vpop.permute.xlu1 %2131 }
 0x2e5   : > { %v11585_v38 = vmax.f32 %v2589_v19, %v2749_v43  ;;  %17482 = vst [vmem:[#allocation226_spill] sm:$0xff] %v11589_v14  ;;  %v11596_v3 = vmax.f32 %v3496_v31, %v17484_v7  ;;  %v4033_v49 = vrot.slane %v3559_v52, 1  ;;  %v4161_v36 = vrot.slane %v3559_v52, 7  ;;  %17485 = vst [vmem:[#allocation178_spill] sm:$0xff] %v11599_v17  ;;  %v17486_v43 = vld [vmem:[#allocation151_spill] sm:$0xff]  ;;  %v17488_v14 = vld [vmem:[#allocation8_spill] sm:$0xff] }
 0x2e6   : > { %17481 = vst [vmem:[#allocation50_spill] sm:$0xff] %v11583_v22  ;;  %v4289_v32 = vrot.slane %v3559_v52, 2  ;;  %v4417_v51 = vrot.slane %v3559_v52, 6  ;;  %v11605_v22 = vadd.f32 %v11228_v5, %v17486_v43  ;;  %v17487_v31 = vrot.slane %v11400_v25, 1  ;;  %v17493_v5 = vld [vmem:[#allocation239_spill] sm:$0xff] }
 0x2e7   : > { %v2830_v20 = vrot.slane %v11585_v38, 1  ;;  %v3587_v15 = vpack.c.bf16 %v11596_v3, %v3559_v52  ;;  %v4208_v19 = vsel %vm1291_vm3, %v17489_v44, %v4161_v36  ;;  %v2958_v44 = vrot.slane %v11585_v38, 7 }
 0x2e8   : > { %v4080_v27 = vsel %vm970_vm2, %v17487_v31, %v4033_v49  ;;  %v4336_v7 = vsel %vm1548_vm4, %v17490_v54, %v4289_v32  ;;  %v17491_v31 = vrot.slane %v11596_v3, 1 }
 0x2e9   : > { %v4096_v58 = vadd.f32 %v4080_v27, %v17488_v14  ;;  %6784 = vmatprep.mubr.msk.bf16.mxu1 %vm420_vm1, %v3587_v15  ;;  %v17492_v27 = vrot.slane %v11596_v3, 7  ;;  %v17494_v15 = vrot.slane %v11596_v3, 2 }
 0x2ea   : > { %v4079_v40 = vsel %vm970_vm2, %v4033_v49, %v17491_v31  ;;  %v3086_v49 = vrot.slane %v11585_v38, 2  ;;  %v4225_v31 = vadd.f32 %v4208_v19, %v17357_v9 }
 0x2eb   : > { %v4207_v14 = vsel %vm1291_vm3, %v4161_v36, %v17492_v27  ;;  %v4097_v41 = vadd.f32 %v4079_v40, %v17356_v55  ;;  %v4128_v54 = vmax.f32 %v11400_v25, %v4096_v58  ;;  %v4335_v35 = vsel %vm1548_vm4, %v4289_v32, %v17494_v15  ;;  %v11653_v55 = vpop.permute.xlu1 %2327  ;;  %v17498_v15 = vld [vmem:[#allocation90_spill] sm:$0xff] }
 0x2ec   : > { %v17495_v27 = vrot.slane %v11400_v25, 6  ;;  %v17496_v40 = vrot.slane %v11532_v56, 1  ;;  %17497 = vst [vmem:[#allocation232_spill] sm:$0xff] %v11653_v55  ;;  %v4352_v19 = vadd.f32 %v4336_v7, %v17498_v15  ;;  %v17499_v36 = vrot.slane %v11286_v45, 1 }
 0x2ed   : > { %v4129_v26 = vmax.f32 %v3559_v52, %v4097_v41  ;;  %v11656_v32 = vmax.f32 %v4128_v54, %v11525_v0  ;;  %v3370_v0 = vmax.f32 %v11267_v23, %v11593_v8  ;;  %v4353_v52 = vadd.f32 %v4335_v35, %v17368_v42 }
 0x2ee   : > { %v4464_v53 = vsel %vm1805_vm5, %v17495_v27, %v4417_v51  ;;  %v2862_v58 = vsel %vm970_vm2, %v2830_v20, %v17496_v40  ;;  %v2863_v25 = vsel %vm970_vm2, %v17499_v36, %v2830_v20  ;;  %v17500_v27 = vrot.slane %v11596_v3, 6 }
 0x2ef   : > { %v2893_v40 = vadd.f32 %v2863_v25, %v17501_v13  ;;  %v2894_v21 = vadd.f32 %v2862_v58, %v17502_v37  ;;  %v4257_v41 = vmax.f32 %v4129_v26, %v4225_v31  ;;  %v4384_v7 = vmax.f32 %v11656_v32, %v4352_v19  ;;  %v17504_v58 = vld [vmem:[#allocation57_spill] sm:$0xff] }
 0x2f0   : > { %v4463_v9 = vsel %vm1805_vm5, %v4417_v51, %v17500_v27  ;;  %v17503_v54 = vrot.slane %v11286_v45, 7  ;;  %v4481_v36 = vadd.f32 %v4464_v53, %v17376_v24  ;;  %v17505_v26 = vrot.slane %v11532_v56, 2  ;;  %v11690_v53 = vpop.permute.xlu1 %2111  ;;  %v17512_v24 = vld [vmem:[#allocation274_spill] sm:$0xff] }
 0x2f1   : > { %v2925_v51 = vmax.f32 %v11286_v45, %v2893_v40  ;;  %v2926_v25 = vmax.f32 %v11585_v38, %v2894_v21  ;;  %v4385_v15 = vmax.f32 %v4257_v41, %v4353_v52  ;;  %v17506_v8 = vrot.slane %v11286_v45, 2  ;;  %17507 = vst [vmem:[#allocation206_spill] sm:$0xff] %v11690_v53  ;;  %v17508_v40 = vld [vmem:[#allocation95_spill] sm:$0xff]  ;;  %v17509_v41 = vld [vmem:[#allocation98_spill] sm:$0xff] }
 0x2f2   : > { %v2991_v20 = vsel %vm1291_vm3, %v17503_v54, %v2958_v44  ;;  %v3118_v35 = vsel %vm1548_vm4, %v3086_v49, %v17505_v26  ;;  %v3214_v32 = vrot.slane %v11585_v38, 6  ;;  %v17511_v26 = vrot.slane %v11286_v45, 6 }
 0x2f3   : > { %v3022_v27 = vadd.f32 %v2991_v20, %v17504_v58  ;;  %v3119_v31 = vsel %vm1548_vm4, %v17506_v8, %v3086_v49  ;;  %v3053_v19 = vmax.f32 %v2925_v51, %v11478_v50  ;;  %v3150_v52 = vadd.f32 %v3118_v35, %v17509_v41  ;;  %v17513_v8 = vld [vmem:[#allocation224_spill] sm:$0xff]  ;;  %v17514_v50 = vld [vmem:[#allocation45_spill] sm:$0xff] }
 0x2f4   : > { %v3149_v54 = vadd.f32 %v3119_v31, %v17508_v40  ;;  %v11695_v20 = vmax.f32 %v4385_v15, %v4481_v36  ;;  %v3247_v42 = vsel %vm1805_vm5, %v17511_v26, %v3214_v32  ;;  %v11703_v49 = vadd.f32 %v11141_v30, %v17512_v24  ;;  %v17515_v15 = vld [vmem:[#allocation129_spill] sm:$0xff]  ;;  %v17517_v24 = vld [vmem:[#allocation120_spill] sm:$0xff] }
 0x2f5   : > { %v3054_v21 = vmax.f32 %v2926_v25, %v3022_v27  ;;  %v11707_v37 = vadd.f32 %v11267_v23, %v17513_v8  ;;  %v11710_v51 = vadd.f32 %v4207_v14, %v17514_v50  ;;  %v3278_v36 = vadd.f32 %v3247_v42, %v17515_v15  ;;  %v17518_v23 = vld [vmem:[#allocation145_spill] sm:$0xff] }
 0x2f6   : > { %17510 = vst [vmem:[#allocation239_spill] sm:$0xff] %v11695_v20  ;;  %v3181_v25 = vmax.f32 %v3053_v19, %v3149_v54  ;;  %v17516_v35 = vrot.slane %v11532_v56, 7  ;;  %v2805_v26 = vpack.c.bf16 %v11585_v38, %v11286_v45  ;;  %v2376_v41 = vadd.f32 %v11653_v55, %v17517_v24  ;;  %v11736_v45 = vpop.permute.xlu1 %2483  ;;  %v17528_v50 = vld [vmem:[#allocation133_spill] sm:$0xff] }
 0x2f7   : > { %v3182_v27 = vmax.f32 %v3054_v21, %v3150_v52  ;;  %v2178_v40 = vadd.f32 %v11690_v53, %v17518_v23  ;;  %v17519_v14 = vrot.slane %v11532_v56, 6  ;;  %17521 = vst [vmem:[#allocation120_spill] sm:$0xff] %v11736_v45  ;;  %v11739_v38 = vadd.f32 %v4463_v9, %v17377_v47  ;;  %v17525_v9 = vld [vmem:[#allocation184_spill] sm:$0xff]  ;;  %v17526_v47 = vld [vmem:[#allocation253_spill] sm:$0xff] }
 0x2f8   : > { %v2990_v31 = vsel %vm1291_vm3, %v2958_v44, %v17516_v35  ;;  %v11728_v42 = vmax.f32 %v3181_v25, %v11512_v2  ;;  %v17520_v44 = vld [vmem:[#allocation204_spill] sm:$0xff]  ;;  %6823 = vmatmul.mubr.msk.bf16.gmra.mxu0 %vm420_vm1, %v2805_v26  ;;  %v17522_v52 = vmax.f32 %v17470_v46, %v11520_v57  ;;  %v17523_v2 = vmax.f32 %v11141_v30, %v11576_v11  ;;  %v17524_v35 = vld [vmem:[#allocation142_spill] sm:$0xff] }
 0x2f9   : > { %v3246_v19 = vsel %vm1805_vm5, %v3214_v32, %v17519_v14  ;;  %v11730_v21 = vmax.f32 %v3182_v27, %v3278_v36  ;;  %v11734_v54 = vadd.f32 %v11599_v17, %v17520_v44  ;;  %v3434_v27 = vmax.f32 %v3370_v0, %v11605_v22  ;;  %v17530_v0 = vld [vmem:[#allocation158_spill] sm:$0xff]  ;;  %v17560_v44 = vld [vmem:[#allocation48_spill] sm:$0xff] }
 0x2fa   : > { %v2408_v32 = vmax.f32 %v17522_v52, %v2376_v41  ;;  %v3433_v25 = vmax.f32 %v17523_v2, %v11273_v12  ;;  %v2210_v36 = vmax.f32 %v17453_v16, %v2178_v40  ;;  %v11753_v14 = vadd.f32 %v11736_v45, %v17524_v35  ;;  %v17527_v41 = vld [vmem:[#allocation60_spill] sm:$0xff]  ;;  %v17531_v2 = vld [vmem:[#allocation197_spill] sm:$0xff] }
 0x2fb   : > { %v3465_v26 = vadd.f32 %v11728_v42, %v17525_v9  ;;  %v3466_v57 = vadd.f32 %v11730_v21, %v17526_v47  ;;  %v11760_v52 = vadd.f32 %v2990_v31, %v17527_v41  ;;  %v11763_v11 = vadd.f32 %v3246_v19, %v17528_v50  ;;  %v17529_v12 = vld [vmem:[#allocation240_spill] sm:$0xff]  ;;  %v17534_v47 = vld [vmem:[#allocation207_spill] sm:$0xff]  ;;  %v17541_v45 = vld [vmem:[#allocation281_spill] sm:$0xff] }
 0x2fc   : > { %v2600_v22 = vmax.f32 %v2408_v32, %v17529_v12  ;;  %v3339_v40 = vadd.f32 %v11728_v42, %v17530_v0  ;;  %v17532_v9 = vld [vmem:[#allocation176_spill] sm:$0xff]  ;;  %v11774_v31 = vadd.f32 %v11728_v42, %v11257_v29  ;;  %v11778_v19 = vadd.f32 %v11730_v21, %v17534_v47  ;;  %v11780_v32 = vpop.permute.xlu1 %2127  ;;  %v17537_v12 = vld [vmem:[#allocation269_spill] sm:$0xff] }
 0x2fd   : > { %v3497_v53 = vmax.f32 %v3433_v25, %v3465_v26  ;;  %v3498_v55 = vmax.f32 %v3434_v27, %v3466_v57  ;;  %v3340_v15 = vadd.f32 %v11730_v21, %v17532_v9  ;;  %17536 = vst [vmem:[#allocation240_spill] sm:$0xff] %v11780_v32  ;;  %v11784_v0 = vadd.f32 %v11141_v30, %v17537_v12  ;;  %v17540_v26 = vld [vmem:[#allocation275_spill] sm:$0xff]  ;;  %v17542_v9 = vld [vmem:[#allocation228_spill] sm:$0xff]  ;;  %v17546_v12 = vld [vmem:[#allocation198_spill] sm:$0xff] }
 0x2fe   : > { %17533 = vst [vmem:[#allocation145_spill] sm:$0xff] %v11774_v31  ;;  %17535 = vst [vmem:[#allocation142_spill] sm:$0xff] %v11778_v19  ;;  %v11787_v25 = vmax.f32 %v4384_v7, %v11551_v34  ;;  %v11796_v47 = vmax.f32 %v2210_v36, %v17542_v9  ;;  %v17544_v19 = vld [vmem:[#allocation171_spill] sm:$0xff]  ;;  %v3371_v30 = vmax.f32 %v11494_v60, %v3339_v40  ;;  %v17550_v27 = vld [vmem:[#allocation277_spill] sm:$0xff] }
 0x2ff   : > { %17538 = vst [vmem:[#allocation197_spill] sm:$0xff] %v11784_v0  ;;  %v3561_v57 = vmax.f32 %v3497_v53, %v17540_v26  ;;  %v11793_v29 = vmax.f32 %v3498_v55, %v17541_v45  ;;  %v11799_v50 = vmax.f32 %v2600_v22, %v17544_v19  ;;  %v11804_v34 = vadd.f32 %v11494_v60, %v17546_v12  ;;  %v17548_v7 = vld [vmem:[#allocation235_spill] sm:$0xff]  ;;  %v17553_v60 = vld [vmem:[#allocation10_spill] sm:$0xff] }
 0x300   : > { %17539 = vst [vmem:[#allocation301_spill] sm:$0xff] %v11787_v25  ;;  %17543 = vst [vmem:[#allocation275_spill] sm:$0xff] %v11796_v47  ;;  %v17549_v41 = vrot.slane %v17548_v7, 1  ;;  %v17551_v58 = vrot.slane %v17550_v27, 1  ;;  %v3372_v9 = vmax.f32 %v11496_v18, %v3340_v15  ;;  %v11830_v40 = vld [vmem:[%s15682_s4 + $0x8] sm:$0xf]  ;;  %v11845_v31 = vpop.permute.xlu1 %2323 }
 0x301   : > { %17545 = vst [vmem:[#allocation281_spill] sm:$0xff] %v11799_v50  ;;  %17547 = vst [vmem:[#allocation228_spill] sm:$0xff] %v11804_v34  ;;  %v3588_v53 = vpack.c.bf16 %v11793_v29, %v3561_v57  ;;  %v4035_v45 = vrot.slane %v3561_v57, 1  ;;  %v16206_v36 = vrot.slane %v11793_v29, 1  ;;  %v4163_v22 = vrot.slane %v3561_v57, 7  ;;  %6916 = vmatprep.subr.msk.bf16.mxu1 %vm469_vm0, %v11830_v40 }
 0x302   : > { %v2850_v55 = vsel %vm970_vm2, %v17551_v58, %v17549_v41  ;;  %v4291_v19 = vrot.slane %v3561_v57, 2  ;;  %v17552_v41 = vrot.slane %v11596_v3, 1  ;;  %v4419_v12 = vrot.slane %v3561_v57, 6  ;;  %17557 = vst [vmem:[#allocation171_spill] sm:$0xff] %v11845_v31 }
 0x303   : > { %6785 = vmatmul.mubr.msk.bf16.gmra.mxu1 %vm420_vm1, %v3588_v53  ;;  %v4077_v58 = vsel %vm970_vm2, %v4035_v45, %v16206_v36  ;;  %v6600_v53 = vld [vmem:[%s15682_s4 + $0xc] sm:$0xf]  ;;  %v17554_v36 = vld [vmem:[#allocation13_spill] sm:$0xff]  ;;  %v17555_v0 = vrot.slane %v11793_v29, 7  ;;  %v17562_v8 = vrot.slane %v11793_v29, 6  ;;  %v17563_v47 = vrot.slane %v11596_v3, 6 }
 0x304   : > { %v4078_v26 = vsel %vm970_vm2, %v17552_v41, %v4035_v45  ;;  %v4099_v34 = vadd.f32 %v4077_v58, %v17554_v36  ;;  %v17556_v41 = vrot.slane %v11596_v3, 7  ;;  %v11852_v58 = vadd.f32 %v11780_v32, %v17470_v46  ;;  %6917 = vmatprep.subr.msk.bf16.mxu0 %vm469_vm0, %v6600_v53  ;;  %v17561_v32 = vld [vmem:[#allocation92_spill] sm:$0xff]  ;;  %v11886_v53 = vpop.permute.xlu1 %2299 }
 0x305   : > { %v4098_v13 = vadd.f32 %v4078_v26, %v17553_v60  ;;  %v4205_v45 = vsel %vm1291_vm3, %v4163_v22, %v17555_v0  ;;  %v17558_v26 = vrot.slane %v11793_v29, 2  ;;  %v17559_v36 = vrot.slane %v11596_v3, 2  ;;  %17565 = vst [vmem:[#allocation302_spill] sm:$0xff] %v11886_v53 }
 0x306   : > { %v4206_v15 = vsel %vm1291_vm3, %v17556_v41, %v4163_v22  ;;  %v4131_v60 = vmax.f32 %v3561_v57, %v4099_v34  ;;  %v17564_v34 = vld [vmem:[#allocation91_spill] sm:$0xff] }
 0x307   : > { %v4333_v0 = vsel %vm1548_vm4, %v4291_v19, %v17558_v26  ;;  %v4334_v22 = vsel %vm1548_vm4, %v17559_v36, %v4291_v19  ;;  %v4130_v20 = vmax.f32 %v11596_v3, %v4098_v13  ;;  %v4227_v46 = vadd.f32 %v4206_v15, %v17560_v44  ;;  %v17567_v41 = vld [vmem:[#allocation159_spill] sm:$0xff] }
 0x308   : > { %v4354_v16 = vadd.f32 %v4334_v22, %v17561_v32  ;;  %v4461_v26 = vsel %vm1805_vm5, %v4419_v12, %v17562_v8  ;;  %v11875_v36 = vsel %vm1805_vm5, %v17563_v47, %v4419_v12  ;;  %v11878_v19 = vmax.f32 %v3372_v9, %v11707_v37  ;;  %v17566_v22 = vld [vmem:[#allocation28_spill] sm:$0xff]  ;;  %v17568_v12 = vld [vmem:[#allocation266_spill] sm:$0xff] }
 0x309   : > { %v4258_v13 = vmax.f32 %v4130_v20, %v11710_v51  ;;  %v11881_v57 = vmax.f32 %v4131_v60, %v4227_v46  ;;  %v11884_v15 = vadd.f32 %v4333_v0, %v17564_v34  ;;  %v2906_v8 = vadd.f32 %v2850_v55, %v17566_v22  ;;  %v17588_v32 = vld [vmem:[#allocation180_spill] sm:$0xff] }
 0x30a   : > { %v2375_v3 = vadd.f32 %v11845_v31, %v17567_v41  ;;  %v2369_v47 = vadd.f32 %v11886_v53, %v17274_v28  ;;  %v11894_v37 = vmax.f32 %v3371_v30, %v11703_v49  ;;  %v16212_v20 = vrot.slane %v11799_v50, 7  ;;  %v17572_v30 = vld [vmem:[#allocation215_spill] sm:$0xff]  ;;  %v17614_v31 = vld [vmem:[#allocation257_spill] sm:$0xff] }
 0x30b   : > { %v4386_v46 = vmax.f32 %v4258_v13, %v4354_v16  ;;  %v11901_v9 = vadd.f32 %v11787_v25, %v17568_v12  ;;  %v17570_v55 = vrot.slane %v17548_v7, 2  ;;  %v17571_v60 = vrot.slane %v17550_v27, 2  ;;  %v17580_v12 = vld [vmem:[#allocation168_spill] sm:$0xff] }
 0x30c   : > { %v17573_v16 = vmax.f32 %v17426_v33, %v17572_v30  ;;  %v17574_v13 = vrot.slane %v17550_v27, 7  ;;  %v11924_v34 = vadd.f32 %v4205_v45, %v17342_v61  ;;  %v17576_v30 = vld [vmem:[#allocation74_spill] sm:$0xff]  ;;  %v17577_v49 = vmax.f32 %v17531_v2, %v11734_v54  ;;  %v17581_v61 = vld [vmem:[#allocation279_spill] sm:$0xff]  ;;  %v17585_v2 = vld [vmem:[#allocation164_spill] sm:$0xff] }
 0x30d   : > { %17569 = vst [vmem:[#allocation159_spill] sm:$0xff] %v11901_v9  ;;  %v3106_v28 = vsel %vm1548_vm4, %v17571_v60, %v17570_v55  ;;  %v11927_v55 = vmax.f32 %v4386_v46, %v11739_v38  ;;  %v2938_v60 = vmax.f32 %v17550_v27, %v2906_v8  ;;  %v11944_v38 = vadd.f32 %v17581_v61, %v17580_v12  ;;  %v17589_v9 = vld [vmem:[#allocation156_spill] sm:$0xff] }
 0x30e   : > { %v11914_v0 = vmax.f32 %v17573_v16, %v2369_v47  ;;  %v2979_v51 = vsel %vm1291_vm3, %v16212_v20, %v17574_v13  ;;  %v11932_v16 = vadd.f32 %v4461_v26, %v17343_v62  ;;  %v11937_v44 = vmax.f32 %v17577_v49, %v2375_v3  ;;  %v11939_v13 = vpop.permute.xlu1 %2675  ;;  %v17579_v20 = vld [vmem:[#allocation110_spill] sm:$0xff]  ;;  %v17586_v3 = vld [vmem:[#allocation265_spill] sm:$0xff] }
 0x30f   : > { %17575 = vst [vmem:[#allocation215_spill] sm:$0xff] %v11927_v55  ;;  %v3034_v47 = vadd.f32 %v2979_v51, %v17576_v30  ;;  %17578 = vst [vmem:[#allocation303_spill] sm:$0xff] %v11939_v13  ;;  %v3162_v45 = vadd.f32 %v3106_v28, %v17579_v20  ;;  %v2751_v8 = vadd.f32 %v11939_v13, %v17254_v10  ;;  %v17583_v26 = vrot.slane %v17550_v27, 6  ;;  %v17587_v62 = vld [vmem:[#allocation242_spill] sm:$0xff] }
 0x310   : > { %17582 = vst [vmem:[#allocation279_spill] sm:$0xff] %v11944_v38  ;;  %v17584_v51 = vrot.slane %v11799_v50, 6  ;;  %v3356_v49 = vadd.f32 %v17586_v3, %v17585_v2  ;;  %v3358_v25 = vadd.f32 %v10504_v63, %v17588_v32  ;;  %v3422_v10 = vadd.f32 %v17581_v61, %v17589_v9  ;;  %v17596_v9 = vld [vmem:[#allocation146_spill] sm:$0xff] }
 0x311   : > { %v3066_v46 = vmax.f32 %v2938_v60, %v3034_v47  ;;  %v17590_v60 = vld [vmem:[#allocation234_spill] sm:$0xff]  ;;  %v17592_v12 = vmax.f32 %v11568_v39, %v11753_v14  ;;  %v11977_v28 = vadd.f32 %v11927_v55, %v17486_v43  ;;  %v17598_v39 = vrot.slane %v11799_v50, 1 }
 0x312   : > { %v3235_v54 = vsel %vm1805_vm5, %v17584_v51, %v17583_v26  ;;  %v11964_v47 = vadd.f32 %v10504_v63, %v17590_v60  ;;  %v11973_v51 = vadd.f32 %v11496_v18, %v11939_v13  ;;  %v11979_v2 = vpop.permute.xlu1 %2679  ;;  %v3390_v63 = vmax.f32 %v17586_v3, %v3358_v25  ;;  %v17602_v13 = vld [vmem:[#allocation29_spill] sm:$0xff] }
 0x313   : > { %v11969_v26 = vmax.f32 %v17592_v12, %v2751_v8  ;;  %17594 = vst [vmem:[#allocation304_spill] sm:$0xff] %v11977_v28  ;;  %v3194_v32 = vmax.f32 %v3066_v46, %v3162_v45  ;;  %17595 = vst [vmem:[#allocation305_spill] sm:$0xff] %v11979_v2  ;;  %v3290_v20 = vadd.f32 %v3235_v54, %v17596_v9  ;;  %v17597_v60 = vrot.slane %v17550_v27, 1  ;;  %v17603_v9 = vld [vmem:[#allocation107_spill] sm:$0xff]  ;;  %v17615_v28 = vld [vmem:[#allocation160_spill] sm:$0xff] }
 0x314   : > { %17591 = vst [vmem:[#allocation265_spill] sm:$0xff] %v11964_v47  ;;  %17593 = vst [vmem:[#allocation242_spill] sm:$0xff] %v11973_v51  ;;  %v17599_v18 = vrot.slane %v17550_v27, 2  ;;  %v17600_v12 = vrot.slane %v11799_v50, 2  ;;  %v2752_v3 = vadd.f32 %v11979_v2, %v17314_v6  ;;  %v3454_v43 = vmax.f32 %v3390_v63, %v3422_v10  ;;  %v17604_v6 = vld [vmem:[#allocation19_spill] sm:$0xff] }
 0x315   : > { %v2851_v14 = vsel %vm970_vm2, %v17598_v39, %v17597_v60  ;;  %v2832_v8 = vrot.slane %v11969_v26, 1  ;;  %v2960_v46 = vrot.slane %v11969_v26, 7  ;;  %v3088_v25 = vrot.slane %v11969_v26, 2  ;;  %v17607_v10 = vld [vmem:[#allocation175_spill] sm:$0xff] }
 0x316   : > { %v3107_v45 = vsel %vm1548_vm4, %v17600_v12, %v17599_v18  ;;  %v3216_v54 = vrot.slane %v11969_v26, 6  ;;  %v2806_v60 = vpack.c.bf16 %v11969_v26, %v11532_v56  ;;  %v12003_v39 = vmax.f32 %v3194_v32, %v3290_v20  ;;  %v17606_v20 = vld [vmem:[#allocation211_spill] sm:$0xff] }
 0x317   : > { %v17601_v27 = vrot.slane %v11532_v56, 1  ;;  %v3388_v12 = vmax.f32 %v17581_v61, %v3356_v49  ;;  %v12011_v55 = vadd.f32 %v2851_v14, %v17602_v13  ;;  %v12014_v30 = vadd.f32 %v3107_v45, %v17603_v9  ;;  %v17608_v49 = vld [vmem:[#allocation268_spill] sm:$0xff]  ;;  %v17670_v47 = vld [vmem:[#allocation275_spill] sm:$0xff] }
 0x318   : > { %v17605_v51 = vrot.slane %v11532_v56, 7  ;;  %6826 = vmatprep.mubr.msk.bf16.mxu0 %vm420_vm1, %v2806_v60  ;;  %v17609_v14 = vrot.slane %v11532_v56, 2  ;;  %v17613_v13 = vld [vmem:[#allocation200_spill] sm:$0xff]  ;;  %v3518_v33 = vmax.f32 %v3454_v43, %v17614_v31  ;;  %v17619_v31 = vld [vmem:[#allocation61_spill] sm:$0xff] }
 0x319   : > { %v2861_v18 = vsel %vm970_vm2, %v17601_v27, %v2832_v8  ;;  %v12024_v27 = vadd.f32 %v17607_v10, %v17606_v20  ;;  %v12041_v20 = vpop.permute.xlu1 %2319  ;;  %v3420_v63 = vadd.f32 %v12003_v39, %v17613_v13  ;;  %v17616_v13 = vld [vmem:[#allocation97_spill] sm:$0xff] }
 0x31a   : > { %v2895_v22 = vadd.f32 %v2861_v18, %v17604_v6  ;;  %v2989_v32 = vsel %vm1291_vm3, %v17605_v51, %v2960_v46  ;;  %v3117_v45 = vsel %vm1548_vm4, %v17609_v14, %v3088_v25  ;;  %v17610_v18 = vrot.slane %v11532_v56, 6  ;;  %17612 = vst [vmem:[#allocation175_spill] sm:$0xff] %v12041_v20 }
 0x31b   : > { %v17611_v51 = vmax.f32 %v11559_v4, %v17493_v5  ;;  %v2374_v14 = vadd.f32 %v12041_v20, %v17518_v23 }
 0x31c   : > { %v3245_v9 = vsel %vm1805_vm5, %v17610_v18, %v3216_v54  ;;  %v2927_v6 = vmax.f32 %v11532_v56, %v2895_v22  ;;  %v3550_v18 = vadd.f32 %v12003_v39, %v17615_v28  ;;  %v3151_v56 = vadd.f32 %v3117_v45, %v17616_v13 }
 0x31d   : > { %v12039_v60 = vmax.f32 %v17611_v51, %v2752_v3  ;;  %v12059_v22 = vadd.f32 %v11728_v42, %v11979_v2  ;;  %v3024_v28 = vadd.f32 %v2989_v32, %v17619_v31  ;;  %v17622_v2 = vld [vmem:[#allocation18_spill] sm:$0xff] }
 0x31e   : > { %v3055_v51 = vmax.f32 %v2927_v6, %v11760_v52  ;;  %v12061_v43 = vmax.f32 %v3518_v33, %v3550_v18  ;;  %v17621_v33 = vld [vmem:[#allocation131_spill] sm:$0xff] }
 0x31f   : > { %v16229_v7 = vrot.slane %v12039_v60, 1  ;;  %v16230_v3 = vrot.slane %v12039_v60, 6  ;;  %17617 = vst [vmem:[#allocation268_spill] sm:$0xff] %v12059_v22  ;;  %v17620_v5 = vrot.slane %v12039_v60, 7  ;;  %v3280_v18 = vadd.f32 %v3245_v9, %v17621_v33  ;;  %v17631_v9 = vld [vmem:[#allocation218_spill] sm:$0xff]  ;;  %v17636_v33 = vld [vmem:[#allocation32_spill] sm:$0xff] }
 0x320   : > { %17618 = vst [vmem:[#allocation257_spill] sm:$0xff] %v12061_v43  ;;  %v3183_v45 = vmax.f32 %v3055_v51, %v3151_v56  ;;  %v17623_v13 = vrot.slane %v12039_v60, 2 }
 0x321   : > { %v2860_v4 = vsel %vm970_vm2, %v2832_v8, %v16229_v7  ;;  %v2988_v52 = vsel %vm1291_vm3, %v2960_v46, %v17620_v5  ;;  %v3244_v6 = vsel %vm1805_vm5, %v3216_v54, %v16230_v3  ;;  %v12082_v7 = vpop.permute.xlu1 %2515  ;;  %v17625_v46 = vmax.f32 %v17517_v24, %v11852_v58  ;;  %v18595_v48 = vld [vmem:[#allocation175_spill] sm:$0xff] }
 0x322   : > { %v2896_v32 = vadd.f32 %v2860_v4, %v17622_v2  ;;  %v3116_v8 = vsel %vm1548_vm4, %v3088_v25, %v17623_v13  ;;  %17624 = vst [vmem:[#allocation306_spill] sm:$0xff] %v12082_v7  ;;  %v12091_v54 = vadd.f32 %v12003_v39, %v11599_v17  ;;  %v12095_v4 = vmax.f32 %v3388_v12, %v3420_v63  ;;  %v17630_v63 = vld [vmem:[#allocation280_spill] sm:$0xff] }
 0x323   : > { %v12087_v5 = vmax.f32 %v17625_v46, %v2374_v14  ;;  %v12098_v51 = vmax.f32 %v3183_v45, %v11763_v11  ;;  %v17628_v14 = vld [vmem:[#allocation100_spill] sm:$0xff]  ;;  %v17629_v46 = vld [vmem:[#allocation83_spill] sm:$0xff]  ;;  %v17634_v58 = vrot.slane %v12061_v43, 1  ;;  %v12157_v20 = vadd.f32 %v17581_v61, %v12082_v7 }
 0x324   : > { %17626 = vst [vmem:[#allocation307_spill] sm:$0xff] %v12091_v54  ;;  %17627 = vst [vmem:[#allocation308_spill] sm:$0xff] %v12095_v4  ;;  %v2928_v13 = vmax.f32 %v11969_v26, %v2896_v32  ;;  %v3152_v56 = vadd.f32 %v3116_v8, %v17628_v14  ;;  %v12106_v3 = vadd.f32 %v12082_v7, %v17629_v46  ;;  %v17632_v32 = vld [vmem:[#allocation82_spill] sm:$0xff]  ;;  %v17644_v2 = vld [vmem:[#allocation64_spill] sm:$0xff] }
 0x325   : > { %v3341_v11 = vadd.f32 %v12098_v51, %v17630_v63  ;;  %v3467_v26 = vadd.f32 %v12098_v51, %v17631_v9  ;;  %v17633_v25 = vrot.slane %v17632_v32, 1  ;;  %v12120_v46 = vpop.permute.xlu1 %2115  ;;  %v17638_v12 = vrot.slane %v17632_v32, 7  ;;  %17646 = vst [vmem:[#allocation310_spill] sm:$0xff] %v12157_v20  ;;  %v17661_v20 = vld [vmem:[#allocation12_spill] sm:$0xff] }
 0x326   : > { %v3056_v45 = vmax.f32 %v2928_v13, %v3024_v28  ;;  %17635 = vst [vmem:[#allocation83_spill] sm:$0xff] %v12120_v46  ;;  %v17639_v63 = vrot.slane %v12061_v43, 7  ;;  %v17640_v13 = vrot.slane %v17632_v32, 2  ;;  %v17641_v9 = vrot.slane %v12061_v43, 2 }
 0x327   : > { %v4088_v8 = vsel %vm970_vm2, %v17634_v58, %v17633_v25  ;;  %v17642_v25 = vrot.slane %v17632_v32, 6  ;;  %v17643_v58 = vrot.slane %v12061_v43, 6  ;;  %v2179_v31 = vadd.f32 %v12120_v46, %v17567_v41 }
 0x328   : > { %v12123_v17 = vadd.f32 %v4088_v8, %v17636_v33  ;;  %v4216_v28 = vsel %vm1291_vm3, %v17639_v63, %v17638_v12  ;;  %v4344_v14 = vsel %vm1548_vm4, %v17641_v9, %v17640_v13  ;;  %v3184_v33 = vmax.f32 %v3056_v45, %v3152_v56  ;;  %v17645_v9 = vld [vmem:[#allocation46_spill] sm:$0xff] }
 0x329   : > { %v12143_v8 = vsel %vm1805_vm5, %v17643_v58, %v17642_v25  ;;  %v3499_v12 = vmax.f32 %v11894_v37, %v3467_v26  ;;  %v3373_v63 = vmax.f32 %v11728_v42, %v3341_v11  ;;  %v12150_v22 = vadd.f32 %v2988_v52, %v17644_v2  ;;  %v17648_v11 = vld [vmem:[#allocation249_spill] sm:$0xff]  ;;  %v17650_v26 = vld [vmem:[#allocation230_spill] sm:$0xff]  ;;  %v17651_v58 = vld [vmem:[#allocation35_spill] sm:$0xff] }
 0x32a   : > { %17637 = vst [vmem:[#allocation309_spill] sm:$0xff] %v12123_v17  ;;  %v12153_v13 = vadd.f32 %v3244_v6, %v17645_v9  ;;  %v12161_v45 = vmax.f32 %v3184_v33, %v3280_v18  ;;  %v2211_v25 = vmax.f32 %v17524_v35, %v2179_v31  ;;  %v12172_v6 = vpop.permute.xlu1 %2119  ;;  %v4860_v31 = vsel %vm469_vm0, %v11830_v40, 0  ;;  %v17649_v18 = vld [vmem:[#allocation288_spill] sm:$0xff]  ;;  %v17654_v52 = vld [vmem:[#allocation290_spill] sm:$0xff] }
 0x32b   : > { %v12165_v37 = vmax.f32 %v3499_v12, %v11279_v1  ;;  %v12168_v42 = vmax.f32 %v3373_v63, %v11540_v59  ;;  %17647 = vst [vmem:[#allocation311_spill] sm:$0xff] %v12172_v6  ;;  %v12184_v12 = vadd.f32 %v4216_v28, %v17651_v58  ;;  %v17652_v63 = vld [vmem:[#allocation114_spill] sm:$0xff]  ;;  %6843 = vmatpush3.bf16.msra.mxu1 %v4860_v31 }
 0x32c   : > { %v3342_v1 = vadd.f32 %v12161_v45, %v17649_v18  ;;  %v2403_v59 = vmax.f32 %v2211_v25, %v17650_v26  ;;  %v12187_v56 = vadd.f32 %v4344_v14, %v17652_v63  ;;  %v3468_v61 = vadd.f32 %v12161_v45, %v17654_v52  ;;  %v17655_v18 = vld [vmem:[#allocation250_spill] sm:$0xff]  ;;  %v17656_v14 = vld [vmem:[#allocation245_spill] sm:$0xff] }
 0x32d   : > { %v4037_v33 = vrot.slane %v12165_v37, 1  ;;  %v4165_v7 = vrot.slane %v12165_v37, 7  ;;  %v4293_v25 = vrot.slane %v12165_v37, 2  ;;  %v4421_v28 = vrot.slane %v12165_v37, 6  ;;  %v17666_v17 = vld [vmem:[#allocation254_spill] sm:$0xff] }
 0x32e   : > { %17653 = vst [vmem:[#allocation249_spill] sm:$0xff] %v12187_v56  ;;  %v2595_v9 = vmax.f32 %v2403_v59, %v17655_v18  ;;  %v3500_v31 = vmax.f32 %v11878_v19, %v3468_v61  ;;  %v17657_v63 = vrot.slane %v11793_v29, 1  ;;  %v17658_v52 = vrot.slane %v11793_v29, 7  ;;  %v17659_v18 = vld [vmem:[#allocation194_spill] sm:$0xff]  ;;  %v12211_v2 = vpop.permute.xlu1 %2495  ;;  %v17664_v56 = vld [vmem:[#allocation172_spill] sm:$0xff] }
 0x32f   : > { %v3421_v59 = vadd.f32 %v17656_v14, %v17659_v18  ;;  %17660 = vst [vmem:[#allocation230_spill] sm:$0xff] %v12211_v2  ;;  %v17662_v26 = vrot.slane %v11793_v29, 2  ;;  %v3374_v61 = vmax.f32 %v11730_v21, %v3342_v1  ;;  %v2562_v18 = vadd.f32 %v12211_v2, %v17517_v24  ;;  %v17668_v1 = vld [vmem:[#allocation54_spill] sm:$0xff] }
 0x330   : > { %v4076_v58 = vsel %vm970_vm2, %v17657_v63, %v4037_v33  ;;  %v4204_v40 = vsel %vm1291_vm3, %v17658_v52, %v4165_v7  ;;  %v17663_v63 = vld [vmem:[#allocation199_spill] sm:$0xff]  ;;  %v12225_v52 = vadd.f32 %v12161_v45, %v11886_v53  ;;  %v12239_v54 = vmax.f32 %v2595_v9, %v17668_v1 }
 0x331   : > { %v4100_v46 = vadd.f32 %v4076_v58, %v17661_v20  ;;  %v4332_v19 = vsel %vm1548_vm4, %v17662_v26, %v4293_v25  ;;  %v12221_v38 = vadd.f32 %v17664_v56, %v17663_v63  ;;  %v12230_v58 = vmax.f32 %v3500_v31, %v17666_v17  ;;  %v17671_v1 = vld [vmem:[#allocation179_spill] sm:$0xff] }
 0x332   : > { %17665 = vst [vmem:[#allocation250_spill] sm:$0xff] %v12225_v52  ;;  %v17667_v20 = vrot.slane %v11793_v29, 6  ;;  %v12243_v56 = vadd.f32 %v12172_v6, %v17517_v24  ;;  %v17669_v52 = vld [vmem:[#allocation94_spill] sm:$0xff]  ;;  %v2594_v17 = vmax.f32 %v17670_v47, %v2562_v18  ;;  %v12254_v43 = vmax.f32 %v3374_v61, %v17671_v1  ;;  %v17673_v18 = vld [vmem:[#allocation52_spill] sm:$0xff]  ;;  %v12271_v61 = vpop.permute.xlu1 %2315 }
 0x333   : > { %v4132_v53 = vmax.f32 %v11793_v29, %v4100_v46  ;;  %v4356_v2 = vadd.f32 %v4332_v19, %v17669_v52  ;;  %v3589_v31 = vpack.c.bf16 %v12230_v58, %v12165_v37  ;;  %v16250_v4 = vrot.slane %v12230_v58, 1  ;;  %v17672_v46 = vld [vmem:[#allocation137_spill] sm:$0xff]  ;;  %17675 = vst [vmem:[#allocation245_spill] sm:$0xff] %v12271_v61 }
 0x334   : > { %v12236_v26 = vsel %vm1805_vm5, %v17667_v20, %v4421_v28  ;;  %v12259_v19 = vmax.f32 %v2594_v17, %v17672_v46  ;;  %v4229_v20 = vadd.f32 %v4204_v40, %v17673_v18  ;;  %v17676_v46 = vld [vmem:[#allocation15_spill] sm:$0xff]  ;;  %v17677_v1 = vrot.slane %v12230_v58, 7 }
 0x335   : > { %v4260_v9 = vmax.f32 %v4132_v53, %v11924_v34  ;;  %6788 = vmatprep.mubr.msk.bf16.mxu1 %vm420_vm1, %v3589_v31  ;;  %v4075_v47 = vsel %vm970_vm2, %v4037_v33, %v16250_v4  ;;  %v17674_v34 = vrot.slane %v12230_v58, 2  ;;  %v2373_v4 = vadd.f32 %v12271_v61, %v17524_v35  ;;  %v17693_v61 = vld [vmem:[#allocation68_spill] sm:$0xff] }
 0x336   : > { %v4101_v31 = vadd.f32 %v4075_v47, %v17676_v46  ;;  %v16251_v24 = vrot.slane %v12259_v19, 1  ;;  %v4203_v17 = vsel %vm1291_vm3, %v4165_v7, %v17677_v1  ;;  %v17679_v47 = vld [vmem:[#allocation75_spill] sm:$0xff]  ;;  %v17681_v33 = vrot.slane %v12239_v54, 1 }
 0x337   : > { %v4331_v53 = vsel %vm1548_vm4, %v4293_v25, %v17674_v34  ;;  %v4388_v29 = vmax.f32 %v4260_v9, %v4356_v2  ;;  %v17678_v2 = vrot.slane %v12230_v58, 6  ;;  %v12293_v40 = vadd.f32 %v12161_v45, %v17679_v47  ;;  %v17685_v25 = vld [vmem:[#allocation23_spill] sm:$0xff]  ;;  %v17688_v47 = vld [vmem:[#allocation93_spill] sm:$0xff] }
 0x338   : > { %v4133_v34 = vmax.f32 %v12165_v37, %v4101_v31  ;;  %v2857_v37 = vsel %vm970_vm2, %v16251_v24, %v17681_v33  ;;  %v17682_v31 = vrot.slane %v12239_v54, 7  ;;  %v17683_v7 = vrot.slane %v12259_v19, 7 }
 0x339   : > { %v4459_v9 = vsel %vm1805_vm5, %v4421_v28, %v17678_v2  ;;  %17680 = vst [vmem:[#allocation172_spill] sm:$0xff] %v12293_v40  ;;  %v17684_v28 = vmax.f32 %v17607_v10, %v17608_v49  ;;  %v12313_v18 = vadd.f32 %v2857_v37, %v17685_v25  ;;  %v17686_v46 = vrot.slane %v12239_v54, 2 }
 0x33a   : > { %v2985_v1 = vsel %vm1291_vm3, %v17683_v7, %v17682_v31  ;;  %v17687_v52 = vrot.slane %v12259_v19, 2  ;;  %v4261_v24 = vmax.f32 %v4133_v34, %v4229_v20  ;;  %v4357_v40 = vadd.f32 %v4331_v53, %v17688_v47 }
 0x33b   : > { %v12310_v2 = vmax.f32 %v17684_v28, %v3421_v59  ;;  %v2212_v31 = vmax.f32 %v17518_v23, %v12243_v56  ;;  %v17689_v59 = vld [vmem:[#allocation216_spill] sm:$0xff]  ;;  %v12330_v28 = vpop.permute.xlu1 %2707  ;;  %v12333_v25 = vmax.f32 %v4388_v29, %v11932_v16  ;;  %v17695_v23 = vld [vmem:[#allocation53_spill] sm:$0xff] }
 0x33c   : > { %v3113_v33 = vsel %vm1548_vm4, %v17687_v52, %v17686_v46  ;;  %v17690_v7 = vmax.f32 %v17567_v41, %v17689_v59  ;;  %17691 = vst [vmem:[#allocation254_spill] sm:$0xff] %v12330_v28  ;;  %v12336_v52 = vadd.f32 %v2985_v1, %v17693_v61  ;;  %v4389_v20 = vmax.f32 %v4261_v24, %v4357_v40  ;;  %v17697_v46 = vld [vmem:[#allocation101_spill] sm:$0xff]  ;;  %v17698_v41 = vld [vmem:[#allocation127_spill] sm:$0xff]  ;;  %v17702_v40 = vld [vmem:[#allocation224_spill] sm:$0xff] }
 0x33d   : > { %17692 = vst [vmem:[#allocation54_spill] sm:$0xff] %v12333_v25  ;;  %v2759_v53 = vadd.f32 %v12330_v28, %v17524_v35  ;;  %v12341_v56 = vadd.f32 %v4203_v17, %v17695_v23  ;;  %v12344_v34 = vadd.f32 %v3113_v33, %v17697_v46  ;;  %v17700_v35 = vmax.f32 %v11937_v44, %v12106_v3  ;;  %v17704_v33 = vld [vmem:[#allocation209_spill] sm:$0xff]  ;;  %v17708_v24 = vld [vmem:[#allocation286_spill] sm:$0xff]  ;;  %v17710_v3 = vld [vmem:[#allocation283_spill] sm:$0xff] }
 0x33e   : > { %v12328_v37 = vmax.f32 %v17690_v7, %v2373_v4  ;;  %17694 = vst [vmem:[#allocation275_spill] sm:$0xff] %v12336_v52  ;;  %v12347_v4 = vadd.f32 %v4459_v9, %v17698_v41  ;;  %v12362_v1 = vadd.f32 %v12333_v25, %v17702_v40  ;;  %v12367_v59 = vadd.f32 %v12098_v51, %v17704_v33  ;;  %v17706_v7 = vld [vmem:[#allocation36_spill] sm:$0xff]  ;;  %v17707_v29 = vld [vmem:[#allocation289_spill] sm:$0xff]  ;;  %v17721_v9 = vld [vmem:[#allocation282_spill] sm:$0xff] }
 0x33f   : > { %17696 = vst [vmem:[#allocation179_spill] sm:$0xff] %v12341_v56  ;;  %v12358_v17 = vmax.f32 %v17700_v35, %v2759_v53  ;;  %v4219_v16 = vadd.f32 %v17707_v29, %v17706_v7  ;;  %v17709_v49 = vmax.f32 %v17632_v32, %v17708_v24  ;;  %v17711_v53 = vrot.slane %v17710_v3, 2  ;;  %v17712_v35 = vld [vmem:[#allocation284_spill] sm:$0xff]  ;;  %v12385_v7 = vpop.permute.xlu1 %2311  ;;  %v17719_v3 = vld [vmem:[#allocation287_spill] sm:$0xff]  ;;  %v17739_v52 = vld [vmem:[#allocation118_spill] sm:$0xff] }
 0x340   : > { %17699 = vst [vmem:[#allocation137_spill] sm:$0xff] %v12347_v4  ;;  %17703 = vst [vmem:[#allocation312_spill] sm:$0xff] %v12362_v1  ;;  %v17713_v41 = vrot.slane %v17712_v35, 2  ;;  %v17715_v33 = vld [vmem:[#allocation188_spill] sm:$0xff]  ;;  %v17722_v47 = vrot.slane %v17721_v9, 6  ;;  %v17723_v29 = vrot.slane %v11799_v50, 1 }
 0x341   : > { %17701 = vst [vmem:[#allocation216_spill] sm:$0xff] %v12358_v17  ;;  %17705 = vst [vmem:[#allocation313_spill] sm:$0xff] %v12367_v59  ;;  %v4249_v44 = vmax.f32 %v17709_v49, %v12184_v12  ;;  %v12389_v12 = vadd.f32 %v17656_v14, %v17715_v33  ;;  %v17717_v49 = vld [vmem:[#allocation291_spill] sm:$0xff]  ;;  %v17724_v46 = vrot.slane %v12358_v17, 1  ;;  %v17725_v61 = vrot.slane %v11799_v50, 7  ;;  %v17733_v59 = vld [vmem:[#allocation73_spill] sm:$0xff] }
 0x342   : > { %v4341_v40 = vsel %vm1548_vm4, %v17713_v41, %v17711_v53  ;;  %17714 = vst [vmem:[#allocation289_spill] sm:$0xff] %v12385_v7  ;;  %v17718_v24 = vmax.f32 %v17712_v35, %v17717_v49  ;;  %v17720_v53 = vrot.slane %v17712_v35, 6  ;;  %v17731_v28 = vrot.slane %v12358_v17, 2  ;;  %v17743_v25 = vld [vmem:[#allocation128_spill] sm:$0xff]  ;;  %v17744_v56 = vld [vmem:[#allocation130_spill] sm:$0xff] }
 0x343   : > { %17716 = vst [vmem:[#allocation286_spill] sm:$0xff] %v12389_v12  ;;  %v4377_v41 = vmax.f32 %v4249_v44, %v17719_v3  ;;  %v2852_v33 = vsel %vm970_vm2, %v17724_v46, %v17723_v29  ;;  %v17727_v3 = vld [vmem:[#allocation227_spill] sm:$0xff]  ;;  %v12445_v1 = vpop.permute.xlu1 %2683  ;;  %v4483_v4 = vadd.f32 %v11875_v36, %v17743_v25  ;;  %v17750_v36 = vmax.f32 %v11881_v57, %v11884_v15 }
 0x344   : > { %v4251_v32 = vmax.f32 %v17718_v24, %v4219_v16  ;;  %v4470_v23 = vsel %vm1805_vm5, %v17722_v47, %v17720_v53  ;;  %v17726_v16 = vrot.slane %v12358_v17, 7  ;;  %v12415_v49 = vadd.f32 %v17607_v10, %v17727_v3  ;;  %v17729_v24 = vld [vmem:[#allocation84_spill] sm:$0xff]  ;;  %v17732_v29 = vld [vmem:[#allocation143_spill] sm:$0xff]  ;;  %17741 = vst [vmem:[#allocation287_spill] sm:$0xff] %v12445_v1 }
 0x345   : > { %v4347_v47 = vadd.f32 %v4341_v40, %v17729_v24  ;;  %v17730_v53 = vrot.slane %v11799_v50, 2  ;;  %v2372_v12 = vadd.f32 %v12385_v7, %v17732_v29  ;;  %v17736_v40 = vrot.slane %v11799_v50, 6 }
 0x346   : > { %v2980_v44 = vsel %vm1291_vm3, %v17726_v16, %v17725_v61  ;;  %17728 = vst [vmem:[#allocation291_spill] sm:$0xff] %v12415_v49  ;;  %v17734_v61 = vrot.slane %v12239_v54, 6  ;;  %v17735_v16 = vrot.slane %v12259_v19, 6  ;;  %v17737_v24 = vrot.slane %v12358_v17, 6 }
 0x347   : > { %v3108_v46 = vsel %vm1548_vm4, %v17731_v28, %v17730_v53  ;;  %v3033_v6 = vadd.f32 %v2980_v44, %v17733_v59  ;;  %v4379_v28 = vmax.f32 %v4251_v32, %v4347_v47  ;;  %v17738_v53 = vld [vmem:[#allocation113_spill] sm:$0xff]  ;;  %v4475_v44 = vadd.f32 %v4470_v23, %v17739_v52  ;;  %v17740_v59 = vld [vmem:[#allocation26_spill] sm:$0xff]  ;;  %v17746_v47 = vld [vmem:[#allocation276_spill] sm:$0xff] }
 0x348   : > { %v3241_v10 = vsel %vm1805_vm5, %v17735_v16, %v17734_v61  ;;  %v3236_v3 = vsel %vm1805_vm5, %v17737_v24, %v17736_v40  ;;  %v4473_v49 = vadd.f32 %v12143_v8, %v17738_v53  ;;  %v12443_v7 = vadd.f32 %v2852_v33, %v17740_v59  ;;  %v17745_v24 = vld [vmem:[#allocation51_spill] sm:$0xff]  ;;  %v17927_v59 = vld [vmem:[#allocation25_spill] sm:$0xff] }
 0x349   : > { %v17742_v61 = vmax.f32 %v11799_v50, %v12011_v55  ;;  %v4485_v32 = vadd.f32 %v12236_v26, %v17744_v56  ;;  %v2753_v8 = vadd.f32 %v12445_v1, %v17745_v24  ;;  %v12458_v23 = vadd.f32 %v12098_v51, %v17746_v47  ;;  %v17753_v24 = vld [vmem:[#allocation108_spill] sm:$0xff]  ;;  %v17778_v50 = vld [vmem:[#allocation65_spill] sm:$0xff] }
 0x34a   : > { %v12460_v33 = vmax.f32 %v4377_v41, %v4473_v49  ;;  %v12462_v40 = vmax.f32 %v4379_v28, %v4475_v44  ;;  %v12471_v26 = vmax.f32 %v17750_v36, %v4483_v4  ;;  %v12476_v25 = vadd.f32 %v3108_v46, %v17753_v24  ;;  %v12496_v44 = vpop.permute.xlu1 %2507 }
 0x34b   : > { %v3065_v16 = vmax.f32 %v17742_v61, %v3033_v6  ;;  %v17749_v6 = vld [vmem:[#allocation43_spill] sm:$0xff]  ;;  %v12473_v56 = vmax.f32 %v4389_v20, %v4485_v32  ;;  %v12478_v52 = vmax.f32 %v2212_v31, %v2372_v12  ;;  %v17754_v41 = vmax.f32 %v11914_v0, %v17587_v62  ;;  %17759 = vst [vmem:[#allocation317_spill] sm:$0xff] %v12496_v44 }
 0x34c   : > { %17747 = vst [vmem:[#allocation143_spill] sm:$0xff] %v12460_v33  ;;  %17748 = vst [vmem:[#allocation51_spill] sm:$0xff] %v12462_v40  ;;  %v12466_v61 = vadd.f32 %v3241_v10, %v17749_v6  ;;  %v12488_v57 = vadd.f32 %v11730_v21, %v12445_v1  ;;  %v12492_v15 = vadd.f32 %v12462_v40, %v17663_v63  ;;  %v17762_v36 = vrot.slane %v17712_v35, 1  ;;  %v17769_v40 = vld [vmem:[#allocation20_spill] sm:$0xff]  ;;  %v17771_v35 = vld [vmem:[#allocation153_spill] sm:$0xff] }
 0x34d   : > { %v3193_v55 = vmax.f32 %v3065_v16, %v12014_v30  ;;  %17751 = vst [vmem:[#allocation314_spill] sm:$0xff] %v12471_v26  ;;  %17752 = vst [vmem:[#allocation315_spill] sm:$0xff] %v12473_v56  ;;  %v2785_v49 = vmax.f32 %v17754_v41, %v2753_v8  ;;  %v17755_v30 = vld [vmem:[#allocation63_spill] sm:$0xff]  ;;  %v17763_v41 = vrot.slane %v17721_v9, 1  ;;  %v17764_v10 = vrot.slane %v12259_v19, 1  ;;  %v17782_v1 = vld [vmem:[#allocation102_spill] sm:$0xff] }
 0x34e   : > { %v3289_v28 = vadd.f32 %v3236_v3, %v17755_v30  ;;  %17756 = vst [vmem:[#allocation316_spill] sm:$0xff] %v12492_v15  ;;  %v17765_v53 = vrot.slane %v12039_v60, 1  ;;  %v17767_v32 = vrot.slane %v12039_v60, 7  ;;  %v17774_v9 = vrot.slane %v12039_v60, 2  ;;  %v17784_v6 = vld [vmem:[#allocation204_spill] sm:$0xff] }
 0x34f   : > { %v2834_v12 = vrot.slane %v2785_v49, 1  ;;  %v2962_v46 = vrot.slane %v2785_v49, 7  ;;  %v3090_v62 = vrot.slane %v2785_v49, 2  ;;  %v3218_v0 = vrot.slane %v2785_v49, 6 }
 0x350   : > { %v2807_v3 = vpack.c.bf16 %v2785_v49, %v12039_v60  ;;  %v12499_v16 = vmax.f32 %v3193_v55, %v3289_v28  ;;  %v4086_v4 = vsel %vm970_vm2, %v17763_v41, %v17762_v36  ;;  %v17766_v28 = vrot.slane %v12259_v19, 7  ;;  %v17768_v41 = vld [vmem:[#allocation21_spill] sm:$0xff] }
 0x351   : > { %v2858_v63 = vsel %vm970_vm2, %v2834_v12, %v17764_v10  ;;  %v2859_v55 = vsel %vm970_vm2, %v17765_v53, %v2834_v12  ;;  %v2987_v36 = vsel %vm1291_vm3, %v17767_v32, %v2962_v46  ;;  %v17770_v10 = vld [vmem:[#allocation67_spill] sm:$0xff]  ;;  %v12531_v53 = vadd.f32 %v12471_v26, %v17771_v35 }
 0x352   : > { %v2986_v8 = vsel %vm1291_vm3, %v2962_v46, %v17766_v28  ;;  %v2897_v21 = vadd.f32 %v2859_v55, %v17768_v41  ;;  %v2898_v20 = vadd.f32 %v2858_v63, %v17769_v40  ;;  %6827 = vmatmul.mubr.msk.bf16.gmra.mxu0 %vm420_vm1, %v2807_v3  ;;  %v17773_v12 = vrot.slane %v12259_v19, 2  ;;  %v17781_v26 = vld [vmem:[#allocation99_spill] sm:$0xff] }
 0x353   : > { %v3027_v31 = vadd.f32 %v2986_v8, %v17770_v10  ;;  %17772 = vst [vmem:[#allocation318_spill] sm:$0xff] %v12531_v53  ;;  %v3115_v46 = vsel %vm1548_vm4, %v17774_v9, %v3090_v62  ;;  %v17775_v63 = vrot.slane %v12259_v19, 6  ;;  %v17776_v3 = vrot.slane %v12039_v60, 6 }
 0x354   : > { %v3114_v28 = vsel %vm1548_vm4, %v3090_v62, %v17773_v12  ;;  %v17777_v55 = vpack.c.bf16 %v12239_v54, %v12259_v19  ;;  %v2929_v12 = vmax.f32 %v12039_v60, %v2897_v21  ;;  %v2930_v35 = vmax.f32 %v2785_v49, %v2898_v20  ;;  %v17786_v21 = vld [vmem:[#allocation229_spill] sm:$0xff] }
 0x355   : > { %v3242_v32 = vsel %vm1805_vm5, %v3218_v0, %v17775_v63  ;;  %v3243_v8 = vsel %vm1805_vm5, %v17776_v3, %v3218_v0  ;;  %v3026_v9 = vadd.f32 %v2987_v36, %v17778_v50  ;;  %v17779_v62 = vmax.f32 %v12259_v19, %v12313_v18  ;;  %v12558_v63 = vpop.permute.xlu1 %2703  ;;  %v17783_v3 = vld [vmem:[#allocation136_spill] sm:$0xff]  ;;  %v17785_v18 = vld [vmem:[#allocation42_spill] sm:$0xff] }
 0x356   : > { %6830 = vmatprep.mubr.msk.bf16.mxu0 %vm420_vm1, %v17777_v55  ;;  %17780 = vst [vmem:[#allocation319_spill] sm:$0xff] %v12558_v63  ;;  %v3153_v15 = vadd.f32 %v3115_v46, %v17781_v26  ;;  %v3154_v0 = vadd.f32 %v3114_v28, %v17782_v1  ;;  %v3283_v30 = vadd.f32 %v3242_v32, %v17783_v3  ;;  %v17787_v28 = vld [vmem:[#allocation47_spill] sm:$0xff]  ;;  %v17789_v32 = vld [vmem:[#allocation5_spill] sm:$0xff]  ;;  %v17929_v41 = vrot.slane %v12239_v54, 2 }
 0x357   : > { %v3059_v47 = vmax.f32 %v17779_v62, %v3027_v31  ;;  %v12565_v55 = vadd.f32 %v12496_v44, %v17784_v6  ;;  %v3057_v60 = vmax.f32 %v2929_v12, %v12150_v22  ;;  %v3058_v49 = vmax.f32 %v2930_v35, %v3026_v9  ;;  %v17794_v9 = vld [vmem:[#allocation243_spill] sm:$0xff] }
 0x358   : > { %v2758_v19 = vadd.f32 %v12558_v63, %v17732_v29  ;;  %v3282_v31 = vadd.f32 %v3243_v8, %v17785_v18  ;;  %v3419_v36 = vadd.f32 %v12499_v16, %v17786_v21  ;;  %v12576_v46 = vadd.f32 %v12473_v56, %v17787_v28  ;;  %v17793_v8 = vld [vmem:[#allocation240_spill] sm:$0xff]  ;;  %v17833_v18 = vld [vmem:[#allocation17_spill] sm:$0xff]  ;;  %v17840_v1 = vld [vmem:[#allocation95_spill] sm:$0xff] }
 0x359   : > { %v3187_v20 = vmax.f32 %v3059_v47, %v12344_v34  ;;  %v12579_v6 = vadd.f32 %v4086_v4, %v17789_v32  ;;  %v3185_v62 = vmax.f32 %v3057_v60, %v3153_v15  ;;  %v3186_v22 = vmax.f32 %v3058_v49, %v3154_v0  ;;  %v17802_v49 = vld [vmem:[#allocation213_spill] sm:$0xff] }
 0x35a   : > { %17788 = vst [vmem:[#allocation204_spill] sm:$0xff] %v12576_v46  ;;  %v17791_v34 = vmax.f32 %v12087_v5, %v17648_v11  ;;  %v12590_v47 = vadd.f32 %v12003_v39, %v12496_v44  ;;  %v12594_v12 = vadd.f32 %v12499_v16, %v17793_v8  ;;  %v3549_v4 = vadd.f32 %v12499_v16, %v17794_v9  ;;  %v17803_v46 = vld [vmem:[#allocation219_spill] sm:$0xff] }
 0x35b   : > { %17790 = vst [vmem:[#allocation320_spill] sm:$0xff] %v12579_v6  ;;  %v12581_v35 = vmax.f32 %v3187_v20, %v3283_v30  ;;  %v12601_v0 = vmax.f32 %v3185_v62, %v12153_v13  ;;  %v12603_v5 = vmax.f32 %v3186_v22, %v3282_v31  ;;  %v17796_v20 = vld [vmem:[#allocation300_spill] sm:$0xff]  ;;  %v17798_v30 = vld [vmem:[#allocation162_spill] sm:$0xff]  ;;  %v17801_v22 = vld [vmem:[#allocation195_spill] sm:$0xff]  ;;  %v17806_v32 = vmax.f32 %v12310_v2, %v12221_v38 }
 0x35c   : > { %v12586_v29 = vmax.f32 %v17791_v34, %v2758_v19  ;;  %v17797_v34 = vmax.f32 %v17656_v14, %v12024_v27  ;;  %v12618_v13 = vadd.f32 %v12460_v33, %v17798_v30  ;;  %v17800_v31 = vld [vmem:[#allocation174_spill] sm:$0xff]  ;;  %v17804_v14 = vrot.slane %v12358_v17, 1  ;;  %v17811_v2 = vld [vmem:[#allocation255_spill] sm:$0xff] }
 0x35d   : > { %v3343_v62 = vadd.f32 %v12601_v0, %v17800_v31  ;;  %v12624_v11 = vadd.f32 %v12603_v5, %v17801_v22  ;;  %v3469_v60 = vadd.f32 %v12601_v0, %v17802_v49  ;;  %v3470_v27 = vadd.f32 %v12603_v5, %v17803_v46 }
 0x35e   : > { %17792 = vst [vmem:[#allocation321_spill] sm:$0xff] %v12586_v29  ;;  %v12614_v28 = vmax.f32 %v17797_v34, %v3419_v36  ;;  %17799 = vst [vmem:[#allocation300_spill] sm:$0xff] %v12618_v13  ;;  %v17805_v36 = vrot.slane %v12586_v29, 1  ;;  %v12641_v53 = vmax.f32 %v17806_v32, %v3549_v4  ;;  %v17808_v9 = vrot.slane %v12358_v17, 7  ;;  %v17830_v13 = vld [vmem:[#allocation138_spill] sm:$0xff] }
 0x35f   : > { %v3375_v15 = vmax.f32 %v12098_v51, %v3343_v62  ;;  %v3501_v6 = vmax.f32 %v12168_v42, %v3469_v60  ;;  %v17809_v33 = vrot.slane %v12586_v29, 7  ;;  %v3502_v38 = vmax.f32 %v12254_v43, %v3470_v27  ;;  %v17813_v42 = vld [vmem:[#allocation170_spill] sm:$0xff]  ;;  %v17814_v60 = vld [vmem:[#allocation145_spill] sm:$0xff] }
 0x360   : > { %v2853_v34 = vsel %vm970_vm2, %v17805_v36, %v17804_v14  ;;  %17807 = vst [vmem:[#allocation322_spill] sm:$0xff] %v12641_v53  ;;  %v17810_v36 = vld [vmem:[#allocation273_spill] sm:$0xff]  ;;  %v12658_v51 = vadd.f32 %v12581_v35, %v12558_v63  ;;  %v12662_v32 = vadd.f32 %v12473_v56, %v17811_v2  ;;  %v12666_v4 = vadd.f32 %v12603_v5, %v17813_v42  ;;  %v17819_v63 = vld [vmem:[#allocation226_spill] sm:$0xff]  ;;  %v17821_v2 = vld [vmem:[#allocation27_spill] sm:$0xff] }
 0x361   : > { %v2981_v14 = vsel %vm1291_vm3, %v17809_v33, %v17808_v9  ;;  %v3471_v30 = vadd.f32 %v12581_v35, %v17810_v36  ;;  %v3439_v62 = vmax.f32 %v3375_v15, %v17814_v60  ;;  %v17815_v33 = vld [vmem:[#allocation197_spill] sm:$0xff]  ;;  %v17817_v19 = vrot.slane %v12358_v17, 2  ;;  %v17822_v36 = vld [vmem:[#allocation72_spill] sm:$0xff] }
 0x362   : > { %17812 = vst [vmem:[#allocation323_spill] sm:$0xff] %v12662_v32  ;;  %v12670_v9 = vmax.f32 %v3501_v6, %v17815_v33  ;;  %v17818_v43 = vrot.slane %v12586_v29, 2  ;;  %v12679_v44 = vmax.f32 %v3502_v38, %v17819_v63  ;;  %v12682_v56 = vadd.f32 %v2853_v34, %v17821_v2  ;;  %v17826_v32 = vld [vmem:[#allocation228_spill] sm:$0xff] }
 0x363   : > { %v3032_v46 = vadd.f32 %v2981_v14, %v17822_v36  ;;  %v17823_v15 = vrot.slane %v12358_v17, 6  ;;  %v17824_v6 = vrot.slane %v12586_v29, 6  ;;  %v3503_v33 = vmax.f32 %v3439_v62, %v3471_v30 }
 0x364   : > { %17816 = vst [vmem:[#allocation145_spill] sm:$0xff] %v12670_v9  ;;  %v3109_v27 = vsel %vm1548_vm4, %v17818_v43, %v17817_v19  ;;  %17820 = vst [vmem:[#allocation197_spill] sm:$0xff] %v12679_v44  ;;  %v4039_v49 = vrot.slane %v12670_v9, 1  ;;  %v4167_v19 = vrot.slane %v12670_v9, 7  ;;  %v4295_v63 = vrot.slane %v12670_v9, 2  ;;  %v17825_v43 = vld [vmem:[#allocation105_spill] sm:$0xff] }
 0x365   : > { %v3237_v60 = vsel %vm1805_vm5, %v17824_v6, %v17823_v15  ;;  %v4040_v38 = vrot.slane %v12679_v44, 1  ;;  %v4168_v34 = vrot.slane %v12679_v44, 7  ;;  %v4296_v14 = vrot.slane %v12679_v44, 2 }
 0x366   : > { %v12698_v21 = vadd.f32 %v3109_v27, %v17825_v43  ;;  %v12701_v42 = vmax.f32 %v3503_v33, %v17826_v32  ;;  %v17828_v30 = vrot.slane %v12230_v58, 1  ;;  %v17829_v15 = vrot.slane %v12230_v58, 7  ;;  %v17831_v27 = vld [vmem:[#allocation14_spill] sm:$0xff]  ;;  %v17838_v43 = vld [vmem:[#allocation179_spill] sm:$0xff] }
 0x367   : > { %v3288_v8 = vadd.f32 %v3237_v60, %v17830_v13  ;;  %v4073_v22 = vsel %vm970_vm2, %v4039_v49, %v4040_v38  ;;  %v4201_v32 = vsel %vm1291_vm3, %v4167_v19, %v4168_v34  ;;  %v17832_v33 = vmax.f32 %v12358_v17, %v12443_v7  ;;  %v17837_v17 = vld [vmem:[#allocation16_spill] sm:$0xff] }
 0x368   : > { %17827 = vst [vmem:[#allocation226_spill] sm:$0xff] %v12701_v42  ;;  %v4074_v62 = vsel %vm970_vm2, %v17828_v30, %v4039_v49  ;;  %v4202_v6 = vsel %vm1291_vm3, %v17829_v15, %v4167_v19  ;;  %v16283_v30 = vrot.slane %v12701_v42, 1  ;;  %v4103_v24 = vadd.f32 %v4073_v22, %v17833_v18 }
 0x369   : > { %v4102_v31 = vadd.f32 %v4074_v62, %v17831_v27  ;;  %v3064_v3 = vmax.f32 %v17832_v33, %v3032_v46  ;;  %v17834_v15 = vrot.slane %v12230_v58, 2  ;;  %v4423_v49 = vrot.slane %v12670_v9, 6  ;;  %v17835_v27 = vld [vmem:[#allocation56_spill] sm:$0xff] }
 0x36a   : > { %v4231_v13 = vadd.f32 %v4202_v6, %v17835_v27  ;;  %v4329_v7 = vsel %vm1548_vm4, %v4295_v63, %v4296_v14  ;;  %v4072_v46 = vsel %vm970_vm2, %v4040_v38, %v16283_v30  ;;  %v4135_v22 = vmax.f32 %v12670_v9, %v4103_v24  ;;  %v17839_v27 = vld [vmem:[#allocation96_spill] sm:$0xff] }
 0x36b   : > { %v4330_v60 = vsel %vm1548_vm4, %v17834_v15, %v4295_v63  ;;  %v4134_v62 = vmax.f32 %v12230_v58, %v4102_v31  ;;  %v17836_v15 = vld [vmem:[#allocation57_spill] sm:$0xff]  ;;  %v4104_v31 = vadd.f32 %v4072_v46, %v17837_v17  ;;  %v4359_v26 = vadd.f32 %v4329_v7, %v17840_v1  ;;  %v17844_v7 = vld [vmem:[#allocation132_spill] sm:$0xff] }
 0x36c   : > { %v4232_v18 = vadd.f32 %v4201_v32, %v17836_v15  ;;  %v4358_v19 = vadd.f32 %v4330_v60, %v17839_v27  ;;  %v4263_v63 = vmax.f32 %v4135_v22, %v4231_v13  ;;  %v17841_v36 = vrot.slane %v12701_v42, 2  ;;  %v17868_v15 = vld [vmem:[#allocation176_spill] sm:$0xff] }
 0x36d   : > { %v4262_v6 = vmax.f32 %v4134_v62, %v17838_v43  ;;  %v4424_v24 = vrot.slane %v12679_v44, 6  ;;  %v16284_v30 = vrot.slane %v12701_v42, 6  ;;  %v4136_v32 = vmax.f32 %v12679_v44, %v4104_v31  ;;  %v12762_v31 = vpop.permute.xlu1 %2503  ;;  %v17872_v44 = vld [vmem:[#allocation184_spill] sm:$0xff] }
 0x36e   : > { %v4328_v38 = vsel %vm1548_vm4, %v4296_v14, %v17841_v36  ;;  %v17842_v46 = vrot.slane %v12230_v58, 6  ;;  %v3192_v60 = vmax.f32 %v3064_v3, %v12476_v25  ;;  %v17843_v13 = vrot.slane %v12701_v42, 7  ;;  %17845 = vst [vmem:[#allocation228_spill] sm:$0xff] %v12762_v31  ;;  %v17846_v58 = vld [vmem:[#allocation98_spill] sm:$0xff]  ;;  %v17847_v3 = vld [vmem:[#allocation137_spill] sm:$0xff] }
 0x36f   : > { %v4390_v33 = vmax.f32 %v4262_v6, %v4358_v19  ;;  %v4391_v36 = vmax.f32 %v4263_v63, %v4359_v26  ;;  %v4457_v14 = vsel %vm1805_vm5, %v4423_v49, %v4424_v24  ;;  %v4264_v19 = vmax.f32 %v4136_v32, %v4232_v18  ;;  %v17851_v18 = vld [vmem:[#allocation173_spill] sm:$0xff] }
 0x370   : > { %v4458_v43 = vsel %vm1805_vm5, %v17842_v46, %v4423_v49  ;;  %v4200_v62 = vsel %vm1291_vm3, %v4168_v34, %v17843_v13  ;;  %v4360_v6 = vadd.f32 %v4328_v38, %v17846_v58  ;;  %v4456_v25 = vsel %vm1805_vm5, %v4424_v24, %v16284_v30  ;;  %v17849_v34 = vld [vmem:[#allocation129_spill] sm:$0xff]  ;;  %v17852_v24 = vld [vmem:[#allocation60_spill] sm:$0xff] }
 0x371   : > { %v4487_v22 = vadd.f32 %v4458_v43, %v17844_v7  ;;  %v12770_v46 = vmax.f32 %v4390_v33, %v17847_v3  ;;  %v4488_v26 = vadd.f32 %v4457_v14, %v17849_v34  ;;  %v12775_v49 = vmax.f32 %v3192_v60, %v3288_v8  ;;  %v17855_v14 = vld [vmem:[#allocation133_spill] sm:$0xff]  ;;  %v17859_v34 = vld [vmem:[#allocation259_spill] sm:$0xff] }
 0x372   : > { %v4055_v43 = vrot.slane %v12641_v53, 1  ;;  %v4392_v13 = vmax.f32 %v4264_v19, %v4360_v6  ;;  %v4183_v32 = vrot.slane %v12641_v53, 7  ;;  %v4311_v7 = vrot.slane %v12641_v53, 2  ;;  %v17858_v6 = vld [vmem:[#allocation54_spill] sm:$0xff] }
 0x373   : > { %17848 = vst [vmem:[#allocation179_spill] sm:$0xff] %v12770_v46  ;;  %v12773_v63 = vmax.f32 %v4391_v36, %v4487_v22  ;;  %v4548_v38 = vadd.f32 %v12770_v46, %v17851_v18  ;;  %v12783_v30 = vadd.f32 %v4200_v62, %v17852_v24  ;;  %v17854_v36 = vld [vmem:[#allocation182_spill] sm:$0xff]  ;;  %v12791_v60 = vadd.f32 %v12499_v16, %v12762_v31  ;;  %v17861_v18 = vld [vmem:[#allocation257_spill] sm:$0xff] }
 0x374   : > { %v2564_v8 = vadd.f32 %v12762_v31, %v17854_v36  ;;  %v12794_v22 = vadd.f32 %v4456_v25, %v17855_v14  ;;  %v12796_v19 = vmax.f32 %v4392_v13, %v4488_v26  ;;  %v3548_v62 = vadd.f32 %v12775_v49, %v17859_v34  ;;  %v17860_v24 = vld [vmem:[#allocation270_spill] sm:$0xff]  ;;  %v17871_v34 = vld [vmem:[#allocation256_spill] sm:$0xff] }
 0x375   : > { %17850 = vst [vmem:[#allocation137_spill] sm:$0xff] %v12773_v63  ;;  %17853 = vst [vmem:[#allocation324_spill] sm:$0xff] %v12783_v30  ;;  %v4580_v3 = vmax.f32 %v17858_v6, %v4548_v38  ;;  %v17862_v1 = vrot.slane %v17861_v18, 1  ;;  %v17863_v58 = vrot.slane %v17861_v18, 7  ;;  %v17864_v26 = vrot.slane %v17861_v18, 2  ;;  %v12815_v38 = vpop.permute.xlu1 %2699  ;;  %v17866_v14 = vld [vmem:[#allocation158_spill] sm:$0xff] }
 0x376   : > { %17856 = vst [vmem:[#allocation182_spill] sm:$0xff] %v12794_v22  ;;  %17857 = vst [vmem:[#allocation325_spill] sm:$0xff] %v12796_v19  ;;  %v12819_v33 = vadd.f32 %v12773_v63, %v17866_v14  ;;  %v4550_v17 = vadd.f32 %v12796_v19, %v17868_v15  ;;  %v12830_v9 = vadd.f32 %v12773_v63, %v17872_v44  ;;  %v17875_v6 = vld [vmem:[#allocation265_spill] sm:$0xff]  ;;  %v17879_v30 = vld [vmem:[#allocation79_spill] sm:$0xff]  ;;  %v4439_v44 = vrot.slane %v12641_v53, 6 }
 0x377   : > { %v4057_v36 = vsel %vm970_vm2, %v4055_v43, %v17862_v1  ;;  %v4185_v25 = vsel %vm1291_vm3, %v4183_v32, %v17863_v58  ;;  %v4313_v13 = vsel %vm1548_vm4, %v4311_v7, %v17864_v26  ;;  %17865 = vst [vmem:[#allocation270_spill] sm:$0xff] %v12815_v38  ;;  %v17869_v1 = vld [vmem:[#allocation304_spill] sm:$0xff]  ;;  %v3418_v58 = vadd.f32 %v12775_v49, %v17871_v34  ;;  %v17878_v14 = vld [vmem:[#allocation33_spill] sm:$0xff] }
 0x378   : > { %17867 = vst [vmem:[#allocation326_spill] sm:$0xff] %v12819_v33  ;;  %v12824_v27 = vmax.f32 %v4580_v3, %v17869_v1  ;;  %17873 = vst [vmem:[#allocation327_spill] sm:$0xff] %v12830_v9  ;;  %v17874_v26 = vld [vmem:[#allocation308_spill] sm:$0xff]  ;;  %v4119_v33 = vadd.f32 %v4057_v36, %v17878_v14  ;;  %v4248_v10 = vadd.f32 %v4185_v25, %v17879_v30  ;;  %v17880_v3 = vld [vmem:[#allocation307_spill] sm:$0xff] }
 0x379   : > { %v17876_v31 = vmax.f32 %v17874_v26, %v17875_v6  ;;  %v4582_v15 = vmax.f32 %v12770_v46, %v4550_v17  ;;  %v17884_v17 = vld [vmem:[#allocation312_spill] sm:$0xff]  ;;  %v17886_v1 = vld [vmem:[#allocation279_spill] sm:$0xff]  ;;  %v17895_v9 = vld [vmem:[#allocation78_spill] sm:$0xff]  ;;  %v17917_v46 = vrot.slane %v12586_v29, 2 }
 0x37a   : > { %17870 = vst [vmem:[#allocation304_spill] sm:$0xff] %v12824_v27  ;;  %v17881_v27 = vld [vmem:[#allocation238_spill] sm:$0xff]  ;;  %v17887_v30 = vmax.f32 %v12003_v39, %v17886_v1  ;;  %v17891_v39 = vrot.slane %v17861_v18, 6 }
 0x37b   : > { %v12835_v22 = vmax.f32 %v17876_v31, %v3548_v62  ;;  %v12844_v34 = vadd.f32 %v12775_v49, %v17881_v27  ;;  %v4151_v31 = vmax.f32 %v12641_v53, %v4119_v33  ;;  %v17882_v62 = vld [vmem:[#allocation309_spill] sm:$0xff]  ;;  %v12854_v26 = vmax.f32 %v4582_v15, %v17884_v17  ;;  %v17893_v1 = vld [vmem:[#allocation30_spill] sm:$0xff] }
 0x37c   : > { %v17883_v36 = vmax.f32 %v17861_v18, %v17882_v62  ;;  %v12859_v14 = vmax.f32 %v17887_v30, %v3418_v58  ;;  %v17890_v15 = vld [vmem:[#allocation249_spill] sm:$0xff]  ;;  %v4441_v30 = vsel %vm1805_vm5, %v4439_v44, %v17891_v39  ;;  %v12876_v58 = vpop.permute.xlu1 %2695 }
 0x37d   : > { %17877 = vst [vmem:[#allocation308_spill] sm:$0xff] %v12835_v22  ;;  %17885 = vst [vmem:[#allocation265_spill] sm:$0xff] %v12854_v26  ;;  %v17888_v33 = vrot.slane %v12835_v22, 1  ;;  %v17889_v62 = vrot.slane %v12835_v22, 7  ;;  %v17901_v39 = vrot.slane %v12835_v22, 6  ;;  %v17916_v26 = vrot.slane %v12586_v29, 7 }
 0x37e   : > { %v4280_v25 = vmax.f32 %v17883_v36, %v4248_v10  ;;  %17892 = vst [vmem:[#allocation307_spill] sm:$0xff] %v12876_v58 }
 0x37f   : > { %v4058_v6 = vsel %vm970_vm2, %v17888_v33, %v4055_v43  ;;  %v4186_v10 = vsel %vm1291_vm3, %v17889_v62, %v4183_v32  ;;  %v17896_v43 = vrot.slane %v12835_v22, 2  ;;  %v17897_v32 = vld [vmem:[#allocation111_spill] sm:$0xff]  ;;  %v12896_v18 = vsel %vm1805_vm5, %v17901_v39, %v4439_v44  ;;  %v17913_v44 = vld [vmem:[#allocation166_spill] sm:$0xff] }
 0x380   : > { %v4408_v36 = vmax.f32 %v4280_v25, %v17890_v15  ;;  %v12879_v17 = vadd.f32 %v4058_v6, %v17893_v1  ;;  %v4247_v27 = vadd.f32 %v4186_v10, %v17895_v9  ;;  %v12887_v62 = vadd.f32 %v4313_v13, %v17897_v32  ;;  %v17899_v25 = vld [vmem:[#allocation112_spill] sm:$0xff]  ;;  %17902 = vst [vmem:[#allocation249_spill] sm:$0xff] %v12896_v18  ;;  %v17903_v6 = vld [vmem:[#allocation62_spill] sm:$0xff] }
 0x381   : > { %v4314_v33 = vsel %vm1548_vm4, %v17896_v43, %v4311_v7  ;;  %v4504_v1 = vadd.f32 %v4441_v30, %v17903_v6  ;;  %v17904_v10 = vld [vmem:[#allocation140_spill] sm:$0xff]  ;;  %v12905_v7 = vadd.f32 %v12603_v5, %v12815_v38  ;;  %v2596_v13 = vmax.f32 %v12478_v52, %v2564_v8  ;;  %v17906_v43 = vld [vmem:[#allocation141_spill] sm:$0xff] }
 0x382   : > { %17894 = vst [vmem:[#allocation309_spill] sm:$0xff] %v12879_v17  ;;  %17898 = vst [vmem:[#allocation312_spill] sm:$0xff] %v12887_v62  ;;  %v12890_v15 = vadd.f32 %v4314_v33, %v17899_v25  ;;  %v2757_v9 = vadd.f32 %v12815_v38, %v17904_v10  ;;  %v12901_v53 = vmax.f32 %v4151_v31, %v4247_v27  ;;  %v17910_v27 = vld [vmem:[#allocation294_spill] sm:$0xff]  ;;  %v17912_v8 = vld [vmem:[#allocation181_spill] sm:$0xff]  ;;  %v17915_v25 = vrot.slane %v12586_v29, 1 }
 0x383   : > { %v2756_v33 = vadd.f32 %v12876_v58, %v17906_v43  ;;  %v12912_v39 = vmax.f32 %v4408_v36, %v4504_v1  ;;  %v17908_v30 = vmax.f32 %v12328_v37, %v12565_v55  ;;  %v3345_v31 = vadd.f32 %v12581_v35, %v17910_v27  ;;  %v17914_v6 = vld [vmem:[#allocation289_spill] sm:$0xff]  ;;  %v17920_v62 = vld [vmem:[#allocation71_spill] sm:$0xff] }
 0x384   : > { %17900 = vst [vmem:[#allocation279_spill] sm:$0xff] %v12890_v15  ;;  %17905 = vst [vmem:[#allocation140_spill] sm:$0xff] %v12901_v53  ;;  %v12927_v43 = vadd.f32 %v12775_v49, %v17912_v8  ;;  %v12931_v36 = vadd.f32 %v12601_v0, %v17913_v44  ;;  %v12942_v32 = vadd.f32 %v12581_v35, %v17914_v6  ;;  %v17919_v8 = vld [vmem:[#allocation24_spill] sm:$0xff]  ;;  %v17922_v15 = vrot.slane %v12239_v54, 1 }
 0x385   : > { %17907 = vst [vmem:[#allocation141_spill] sm:$0xff] %v12912_v39  ;;  %v12917_v10 = vmax.f32 %v17908_v30, %v2757_v9  ;;  %v12923_v52 = vmax.f32 %v2596_v13, %v2756_v33  ;;  %v17918_v39 = vrot.slane %v12586_v29, 6 }
 0x387   : > { %17909 = vst [vmem:[#allocation328_spill] sm:$0xff] %v12917_v10  ;;  %17911 = vst [vmem:[#allocation329_spill] sm:$0xff] %v12923_v52  ;;  %v2838_v37 = vrot.slane %v12917_v10, 1  ;;  %v2966_v55 = vrot.slane %v12917_v10, 7  ;;  %v3094_v9 = vrot.slane %v12917_v10, 2  ;;  %v3222_v1 = vrot.slane %v12917_v10, 6 }
 0x388   : > { %v2837_v30 = vrot.slane %v12923_v52, 1  ;;  %v2965_v13 = vrot.slane %v12923_v52, 7  ;;  %v3093_v33 = vrot.slane %v12923_v52, 2  ;;  %v3221_v18 = vrot.slane %v12923_v52, 6 }
 0x389   : > { %v2854_v38 = vsel %vm970_vm2, %v2838_v37, %v17915_v25  ;;  %v2982_v44 = vsel %vm1291_vm3, %v2966_v55, %v17916_v26  ;;  %v3110_v63 = vsel %vm1548_vm4, %v3094_v9, %v17917_v46  ;;  %v3238_v6 = vsel %vm1805_vm5, %v3222_v1, %v17918_v39  ;;  %v17921_v25 = vld [vmem:[#allocation106_spill] sm:$0xff] }
 0x38a   : > { %v2902_v27 = vadd.f32 %v2854_v38, %v17919_v8  ;;  %v3031_v53 = vadd.f32 %v2982_v44, %v17920_v62  ;;  %v3158_v19 = vadd.f32 %v3110_v63, %v17921_v25  ;;  %v2855_v26 = vsel %vm970_vm2, %v2837_v30, %v2838_v37  ;;  %v17925_v25 = vld [vmem:[#allocation59_spill] sm:$0xff]  ;;  %v17926_v37 = vld [vmem:[#allocation22_spill] sm:$0xff] }
 0x38b   : > { %v2856_v46 = vsel %vm970_vm2, %v17922_v15, %v2837_v30  ;;  %v2983_v17 = vsel %vm1291_vm3, %v2965_v13, %v2966_v55  ;;  %v17923_v39 = vrot.slane %v12239_v54, 7  ;;  %v17924_v63 = vmax.f32 %v12586_v29, %v12682_v56  ;;  %v17928_v30 = vld [vmem:[#allocation70_spill] sm:$0xff] }
 0x38c   : > { %v3287_v62 = vadd.f32 %v3238_v6, %v17925_v25  ;;  %v2900_v50 = vadd.f32 %v2856_v46, %v17926_v37  ;;  %v2901_v2 = vadd.f32 %v2855_v26, %v17927_v59  ;;  %v2934_v15 = vmax.f32 %v12917_v10, %v2902_v27  ;;  %v17930_v46 = vld [vmem:[#allocation69_spill] sm:$0xff]  ;;  %v17931_v27 = vld [vmem:[#allocation104_spill] sm:$0xff] }
 0x38d   : > { %v2984_v38 = vsel %vm1291_vm3, %v17923_v39, %v2965_v13  ;;  %v3063_v44 = vmax.f32 %v17924_v63, %v3031_v53  ;;  %v3030_v8 = vadd.f32 %v2983_v17, %v17928_v30  ;;  %v3111_v55 = vsel %vm1548_vm4, %v3093_v33, %v3094_v9  ;;  %v17937_v25 = vld [vmem:[#allocation272_spill] sm:$0xff]  ;;  %v17938_v30 = vld [vmem:[#allocation142_spill] sm:$0xff] }
 0x38e   : > { %v3112_v13 = vsel %vm1548_vm4, %v17929_v41, %v3093_v33  ;;  %v2932_v53 = vmax.f32 %v12239_v54, %v2900_v50  ;;  %v2933_v6 = vmax.f32 %v12923_v52, %v2901_v2  ;;  %v3029_v26 = vadd.f32 %v2984_v38, %v17930_v46  ;;  %v17933_v33 = vld [vmem:[#allocation275_spill] sm:$0xff] }
 0x38f   : > { %v3191_v56 = vmax.f32 %v3063_v44, %v12698_v21  ;;  %v3062_v39 = vmax.f32 %v2934_v15, %v3030_v8  ;;  %v3156_v63 = vadd.f32 %v3112_v13, %v17931_v27  ;;  %v3239_v17 = vsel %vm1805_vm5, %v3221_v18, %v3222_v1  ;;  %v17934_v50 = vld [vmem:[#allocation103_spill] sm:$0xff] }
 0x390   : > { %v17932_v9 = vrot.slane %v12239_v54, 6  ;;  %v3060_v21 = vmax.f32 %v2932_v53, %v17933_v33  ;;  %v3061_v44 = vmax.f32 %v2933_v6, %v3029_v26  ;;  %v3157_v10 = vadd.f32 %v3111_v55, %v17934_v50  ;;  %v17935_v52 = vld [vmem:[#allocation139_spill] sm:$0xff]  ;;  %v17941_v55 = vld [vmem:[#allocation232_spill] sm:$0xff]  ;;  %v17942_v26 = vld [vmem:[#allocation313_spill] sm:$0xff] }
 0x391   : > { %v3319_v41 = vmax.f32 %v3191_v56, %v3287_v62  ;;  %v3190_v2 = vmax.f32 %v3062_v39, %v3158_v19  ;;  %v17936_v8 = vld [vmem:[#allocation135_spill] sm:$0xff]  ;;  %v3377_v13 = vmax.f32 %v12601_v0, %v3345_v31  ;;  %v17943_v39 = vmax.f32 %v12614_v28, %v17860_v24 }
 0x392   : > { %v3240_v29 = vsel %vm1805_vm5, %v17932_v9, %v3221_v18  ;;  %v3286_v15 = vadd.f32 %v3239_v17, %v17936_v8  ;;  %v3188_v27 = vmax.f32 %v3060_v21, %v3156_v63  ;;  %v3189_v54 = vmax.f32 %v3061_v44, %v3157_v10  ;;  %v17940_v53 = vld [vmem:[#allocation311_spill] sm:$0xff]  ;;  %v17947_v21 = vld [vmem:[#allocation230_spill] sm:$0xff]  ;;  %v18004_v8 = vld [vmem:[#allocation76_spill] sm:$0xff] }
 0x393   : > { %v3285_v38 = vadd.f32 %v3240_v29, %v17935_v52  ;;  %v3547_v1 = vadd.f32 %v3319_v41, %v17937_v25  ;;  %v17939_v18 = vmax.f32 %v12161_v45, %v12624_v11  ;;  %v3349_v6 = vadd.f32 %v3319_v41, %v17940_v53  ;;  %v17945_v9 = vld [vmem:[#allocation83_spill] sm:$0xff]  ;;  %v18003_v53 = vld [vmem:[#allocation74_spill] sm:$0xff] }
 0x394   : > { %v3318_v56 = vmax.f32 %v3190_v2, %v3286_v15  ;;  %v3417_v19 = vadd.f32 %v3319_v41, %v17941_v55  ;;  %v3441_v29 = vmax.f32 %v3377_v13, %v17942_v26  ;;  %v3316_v63 = vmax.f32 %v3188_v27, %v12466_v61  ;;  %v17948_v2 = vld [vmem:[#allocation177_spill] sm:$0xff]  ;;  %v17949_v13 = vld [vmem:[#allocation206_spill] sm:$0xff] }
 0x395   : > { %v3440_v62 = vmax.f32 %v17939_v18, %v17938_v30  ;;  %v13017_v31 = vmax.f32 %v17943_v39, %v3547_v1  ;;  %v3317_v10 = vmax.f32 %v3189_v54, %v3285_v38  ;;  %v3383_v17 = vmax.f32 %v3319_v41, %v12594_v12  ;;  %v17946_v30 = vld [vmem:[#allocation171_spill] sm:$0xff]  ;;  %v17951_v38 = vld [vmem:[#allocation245_spill] sm:$0xff]  ;;  %v17955_v27 = vld [vmem:[#allocation250_spill] sm:$0xff] }
 0x396   : > { %v3348_v45 = vadd.f32 %v3318_v56, %v17945_v9  ;;  %v3382_v11 = vmax.f32 %v3318_v56, %v12927_v43  ;;  %v3416_v33 = vadd.f32 %v3318_v56, %v17946_v30  ;;  %v3475_v44 = vadd.f32 %v3319_v41, %v17947_v21  ;;  %v17952_v54 = vld [vmem:[#allocation175_spill] sm:$0xff]  ;;  %v17956_v55 = vld [vmem:[#allocation221_spill] sm:$0xff] }
 0x397   : > { %17944 = vst [vmem:[#allocation275_spill] sm:$0xff] %v13017_v31  ;;  %v3346_v15 = vadd.f32 %v3316_v63, %v17948_v2  ;;  %v3347_v18 = vadd.f32 %v3317_v10, %v17949_v13  ;;  %v3381_v28 = vmax.f32 %v3317_v10, %v3349_v6  ;;  %v17950_v24 = vmax.f32 %v12499_v16, %v17796_v20  ;;  %v18001_v13 = vld [vmem:[#allocation72_spill] sm:$0xff] }
 0x398   : > { %v3380_v12 = vmax.f32 %v3316_v63, %v3348_v45  ;;  %v3414_v1 = vadd.f32 %v3316_v63, %v17951_v38  ;;  %v3415_v43 = vadd.f32 %v3317_v10, %v17952_v54  ;;  %v17953_v6 = vmax.f32 %v12775_v49, %v17880_v3  ;;  %v18000_v54 = vld [vmem:[#allocation70_spill] sm:$0xff] }
 0x399   : > { %v3449_v61 = vmax.f32 %v17950_v24, %v3417_v19  ;;  %v3378_v26 = vmax.f32 %v12603_v5, %v3346_v15  ;;  %v3379_v41 = vmax.f32 %v12581_v35, %v3347_v18  ;;  %v3445_v39 = vmax.f32 %v3381_v28, %v12942_v32  ;;  %v17954_v24 = vld [vmem:[#allocation120_spill] sm:$0xff]  ;;  %v17957_v15 = vld [vmem:[#allocation233_spill] sm:$0xff] }
 0x39a   : > { %v3448_v25 = vmax.f32 %v17953_v6, %v3416_v33  ;;  %v3444_v16 = vmax.f32 %v3380_v12, %v12666_v4  ;;  %v3446_v20 = vmax.f32 %v3382_v11, %v3414_v1  ;;  %v3447_v19 = vmax.f32 %v3383_v17, %v3415_v43  ;;  %v17958_v33 = vld [vmem:[#allocation286_spill] sm:$0xff]  ;;  %v17960_v1 = vld [vmem:[#allocation291_spill] sm:$0xff]  ;;  %v17961_v43 = vld [vmem:[#allocation208_spill] sm:$0xff] }
 0x39b   : > { %v3472_v45 = vadd.f32 %v3316_v63, %v17954_v24  ;;  %v3442_v21 = vmax.f32 %v3378_v26, %v17955_v27  ;;  %v3443_v38 = vmax.f32 %v3379_v41, %v12931_v36  ;;  %v3473_v5 = vadd.f32 %v3317_v10, %v17956_v55  ;;  %v17959_v12 = vld [vmem:[#allocation310_spill] sm:$0xff]  ;;  %v17997_v55 = vld [vmem:[#allocation65_spill] sm:$0xff] }
 0x39c   : > { %v3474_v35 = vadd.f32 %v3318_v56, %v17957_v15  ;;  %v3508_v32 = vmax.f32 %v3444_v16, %v12844_v34  ;;  %v3509_v49 = vmax.f32 %v3445_v39, %v12791_v60  ;;  %v3510_v3 = vmax.f32 %v3446_v20, %v12590_v47  ;;  %v17962_v34 = vld [vmem:[#allocation254_spill] sm:$0xff]  ;;  %v17963_v60 = vld [vmem:[#allocation248_spill] sm:$0xff]  ;;  %v17964_v47 = vld [vmem:[#allocation241_spill] sm:$0xff] }
 0x39d   : > { %v3504_v18 = vmax.f32 %v3440_v62, %v3472_v45  ;;  %v3505_v4 = vmax.f32 %v3441_v29, %v3473_v5  ;;  %v3507_v17 = vmax.f32 %v3443_v38, %v3475_v44  ;;  %v3511_v28 = vmax.f32 %v3447_v19, %v17958_v33  ;;  %v17967_v38 = vld [vmem:[#allocation268_spill] sm:$0xff] }
 0x39e   : > { %v3506_v11 = vmax.f32 %v3442_v21, %v3474_v35  ;;  %v3512_v27 = vmax.f32 %v3448_v25, %v17959_v12  ;;  %v3513_v36 = vmax.f32 %v3449_v61, %v17960_v1  ;;  %v3514_v26 = vmax.f32 %v12859_v14, %v17961_v43  ;;  %v17965_v21 = vld [vmem:[#allocation242_spill] sm:$0xff]  ;;  %v17971_v61 = vld [vmem:[#allocation172_spill] sm:$0xff] }
 0x39f   : > { %v3541_v62 = vadd.f32 %v12601_v0, %v12876_v58  ;;  %v3544_v41 = vadd.f32 %v3316_v63, %v17962_v34  ;;  %v3545_v39 = vadd.f32 %v3317_v10, %v17963_v60  ;;  %v3546_v29 = vadd.f32 %v3318_v56, %v17964_v47  ;;  %v17995_v34 = vld [vmem:[#allocation61_spill] sm:$0xff] }
 0x3a0   : > { %v13059_v44 = vmax.f32 %v3504_v18, %v17965_v21  ;;  %v13062_v6 = vmax.f32 %v3505_v4, %v17967_v38  ;;  %v13065_v25 = vmax.f32 %v3506_v11, %v12488_v57  ;;  %v13068_v14 = vmax.f32 %v3507_v17, %v12458_v23 }
 0x3a1   : > { %v13071_v0 = vmax.f32 %v3508_v32, %v17971_v61  ;;  %v13073_v63 = vmax.f32 %v3509_v49, %v3541_v62  ;;  %v13076_v10 = vmax.f32 %v3510_v3, %v12905_v7  ;;  %v13079_v56 = vmax.f32 %v3511_v28, %v12658_v51  ;;  %v17981_v61 = vld [vmem:[#allocation19_spill] sm:$0xff] }
 0x3a2   : > { %17966 = vst [vmem:[#allocation142_spill] sm:$0xff] %v13059_v44  ;;  %17968 = vst [vmem:[#allocation313_spill] sm:$0xff] %v13062_v6  ;;  %v13081_v16 = vmax.f32 %v3512_v27, %v3544_v41  ;;  %v13083_v20 = vmax.f32 %v3513_v36, %v3545_v39  ;;  %v13085_v57 = vmax.f32 %v3514_v26, %v3546_v29  ;;  %v4042_v23 = vrot.slane %v13059_v44, 1 }
 0x3a3   : > { %17969 = vst [vmem:[#allocation250_spill] sm:$0xff] %v13065_v25  ;;  %17970 = vst [vmem:[#allocation286_spill] sm:$0xff] %v13068_v14  ;;  %v4043_v19 = vrot.slane %v13062_v6, 1  ;;  %v4044_v45 = vrot.slane %v13065_v25, 1  ;;  %v4045_v5 = vrot.slane %v13068_v14, 1  ;;  %v4046_v7 = vrot.slane %v13071_v0, 1 }
 0x3a4   : > { %17972 = vst [vmem:[#allocation310_spill] sm:$0xff] %v13071_v0  ;;  %17973 = vst [vmem:[#allocation291_spill] sm:$0xff] %v13073_v63  ;;  %v4047_v35 = vrot.slane %v13073_v63, 1  ;;  %v4048_v51 = vrot.slane %v13076_v10, 1  ;;  %v4049_v18 = vrot.slane %v13079_v56, 1  ;;  %v4050_v32 = vrot.slane %v13081_v16, 1 }
 0x3a5   : > { %17974 = vst [vmem:[#allocation208_spill] sm:$0xff] %v13076_v10  ;;  %17975 = vst [vmem:[#allocation242_spill] sm:$0xff] %v13079_v56  ;;  %v4051_v49 = vrot.slane %v13083_v20, 1  ;;  %v4052_v3 = vrot.slane %v13085_v57, 1  ;;  %v4053_v4 = vrot.slane %v13017_v31, 1  ;;  %v4067_v17 = vsel %vm970_vm2, %v4045_v5, %v4046_v7 }
 0x3a6   : > { %17976 = vst [vmem:[#allocation268_spill] sm:$0xff] %v13081_v16  ;;  %17977 = vst [vmem:[#allocation172_spill] sm:$0xff] %v13083_v20  ;;  %v4066_v11 = vsel %vm970_vm2, %v4046_v7, %v4047_v35  ;;  %v4063_v28 = vsel %vm970_vm2, %v4049_v18, %v4050_v32  ;;  %v4064_v12 = vsel %vm970_vm2, %v4048_v51, %v4049_v18  ;;  %v17979_v1 = vrot.slane %v12835_v22, 1 }
 0x3a7   : > { %17978 = vst [vmem:[#allocation330_spill] sm:$0xff] %v13085_v57  ;;  %v4062_v33 = vsel %vm970_vm2, %v4050_v32, %v4051_v49  ;;  %v4065_v27 = vsel %vm970_vm2, %v4047_v35, %v4048_v51  ;;  %v4060_v43 = vsel %vm970_vm2, %v4052_v3, %v4053_v4  ;;  %v4061_v26 = vsel %vm970_vm2, %v4051_v49, %v4052_v3  ;;  %v17982_v35 = vld [vmem:[#allocation18_spill] sm:$0xff]  ;;  %v17985_v49 = vld [vmem:[#allocation24_spill] sm:$0xff] }
 0x3a8   : > { %v4059_v36 = vsel %vm970_vm2, %v4053_v4, %v17979_v1  ;;  %v4068_v62 = vsel %vm970_vm2, %v4044_v45, %v4045_v5  ;;  %v4069_v41 = vsel %vm970_vm2, %v4043_v19, %v4044_v45  ;;  %v4070_v39 = vsel %vm970_vm2, %v4042_v23, %v4043_v19  ;;  %v17983_v5 = vld [vmem:[#allocation21_spill] sm:$0xff]  ;;  %v17984_v45 = vld [vmem:[#allocation23_spill] sm:$0xff] }
 0x3a9   : > { %v17980_v29 = vrot.slane %v12701_v42, 1  ;;  %v13130_v38 = vadd.f32 %v4068_v62, %v17769_v40  ;;  %v13136_v51 = vadd.f32 %v4070_v39, %v17982_v35  ;;  %v13139_v18 = vadd.f32 %v4069_v41, %v17983_v5  ;;  %v17986_v4 = vld [vmem:[#allocation27_spill] sm:$0xff]  ;;  %v17989_v39 = vld [vmem:[#allocation26_spill] sm:$0xff] }
 0x3aa   : > { %v13142_v32 = vadd.f32 %v4067_v17, %v17984_v45  ;;  %v13145_v19 = vadd.f32 %v4066_v11, %v17926_v37  ;;  %v13151_v3 = vadd.f32 %v4064_v12, %v17985_v49  ;;  %v13154_v1 = vadd.f32 %v4063_v28, %v17986_v4  ;;  %v17990_v11 = vld [vmem:[#allocation29_spill] sm:$0xff]  ;;  %v17992_v12 = vld [vmem:[#allocation31_spill] sm:$0xff] }
 0x3ab   : > { %v4071_v21 = vsel %vm970_vm2, %v17980_v29, %v4042_v23  ;;  %v13148_v23 = vadd.f32 %v4065_v27, %v17927_v59  ;;  %v17987_v62 = vrot.slane %v12835_v22, 7  ;;  %v17988_v41 = vrot.slane %v13017_v31, 7  ;;  %v17991_v27 = vld [vmem:[#allocation28_spill] sm:$0xff] }
 0x3ac   : > { %v13133_v7 = vadd.f32 %v4071_v21, %v17981_v61  ;;  %v13163_v29 = vadd.f32 %v4062_v33, %v17989_v39  ;;  %v13166_v21 = vadd.f32 %v4061_v26, %v17990_v11  ;;  %v13169_v40 = vadd.f32 %v4060_v43, %v17991_v27 }
 0x3ad   : > { %v4187_v17 = vsel %vm1291_vm3, %v17988_v41, %v17987_v62  ;;  %v13172_v49 = vadd.f32 %v4059_v36, %v17992_v12  ;;  %v4138_v61 = vmax.f32 %v13059_v44, %v13136_v51  ;;  %v4139_v62 = vmax.f32 %v13062_v6, %v13139_v18 }
 0x3ae   : > { %v4137_v28 = vmax.f32 %v12701_v42, %v13133_v7  ;;  %v4140_v33 = vmax.f32 %v13065_v25, %v13130_v38  ;;  %v4141_v26 = vmax.f32 %v13068_v14, %v13142_v32  ;;  %v4142_v43 = vmax.f32 %v13071_v0, %v13145_v19 }
 0x3af   : > { %v4144_v36 = vmax.f32 %v13076_v10, %v13151_v3  ;;  %v4143_v7 = vmax.f32 %v13073_v63, %v13148_v23  ;;  %v4145_v51 = vmax.f32 %v13079_v56, %v13154_v1  ;;  %v4146_v18 = vmax.f32 %v13081_v16, %v13163_v29 }
 0x3b0   : > { %v4147_v38 = vmax.f32 %v13083_v20, %v13166_v21  ;;  %v4148_v32 = vmax.f32 %v13085_v57, %v13169_v40  ;;  %v4170_v19 = vrot.slane %v13059_v44, 7  ;;  %v4171_v41 = vrot.slane %v13062_v6, 7 }
 0x3b1   : > { %v4172_v3 = vrot.slane %v13065_v25, 7  ;;  %v4173_v23 = vrot.slane %v13068_v14, 7  ;;  %v4174_v27 = vrot.slane %v13071_v0, 7  ;;  %v4175_v1 = vrot.slane %v13073_v63, 7 }
 0x3b2   : > { %v4176_v29 = vrot.slane %v13076_v10, 7  ;;  %v4177_v39 = vrot.slane %v13079_v56, 7  ;;  %v4178_v21 = vrot.slane %v13081_v16, 7  ;;  %v4179_v40 = vrot.slane %v13083_v20, 7 }
 0x3b3   : > { %v4180_v35 = vrot.slane %v13085_v57, 7  ;;  %v4194_v11 = vsel %vm1291_vm3, %v4174_v27, %v4175_v1  ;;  %v4195_v4 = vsel %vm1291_vm3, %v4173_v23, %v4174_v27  ;;  %v4196_v59 = vsel %vm1291_vm3, %v4172_v3, %v4173_v23 }
 0x3b4   : > { %v4193_v12 = vsel %vm1291_vm3, %v4175_v1, %v4176_v29  ;;  %v17993_v37 = vrot.slane %v13017_v31, 7  ;;  %v4190_v47 = vsel %vm1291_vm3, %v4178_v21, %v4179_v40  ;;  %v4191_v1 = vsel %vm1291_vm3, %v4177_v39, %v4178_v21  ;;  %v17996_v21 = vld [vmem:[#allocation64_spill] sm:$0xff] }
 0x3b5   : > { %v4189_v5 = vsel %vm1291_vm3, %v4179_v40, %v4180_v35  ;;  %v4192_v27 = vsel %vm1291_vm3, %v4176_v29, %v4177_v39  ;;  %v4197_v23 = vsel %vm1291_vm3, %v4171_v41, %v4172_v3  ;;  %v4198_v60 = vsel %vm1291_vm3, %v4170_v19, %v4171_v41  ;;  %v17998_v29 = vld [vmem:[#allocation67_spill] sm:$0xff]  ;;  %v17999_v3 = vld [vmem:[#allocation68_spill] sm:$0xff] }
 0x3b6   : > { %v4188_v45 = vsel %vm1291_vm3, %v4180_v35, %v17993_v37  ;;  %v17994_v37 = vrot.slane %v12701_v42, 7  ;;  %v4149_v40 = vmax.f32 %v13017_v31, %v13172_v49  ;;  %v4235_v15 = vadd.f32 %v4198_v60, %v17996_v21  ;;  %v18006_v21 = vld [vmem:[#allocation77_spill] sm:$0xff] }
 0x3b7   : > { %v4236_v39 = vadd.f32 %v4197_v23, %v17997_v55  ;;  %v4237_v24 = vadd.f32 %v4196_v59, %v17998_v29  ;;  %v4238_v30 = vadd.f32 %v4195_v4, %v17999_v3  ;;  %v4239_v41 = vadd.f32 %v4194_v11, %v17930_v46  ;;  %v18007_v55 = vld [vmem:[#allocation324_spill] sm:$0xff] }
 0x3b8   : > { %v4199_v35 = vsel %vm1291_vm3, %v17994_v37, %v4170_v19  ;;  %v4240_v9 = vadd.f32 %v4193_v12, %v18000_v54  ;;  %v4242_v2 = vadd.f32 %v4191_v1, %v18001_v13  ;;  %v18002_v19 = vld [vmem:[#allocation73_spill] sm:$0xff]  ;;  %v4244_v49 = vadd.f32 %v4189_v5, %v18003_v53  ;;  %v18072_v54 = vld [vmem:[#allocation231_spill] sm:$0xff] }
 0x3b9   : > { %v4234_v58 = vadd.f32 %v4199_v35, %v17995_v34  ;;  %v4243_v37 = vadd.f32 %v4190_v47, %v18002_v19  ;;  %v4245_v35 = vadd.f32 %v4188_v45, %v18004_v8  ;;  %v18005_v34 = vld [vmem:[#allocation71_spill] sm:$0xff]  ;;  %v4246_v23 = vadd.f32 %v4187_v17, %v18006_v21  ;;  %v18017_v8 = vld [vmem:[#allocation104_spill] sm:$0xff]  ;;  %v18085_v19 = vld [vmem:[#allocation229_spill] sm:$0xff] }
 0x3ba   : > { %v4241_v60 = vadd.f32 %v4192_v27, %v18005_v34  ;;  %v13253_v59 = vmax.f32 %v4137_v28, %v18007_v55  ;;  %v13257_v11 = vmax.f32 %v4139_v62, %v4235_v15  ;;  %v13259_v12 = vmax.f32 %v4140_v33, %v4236_v39  ;;  %v18086_v34 = vld [vmem:[#allocation194_spill] sm:$0xff] }
 0x3bb   : > { %v13255_v4 = vmax.f32 %v4138_v61, %v4234_v58  ;;  %v13261_v1 = vmax.f32 %v4141_v26, %v4237_v24  ;;  %v13263_v47 = vmax.f32 %v4143_v7, %v4239_v41  ;;  %v13265_v5 = vmax.f32 %v4142_v43, %v4238_v30  ;;  %v18008_v43 = vld [vmem:[#allocation309_spill] sm:$0xff] }
 0x3bc   : > { %v13267_v45 = vmax.f32 %v4144_v36, %v4240_v9  ;;  %v13269_v27 = vmax.f32 %v4145_v51, %v4241_v60  ;;  %v13271_v17 = vmax.f32 %v4146_v18, %v4242_v2  ;;  %v13273_v55 = vmax.f32 %v4147_v38, %v4243_v37 }
 0x3bd   : > { %v13275_v58 = vmax.f32 %v4148_v32, %v4244_v49  ;;  %v13277_v15 = vmax.f32 %v4149_v40, %v4245_v35  ;;  %v4298_v61 = vrot.slane %v13059_v44, 2  ;;  %v4299_v24 = vrot.slane %v13062_v6, 2 }
 0x3be   : > { %v4300_v28 = vrot.slane %v13065_v25, 2  ;;  %v4301_v30 = vrot.slane %v13068_v14, 2  ;;  %v4302_v9 = vrot.slane %v13071_v0, 2  ;;  %v4303_v62 = vrot.slane %v13073_v63, 2 }
 0x3bf   : > { %v4304_v2 = vrot.slane %v13076_v10, 2  ;;  %v4305_v33 = vrot.slane %v13079_v56, 2  ;;  %v4306_v26 = vrot.slane %v13081_v16, 2  ;;  %v18009_v36 = vmax.f32 %v12835_v22, %v18008_v43 }
 0x3c0   : > { %v4307_v51 = vrot.slane %v13083_v20, 2  ;;  %v4308_v18 = vrot.slane %v13085_v57, 2  ;;  %v4309_v38 = vrot.slane %v13017_v31, 2  ;;  %v4323_v41 = vsel %vm1548_vm4, %v4301_v30, %v4302_v9 }
 0x3c1   : > { %v13291_v7 = vmax.f32 %v18009_v36, %v4246_v23  ;;  %v4319_v32 = vsel %vm1548_vm4, %v4305_v33, %v4306_v26  ;;  %v4320_v40 = vsel %vm1548_vm4, %v4304_v2, %v4305_v33  ;;  %v4321_v39 = vsel %vm1548_vm4, %v4303_v62, %v4304_v2 }
 0x3c2   : > { %v18010_v37 = vrot.slane %v12835_v22, 2  ;;  %v4317_v35 = vsel %vm1548_vm4, %v4307_v51, %v4308_v18  ;;  %v4318_v60 = vsel %vm1548_vm4, %v4306_v26, %v4307_v51  ;;  %v4322_v23 = vsel %vm1548_vm4, %v4302_v9, %v4303_v62  ;;  %v18012_v51 = vld [vmem:[#allocation97_spill] sm:$0xff]  ;;  %v18013_v9 = vld [vmem:[#allocation100_spill] sm:$0xff] }
 0x3c3   : > { %v4324_v2 = vsel %vm1548_vm4, %v4300_v28, %v4301_v30  ;;  %v4325_v33 = vsel %vm1548_vm4, %v4299_v24, %v4300_v28  ;;  %v4326_v43 = vsel %vm1548_vm4, %v4298_v61, %v4299_v24  ;;  %v18011_v36 = vrot.slane %v12701_v42, 2  ;;  %v18014_v30 = vld [vmem:[#allocation99_spill] sm:$0xff]  ;;  %v18015_v28 = vld [vmem:[#allocation102_spill] sm:$0xff]  ;;  %v18016_v24 = vld [vmem:[#allocation101_spill] sm:$0xff] }
 0x3c4   : > { %v4315_v49 = vsel %vm1548_vm4, %v4309_v38, %v18010_v37  ;;  %v4316_v26 = vsel %vm1548_vm4, %v4308_v18, %v4309_v38  ;;  %v13330_v62 = vadd.f32 %v4326_v43, %v18013_v9  ;;  %v13333_v13 = vadd.f32 %v4325_v33, %v18014_v30  ;;  %v18018_v38 = vld [vmem:[#allocation106_spill] sm:$0xff]  ;;  %v18019_v43 = vld [vmem:[#allocation105_spill] sm:$0xff]  ;;  %v18020_v33 = vld [vmem:[#allocation108_spill] sm:$0xff] }
 0x3c5   : > { %v4327_v37 = vsel %vm1548_vm4, %v18011_v36, %v4298_v61  ;;  %v13336_v3 = vadd.f32 %v4324_v2, %v18015_v28  ;;  %v13339_v21 = vadd.f32 %v4323_v41, %v18016_v24  ;;  %v13342_v61 = vadd.f32 %v4322_v23, %v18017_v8  ;;  %v18021_v2 = vld [vmem:[#allocation107_spill] sm:$0xff]  ;;  %v18022_v41 = vld [vmem:[#allocation110_spill] sm:$0xff]  ;;  %v18023_v23 = vld [vmem:[#allocation109_spill] sm:$0xff] }
 0x3c6   : > { %v13327_v53 = vadd.f32 %v4327_v37, %v18012_v51  ;;  %v13345_v18 = vadd.f32 %v4321_v39, %v17934_v50  ;;  %v13348_v36 = vadd.f32 %v4320_v40, %v18018_v38  ;;  %v13351_v37 = vadd.f32 %v4319_v32, %v18019_v43  ;;  %v18081_v43 = vld [vmem:[#allocation289_spill] sm:$0xff]  ;;  %v18083_v24 = vld [vmem:[#allocation200_spill] sm:$0xff]  ;;  %v18084_v30 = vld [vmem:[#allocation323_spill] sm:$0xff] }
 0x3c7   : > { %v13354_v51 = vadd.f32 %v4318_v60, %v18020_v33  ;;  %v13357_v28 = vadd.f32 %v4317_v35, %v18021_v2  ;;  %v13360_v9 = vadd.f32 %v4316_v26, %v18022_v41  ;;  %v13363_v8 = vadd.f32 %v4315_v49, %v18023_v23  ;;  %v18080_v2 = vld [vmem:[#allocation256_spill] sm:$0xff]  ;;  %v18082_v50 = vld [vmem:[#allocation245_spill] sm:$0xff] }
 0x3c8   : > { %v4393_v39 = vmax.f32 %v13253_v59, %v13327_v53  ;;  %v4394_v40 = vmax.f32 %v13255_v4, %v13330_v62  ;;  %v4395_v32 = vmax.f32 %v13257_v11, %v13333_v13  ;;  %v4396_v60 = vmax.f32 %v13259_v12, %v13336_v3 }
 0x3c9   : > { %v4397_v35 = vmax.f32 %v13261_v1, %v13339_v21  ;;  %v4399_v26 = vmax.f32 %v13263_v47, %v13345_v18  ;;  %v4398_v49 = vmax.f32 %v13265_v5, %v13342_v61  ;;  %v4400_v53 = vmax.f32 %v13267_v45, %v13348_v36 }
 0x3ca   : > { %v4401_v59 = vmax.f32 %v13269_v27, %v13351_v37  ;;  %v4402_v13 = vmax.f32 %v13271_v17, %v13354_v51  ;;  %v4403_v3 = vmax.f32 %v13273_v55, %v13357_v28  ;;  %v4404_v21 = vmax.f32 %v13275_v58, %v13360_v9  ;;  %v18024_v58 = vld [vmem:[#allocation279_spill] sm:$0xff] }
 0x3cb   : > { %v4405_v4 = vmax.f32 %v13277_v15, %v13363_v8  ;;  %v4426_v11 = vrot.slane %v13059_v44, 6  ;;  %v4427_v12 = vrot.slane %v13062_v6, 6  ;;  %v4428_v1 = vrot.slane %v13065_v25, 6 }
 0x3cc   : > { %v4429_v47 = vrot.slane %v13068_v14, 6  ;;  %v4430_v5 = vrot.slane %v13071_v0, 6  ;;  %v4431_v45 = vrot.slane %v13073_v63, 6  ;;  %v4432_v27 = vrot.slane %v13076_v10, 6  ;;  %v18032_v10 = vld [vmem:[#allocation135_spill] sm:$0xff] }
 0x3cd   : > { %v4433_v17 = vrot.slane %v13079_v56, 6  ;;  %v4434_v55 = vrot.slane %v13081_v16, 6  ;;  %v4406_v8 = vmax.f32 %v13291_v7, %v18024_v58  ;;  %v4435_v15 = vrot.slane %v13083_v20, 6  ;;  %v18033_v0 = vld [vmem:[#allocation59_spill] sm:$0xff]  ;;  %v18038_v56 = vld [vmem:[#allocation58_spill] sm:$0xff] }
 0x3ce   : > { %v4436_v51 = vrot.slane %v13085_v57, 6  ;;  %v4437_v9 = vrot.slane %v13017_v31, 6  ;;  %v4449_v61 = vsel %vm1805_vm5, %v4431_v45, %v4432_v27  ;;  %v4451_v18 = vsel %vm1805_vm5, %v4429_v47, %v4430_v5  ;;  %v18030_v31 = vld [vmem:[#allocation136_spill] sm:$0xff]  ;;  %v18035_v16 = vld [vmem:[#allocation63_spill] sm:$0xff] }
 0x3cf   : > { %v4447_v62 = vsel %vm1805_vm5, %v4433_v17, %v4434_v55  ;;  %v4448_v28 = vsel %vm1805_vm5, %v4432_v27, %v4433_v17  ;;  %v18025_v7 = vrot.slane %v12835_v22, 6  ;;  %v4446_v58 = vsel %vm1805_vm5, %v4434_v55, %v4435_v15  ;;  %v18029_v22 = vld [vmem:[#allocation42_spill] sm:$0xff] }
 0x3d0   : > { %v4445_v37 = vsel %vm1805_vm5, %v4435_v15, %v4436_v51  ;;  %v4450_v17 = vsel %vm1805_vm5, %v4430_v5, %v4431_v45  ;;  %v4452_v27 = vsel %vm1805_vm5, %v4428_v1, %v4429_v47  ;;  %v4453_v41 = vsel %vm1805_vm5, %v4427_v12, %v4428_v1  ;;  %v18027_v15 = vld [vmem:[#allocation131_spill] sm:$0xff]  ;;  %v18028_v5 = vld [vmem:[#allocation46_spill] sm:$0xff] }
 0x3d1   : > { %v4443_v36 = vsel %vm1805_vm5, %v4437_v9, %v18025_v7  ;;  %v4454_v33 = vsel %vm1805_vm5, %v4426_v11, %v4427_v12  ;;  %v18026_v7 = vrot.slane %v12701_v42, 6  ;;  %v4444_v55 = vsel %vm1805_vm5, %v4436_v51, %v4437_v9  ;;  %v18031_v1 = vld [vmem:[#allocation43_spill] sm:$0xff]  ;;  %v18036_v9 = vld [vmem:[#allocation146_spill] sm:$0xff] }
 0x3d2   : > { %v4491_v45 = vadd.f32 %v4454_v33, %v18028_v5  ;;  %v4492_v47 = vadd.f32 %v4453_v41, %v18029_v22  ;;  %v4493_v57 = vadd.f32 %v4452_v27, %v18030_v31  ;;  %v4494_v20 = vadd.f32 %v4451_v18, %v18031_v1  ;;  %v18039_v22 = vld [vmem:[#allocation66_spill] sm:$0xff]  ;;  %v18040_v27 = vld [vmem:[#allocation249_spill] sm:$0xff]  ;;  %v18078_v31 = vld [vmem:[#allocation171_spill] sm:$0xff] }
 0x3d3   : > { %v4455_v38 = vsel %vm1805_vm5, %v18026_v7, %v4426_v11  ;;  %v4495_v12 = vadd.f32 %v4450_v17, %v17935_v52  ;;  %v4496_v63 = vadd.f32 %v4449_v61, %v18032_v10  ;;  %v4497_v14 = vadd.f32 %v4448_v28, %v18033_v0  ;;  %v18034_v11 = vld [vmem:[#allocation138_spill] sm:$0xff]  ;;  %v18061_v10 = vld [vmem:[#allocation240_spill] sm:$0xff]  ;;  %v18076_v0 = vld [vmem:[#allocation175_spill] sm:$0xff] }
 0x3d4   : > { %v4490_v23 = vadd.f32 %v4455_v38, %v18027_v15  ;;  %v4498_v7 = vadd.f32 %v4447_v62, %v18034_v11  ;;  %v4499_v51 = vadd.f32 %v4446_v58, %v18035_v16  ;;  %v4500_v38 = vadd.f32 %v4445_v37, %v18036_v9  ;;  %v18037_v15 = vld [vmem:[#allocation148_spill] sm:$0xff]  ;;  %v18041_v18 = vld [vmem:[#allocation182_spill] sm:$0xff]  ;;  %v18043_v9 = vld [vmem:[#allocation325_spill] sm:$0xff] }
 0x3d5   : > { %v4501_v33 = vadd.f32 %v4444_v55, %v18037_v15  ;;  %v4502_v41 = vadd.f32 %v4443_v36, %v18038_v56  ;;  %v4503_v25 = vadd.f32 %v18040_v27, %v18039_v22  ;;  %v13451_v1 = vmax.f32 %v4393_v39, %v18041_v18  ;;  %v18042_v27 = vld [vmem:[#allocation207_spill] sm:$0xff]  ;;  %v18044_v18 = vld [vmem:[#allocation253_spill] sm:$0xff]  ;;  %v18066_v22 = vld [vmem:[#allocation164_spill] sm:$0xff] }
 0x3d6   : > { %v13453_v17 = vmax.f32 %v4394_v40, %v4490_v23  ;;  %v13455_v61 = vmax.f32 %v4395_v32, %v4491_v45  ;;  %v13457_v28 = vmax.f32 %v4396_v60, %v4492_v47  ;;  %v13459_v62 = vmax.f32 %v4397_v35, %v4493_v57  ;;  %v18048_v35 = vld [vmem:[#allocation312_spill] sm:$0xff]  ;;  %v18060_v11 = vld [vmem:[#allocation83_spill] sm:$0xff]  ;;  %v18068_v15 = vld [vmem:[#allocation137_spill] sm:$0xff] }
 0x3d7   : > { %v13461_v58 = vmax.f32 %v4399_v26, %v4495_v12  ;;  %v13463_v37 = vmax.f32 %v4400_v53, %v4496_v63  ;;  %v13465_v55 = vmax.f32 %v4401_v59, %v4497_v14  ;;  %v13467_v36 = vmax.f32 %v4402_v13, %v4498_v7  ;;  %v18047_v14 = vld [vmem:[#allocation140_spill] sm:$0xff]  ;;  %v18050_v59 = vld [vmem:[#allocation287_spill] sm:$0xff]  ;;  %v18055_v12 = vld [vmem:[#allocation294_spill] sm:$0xff] }
 0x3d8   : > { %v4618_v39 = vadd.f32 %v18043_v9, %v18042_v27  ;;  %v13473_v23 = vadd.f32 %v18043_v9, %v18044_v18  ;;  %v13475_v40 = vmax.f32 %v4398_v49, %v4494_v20  ;;  %v13477_v32 = vmax.f32 %v4403_v3, %v4499_v51  ;;  %v18051_v45 = vld [vmem:[#allocation280_spill] sm:$0xff]  ;;  %v18056_v7 = vld [vmem:[#allocation311_spill] sm:$0xff]  ;;  %v18062_v27 = vld [vmem:[#allocation178_spill] sm:$0xff] }
 0x3d9   : > { %v13479_v57 = vmax.f32 %v4404_v21, %v4500_v38  ;;  %v13481_v60 = vmax.f32 %v4405_v4, %v4501_v33  ;;  %v13483_v63 = vmax.f32 %v4406_v8, %v4502_v41  ;;  %v18049_v26 = vmax.f32 %v18047_v14, %v18048_v35  ;;  %v18052_v49 = vld [vmem:[#allocation288_spill] sm:$0xff]  ;;  %v18053_v21 = vld [vmem:[#allocation174_spill] sm:$0xff]  ;;  %v18054_v8 = vld [vmem:[#allocation195_spill] sm:$0xff] }
 0x3da   : > { %18045 = vst [vmem:[#allocation324_spill] sm:$0xff] %v13473_v23  ;;  %v13492_v13 = vadd.f32 %v18043_v9, %v18050_v59  ;;  %v4551_v20 = vadd.f32 %v13451_v1, %v18051_v45  ;;  %v4552_v3 = vadd.f32 %v13453_v17, %v18052_v49  ;;  %v4553_v4 = vadd.f32 %v13455_v61, %v18053_v21  ;;  %v18057_v38 = vld [vmem:[#allocation181_spill] sm:$0xff]  ;;  %v18059_v35 = vld [vmem:[#allocation206_spill] sm:$0xff]  ;;  %v18064_v45 = vld [vmem:[#allocation168_spill] sm:$0xff] }
 0x3db   : > { %18046 = vst [vmem:[#allocation309_spill] sm:$0xff] %v13483_v63  ;;  %v13488_v53 = vmax.f32 %v18049_v26, %v4503_v25  ;;  %v4554_v47 = vadd.f32 %v13457_v28, %v18054_v8  ;;  %v4555_v25 = vadd.f32 %v13459_v62, %v18055_v12  ;;  %v4559_v51 = vadd.f32 %v13465_v55, %v18056_v7  ;;  %v18058_v41 = vld [vmem:[#allocation177_spill] sm:$0xff]  ;;  %v18065_v18 = vld [vmem:[#allocation211_spill] sm:$0xff]  ;;  %v18074_v16 = vld [vmem:[#allocation302_spill] sm:$0xff] }
 0x3dc   : > { %v4560_v33 = vadd.f32 %v13467_v36, %v18057_v38  ;;  %v4556_v14 = vadd.f32 %v13475_v40, %v18058_v41  ;;  %v4557_v26 = vadd.f32 %v13461_v58, %v18059_v35  ;;  %v4558_v59 = vadd.f32 %v13463_v37, %v18060_v11  ;;  %v18063_v21 = vld [vmem:[#allocation297_spill] sm:$0xff]  ;;  %v18071_v7 = vld [vmem:[#allocation179_spill] sm:$0xff]  ;;  %v18077_v52 = vld [vmem:[#allocation170_spill] sm:$0xff] }
 0x3dd   : > { %v4561_v8 = vadd.f32 %v13477_v32, %v18061_v10  ;;  %v4562_v12 = vadd.f32 %v13479_v57, %v18062_v27  ;;  %v4563_v49 = vadd.f32 %v13481_v60, %v18063_v21  ;;  %v4564_v38 = vadd.f32 %v13483_v63, %v18064_v45  ;;  %v18067_v35 = vld [vmem:[#allocation141_spill] sm:$0xff]  ;;  %v18079_v5 = vld [vmem:[#allocation232_spill] sm:$0xff] }
 0x3de   : > { %v4565_v41 = vadd.f32 %v13488_v53, %v18065_v18  ;;  %v4566_v56 = vadd.f32 %v18067_v35, %v18066_v22  ;;  %v4583_v11 = vmax.f32 %v18068_v15, %v4551_v20  ;;  %v4584_v6 = vmax.f32 %v18043_v9, %v4552_v3 }
 0x3df   : > { %v4585_v10 = vmax.f32 %v13451_v1, %v4553_v4  ;;  %v4586_v27 = vmax.f32 %v13453_v17, %v4554_v47  ;;  %v4591_v44 = vmax.f32 %v13461_v58, %v4559_v51  ;;  %v4592_v21 = vmax.f32 %v13463_v37, %v4560_v33  ;;  %v18069_v33 = vld [vmem:[#allocation300_spill] sm:$0xff] }
 0x3e0   : > { %v4593_v45 = vmax.f32 %v13465_v55, %v4561_v8  ;;  %v4587_v42 = vmax.f32 %v13455_v61, %v4555_v25  ;;  %v4588_v18 = vmax.f32 %v13457_v28, %v4556_v14  ;;  %v4589_v22 = vmax.f32 %v13459_v62, %v4557_v26  ;;  %v18070_v25 = vld [vmem:[#allocation203_spill] sm:$0xff] }
 0x3e1   : > { %v4594_v20 = vmax.f32 %v13467_v36, %v4562_v12  ;;  %v4590_v9 = vmax.f32 %v13475_v40, %v4558_v59  ;;  %v4595_v3 = vmax.f32 %v13477_v32, %v4563_v49  ;;  %v4596_v4 = vmax.f32 %v13479_v57, %v4564_v38  ;;  %v18073_v12 = vld [vmem:[#allocation209_spill] sm:$0xff]  ;;  %v18075_v38 = vld [vmem:[#allocation166_spill] sm:$0xff] }
 0x3e2   : > { %v4597_v47 = vmax.f32 %v13481_v60, %v4565_v41  ;;  %v4598_v51 = vmax.f32 %v13483_v63, %v4566_v56  ;;  %v4599_v8 = vmax.f32 %v13488_v53, %v18069_v33  ;;  %v4616_v14 = vadd.f32 %v18071_v7, %v18070_v25 }
 0x3e3   : > { %v4617_v26 = vadd.f32 %v18068_v15, %v18072_v54  ;;  %v4619_v59 = vadd.f32 %v13451_v1, %v18073_v12  ;;  %v4620_v49 = vadd.f32 %v13453_v17, %v18074_v16  ;;  %v4621_v41 = vadd.f32 %v13455_v61, %v18075_v38 }
 0x3e4   : > { %v4625_v56 = vadd.f32 %v13461_v58, %v18076_v0  ;;  %v4622_v33 = vadd.f32 %v13457_v28, %v18077_v52  ;;  %v4626_v25 = vadd.f32 %v13463_v37, %v18078_v31  ;;  %v4627_v54 = vadd.f32 %v13465_v55, %v18079_v5 }
 0x3e5   : > { %v4628_v12 = vadd.f32 %v13467_v36, %v18080_v2  ;;  %v4623_v16 = vadd.f32 %v13459_v62, %v18081_v43  ;;  %v4624_v38 = vadd.f32 %v13475_v40, %v18082_v50  ;;  %v4630_v0 = vadd.f32 %v13479_v57, %v18083_v24 }
 0x3e6   : > { %v13571_v52 = vmax.f32 %v4583_v11, %v18084_v30  ;;  %v4629_v31 = vadd.f32 %v13477_v32, %v18085_v19  ;;  %v4631_v5 = vadd.f32 %v13481_v60, %v18086_v34  ;;  %v13577_v46 = vmax.f32 %v4584_v6, %v4616_v14  ;;  %v18101_v34 = vld [vmem:[#allocation227_spill] sm:$0xff] }
 0x3e7   : > { %v13579_v2 = vmax.f32 %v4585_v10, %v4617_v26  ;;  %v13581_v43 = vmax.f32 %v4586_v27, %v4618_v39  ;;  %v13583_v23 = vmax.f32 %v4587_v42, %v4619_v59  ;;  %v13585_v50 = vmax.f32 %v4588_v18, %v4620_v49  ;;  %v18097_v26 = vld [vmem:[#allocation228_spill] sm:$0xff]  ;;  %v18098_v59 = vld [vmem:[#allocation317_spill] sm:$0xff] }
 0x3e8   : > { %v13587_v24 = vmax.f32 %v4593_v45, %v4625_v56  ;;  %v13589_v30 = vmax.f32 %v4589_v22, %v4621_v41  ;;  %v13591_v11 = vmax.f32 %v4594_v20, %v4626_v25  ;;  %v13593_v19 = vmax.f32 %v4595_v3, %v4627_v54  ;;  %v18088_v22 = vld [vmem:[#allocation290_spill] sm:$0xff]  ;;  %v18089_v20 = vld [vmem:[#allocation213_spill] sm:$0xff]  ;;  %v18090_v3 = vld [vmem:[#allocation219_spill] sm:$0xff] }
 0x3e9   : > { %v13595_v29 = vmax.f32 %v4596_v4, %v4628_v12  ;;  %v13597_v6 = vmax.f32 %v4590_v9, %v4622_v33  ;;  %v13599_v10 = vmax.f32 %v4591_v44, %v4623_v16  ;;  %v13601_v27 = vmax.f32 %v4592_v21, %v4624_v38  ;;  %v18091_v4 = vld [vmem:[#allocation273_spill] sm:$0xff]  ;;  %v18092_v16 = vld [vmem:[#allocation120_spill] sm:$0xff]  ;;  %v18096_v25 = vld [vmem:[#allocation238_spill] sm:$0xff] }
 0x3ea   : > { %v13603_v42 = vmax.f32 %v4598_v51, %v4630_v0  ;;  %v13605_v39 = vmax.f32 %v4597_v47, %v4629_v31  ;;  %v13607_v18 = vmax.f32 %v4599_v8, %v4631_v5  ;;  %v4678_v45 = vadd.f32 %v13453_v17, %v18088_v22  ;;  %v18093_v21 = vld [vmem:[#allocation221_spill] sm:$0xff]  ;;  %v18095_v51 = vld [vmem:[#allocation230_spill] sm:$0xff]  ;;  %v18099_v38 = vld [vmem:[#allocation188_spill] sm:$0xff] }
 0x3eb   : > { %v4679_v54 = vadd.f32 %v13455_v61, %v18089_v20  ;;  %v4680_v9 = vadd.f32 %v13457_v28, %v18090_v3  ;;  %v4681_v44 = vadd.f32 %v13459_v62, %v18091_v4  ;;  %v4682_v0 = vadd.f32 %v13475_v40, %v18092_v16  ;;  %v18094_v5 = vld [vmem:[#allocation233_spill] sm:$0xff]  ;;  %v18100_v56 = vld [vmem:[#allocation306_spill] sm:$0xff]  ;;  %v18103_v16 = vld [vmem:[#allocation260_spill] sm:$0xff] }
 0x3ec   : > { %18087 = vst [vmem:[#allocation279_spill] sm:$0xff] %v13603_v42  ;;  %v4683_v31 = vadd.f32 %v13461_v58, %v18093_v21  ;;  %v4684_v47 = vadd.f32 %v13463_v37, %v18094_v5  ;;  %v4685_v8 = vadd.f32 %v13465_v55, %v18095_v51  ;;  %v4686_v14 = vadd.f32 %v13467_v36, %v18096_v25  ;;  %v18102_v21 = vld [vmem:[#allocation183_spill] sm:$0xff]  ;;  %v18105_v3 = vld [vmem:[#allocation265_spill] sm:$0xff] }
 0x3ed   : > { %v4687_v12 = vadd.f32 %v13477_v32, %v18097_v26  ;;  %v4688_v49 = vadd.f32 %v13479_v57, %v18098_v59  ;;  %v4689_v41 = vadd.f32 %v13481_v60, %v18099_v38  ;;  %v4690_v33 = vadd.f32 %v13483_v63, %v18100_v56  ;;  %v18104_v25 = vld [vmem:[#allocation143_spill] sm:$0xff] }
 0x3ee   : > { %v4691_v5 = vadd.f32 %v13488_v53, %v18101_v34  ;;  %v4692_v51 = vadd.f32 %v18067_v35, %v18102_v21  ;;  %v4693_v4 = vadd.f32 %v18104_v25, %v18103_v16  ;;  %v4710_v20 = vmax.f32 %v18105_v3, %v4678_v45  ;;  %v18108_v3 = vld [vmem:[#allocation215_spill] sm:$0xff] }
 0x3ef   : > { %v4711_v22 = vmax.f32 %v13571_v52, %v4679_v54  ;;  %v4712_v59 = vmax.f32 %v13577_v46, %v4680_v9  ;;  %v4713_v38 = vmax.f32 %v13579_v2, %v4681_v44  ;;  %v4714_v42 = vmax.f32 %v13581_v43, %v4682_v0  ;;  %v18106_v54 = vld [vmem:[#allocation316_spill] sm:$0xff]  ;;  %v18109_v9 = vld [vmem:[#allocation269_spill] sm:$0xff]  ;;  %v18112_v0 = vld [vmem:[#allocation54_spill] sm:$0xff] }
 0x3f0   : > { %v4717_v56 = vmax.f32 %v13589_v30, %v4685_v8  ;;  %v4715_v34 = vmax.f32 %v13583_v23, %v4683_v31  ;;  %v4718_v63 = vmax.f32 %v13597_v6, %v4686_v14  ;;  %v4719_v21 = vmax.f32 %v13599_v10, %v4687_v12  ;;  %v18107_v6 = vld [vmem:[#allocation225_spill] sm:$0xff]  ;;  %v18113_v31 = vld [vmem:[#allocation198_spill] sm:$0xff]  ;;  %v18119_v14 = vld [vmem:[#allocation307_spill] sm:$0xff] }
 0x3f1   : > { %v4720_v16 = vmax.f32 %v13601_v27, %v4688_v49  ;;  %v4716_v45 = vmax.f32 %v13585_v50, %v4684_v47  ;;  %v4721_v52 = vmax.f32 %v13587_v24, %v4689_v41  ;;  %v4724_v46 = vmax.f32 %v13595_v29, %v4692_v51  ;;  %v18110_v27 = vld [vmem:[#allocation314_spill] sm:$0xff]  ;;  %v18114_v29 = vld [vmem:[#allocation315_spill] sm:$0xff] }
 0x3f2   : > { %v4725_v2 = vmax.f32 %v13605_v39, %v4693_v4  ;;  %v4722_v43 = vmax.f32 %v13591_v11, %v4690_v33  ;;  %v4723_v30 = vmax.f32 %v13593_v19, %v4691_v5  ;;  %v4727_v23 = vmax.f32 %v13607_v18, %v18106_v54  ;;  %v18111_v50 = vld [vmem:[#allocation278_spill] sm:$0xff]  ;;  %v18115_v39 = vld [vmem:[#allocation303_spill] sm:$0xff]  ;;  %v18116_v4 = vld [vmem:[#allocation305_spill] sm:$0xff] }
 0x3f3   : > { %v4742_v10 = vadd.f32 %v18108_v3, %v18107_v6  ;;  %v4743_v44 = vadd.f32 %v18110_v27, %v18109_v9  ;;  %v4744_v24 = vadd.f32 %v18112_v0, %v18111_v50  ;;  %v4745_v47 = vadd.f32 %v18114_v29, %v18113_v31  ;;  %v18117_v5 = vld [vmem:[#allocation276_spill] sm:$0xff]  ;;  %v18118_v51 = vld [vmem:[#allocation75_spill] sm:$0xff]  ;;  %v18120_v49 = vld [vmem:[#allocation270_spill] sm:$0xff] }
 0x3f4   : > { %v4746_v11 = vadd.f32 %v18071_v7, %v18115_v39  ;;  %v4747_v19 = vadd.f32 %v18068_v15, %v18116_v4  ;;  %v4749_v18 = vadd.f32 %v13451_v1, %v18117_v5  ;;  %v4750_v8 = vadd.f32 %v13453_v17, %v18118_v51  ;;  %v18121_v33 = vld [vmem:[#allocation319_spill] sm:$0xff]  ;;  %v18122_v31 = vld [vmem:[#allocation254_spill] sm:$0xff]  ;;  %v18123_v50 = vld [vmem:[#allocation248_spill] sm:$0xff] }
 0x3f5   : > { %v4751_v12 = vadd.f32 %v13455_v61, %v18119_v14  ;;  %v4752_v41 = vadd.f32 %v13457_v28, %v18120_v49  ;;  %v4753_v54 = vadd.f32 %v13459_v62, %v18121_v33  ;;  %v4754_v39 = vadd.f32 %v13475_v40, %v18122_v31  ;;  %v18124_v4 = vld [vmem:[#allocation241_spill] sm:$0xff]  ;;  %v18125_v9 = vld [vmem:[#allocation272_spill] sm:$0xff]  ;;  %v18126_v51 = vld [vmem:[#allocation243_spill] sm:$0xff] }
 0x3f6   : > { %v4755_v15 = vadd.f32 %v13461_v58, %v18123_v50  ;;  %v4756_v5 = vadd.f32 %v13463_v37, %v18124_v4  ;;  %v4757_v17 = vadd.f32 %v13465_v55, %v18125_v9  ;;  %v4759_v61 = vadd.f32 %v13477_v32, %v18126_v51  ;;  %v18156_v51 = vld [vmem:[#allocation69_spill] sm:$0xff]  ;;  %v18157_v50 = vld [vmem:[#allocation71_spill] sm:$0xff] }
 0x3f7   : > { %v13691_v6 = vmax.f32 %v4710_v20, %v4742_v10  ;;  %v13693_v28 = vmax.f32 %v4711_v22, %v4743_v44  ;;  %v13695_v62 = vmax.f32 %v4712_v59, %v4744_v24  ;;  %v13697_v33 = vmax.f32 %v4713_v38, %v4745_v47  ;;  %v18158_v49 = vld [vmem:[#allocation73_spill] sm:$0xff]  ;;  %v18278_v7 = vld [vmem:[#allocation251_spill] sm:$0xff] }
 0x3f8   : > { %v13699_v40 = vmax.f32 %v4714_v42, %v4746_v11  ;;  %v13701_v58 = vmax.f32 %v4715_v34, %v4747_v19  ;;  %v13704_v37 = vmax.f32 %v4716_v45, %v13492_v13  ;;  %v13706_v4 = vmax.f32 %v4717_v56, %v4749_v18  ;;  %v18143_v18 = vld [vmem:[#allocation21_spill] sm:$0xff] }
 0x3f9   : > { %18127 = vst [vmem:[#allocation249_spill] sm:$0xff] %v13691_v6  ;;  %18128 = vst [vmem:[#allocation182_spill] sm:$0xff] %v13693_v28  ;;  %v13708_v55 = vmax.f32 %v4718_v63, %v4750_v8  ;;  %v13710_v32 = vmax.f32 %v4719_v21, %v4751_v12  ;;  %v13712_v20 = vmax.f32 %v4720_v16, %v4752_v41  ;;  %v18144_v12 = vld [vmem:[#allocation23_spill] sm:$0xff] }
 0x3fa   : > { %18129 = vst [vmem:[#allocation325_spill] sm:$0xff] %v13695_v62  ;;  %18130 = vst [vmem:[#allocation140_spill] sm:$0xff] %v13697_v33  ;;  %v13714_v22 = vmax.f32 %v4721_v52, %v4753_v54  ;;  %v13716_v59 = vmax.f32 %v4722_v43, %v4754_v39  ;;  %v13718_v38 = vmax.f32 %v4723_v30, %v4755_v15  ;;  %v16341_v56 = vrot.slane %v13699_v40, 1  ;;  %v18145_v54 = vld [vmem:[#allocation22_spill] sm:$0xff]  ;;  %v18270_v28 = vld [vmem:[#allocation55_spill] sm:$0xff] }
 0x3fb   : > { %18131 = vst [vmem:[#allocation312_spill] sm:$0xff] %v13699_v40  ;;  %18132 = vst [vmem:[#allocation141_spill] sm:$0xff] %v13701_v58  ;;  %v13720_v42 = vmax.f32 %v4724_v46, %v4756_v5  ;;  %v13722_v34 = vmax.f32 %v4725_v2, %v4757_v17  ;;  %v13724_v13 = vmax.f32 %v4727_v23, %v4759_v61  ;;  %v5073_v63 = vrot.slane %v13701_v58, 1  ;;  %v18147_v17 = vld [vmem:[#allocation25_spill] sm:$0xff]  ;;  %v18264_v62 = vld [vmem:[#allocation258_spill] sm:$0xff] }
 0x3fc   : > { %18133 = vst [vmem:[#allocation137_spill] sm:$0xff] %v13704_v37  ;;  %18134 = vst [vmem:[#allocation300_spill] sm:$0xff] %v13706_v4  ;;  %v5074_v21 = vrot.slane %v13704_v37, 1  ;;  %v5075_v16 = vrot.slane %v13706_v4, 1  ;;  %v5076_v45 = vrot.slane %v13708_v55, 1  ;;  %v5077_v52 = vrot.slane %v13710_v32, 1 }
 0x3fd   : > { %18135 = vst [vmem:[#allocation323_spill] sm:$0xff] %v13708_v55  ;;  %18136 = vst [vmem:[#allocation228_spill] sm:$0xff] %v13710_v32  ;;  %v16336_v43 = vrot.slane %v13712_v20, 1  ;;  %v16337_v46 = vrot.slane %v13714_v22, 1  ;;  %v16334_v2 = vrot.slane %v13716_v59, 1  ;;  %v16335_v30 = vrot.slane %v13718_v38, 1 }
 0x3fe   : > { %18137 = vst [vmem:[#allocation143_spill] sm:$0xff] %v13712_v20  ;;  %18138 = vst [vmem:[#allocation265_spill] sm:$0xff] %v13714_v22  ;;  %v16333_v23 = vrot.slane %v13720_v42, 1  ;;  %v13739_v10 = vsel %vm970_vm2, %v5074_v21, %v5075_v16  ;;  %v5096_v24 = vsel %vm970_vm2, %v5076_v45, %v5077_v52  ;;  %v5097_v47 = vsel %vm970_vm2, %v5075_v16, %v5076_v45  ;;  %v18149_v45 = vld [vmem:[#allocation29_spill] sm:$0xff] }
 0x3ff   : > { %18139 = vst [vmem:[#allocation316_spill] sm:$0xff] %v13716_v59  ;;  %18140 = vst [vmem:[#allocation307_spill] sm:$0xff] %v13718_v38  ;;  %v5095_v44 = vsel %vm970_vm2, %v5077_v52, %v16336_v43  ;;  %v5099_v39 = vsel %vm970_vm2, %v5073_v63, %v5074_v21  ;;  %v5093_v19 = vsel %vm970_vm2, %v16337_v46, %v16334_v2  ;;  %v18148_v21 = vld [vmem:[#allocation27_spill] sm:$0xff]  ;;  %v16345_v2 = vrot.slane %v13697_v33, 7 }
 0x400   : > { %18141 = vst [vmem:[#allocation331_spill] sm:$0xff] %v13739_v10  ;;  %v5091_v11 = vsel %vm970_vm2, %v16335_v30, %v16333_v23  ;;  %v13767_v5 = vsel %vm970_vm2, %v16341_v56, %v5073_v63  ;;  %v5137_v8 = vadd.f32 %v5099_v39, %v18143_v18  ;;  %v5139_v41 = vadd.f32 %v5097_v47, %v18144_v12  ;;  %v18155_v56 = vld [vmem:[#allocation304_spill] sm:$0xff] }
 0x401   : > { %18142 = vst [vmem:[#allocation332_spill] sm:$0xff] %v13767_v5  ;;  %v13772_v15 = vadd.f32 %v5096_v24, %v18145_v54  ;;  %v5141_v61 = vadd.f32 %v5095_v44, %v18147_v17  ;;  %v5143_v16 = vadd.f32 %v5093_v19, %v18148_v21  ;;  %v5145_v52 = vadd.f32 %v5091_v11, %v18149_v45 }
 0x402   : > { %v5169_v23 = vmax.f32 %v13701_v58, %v5137_v8  ;;  %v5200_v63 = vrot.slane %v13699_v40, 7  ;;  %v5171_v30 = vmax.f32 %v13706_v4, %v5139_v41  ;;  %v5201_v19 = vrot.slane %v13701_v58, 7 }
 0x403   : > { %18146 = vst [vmem:[#allocation21_spill] sm:$0xff] %v13772_v15  ;;  %v5173_v24 = vmax.f32 %v13710_v32, %v5141_v61  ;;  %v5175_v39 = vmax.f32 %v13714_v22, %v5143_v16  ;;  %v5177_v44 = vmax.f32 %v13718_v38, %v5145_v52  ;;  %v5202_v11 = vrot.slane %v13704_v37, 7 }
 0x404   : > { %v16339_v18 = vrot.slane %v13706_v4, 7  ;;  %v16340_v8 = vrot.slane %v13708_v55, 7  ;;  %v5205_v12 = vrot.slane %v13710_v32, 7  ;;  %v5206_v41 = vrot.slane %v13712_v20, 7 }
 0x405   : > { %v16338_v54 = vrot.slane %v13714_v22, 7  ;;  %v16344_v17 = vrot.slane %v13716_v59, 7  ;;  %v16343_v61 = vrot.slane %v13718_v38, 7  ;;  %v13801_v16 = vsel %vm1291_vm3, %v5201_v19, %v5202_v11 }
 0x406   : > { %v5226_v21 = vsel %vm1291_vm3, %v5202_v11, %v16339_v18  ;;  %18150 = vst [vmem:[#allocation23_spill] sm:$0xff] %v13801_v16  ;;  %v13809_v52 = vsel %vm1291_vm3, %v5205_v12, %v5206_v41  ;;  %v5224_v43 = vsel %vm1291_vm3, %v16340_v8, %v5205_v12  ;;  %v5228_v46 = vsel %vm1291_vm3, %v5200_v63, %v5201_v19  ;;  %v18153_v18 = vld [vmem:[#allocation67_spill] sm:$0xff]  ;;  %v18154_v8 = vld [vmem:[#allocation324_spill] sm:$0xff] }
 0x407   : > { %v5222_v45 = vsel %vm1291_vm3, %v5206_v41, %v16338_v54  ;;  %v5220_v11 = vsel %vm1291_vm3, %v16344_v17, %v16343_v61  ;;  %v13827_v41 = vsel %vm1291_vm3, %v16345_v2, %v5200_v63  ;;  %v18152_v54 = vld [vmem:[#allocation64_spill] sm:$0xff]  ;;  %v5267_v12 = vadd.f32 %v5226_v21, %v18153_v18 }
 0x408   : > { %18151 = vst [vmem:[#allocation22_spill] sm:$0xff] %v13827_v41  ;;  %v5265_v47 = vadd.f32 %v5228_v46, %v18152_v54  ;;  %v4708_v19 = vmax.f32 %v18155_v56, %v18154_v8  ;;  %v5269_v9 = vadd.f32 %v5224_v43, %v18156_v51  ;;  %v5271_v31 = vadd.f32 %v5222_v45, %v18157_v50  ;;  %v18162_v45 = vld [vmem:[#allocation159_spill] sm:$0xff] }
 0x409   : > { %v5273_v15 = vadd.f32 %v5220_v11, %v18158_v49  ;;  %v5299_v17 = vmax.f32 %v5171_v30, %v5267_v12  ;;  %v16351_v16 = vrot.slane %v13699_v40, 2  ;;  %v5329_v63 = vrot.slane %v13701_v58, 2  ;;  %v18164_v12 = vld [vmem:[#allocation99_spill] sm:$0xff] }
 0x40a   : > { %v5297_v61 = vmax.f32 %v5169_v23, %v5265_v47  ;;  %v13838_v2 = vmax.f32 %v5173_v24, %v5269_v9  ;;  %v13840_v46 = vmax.f32 %v5175_v39, %v5271_v31  ;;  %v5330_v56 = vrot.slane %v13704_v37, 2 }
 0x40b   : > { %v13842_v18 = vmax.f32 %v5177_v44, %v5273_v15  ;;  %v5331_v51 = vrot.slane %v13706_v4, 2  ;;  %v5332_v50 = vrot.slane %v13708_v55, 2  ;;  %v5333_v49 = vrot.slane %v13710_v32, 2 }
 0x40c   : > { %v16348_v43 = vrot.slane %v13712_v20, 2  ;;  %v16350_v30 = vrot.slane %v13714_v22, 2  ;;  %v16349_v23 = vrot.slane %v13716_v59, 2  ;;  %v16347_v9 = vrot.slane %v13718_v38, 2 }
 0x40d   : > { %v16346_v31 = vrot.slane %v13720_v42, 2  ;;  %v13859_v47 = vsel %vm1548_vm4, %v5332_v50, %v5333_v49  ;;  %v5353_v24 = vsel %vm1548_vm4, %v5331_v51, %v5332_v50  ;;  %v13865_v39 = vsel %vm1548_vm4, %v5330_v56, %v5331_v51  ;;  %v18165_v50 = vld [vmem:[#allocation101_spill] sm:$0xff] }
 0x40e   : > { %v5351_v15 = vsel %vm1548_vm4, %v5333_v49, %v16348_v43  ;;  %18159 = vst [vmem:[#allocation25_spill] sm:$0xff] %v13859_v47  ;;  %18160 = vst [vmem:[#allocation27_spill] sm:$0xff] %v13865_v39  ;;  %v5349_v8 = vsel %vm1548_vm4, %v16350_v30, %v16349_v23  ;;  %v5355_v54 = vsel %vm1548_vm4, %v5329_v63, %v5330_v56  ;;  %v18167_v43 = vld [vmem:[#allocation105_spill] sm:$0xff]  ;;  %v18168_v30 = vld [vmem:[#allocation107_spill] sm:$0xff]  ;;  %v16358_v56 = vrot.slane %v13697_v33, 6 }
 0x40f   : > { %v5347_v44 = vsel %vm1548_vm4, %v16347_v9, %v16346_v31  ;;  %v13885_v21 = vsel %vm1548_vm4, %v16351_v16, %v5329_v63  ;;  %v13888_v11 = vmax.f32 %v4708_v19, %v18162_v45  ;;  %v5393_v51 = vadd.f32 %v5355_v54, %v18164_v12  ;;  %v18166_v31 = vld [vmem:[#allocation103_spill] sm:$0xff] }
 0x410   : > { %18161 = vst [vmem:[#allocation29_spill] sm:$0xff] %v13885_v21  ;;  %v5395_v49 = vadd.f32 %v5353_v24, %v18165_v50  ;;  %v5397_v9 = vadd.f32 %v5351_v15, %v18166_v31  ;;  %v5399_v23 = vadd.f32 %v5349_v8, %v18167_v43  ;;  %v5401_v39 = vadd.f32 %v5347_v44, %v18168_v30  ;;  %v18233_v21 = vld [vmem:[#allocation85_spill] sm:$0xff]  ;;  %v18243_v47 = vld [vmem:[#allocation295_spill] sm:$0xff] }
 0x411   : > { %18163 = vst [vmem:[#allocation64_spill] sm:$0xff] %v13888_v11  ;;  %v5456_v10 = vrot.slane %v13699_v40, 6  ;;  %v5425_v41 = vmax.f32 %v5297_v61, %v5393_v51  ;;  %v5457_v19 = vrot.slane %v13701_v58, 6  ;;  %v5458_v31 = vrot.slane %v13704_v37, 6  ;;  %v18172_v51 = vld [vmem:[#allocation46_spill] sm:$0xff]  ;;  %v18214_v58 = vld [vmem:[#allocation257_spill] sm:$0xff] }
 0x412   : > { %v5427_v63 = vmax.f32 %v5299_v17, %v5395_v49  ;;  %v5429_v16 = vmax.f32 %v13838_v2, %v5397_v9  ;;  %v5431_v54 = vmax.f32 %v13840_v46, %v5399_v23  ;;  %v5433_v24 = vmax.f32 %v13842_v18, %v5401_v39  ;;  %v18173_v49 = vld [vmem:[#allocation136_spill] sm:$0xff] }
 0x413   : > { %v16353_v43 = vrot.slane %v13706_v4, 6  ;;  %v16354_v30 = vrot.slane %v13708_v55, 6  ;;  %v5461_v15 = vrot.slane %v13710_v32, 6  ;;  %v5462_v44 = vrot.slane %v13712_v20, 6  ;;  %v18211_v20 = vld [vmem:[#allocation172_spill] sm:$0xff]  ;;  %v18217_v4 = vld [vmem:[#allocation298_spill] sm:$0xff] }
 0x414   : > { %v16352_v17 = vrot.slane %v13714_v22, 6  ;;  %v16356_v2 = vrot.slane %v13716_v59, 6  ;;  %v16355_v61 = vrot.slane %v13718_v38, 6  ;;  %v13915_v18 = vsel %vm1805_vm5, %v5457_v19, %v5458_v31  ;;  %v18206_v38 = vld [vmem:[#allocation268_spill] sm:$0xff]  ;;  %v18212_v22 = vld [vmem:[#allocation330_spill] sm:$0xff] }
 0x415   : > { %v5482_v46 = vsel %vm1805_vm5, %v5458_v31, %v16353_v43  ;;  %18169 = vst [vmem:[#allocation67_spill] sm:$0xff] %v13915_v18  ;;  %v13923_v9 = vsel %vm1805_vm5, %v5461_v15, %v5462_v44  ;;  %v5480_v39 = vsel %vm1805_vm5, %v16354_v30, %v5461_v15  ;;  %v5484_v8 = vsel %vm1805_vm5, %v5456_v10, %v5457_v19  ;;  %v18174_v15 = vld [vmem:[#allocation139_spill] sm:$0xff]  ;;  %v18220_v55 = vld [vmem:[#allocation284_spill] sm:$0xff] }
 0x416   : > { %v5478_v23 = vsel %vm1805_vm5, %v5462_v44, %v16352_v17  ;;  %18170 = vst [vmem:[#allocation324_spill] sm:$0xff] %v13923_v9  ;;  %v5476_v45 = vsel %vm1805_vm5, %v16356_v2, %v16355_v61  ;;  %v13941_v12 = vsel %vm1805_vm5, %v16358_v56, %v5456_v10  ;;  %v5521_v50 = vadd.f32 %v5484_v8, %v18172_v51  ;;  %v18175_v19 = vld [vmem:[#allocation59_spill] sm:$0xff]  ;;  %v18179_v8 = vld [vmem:[#allocation145_spill] sm:$0xff]  ;;  %v18187_v56 = vld [vmem:[#allocation216_spill] sm:$0xff] }
 0x417   : > { %18171 = vst [vmem:[#allocation304_spill] sm:$0xff] %v13941_v12  ;;  %v5523_v31 = vadd.f32 %v5482_v46, %v18173_v49  ;;  %v5525_v44 = vadd.f32 %v5480_v39, %v18174_v15  ;;  %v5527_v17 = vadd.f32 %v5478_v23, %v18175_v19  ;;  %v18176_v43 = vld [vmem:[#allocation63_spill] sm:$0xff]  ;;  %v18180_v51 = vld [vmem:[#allocation197_spill] sm:$0xff]  ;;  %v18182_v39 = vld [vmem:[#allocation328_spill] sm:$0xff]  ;;  %v18231_v12 = vrot.slane %v18220_v55, 2 }
 0x418   : > { %v5529_v30 = vadd.f32 %v5476_v45, %v18176_v43  ;;  %v7314_v61 = vld [vmem:[%s15682_s4 + $0xc] sm:$0xf]  ;;  %v13952_v32 = vmax.f32 %v5425_v41, %v5521_v50  ;;  %v3590_v46 = vpack.c.bf16 %v18180_v51, %v18179_v8  ;;  %v18181_v49 = vld [vmem:[#allocation329_spill] sm:$0xff]  ;;  %v18188_v41 = vld [vmem:[#allocation292_spill] sm:$0xff] }
 0x419   : > { %v5890_v2 = vsel %vm469_vm0, %v7314_v61, 0  ;;  %v13954_v10 = vmax.f32 %v5427_v63, %v5523_v31  ;;  %v2809_v15 = vpack.c.bf16 %v18182_v39, %v18181_v49  ;;  %v13960_v23 = vmax.f32 %v5429_v16, %v5525_v44  ;;  %v18186_v19 = vld [vmem:[#allocation321_spill] sm:$0xff]  ;;  %v18189_v63 = vld [vmem:[#allocation196_spill] sm:$0xff]  ;;  %v18190_v31 = vld [vmem:[#allocation218_spill] sm:$0xff] }
 0x41a   : > { %18177 = vst [vmem:[#allocation69_spill] sm:$0xff] %v13952_v32  ;;  %6877 = vmatpush3.bf16.msra.mxu0 %v5890_v2  ;;  %v13962_v43 = vmax.f32 %v5431_v54, %v5527_v17  ;;  %v13964_v45 = vmax.f32 %v5433_v24, %v5529_v30  ;;  %v2810_v61 = vpack.c.bf16 %v18187_v56, %v18186_v19  ;;  %v4413_v50 = vrot.slane %v18188_v41, 6  ;;  %v18192_v51 = vld [vmem:[#allocation259_spill] sm:$0xff]  ;;  %v18193_v54 = vld [vmem:[#allocation160_spill] sm:$0xff]  ;;  %v18194_v24 = vld [vmem:[#allocation70_spill] sm:$0xff] }
 0x41b   : > { %18178 = vst [vmem:[#allocation71_spill] sm:$0xff] %v13954_v10  ;;  %18183 = vst [vmem:[#allocation73_spill] sm:$0xff] %v13960_v23  ;;  %v13971_v2 = vadd.f32 %v18114_v29, %v18189_v63  ;;  %v13975_v8 = vadd.f32 %v13451_v1, %v18190_v31  ;;  %v13979_v16 = vadd.f32 %v13467_v36, %v18192_v51  ;;  %6789 = vmatmul.mubr.msk.bf16.gmra.mxu1 %vm420_vm1, %v3590_v46  ;;  %v18196_v17 = vld [vmem:[#allocation311_spill] sm:$0xff]  ;;  %v18197_v44 = vld [vmem:[#allocation289_spill] sm:$0xff] }
 0x41c   : > { %18184 = vst [vmem:[#allocation159_spill] sm:$0xff] %v13962_v43  ;;  %18185 = vst [vmem:[#allocation99_spill] sm:$0xff] %v13964_v45  ;;  %6831 = vmatmul.mubr.msk.bf16.gmra.mxu0 %vm420_vm1, %v2809_v15  ;;  %v13985_v56 = vadd.f32 %v13479_v57, %v18193_v54  ;;  %v13989_v30 = vadd.f32 %v13809_v52, %v18194_v24  ;;  %v5589_v1 = vadd.f32 %v13962_v43, %v18196_v17  ;;  %v18198_v46 = vld [vmem:[#allocation281_spill] sm:$0xff]  ;;  %v18200_v57 = vld [vmem:[#allocation226_spill] sm:$0xff] }
 0x41d   : > { %18191 = vst [vmem:[#allocation101_spill] sm:$0xff] %v13975_v8  ;;  %v5653_v49 = vadd.f32 %v13954_v10, %v18197_v44  ;;  %6834 = vmatprep.mubr.msk.bf16.mxu0 %vm420_vm1, %v2810_v61  ;;  %v5781_v36 = vadd.f32 %v13952_v32, %v18119_v14  ;;  %v18199_v39 = vld [vmem:[#allocation277_spill] sm:$0xff]  ;;  %v18201_v19 = vld [vmem:[#allocation142_spill] sm:$0xff]  ;;  %v18202_v51 = vld [vmem:[#allocation283_spill] sm:$0xff]  ;;  %v5717_v17 = vadd.f32 %v13964_v45, %v18097_v26  ;;  %v18229_v37 = vrot.slane %v18188_v41, 2 }
 0x41e   : > { %18195 = vst [vmem:[#allocation103_spill] sm:$0xff] %v13989_v30  ;;  %v2811_v15 = vpack.c.bf16 %v18199_v39, %v18198_v46  ;;  %v3591_v54 = vpack.c.bf16 %v18201_v19, %v18200_v57  ;;  %v4412_v52 = vrot.slane %v18202_v51, 6  ;;  %v5621_v24 = vmax.f32 %v13960_v23, %v5589_v1  ;;  %v18203_v43 = vld [vmem:[#allocation313_spill] sm:$0xff]  ;;  %v18204_v44 = vld [vmem:[#allocation250_spill] sm:$0xff]  ;;  %v18209_v30 = vld [vmem:[#allocation291_spill] sm:$0xff] }
 0x41f   : > { %v3592_v59 = vpack.c.bf16 %v18204_v44, %v18203_v43  ;;  %v18205_v61 = vld [vmem:[#allocation242_spill] sm:$0xff]  ;;  %v18210_v57 = vld [vmem:[#allocation208_spill] sm:$0xff]  ;;  %v18223_v1 = vld [vmem:[#allocation39_spill] sm:$0xff] }
 0x420   : > { %v3595_v9 = vpack.c.bf16 %v18206_v38, %v18205_v61  ;;  %6792 = vmatprep.mubr.msk.bf16.mxu1 %vm420_vm1, %v3591_v54  ;;  %v18207_v14 = vld [vmem:[#allocation286_spill] sm:$0xff]  ;;  %v3594_v19 = vpack.c.bf16 %v18210_v57, %v18209_v30  ;;  %v5685_v45 = vmax.f32 %v5621_v24, %v5653_v49  ;;  %v18215_v10 = vld [vmem:[#allocation320_spill] sm:$0xff]  ;;  %v18218_v38 = vld [vmem:[#allocation293_spill] sm:$0xff]  ;;  %v18219_v54 = vrot.slane %v18202_v51, 7 }
 0x421   : > { %v18208_v46 = vld [vmem:[#allocation310_spill] sm:$0xff]  ;;  %v4126_v61 = vmax.f32 %v18218_v38, %v18217_v4  ;;  %v18224_v32 = vld [vmem:[#allocation271_spill] sm:$0xff]  ;;  %v18225_v26 = vld [vmem:[#allocation296_spill] sm:$0xff]  ;;  %v18227_v24 = vrot.slane %v18218_v38, 2 }
 0x422   : > { %v3593_v39 = vpack.c.bf16 %v18208_v46, %v18207_v14  ;;  %v18213_v23 = vld [vmem:[#allocation322_spill] sm:$0xff]  ;;  %v18221_v14 = vrot.slane %v18220_v55, 7  ;;  %v18222_v46 = vld [vmem:[#allocation37_spill] sm:$0xff]  ;;  %v4222_v18 = vadd.f32 %v18224_v32, %v18223_v1  ;;  %v18226_v49 = vrot.slane %v18225_v26, 2 }
 0x423   : > { %v18216_v43 = vld [vmem:[#allocation282_spill] sm:$0xff]  ;;  %v18228_v4 = vmov %v18227_v24  ;;  %6793 = vmatmul.mubr.msk.bf16.gmra.mxu1 %vm420_vm1, %v3592_v59 }
 0x424   : > { %v4122_v44 = vmax.f32 %v18216_v43, %v18215_v10  ;;  %v4213_v30 = vsel %vm1291_vm3, %v18221_v14, %v18219_v54  ;;  %v4338_v10 = vsel %vm1548_vm4, %v18227_v24, %v18226_v49  ;;  %v4339_v31 = vsel %vm1548_vm4, %v18229_v37, %v18228_v4  ;;  %v18230_v14 = vld [vmem:[#allocation236_spill] sm:$0xff]  ;;  %6835 = vmatmul.mubr.msk.bf16.gmra.mxu0 %vm420_vm1, %v2811_v15  ;;  %v18234_v41 = vld [vmem:[#allocation214_spill] sm:$0xff]  ;;  %v18238_v4 = vld [vmem:[#allocation263_spill] sm:$0xff] }
 0x425   : > { %v4220_v57 = vadd.f32 %v4213_v30, %v18222_v46  ;;  %v5749_v54 = vmax.f32 %v5685_v45, %v5717_v17  ;;  %v18232_v32 = vrot.slane %v18216_v43, 2  ;;  %v4349_v5 = vadd.f32 %v4339_v31, %v18233_v21  ;;  %v18236_v17 = vld [vmem:[#allocation81_spill] sm:$0xff]  ;;  %6796 = vmatprep.mubr.msk.bf16.mxu1 %vm420_vm1, %v3593_v39  ;;  %v18242_v15 = vld [vmem:[#allocation222_spill] sm:$0xff] }
 0x426   : > { %v4250_v30 = vmax.f32 %v4122_v44, %v18230_v14  ;;  %v18235_v49 = vmax.f32 %v18202_v51, %v18234_v41  ;;  %v4254_v45 = vmax.f32 %v4126_v61, %v4222_v18  ;;  %v18239_v14 = vld [vmem:[#allocation235_spill] sm:$0xff]  ;;  %v18244_v18 = vrot.slane %v18218_v38, 6  ;;  %v18249_v38 = vld [vmem:[#allocation121_spill] sm:$0xff]  ;;  %v18251_v41 = vld [vmem:[#allocation308_spill] sm:$0xff] }
 0x427   : > { %v4342_v26 = vsel %vm1548_vm4, %v18232_v32, %v18231_v12  ;;  %v14058_v24 = vmax.f32 %v5749_v54, %v5781_v36  ;;  %v18240_v40 = vpack.c.bf16 %v18238_v4, %v18239_v14  ;;  %v18241_v12 = vld [vmem:[#allocation88_spill] sm:$0xff]  ;;  %v4381_v59 = vmax.f32 %v18242_v15, %v4349_v5  ;;  %v18247_v5 = vld [vmem:[#allocation82_spill] sm:$0xff]  ;;  %v18257_v15 = vld [vmem:[#allocation149_spill] sm:$0xff] }
 0x428   : > { %v4252_v37 = vmax.f32 %v18235_v49, %v4220_v57  ;;  %v4346_v44 = vadd.f32 %v4342_v26, %v18236_v17  ;;  %v4350_v31 = vadd.f32 %v4338_v10, %v18241_v12  ;;  %v4467_v36 = vsel %vm1805_vm5, %v4413_v50, %v18244_v18  ;;  %v18250_v26 = vld [vmem:[#allocation275_spill] sm:$0xff]  ;;  %v18273_v8 = vld [vmem:[#allocation50_spill] sm:$0xff] }
 0x429   : > { %18237 = vst [vmem:[#allocation105_spill] sm:$0xff] %v14058_v24  ;;  %6838 = vmatprep.mubr.msk.bf16.mxu0 %vm420_vm1, %v18240_v40  ;;  %v4468_v61 = vsel %vm1805_vm5, %v4412_v52, %v4413_v50  ;;  %v18245_v40 = vrot.slane %v18220_v55, 6  ;;  %v18246_v10 = vrot.slane %v18216_v43, 6  ;;  %v18248_v54 = vrot.slane %v18247_v5, 6  ;;  %v18254_v55 = vld [vmem:[#allocation117_spill] sm:$0xff]  ;;  %v18256_v43 = vld [vmem:[#allocation51_spill] sm:$0xff] }
 0x42a   : > { %v4378_v32 = vmax.f32 %v4250_v30, %v4346_v44  ;;  %v4380_v51 = vmax.f32 %v4252_v37, %v18243_v47  ;;  %v4382_v57 = vmax.f32 %v4254_v45, %v4350_v31  ;;  %v4477_v30 = vadd.f32 %v4468_v61, %v18249_v38  ;;  %v18252_v37 = vld [vmem:[#allocation116_spill] sm:$0xff]  ;;  %v18253_v45 = vld [vmem:[#allocation115_spill] sm:$0xff] }
 0x42b   : > { %v4469_v39 = vsel %vm1805_vm5, %v18245_v40, %v4412_v52  ;;  %v4471_v47 = vsel %vm1805_vm5, %v18248_v54, %v18246_v10  ;;  %v3597_v49 = vpack.c.bf16 %v18251_v41, %v18250_v26  ;;  %v4478_v4 = vadd.f32 %v4467_v36, %v18254_v55  ;;  %v18255_v52 = vld [vmem:[#allocation152_spill] sm:$0xff]  ;;  %v18258_v18 = vld [vmem:[#allocation299_spill] sm:$0xff]  ;;  %v18259_v10 = vld [vmem:[#allocation150_spill] sm:$0xff]  ;;  %6797 = vmatmul.mubr.msk.bf16.gmra.mxu1 %vm420_vm1, %v3594_v19 }
 0x42c   : > { %v4474_v50 = vadd.f32 %v4471_v47, %v18252_v37  ;;  %v4476_v44 = vadd.f32 %v4469_v39, %v18253_v45  ;;  %v14090_v14 = vmax.f32 %v4381_v59, %v4477_v30  ;;  %v4537_v31 = vadd.f32 %v18256_v43, %v18255_v52  ;;  %v18260_v61 = vld [vmem:[#allocation239_spill] sm:$0xff]  ;;  %v18263_v24 = vld [vmem:[#allocation144_spill] sm:$0xff]  ;;  %6800 = vmatprep.mubr.msk.bf16.mxu1 %vm420_vm1, %v3595_v9  ;;  %v18276_v9 = vld [vmem:[#allocation169_spill] sm:$0xff] }
 0x42d   : > { %v14096_v40 = vadd.f32 %v18258_v18, %v18257_v15  ;;  %v4543_v5 = vadd.f32 %v18260_v61, %v18259_v10  ;;  %v14104_v47 = vmax.f32 %v4382_v57, %v4478_v4  ;;  %v18262_v39 = vld [vmem:[#allocation163_spill] sm:$0xff]  ;;  %v4601_v33 = vadd.f32 %v13488_v53, %v18263_v24  ;;  %v18269_v4 = vld [vmem:[#allocation301_spill] sm:$0xff]  ;;  %v18277_v15 = vld [vmem:[#allocation192_spill] sm:$0xff] }
 0x42e   : > { %v14100_v54 = vmax.f32 %v4378_v32, %v4474_v50  ;;  %v14102_v26 = vmax.f32 %v4380_v51, %v4476_v44  ;;  %v4544_v59 = vadd.f32 %v18108_v3, %v18262_v39  ;;  %v4569_v36 = vmax.f32 %v18104_v25, %v4537_v31  ;;  %v18265_v32 = vld [vmem:[#allocation247_spill] sm:$0xff]  ;;  %v18268_v44 = vld [vmem:[#allocation161_spill] sm:$0xff] }
 0x42f   : > { %18261 = vst [vmem:[#allocation107_spill] sm:$0xff] %v14104_v47  ;;  %v4573_v30 = vmax.f32 %v14090_v14, %v14096_v40  ;;  %v4575_v41 = vmax.f32 %v18258_v18, %v4543_v5  ;;  %v18266_v50 = vpack.c.bf16 %v18264_v62, %v18265_v32  ;;  %v18267_v51 = vld [vmem:[#allocation147_spill] sm:$0xff]  ;;  %v4542_v31 = vadd.f32 %v18269_v4, %v18268_v44  ;;  %v18271_v32 = vld [vmem:[#allocation193_spill] sm:$0xff]  ;;  %v18274_v40 = vld [vmem:[#allocation318_spill] sm:$0xff] }
 0x430   : > { %v4538_v57 = vadd.f32 %v14102_v26, %v18267_v51  ;;  %v4576_v63 = vmax.f32 %v18269_v4, %v4544_v59  ;;  %v4602_v62 = vadd.f32 %v18067_v35, %v18270_v28  ;;  %v4607_v19 = vadd.f32 %v14090_v14, %v18271_v32  ;;  %v18281_v24 = vld [vmem:[#allocation309_spill] sm:$0xff] }
 0x431   : > { %6839 = vmatmul.mubr.msk.bf16.gmra.mxu0 %vm420_vm1, %v18266_v50  ;;  %v18272_v50 = vld [vmem:[#allocation217_spill] sm:$0xff]  ;;  %v4633_v10 = vmax.f32 %v4569_v36, %v4601_v33  ;;  %v18275_v5 = vmax.f32 %v18260_v61, %v18274_v40  ;;  %v4665_v59 = vadd.f32 %v14090_v14, %v18276_v9  ;;  %v4666_v32 = vadd.f32 %v14104_v47, %v18277_v15  ;;  %v18279_v36 = vld [vmem:[#allocation252_spill] sm:$0xff] }
 0x432   : > { %v4608_v6 = vadd.f32 %v14104_v47, %v18272_v50  ;;  %v4570_v39 = vmax.f32 %v14100_v54, %v4538_v57  ;;  %v14140_v29 = vmax.f32 %v4575_v41, %v4607_v19  ;;  %v4672_v50 = vadd.f32 %v18112_v0, %v18278_v7  ;;  %v18282_v41 = vld [vmem:[#allocation261_spill] sm:$0xff]  ;;  %v18284_v15 = vld [vmem:[#allocation180_spill] sm:$0xff]  ;;  %v18298_v0 = vld [vmem:[#allocation154_spill] sm:$0xff] }
 0x433   : > { %v4641_v11 = vmax.f32 %v18275_v5, %v18273_v8  ;;  %v4697_v57 = vmax.f32 %v4633_v10, %v4665_v59  ;;  %v4729_v40 = vadd.f32 %v13481_v60, %v18279_v36  ;;  %v18280_v5 = vld [vmem:[#allocation237_spill] sm:$0xff]  ;;  %v4568_v7 = vadd.f32 %v14100_v54, %v18284_v15  ;;  %v18331_v36 = vld [vmem:[#allocation79_spill] sm:$0xff] }
 0x434   : > { %v4640_v44 = vmax.f32 %v4576_v63, %v4608_v6  ;;  %v4634_v28 = vmax.f32 %v4570_v39, %v4602_v62  ;;  %v4730_v9 = vadd.f32 %v18281_v24, %v18280_v5  ;;  %v4736_v6 = vadd.f32 %v14102_v26, %v18282_v41  ;;  %v18283_v63 = vld [vmem:[#allocation267_spill] sm:$0xff]  ;;  %v18295_v41 = vld [vmem:[#allocation189_spill] sm:$0xff] }
 0x435   : > { %v4705_v33 = vmax.f32 %v4641_v11, %v13971_v2  ;;  %v4737_v19 = vadd.f32 %v14090_v14, %v18283_v63  ;;  %v4574_v10 = vmax.f32 %v14104_v47, %v4542_v31  ;;  %v14158_v11 = vmax.f32 %v4697_v57, %v4729_v40  ;;  %v18288_v31 = vld [vmem:[#allocation157_spill] sm:$0xff] }
 0x436   : > { %v4704_v8 = vmax.f32 %v4640_v44, %v4672_v50  ;;  %v4698_v39 = vmax.f32 %v4634_v28, %v4666_v32  ;;  %v18286_v44 = vld [vmem:[#allocation134_spill] sm:$0xff]  ;;  %v18287_v59 = vpack.c.bf16 %v18212_v22, %v18211_v20  ;;  %v4540_v28 = vadd.f32 %v14104_v47, %v18288_v31  ;;  %v18289_v32 = vld [vmem:[#allocation187_spill] sm:$0xff]  ;;  %v18292_v22 = vld [vmem:[#allocation185_spill] sm:$0xff] }
 0x437   : > { %v14162_v60 = vmax.f32 %v4705_v33, %v4737_v19  ;;  %v4539_v62 = vadd.f32 %v14090_v14, %v18286_v44  ;;  %v4603_v57 = vadd.f32 %v18104_v25, %v18289_v32  ;;  %v18290_v33 = vld [vmem:[#allocation186_spill] sm:$0xff]  ;;  %v18294_v50 = vld [vmem:[#allocation244_spill] sm:$0xff]  ;;  %v18302_v44 = vld [vmem:[#allocation191_spill] sm:$0xff] }
 0x438   : > { %v14160_v2 = vmax.f32 %v4704_v8, %v4736_v6  ;;  %6801 = vmatmul.mubr.msk.bf16.gmra.mxu1 %vm420_vm1, %v18287_v59  ;;  %v14171_v15 = vmax.f32 %v4698_v39, %v4730_v9  ;;  %v4604_v40 = vadd.f32 %v14100_v54, %v18290_v33  ;;  %v18291_v8 = vld [vmem:[#allocation205_spill] sm:$0xff]  ;;  %v4668_v9 = vadd.f32 %v18269_v4, %v18292_v22  ;;  %v18296_v47 = vld [vmem:[#allocation190_spill] sm:$0xff]  ;;  %v18297_v4 = vld [vmem:[#allocation156_spill] sm:$0xff] }
 0x439   : > { %18285 = vst [vmem:[#allocation46_spill] sm:$0xff] %v14162_v60  ;;  %6804 = vmatprep.mubr.msk.bf16.mxu1 %vm420_vm1, %v3597_v49  ;;  %v4571_v14 = vmax.f32 %v18256_v43, %v4539_v62  ;;  %v4667_v20 = vadd.f32 %v18258_v18, %v18291_v8  ;;  %v18293_v6 = vld [vmem:[#allocation201_spill] sm:$0xff]  ;;  %v4572_v59 = vmax.f32 %v14102_v26, %v4540_v28  ;;  %v18301_v31 = vld [vmem:[#allocation234_spill] sm:$0xff] }
 0x43a   : > { %v4731_v19 = vadd.f32 %v13488_v53, %v18293_v6  ;;  %v4793_v39 = vpack.c.bf16 %v14171_v15, %v14158_v11  ;;  %v4732_v63 = vadd.f32 %v18067_v35, %v18294_v50  ;;  %v4600_v49 = vmax.f32 %v18067_v35, %v4568_v7  ;;  %v18299_v28 = vld [vmem:[#allocation165_spill] sm:$0xff]  ;;  %v18300_v50 = vld [vmem:[#allocation123_spill] sm:$0xff] }
 0x43b   : > { %v4635_v62 = vmax.f32 %v4571_v14, %v4603_v57  ;;  %v4605_v18 = vadd.f32 %v18256_v43, %v18295_v41  ;;  %v4606_v22 = vadd.f32 %v14102_v26, %v18296_v47  ;;  %v4632_v53 = vadd.f32 %v18281_v24, %v18297_v4 }
 0x43c   : > { %v4636_v8 = vmax.f32 %v4572_v59, %v4604_v40  ;;  %v4669_v6 = vadd.f32 %v18260_v61, %v18298_v0  ;;  %v4670_v33 = vadd.f32 %v18108_v3, %v18299_v28  ;;  %v4671_v7 = vadd.f32 %v18110_v27, %v18300_v50  ;;  %v18303_v0 = vld [vmem:[#allocation210_spill] sm:$0xff] }
 0x43d   : > { %v4699_v35 = vmax.f32 %v4635_v62, %v4667_v20  ;;  %v4637_v57 = vmax.f32 %v4573_v30, %v4605_v18  ;;  %v4638_v14 = vmax.f32 %v4574_v10, %v4606_v22  ;;  %v4664_v41 = vmax.f32 %v4600_v49, %v4632_v53  ;;  %v18305_v10 = vld [vmem:[#allocation279_spill] sm:$0xff]  ;;  %v18326_v3 = vld [vmem:[#allocation34_spill] sm:$0xff] }
 0x43e   : > { %v4700_v32 = vmax.f32 %v4636_v8, %v4668_v9  ;;  %v4694_v47 = vadd.f32 %v14100_v54, %v18301_v31  ;;  %v4696_v24 = vadd.f32 %v14102_v26, %v18302_v44  ;;  %v4703_v40 = vmax.f32 %v14140_v29, %v4671_v7  ;;  %v18306_v26 = vld [vmem:[#allocation220_spill] sm:$0xff]  ;;  %v18307_v22 = vld [vmem:[#allocation223_spill] sm:$0xff]  ;;  %v18327_v27 = vld [vmem:[#allocation38_spill] sm:$0xff] }
 0x43f   : > { %v14210_v59 = vmax.f32 %v4699_v35, %v4731_v19  ;;  %v4701_v4 = vmax.f32 %v4637_v57, %v4669_v6  ;;  %v4702_v28 = vmax.f32 %v4638_v14, %v4670_v33  ;;  %v4733_v50 = vadd.f32 %v18104_v25, %v18303_v0  ;;  %v18325_v0 = vld [vmem:[#allocation35_spill] sm:$0xff] }
 0x440   : > { %v18304_v18 = vpack.c.bf16 %v18214_v58, %v18213_v23  ;;  %v14218_v30 = vmax.f32 %v4700_v32, %v4732_v63  ;;  %v4726_v8 = vmax.f32 %v18305_v10, %v4694_v47  ;;  %v4728_v20 = vmax.f32 %v4664_v41, %v4696_v24 }
 0x441   : > { %v4734_v29 = vadd.f32 %v14100_v54, %v18306_v26  ;;  %v4735_v33 = vadd.f32 %v18256_v43, %v18307_v22  ;;  %v14226_v9 = vmax.f32 %v4701_v4, %v4733_v50  ;;  %v5055_v25 = vrot.slane %v14158_v11, 1  ;;  %v18320_v22 = vld [vmem:[#allocation33_spill] sm:$0xff]  ;;  %v18324_v26 = vld [vmem:[#allocation36_spill] sm:$0xff] }
 0x442   : > { %6805 = vmatmul.mubr.msk.bf16.gmra.mxu1 %vm420_vm1, %v18304_v18  ;;  %v5056_v58 = vrot.slane %v14171_v15, 1  ;;  %v4794_v23 = vpack.c.bf16 %v14218_v30, %v14210_v59  ;;  %v14235_v47 = vmax.f32 %v4726_v8, %v13979_v16  ;;  %v14238_v54 = vmax.f32 %v4728_v20, %v13985_v56  ;;  %v18312_v20 = vld [vmem:[#allocation3_spill] sm:$0xff] }
 0x443   : > { %6844 = vmatprep.mubr.msk.bf16.mxu1 %vm420_vm1, %v4793_v39  ;;  %v14232_v63 = vmax.f32 %v4702_v28, %v4734_v29  ;;  %v14240_v41 = vmax.f32 %v4703_v40, %v4735_v33  ;;  %v5057_v43 = vrot.slane %v14210_v59, 1  ;;  %v5058_v4 = vrot.slane %v14218_v30, 1  ;;  %v18313_v33 = vld [vmem:[#allocation5_spill] sm:$0xff] }
 0x444   : > { %v5059_v50 = vrot.slane %v14226_v9, 1  ;;  %v16398_v6 = vrot.slane %v14160_v2, 1  ;;  %v5084_v19 = vrot.slane %v14235_v47, 1  ;;  %v5086_v16 = vrot.slane %v14238_v54, 1 }
 0x445   : > { %v5060_v32 = vrot.slane %v14232_v63, 1  ;;  %v5061_v39 = vrot.slane %v14240_v41, 1  ;;  %v5115_v49 = vsel %vm970_vm2, %v5057_v43, %v5058_v4  ;;  %v5116_v62 = vsel %vm970_vm2, %v5056_v58, %v5057_v43 }
 0x446   : > { %v5114_v56 = vsel %vm970_vm2, %v5058_v4, %v5059_v50  ;;  %v18308_v53 = vrot.slane %v13724_v13, 1  ;;  %v18310_v57 = vrot.slane %v13722_v34, 1  ;;  %v5117_v10 = vsel %vm970_vm2, %v5055_v25, %v5056_v58  ;;  %v18314_v4 = vld [vmem:[#allocation2_spill] sm:$0xff] }
 0x447   : > { %v5113_v24 = vsel %vm970_vm2, %v5059_v50, %v5060_v32  ;;  %v14274_v40 = vsel %vm970_vm2, %v5061_v39, %v16398_v6  ;;  %v5112_v18 = vsel %vm970_vm2, %v5060_v32, %v5061_v39  ;;  %v5118_v8 = vsel %vm970_vm2, %v5086_v16, %v5055_v25  ;;  %v18317_v6 = vld [vmem:[#allocation6_spill] sm:$0xff]  ;;  %v18318_v39 = vld [vmem:[#allocation31_spill] sm:$0xff] }
 0x448   : > { %v5087_v28 = vsel %vm970_vm2, %v18308_v53, %v5086_v16  ;;  %v18309_v7 = vmov %v18308_v53  ;;  %v5089_v14 = vsel %vm970_vm2, %v18310_v57, %v5084_v19  ;;  %18311 = vst [vmem:[#allocation136_spill] sm:$0xff] %v14274_v40  ;;  %v5119_v29 = vadd.f32 %v5117_v10, %v18312_v20  ;;  %v18319_v58 = vld [vmem:[#allocation30_spill] sm:$0xff]  ;;  %v18321_v16 = vld [vmem:[#allocation32_spill] sm:$0xff]  ;;  %v18329_v40 = vld [vmem:[#allocation77_spill] sm:$0xff] }
 0x449   : > { %v5088_v35 = vsel %vm970_vm2, %v5084_v19, %v18309_v7  ;;  %v5120_v43 = vadd.f32 %v5116_v62, %v18313_v33  ;;  %v5121_v50 = vadd.f32 %v5115_v49, %v18314_v4  ;;  %v18315_v19 = vld [vmem:[#allocation4_spill] sm:$0xff]  ;;  %v18316_v7 = vld [vmem:[#allocation7_spill] sm:$0xff]  ;;  %v5124_v32 = vadd.f32 %v5112_v18, %v18317_v6 }
 0x44a   : > { %6845 = vmatmul.mubr.msk.bf16.vlgmr.msra.gmra.mxu1 %vm420_vm1, %v4794_v23  ;;  %v5122_v53 = vadd.f32 %v5114_v56, %v18315_v19  ;;  %v5123_v57 = vadd.f32 %v5113_v24, %v18316_v7  ;;  %v5147_v44 = vadd.f32 %v5089_v14, %v18318_v39  ;;  %v5148_v31 = vadd.f32 %v5088_v35, %v18319_v58 }
 0x44b   : > { %v5149_v25 = vadd.f32 %v5087_v28, %v18320_v22  ;;  %v5150_v23 = vadd.f32 %v5118_v8, %v18321_v16  ;;  %v5151_v10 = vmax.f32 %v14158_v11, %v5119_v29  ;;  %v5152_v62 = vmax.f32 %v14171_v15, %v5120_v43 }
 0x44c   : > { %v5153_v49 = vmax.f32 %v14210_v59, %v5121_v50  ;;  %v5154_v56 = vmax.f32 %v14218_v30, %v5122_v53  ;;  %v5155_v24 = vmax.f32 %v14226_v9, %v5123_v57  ;;  %v5156_v6 = vmax.f32 %v14232_v63, %v5124_v32 }
 0x44d   : > { %v5179_v14 = vmax.f32 %v13722_v34, %v5147_v44  ;;  %v5180_v35 = vmax.f32 %v14235_v47, %v5148_v31  ;;  %v5181_v22 = vmax.f32 %v13724_v13, %v5149_v25  ;;  %v5182_v28 = vmax.f32 %v14238_v54, %v5150_v23 }
 0x44e   : > { %v5183_v18 = vrot.slane %v14158_v11, 7  ;;  %v5184_v8 = vrot.slane %v14171_v15, 7  ;;  %v5185_v20 = vrot.slane %v14210_v59, 7  ;;  %v5186_v29 = vrot.slane %v14218_v30, 7 }
 0x44f   : > { %v5187_v33 = vrot.slane %v14226_v9, 7  ;;  %v5188_v43 = vrot.slane %v14232_v63, 7  ;;  %v16399_v44 = vrot.slane %v14240_v41, 7  ;;  %v5211_v31 = vrot.slane %v13722_v34, 7 }
 0x450   : > { %v5212_v4 = vrot.slane %v14235_v47, 7  ;;  %v5213_v50 = vrot.slane %v13724_v13, 7  ;;  %v5214_v19 = vrot.slane %v14238_v54, 7  ;;  %v5243_v53 = vsel %vm1291_vm3, %v5185_v20, %v5186_v29 }
 0x451   : > { %v18322_v7 = vrot.slane %v13720_v42, 7  ;;  %v14324_v32 = vsel %vm1291_vm3, %v5188_v43, %v16399_v44  ;;  %v5241_v39 = vsel %vm1291_vm3, %v5187_v33, %v5188_v43  ;;  %v5242_v58 = vsel %vm1291_vm3, %v5186_v29, %v5187_v33 }
 0x452   : > { %18323 = vst [vmem:[#allocation139_spill] sm:$0xff] %v14324_v32  ;;  %v5215_v25 = vsel %vm1291_vm3, %v5213_v50, %v5214_v19  ;;  %v5216_v16 = vsel %vm1291_vm3, %v5212_v4, %v5213_v50  ;;  %v5217_v23 = vsel %vm1291_vm3, %v5211_v31, %v5212_v4  ;;  %v5245_v44 = vsel %vm1291_vm3, %v5183_v18, %v5184_v8  ;;  %v18328_v4 = vld [vmem:[#allocation76_spill] sm:$0xff] }
 0x453   : > { %v5218_v57 = vsel %vm1291_vm3, %v18322_v7, %v5211_v31  ;;  %v5244_v7 = vsel %vm1291_vm3, %v5184_v8, %v5185_v20  ;;  %v5246_v43 = vsel %vm1291_vm3, %v5214_v19, %v5183_v18  ;;  %v5250_v33 = vadd.f32 %v5243_v53, %v18222_v46  ;;  %v18330_v8 = vld [vmem:[#allocation78_spill] sm:$0xff] }
 0x454   : > { %v5249_v29 = vadd.f32 %v5244_v7, %v18324_v26  ;;  %v5247_v61 = vadd.f32 %v5246_v43, %v18325_v0  ;;  %v5248_v50 = vadd.f32 %v5245_v44, %v18326_v3  ;;  %v5251_v32 = vadd.f32 %v5242_v58, %v18327_v27 }
 0x455   : > { %v5252_v31 = vadd.f32 %v5241_v39, %v18223_v1  ;;  %v5275_v20 = vadd.f32 %v5218_v57, %v18328_v4  ;;  %v5276_v60 = vadd.f32 %v5217_v23, %v18329_v40  ;;  %v5277_v5 = vadd.f32 %v5216_v16, %v18330_v8 }
 0x456   : > { %v5278_v18 = vadd.f32 %v5215_v25, %v18331_v36  ;;  %v14352_v19 = vmax.f32 %v5151_v10, %v5247_v61  ;;  %v14354_v26 = vmax.f32 %v5152_v62, %v5248_v50  ;;  %v14356_v46 = vmax.f32 %v5153_v49, %v5249_v29  ;;  %v18332_v29 = vld [vmem:[#allocation80_spill] sm:$0xff] }
 0x457   : > { %v14358_v0 = vmax.f32 %v5154_v56, %v5250_v33  ;;  %v14360_v3 = vmax.f32 %v5155_v24, %v5251_v32  ;;  %v14362_v27 = vmax.f32 %v5156_v6, %v5252_v31  ;;  %v14364_v1 = vmax.f32 %v5179_v14, %v5275_v20  ;;  %v18333_v31 = vld [vmem:[#allocation84_spill] sm:$0xff]  ;;  %v18334_v20 = vld [vmem:[#allocation86_spill] sm:$0xff] }
 0x458   : > { %v14366_v44 = vmax.f32 %v5180_v35, %v5276_v60  ;;  %v14368_v40 = vmax.f32 %v5181_v22, %v5277_v5  ;;  %v14370_v53 = vmax.f32 %v5182_v28, %v5278_v18  ;;  %v5311_v61 = vrot.slane %v14158_v11, 2 }
 0x459   : > { %v5312_v36 = vrot.slane %v14171_v15, 2  ;;  %v5313_v10 = vrot.slane %v14210_v59, 2  ;;  %v5314_v62 = vrot.slane %v14218_v30, 2  ;;  %v5315_v49 = vrot.slane %v14226_v9, 2 }
 0x45a   : > { %v5316_v56 = vrot.slane %v14232_v63, 2  ;;  %v5317_v24 = vrot.slane %v14240_v41, 2  ;;  %v5318_v60 = vrot.slane %v14160_v2, 2  ;;  %v16405_v5 = vrot.slane %v13722_v34, 2 }
 0x45b   : > { %v5340_v6 = vrot.slane %v14235_v47, 2  ;;  %v5341_v14 = vrot.slane %v13724_v13, 2  ;;  %v5342_v35 = vrot.slane %v14238_v54, 2  ;;  %v5370_v28 = vsel %vm1548_vm4, %v5314_v62, %v5315_v49 }
 0x45c   : > { %v5369_v22 = vsel %vm1548_vm4, %v5315_v49, %v5316_v56  ;;  %v14396_v32 = vsel %vm1548_vm4, %v5317_v24, %v5318_v60  ;;  %v5368_v39 = vsel %vm1548_vm4, %v5316_v56, %v5317_v24  ;;  %v5371_v58 = vsel %vm1548_vm4, %v5313_v10, %v5314_v62  ;;  %v18335_v49 = vld [vmem:[#allocation109_spill] sm:$0xff]  ;;  %v18336_v56 = vld [vmem:[#allocation112_spill] sm:$0xff] }
 0x45d   : > { %v5345_v57 = vsel %vm1548_vm4, %v16405_v5, %v5340_v6  ;;  %v5343_v25 = vsel %vm1548_vm4, %v5341_v14, %v5342_v35  ;;  %v5344_v16 = vsel %vm1548_vm4, %v5340_v6, %v5341_v14  ;;  %v5372_v23 = vsel %vm1548_vm4, %v5312_v36, %v5313_v10  ;;  %v18338_v14 = vld [vmem:[#allocation114_spill] sm:$0xff]  ;;  %v18433_v5 = vld [vmem:[#allocation93_spill] sm:$0xff] }
 0x45e   : > { %v5373_v7 = vsel %vm1548_vm4, %v5311_v61, %v5312_v36  ;;  %v5374_v43 = vsel %vm1548_vm4, %v5342_v35, %v5311_v61  ;;  %v5376_v50 = vadd.f32 %v5372_v23, %v18236_v17  ;;  %v5377_v4 = vadd.f32 %v5371_v58, %v18333_v31  ;;  %v18337_v36 = vld [vmem:[#allocation111_spill] sm:$0xff] }
 0x45f   : > { %v5375_v33 = vadd.f32 %v5373_v7, %v18332_v29  ;;  %v5378_v8 = vadd.f32 %v5370_v28, %v18334_v20  ;;  %v5379_v18 = vadd.f32 %v5369_v22, %v18233_v21  ;;  %v5380_v62 = vadd.f32 %v5368_v39, %v18241_v12  ;;  %v18339_v20 = vld [vmem:[#allocation113_spill] sm:$0xff] }
 0x460   : > { %v5403_v10 = vadd.f32 %v5345_v57, %v18335_v49  ;;  %v5404_v24 = vadd.f32 %v5344_v16, %v18336_v56  ;;  %v5405_v6 = vadd.f32 %v5343_v25, %v18337_v36  ;;  %v5406_v61 = vadd.f32 %v5374_v43, %v18338_v14  ;;  %v18341_v36 = vld [vmem:[#allocation148_spill] sm:$0xff]  ;;  %v18342_v14 = vld [vmem:[#allocation58_spill] sm:$0xff] }
 0x461   : > { %v5407_v35 = vmax.f32 %v14352_v19, %v5375_v33  ;;  %v5408_v17 = vmax.f32 %v14354_v26, %v5376_v50  ;;  %v5409_v58 = vmax.f32 %v14356_v46, %v5377_v4  ;;  %v5410_v28 = vmax.f32 %v14358_v0, %v5378_v8 }
 0x462   : > { %v5411_v21 = vmax.f32 %v14360_v3, %v5379_v18  ;;  %v5412_v12 = vmax.f32 %v14362_v27, %v5380_v62  ;;  %v5435_v22 = vmax.f32 %v14364_v1, %v5403_v10  ;;  %v5436_v57 = vmax.f32 %v14366_v44, %v5404_v24  ;;  %v18340_v62 = vld [vmem:[#allocation118_spill] sm:$0xff] }
 0x463   : > { %v5437_v39 = vmax.f32 %v14368_v40, %v5405_v6  ;;  %v5438_v25 = vmax.f32 %v14370_v53, %v5406_v61  ;;  %v5439_v19 = vrot.slane %v14158_v11, 6  ;;  %v5440_v26 = vrot.slane %v14171_v15, 6 }
 0x464   : > { %v5441_v46 = vrot.slane %v14210_v59, 6  ;;  %v5442_v0 = vrot.slane %v14218_v30, 6  ;;  %v5443_v3 = vrot.slane %v14226_v9, 6  ;;  %v5444_v27 = vrot.slane %v14232_v63, 6 }
 0x465   : > { %v5445_v1 = vrot.slane %v14240_v41, 6  ;;  %v16404_v44 = vrot.slane %v13720_v42, 6  ;;  %v5467_v40 = vrot.slane %v13722_v34, 6  ;;  %v5468_v53 = vrot.slane %v14235_v47, 6 }
 0x466   : > { %v5469_v11 = vrot.slane %v13724_v13, 6  ;;  %v5470_v15 = vrot.slane %v14238_v54, 6  ;;  %v5497_v30 = vsel %vm1805_vm5, %v5443_v3, %v5444_v27  ;;  %v5498_v16 = vsel %vm1805_vm5, %v5442_v0, %v5443_v3 }
 0x467   : > { %v14448_v59 = vsel %vm1805_vm5, %v5444_v27, %v5445_v1  ;;  %v5473_v7 = vsel %vm1805_vm5, %v5467_v40, %v5468_v53  ;;  %v5474_v43 = vsel %vm1805_vm5, %v16404_v44, %v5467_v40  ;;  %v5499_v29 = vsel %vm1805_vm5, %v5441_v46, %v5442_v0  ;;  %v18344_v0 = vld [vmem:[#allocation62_spill] sm:$0xff]  ;;  %v18432_v44 = vld [vmem:[#allocation251_spill] sm:$0xff] }
 0x468   : > { %v5472_v23 = vsel %vm1805_vm5, %v5468_v53, %v5469_v11  ;;  %v5471_v33 = vsel %vm1805_vm5, %v5469_v11, %v5470_v15  ;;  %v5500_v50 = vsel %vm1805_vm5, %v5440_v26, %v5441_v46  ;;  %v5501_v31 = vsel %vm1805_vm5, %v5439_v19, %v5440_v26  ;;  %v18343_v26 = vld [vmem:[#allocation66_spill] sm:$0xff] }
 0x469   : > { %v5502_v4 = vsel %vm1805_vm5, %v5470_v15, %v5439_v19  ;;  %v5504_v18 = vadd.f32 %v5501_v31, %v18252_v37  ;;  %v5505_v49 = vadd.f32 %v5500_v50, %v18340_v62  ;;  %v5506_v10 = vadd.f32 %v5499_v29, %v18253_v45  ;;  %v18351_v29 = vld [vmem:[#allocation46_spill] sm:$0xff]  ;;  %v18352_v50 = vld [vmem:[#allocation9_spill] sm:$0xff]  ;;  %v18353_v31 = vld [vmem:[#allocation136_spill] sm:$0xff] }
 0x46a   : > { %v5503_v8 = vadd.f32 %v5502_v4, %v18339_v20  ;;  %v5507_v56 = vadd.f32 %v5498_v16, %v18249_v38  ;;  %v5508_v24 = vadd.f32 %v5497_v30, %v18254_v55  ;;  %v5531_v6 = vadd.f32 %v5474_v43, %v18341_v36  ;;  %v18348_v30 = vld [vmem:[#allocation55_spill] sm:$0xff] }
 0x46b   : > { %v5532_v61 = vadd.f32 %v5473_v7, %v18342_v14  ;;  %v5533_v46 = vadd.f32 %v5472_v23, %v18343_v26  ;;  %v5534_v19 = vadd.f32 %v5471_v33, %v18344_v0  ;;  %v14484_v27 = vmax.f32 %v5408_v17, %v5504_v18  ;;  %v18350_v23 = vld [vmem:[#allocation237_spill] sm:$0xff]  ;;  %v18355_v18 = vld [vmem:[#allocation139_spill] sm:$0xff] }
 0x46c   : > { %v14482_v3 = vmax.f32 %v5407_v35, %v5503_v8  ;;  %v14486_v37 = vmax.f32 %v5409_v58, %v5505_v49  ;;  %v14488_v40 = vmax.f32 %v5410_v28, %v5506_v10  ;;  %v14490_v45 = vmax.f32 %v5411_v21, %v5507_v56  ;;  %v18345_v58 = vld [vmem:[#allocation169_spill] sm:$0xff]  ;;  %v18346_v21 = vld [vmem:[#allocation192_spill] sm:$0xff] }
 0x46d   : > { %v14492_v38 = vmax.f32 %v5412_v12, %v5508_v24  ;;  %v14494_v55 = vmax.f32 %v5435_v22, %v5531_v6  ;;  %v14496_v53 = vmax.f32 %v5436_v57, %v5532_v61  ;;  %v14498_v11 = vmax.f32 %v5437_v39, %v5533_v46  ;;  %v18347_v22 = vld [vmem:[#allocation144_spill] sm:$0xff]  ;;  %v18357_v24 = vld [vmem:[#allocation87_spill] sm:$0xff] }
 0x46e   : > { %v14500_v15 = vmax.f32 %v5438_v25, %v5534_v19  ;;  %v5567_v35 = vadd.f32 %v14486_v37, %v18255_v52  ;;  %v5568_v17 = vadd.f32 %v14488_v40, %v18267_v51  ;;  %v5695_v28 = vadd.f32 %v14490_v45, %v18345_v58  ;;  %v18349_v25 = vld [vmem:[#allocation252_spill] sm:$0xff]  ;;  %v18361_v58 = vld [vmem:[#allocation90_spill] sm:$0xff] }
 0x46f   : > { %v5696_v12 = vadd.f32 %v14492_v38, %v18346_v21  ;;  %v5631_v57 = vadd.f32 %v14498_v11, %v18347_v22  ;;  %v5759_v16 = vadd.f32 %v14494_v55, %v18349_v25  ;;  %v5760_v52 = vadd.f32 %v14496_v53, %v18350_v23  ;;  %v18354_v8 = vld [vmem:[#allocation40_spill] sm:$0xff] }
 0x470   : > { %v5632_v39 = vadd.f32 %v14500_v15, %v18348_v30  ;;  %v5599_v51 = vmax.f32 %v14482_v3, %v5567_v35  ;;  %v5600_v7 = vmax.f32 %v14484_v27, %v5568_v17  ;;  %v4795_v43 = vpack.c.bf16 %v14232_v63, %v14226_v9  ;;  %v18358_v6 = vld [vmem:[#allocation8_spill] sm:$0xff]  ;;  %v18360_v17 = vld [vmem:[#allocation41_spill] sm:$0xff] }
 0x471   : > { %v5063_v33 = vrot.slane %v18351_v29, 1  ;;  %v5125_v4 = vadd.f32 %v18353_v31, %v18352_v50  ;;  %v5190_v20 = vrot.slane %v14160_v2, 7  ;;  %v5253_v62 = vadd.f32 %v18355_v18, %v18354_v8 }
 0x472   : > { %v5319_v49 = vrot.slane %v18351_v29, 2  ;;  %v5663_v10 = vmax.f32 %v5599_v51, %v5631_v57  ;;  %v5664_v56 = vmax.f32 %v5600_v7, %v5632_v39  ;;  %6848 = vmatprep.mubr.msk.bf16.mxu1 %vm420_vm1, %v4795_v43  ;;  %v18356_v9 = vrot.slane %v14160_v2, 1  ;;  %v18362_v39 = vld [vmem:[#allocation124_spill] sm:$0xff]  ;;  %v18363_v7 = vld [vmem:[#allocation134_spill] sm:$0xff] }
 0x473   : > { %v5381_v36 = vadd.f32 %v14396_v32, %v18357_v24  ;;  %v5157_v61 = vmax.f32 %v14240_v41, %v5125_v4  ;;  %v18359_v26 = vrot.slane %v14240_v41, 7  ;;  %v5446_v30 = vrot.slane %v14160_v2, 6  ;;  %v18365_v4 = vld [vmem:[#allocation187_spill] sm:$0xff]  ;;  %v18368_v24 = vld [vmem:[#allocation201_spill] sm:$0xff] }
 0x474   : > { %v5110_v63 = vsel %vm970_vm2, %v18356_v9, %v5063_v33  ;;  %v5366_v0 = vsel %vm1548_vm4, %v5318_v60, %v5319_v49  ;;  %v5727_v19 = vmax.f32 %v5663_v10, %v5695_v28  ;;  %v5728_v35 = vmax.f32 %v5664_v56, %v5696_v12  ;;  %v18364_v60 = vld [vmem:[#allocation157_spill] sm:$0xff]  ;;  %v18367_v9 = vld [vmem:[#allocation186_spill] sm:$0xff] }
 0x475   : > { %v5126_v14 = vadd.f32 %v5110_v63, %v18358_v6  ;;  %v5239_v46 = vsel %vm1291_vm3, %v18359_v26, %v5190_v20  ;;  %v5382_v21 = vadd.f32 %v5366_v0, %v18361_v58  ;;  %v5285_v57 = vmax.f32 %v5157_v61, %v5253_v62  ;;  %v18369_v6 = vld [vmem:[#allocation244_spill] sm:$0xff]  ;;  %v18370_v61 = vld [vmem:[#allocation167_spill] sm:$0xff]  ;;  %v18371_v26 = vld [vmem:[#allocation54_spill] sm:$0xff] }
 0x476   : > { %v5254_v32 = vadd.f32 %v5239_v46, %v18360_v17  ;;  %v5509_v25 = vadd.f32 %v14448_v59, %v18362_v39  ;;  %v5791_v23 = vmax.f32 %v5727_v19, %v5759_v16  ;;  %v5792_v51 = vmax.f32 %v5728_v35, %v5760_v52  ;;  %v18366_v59 = vld [vmem:[#allocation119_spill] sm:$0xff]  ;;  %v18372_v0 = vld [vmem:[#allocation204_spill] sm:$0xff]  ;;  %v18373_v19 = vld [vmem:[#allocation314_spill] sm:$0xff] }
 0x477   : > { %v5158_v22 = vmax.f32 %v14160_v2, %v5126_v14  ;;  %v5569_v43 = vadd.f32 %v14490_v45, %v18363_v7  ;;  %v5570_v28 = vadd.f32 %v14492_v38, %v18364_v60  ;;  %v5413_v50 = vmax.f32 %v5285_v57, %v5381_v36  ;;  %v18374_v58 = vld [vmem:[#allocation205_spill] sm:$0xff]  ;;  %v18379_v7 = vld [vmem:[#allocation239_spill] sm:$0xff]  ;;  %v18380_v60 = vld [vmem:[#allocation246_spill] sm:$0xff] }
 0x478   : > { %v5495_v31 = vsel %vm1805_vm5, %v5445_v1, %v5446_v30  ;;  %v5633_v8 = vadd.f32 %v14482_v3, %v18365_v4  ;;  %v5823_v18 = vpack.c.bf16 %v5792_v51, %v5791_v23  ;;  %v5634_v63 = vadd.f32 %v14484_v27, %v18367_v9  ;;  %v18376_v57 = vld [vmem:[#allocation301_spill] sm:$0xff]  ;;  %v18378_v51 = vld [vmem:[#allocation264_spill] sm:$0xff] }
 0x479   : > { %v5286_v12 = vmax.f32 %v5158_v22, %v5254_v32  ;;  %v5510_v16 = vadd.f32 %v5495_v31, %v18366_v59  ;;  %v5601_v52 = vmax.f32 %v14486_v37, %v5569_v43  ;;  %v5602_v62 = vmax.f32 %v14488_v40, %v5570_v28  ;;  %v18375_v22 = vld [vmem:[#allocation212_spill] sm:$0xff]  ;;  %v18381_v28 = vld [vmem:[#allocation179_spill] sm:$0xff] }
 0x47a   : > { %v14569_v56 = vmax.f32 %v5413_v50, %v5509_v25  ;;  %v5761_v36 = vadd.f32 %v14498_v11, %v18368_v24  ;;  %6878 = vmatprep.mubr.msk.bf16.mxu0 %vm420_vm1, %v5823_v18  ;;  %v5762_v14 = vadd.f32 %v14500_v15, %v18369_v6  ;;  %v4546_v46 = vadd.f32 %v18371_v26, %v18370_v61  ;;  %v18377_v25 = vld [vmem:[#allocation215_spill] sm:$0xff]  ;;  %v18387_v6 = vld [vmem:[#allocation149_spill] sm:$0xff] }
 0x47b   : > { %v5414_v10 = vmax.f32 %v5286_v12, %v5382_v21  ;;  %v5665_v1 = vmax.f32 %v5601_v52, %v5633_v8  ;;  %v4579_v35 = vmax.f32 %v18373_v19, %v18372_v0  ;;  %v5666_v32 = vmax.f32 %v5602_v62, %v5634_v63  ;;  %v18382_v50 = vld [vmem:[#allocation155_spill] sm:$0xff]  ;;  %v18384_v8 = vld [vmem:[#allocation185_spill] sm:$0xff] }
 0x47c   : > { %v5697_v21 = vadd.f32 %v14569_v56, %v18374_v58  ;;  %v4610_v39 = vadd.f32 %v18376_v57, %v18375_v22  ;;  %v4578_v23 = vmax.f32 %v18377_v25, %v4546_v46  ;;  %v4611_v43 = vadd.f32 %v18379_v7, %v18378_v51  ;;  %v18383_v31 = vld [vmem:[#allocation107_spill] sm:$0xff]  ;;  %v18388_v57 = vld [vmem:[#allocation161_spill] sm:$0xff] }
 0x47d   : > { %v14582_v17 = vmax.f32 %v5414_v10, %v5510_v16  ;;  %v4674_v12 = vadd.f32 %v18381_v28, %v18380_v60  ;;  %v4738_v4 = vadd.f32 %v18383_v31, %v18382_v50  ;;  %v18385_v16 = vld [vmem:[#allocation262_spill] sm:$0xff]  ;;  %v18386_v52 = vld [vmem:[#allocation299_spill] sm:$0xff]  ;;  %v5191_v10 = vrot.slane %v18351_v29, 7  ;;  %v18390_v31 = vld [vmem:[#allocation44_spill] sm:$0xff] }
 0x47e   : > { %v5729_v59 = vmax.f32 %v5665_v1, %v5697_v21  ;;  %v4739_v62 = vadd.f32 %v18386_v52, %v18385_v16  ;;  %v4642_v9 = vmax.f32 %v4578_v23, %v4610_v39  ;;  %v4643_v63 = vmax.f32 %v4579_v35, %v4611_v43  ;;  %v18389_v25 = vld [vmem:[#allocation327_spill] sm:$0xff]  ;;  %v18391_v23 = vld [vmem:[#allocation126_spill] sm:$0xff] }
 0x47f   : > { %v5698_v18 = vadd.f32 %v14582_v17, %v18384_v8  ;;  %v5447_v24 = vrot.slane %v18351_v29, 6  ;;  %v5571_v26 = vadd.f32 %v14569_v56, %v18387_v6  ;;  %v5238_v58 = vsel %vm1291_vm3, %v5190_v20, %v5191_v10  ;;  %v18393_v52 = vld [vmem:[#allocation190_spill] sm:$0xff] }
 0x480   : > { %v5793_v0 = vmax.f32 %v5729_v59, %v5761_v36  ;;  %v5572_v1 = vadd.f32 %v14582_v17, %v18388_v57  ;;  %v4706_v21 = vmax.f32 %v4642_v9, %v4674_v12  ;;  %v4707_v28 = vmax.f32 %v4643_v63, %v18389_v25  ;;  %v18392_v59 = vld [vmem:[#allocation189_spill] sm:$0xff]  ;;  %v18394_v6 = vld [vmem:[#allocation210_spill] sm:$0xff] }
 0x481   : > { %v5730_v46 = vmax.f32 %v5666_v32, %v5698_v18  ;;  %v5255_v8 = vadd.f32 %v5238_v58, %v18390_v31  ;;  %v5494_v35 = vsel %vm1805_vm5, %v5446_v30, %v5447_v24  ;;  %v5603_v32 = vmax.f32 %v14490_v45, %v5571_v26 }
 0x482   : > { %v5511_v43 = vadd.f32 %v5494_v35, %v18391_v23  ;;  %v5604_v36 = vmax.f32 %v14492_v38, %v5572_v1  ;;  %v14614_v18 = vmax.f32 %v4706_v21, %v4738_v4  ;;  %v14616_v20 = vmax.f32 %v4707_v28, %v4739_v62  ;;  %v18396_v35 = vld [vmem:[#allocation11_spill] sm:$0xff]  ;;  %v18397_v23 = vld [vmem:[#allocation10_spill] sm:$0xff] }
 0x483   : > { %v5794_v39 = vmax.f32 %v5730_v46, %v5762_v14  ;;  %v5635_v12 = vadd.f32 %v14486_v37, %v18392_v59  ;;  %v5636_v9 = vadd.f32 %v14488_v40, %v18393_v52  ;;  %v14624_v30 = vadd.f32 %v14482_v3, %v18394_v6  ;;  %v18395_v14 = vld [vmem:[#allocation220_spill] sm:$0xff]  ;;  %v18399_v52 = vld [vmem:[#allocation89_spill] sm:$0xff] }
 0x484   : > { %v14628_v26 = vadd.f32 %v14484_v27, %v18395_v14  ;;  %v4796_v4 = vpack.c.bf16 %v14160_v2, %v14240_v41  ;;  %v5064_v62 = vrot.slane %v14614_v18, 1  ;;  %v5065_v46 = vrot.slane %v14616_v20, 1 }
 0x485   : > { %v5824_v63 = vpack.c.bf16 %v5794_v39, %v5793_v0  ;;  %v5192_v58 = vrot.slane %v14614_v18, 7  ;;  %v5320_v57 = vrot.slane %v14614_v18, 2  ;;  %v5321_v0 = vrot.slane %v14616_v20, 2 }
 0x486   : > { %v5448_v1 = vrot.slane %v14614_v18, 6  ;;  %v14639_v21 = vmax.f32 %v5603_v32, %v5635_v12  ;;  %v14641_v25 = vmax.f32 %v5604_v36, %v5636_v9  ;;  %6849 = vmatmul.mubr.msk.bf16.gmra.mxu1 %vm420_vm1, %v4796_v4  ;;  %v5108_v2 = vsel %vm970_vm2, %v5064_v62, %v5065_v46  ;;  %v18398_v36 = vld [vmem:[#allocation45_spill] sm:$0xff]  ;;  %v18401_v4 = vld [vmem:[#allocation122_spill] sm:$0xff] }
 0x487   : > { %6879 = vmatmul.mubr.msk.bf16.vlgmr.msra.gmra.mxu0 %vm420_vm1, %v5824_v63  ;;  %v5109_v41 = vsel %vm970_vm2, %v5063_v33, %v5064_v62  ;;  %v5237_v28 = vsel %vm1291_vm3, %v5191_v10, %v5192_v58  ;;  %v5365_v31 = vsel %vm1548_vm4, %v5319_v49, %v5320_v57  ;;  %v5128_v32 = vadd.f32 %v5108_v2, %v18397_v23  ;;  %v18400_v33 = vld [vmem:[#allocation92_spill] sm:$0xff]  ;;  %v18402_v2 = vld [vmem:[#allocation326_spill] sm:$0xff] }
 0x488   : > { %v5127_v39 = vadd.f32 %v5109_v41, %v18396_v35  ;;  %v5256_v59 = vadd.f32 %v5237_v28, %v18398_v36  ;;  %v5364_v12 = vsel %vm1548_vm4, %v5320_v57, %v5321_v0  ;;  %v5383_v9 = vadd.f32 %v5365_v31, %v18399_v52  ;;  %v18403_v41 = vld [vmem:[#allocation315_spill] sm:$0xff]  ;;  %v18404_v57 = vld [vmem:[#allocation274_spill] sm:$0xff]  ;;  %v18405_v35 = vld [vmem:[#allocation285_spill] sm:$0xff] }
 0x489   : > { %v5384_v63 = vadd.f32 %v5364_v12, %v18400_v33  ;;  %v5493_v10 = vsel %vm1805_vm5, %v5447_v24, %v5448_v1  ;;  %v4797_v6 = vpack.c.bf16 %v14614_v18, %v18351_v29  ;;  %v5160_v14 = vmax.f32 %v14614_v18, %v5128_v32  ;;  %v18406_v23 = vld [vmem:[#allocation64_spill] sm:$0xff] }
 0x48a   : > { %v5159_v49 = vmax.f32 %v18351_v29, %v5127_v39  ;;  %v5512_v62 = vadd.f32 %v5493_v10, %v18401_v4  ;;  %v4581_v28 = vmax.f32 %v18403_v41, %v18402_v2  ;;  %v4613_v31 = vadd.f32 %v18373_v19, %v18404_v57  ;;  %v18407_v4 = vld [vmem:[#allocation13_spill] sm:$0xff] }
 0x48b   : > { %6852 = vmatprep.mubr.msk.bf16.mxu1 %vm420_vm1, %v4797_v6  ;;  %v4741_v24 = vadd.f32 %v18379_v7, %v18405_v35  ;;  %v5066_v36 = vrot.slane %v18406_v23, 1  ;;  %v5193_v12 = vrot.slane %v14616_v20, 7  ;;  %v5288_v39 = vmax.f32 %v5160_v14, %v5256_v59  ;;  %v18408_v59 = vld [vmem:[#allocation101_spill] sm:$0xff]  ;;  %v18409_v14 = vld [vmem:[#allocation48_spill] sm:$0xff] }
 0x48c   : > { %v5287_v29 = vmax.f32 %v5159_v49, %v5255_v8  ;;  %v5194_v18 = vrot.slane %v18406_v23, 7  ;;  %v5322_v32 = vrot.slane %v18406_v23, 2  ;;  %v4645_v52 = vmax.f32 %v4581_v28, %v4613_v31  ;;  %v18410_v28 = vld [vmem:[#allocation49_spill] sm:$0xff] }
 0x48d   : > { %v5107_v33 = vsel %vm970_vm2, %v5065_v46, %v5066_v36  ;;  %v5236_v19 = vsel %vm1291_vm3, %v5192_v58, %v5193_v12  ;;  %v5449_v10 = vrot.slane %v14616_v20, 6  ;;  %v5416_v6 = vmax.f32 %v5288_v39, %v5384_v63 }
 0x48e   : > { %v5415_v7 = vmax.f32 %v5287_v29, %v5383_v9  ;;  %v5129_v2 = vadd.f32 %v5107_v33, %v18407_v4  ;;  %v5235_v8 = vsel %vm1291_vm3, %v5193_v12, %v5194_v18  ;;  %v4709_v49 = vmax.f32 %v4645_v52, %v18408_v59  ;;  %v18411_v29 = vld [vmem:[#allocation91_spill] sm:$0xff] }
 0x48f   : > { %v5257_v41 = vadd.f32 %v5236_v19, %v18409_v14  ;;  %v5258_v46 = vadd.f32 %v5235_v8, %v18410_v28  ;;  %v5363_v58 = vsel %vm1548_vm4, %v5321_v0, %v5322_v32  ;;  %v14698_v9 = vmax.f32 %v5416_v6, %v5512_v62  ;;  %v18412_v19 = vld [vmem:[#allocation193_spill] sm:$0xff]  ;;  %v18413_v8 = vld [vmem:[#allocation154_spill] sm:$0xff]  ;;  %v18415_v6 = vld [vmem:[#allocation128_spill] sm:$0xff] }
 0x490   : > { %v14696_v31 = vmax.f32 %v5415_v7, %v5511_v43  ;;  %v5161_v63 = vmax.f32 %v14616_v20, %v5129_v2  ;;  %v5385_v39 = vadd.f32 %v5363_v58, %v18411_v29  ;;  %v14702_v33 = vmax.f32 %v4709_v49, %v4741_v24  ;;  %v18414_v0 = vld [vmem:[#allocation165_spill] sm:$0xff]  ;;  %v18416_v49 = vld [vmem:[#allocation150_spill] sm:$0xff] }
 0x491   : > { %v5450_v12 = vrot.slane %v18406_v23, 6  ;;  %v5492_v52 = vsel %vm1805_vm5, %v5448_v1, %v5449_v10  ;;  %v5637_v4 = vadd.f32 %v14490_v45, %v18412_v19  ;;  %v5700_v62 = vadd.f32 %v14698_v9, %v18414_v0 }
 0x492   : > { %v5699_v43 = vadd.f32 %v14696_v31, %v18413_v8  ;;  %v5289_v7 = vmax.f32 %v5161_v63, %v5257_v41  ;;  %v5513_v2 = vadd.f32 %v5492_v52, %v18415_v6  ;;  %v5067_v24 = vrot.slane %v14702_v33, 1  ;;  %v18417_v41 = vld [vmem:[#allocation125_spill] sm:$0xff]  ;;  %v18418_v8 = vld [vmem:[#allocation163_spill] sm:$0xff] }
 0x493   : > { %v5323_v59 = vrot.slane %v14702_v33, 2  ;;  %v5491_v1 = vsel %vm1805_vm5, %v5449_v10, %v5450_v12  ;;  %v5573_v14 = vadd.f32 %v14696_v31, %v18416_v49  ;;  %v5732_v58 = vmax.f32 %v14641_v25, %v5700_v62 }
 0x494   : > { %v5731_v28 = vmax.f32 %v14639_v21, %v5699_v43  ;;  %v5417_v29 = vmax.f32 %v5289_v7, %v5385_v39  ;;  %v5514_v63 = vadd.f32 %v5491_v1, %v18417_v41  ;;  %v5106_v52 = vsel %vm970_vm2, %v5066_v36, %v5067_v24  ;;  %v18419_v43 = vld [vmem:[#allocation12_spill] sm:$0xff]  ;;  %v18420_v39 = vld [vmem:[#allocation94_spill] sm:$0xff]  ;;  %v18421_v1 = vld [vmem:[#allocation217_spill] sm:$0xff] }
 0x495   : > { %v5362_v19 = vsel %vm1548_vm4, %v5322_v32, %v5323_v59  ;;  %v5574_v0 = vadd.f32 %v14698_v9, %v18418_v8  ;;  %v5605_v10 = vmax.f32 %v14569_v56, %v5573_v14  ;;  %v5796_v21 = vmax.f32 %v5732_v58, %v14628_v26  ;;  %v18422_v14 = vld [vmem:[#allocation223_spill] sm:$0xff] }
 0x496   : > { %v5795_v6 = vmax.f32 %v5731_v28, %v14624_v30  ;;  %v5130_v25 = vadd.f32 %v5106_v52, %v18419_v43  ;;  %v5386_v62 = vadd.f32 %v5362_v19, %v18420_v39  ;;  %v14736_v7 = vmax.f32 %v5417_v29, %v5513_v2  ;;  %v18423_v28 = vld [vmem:[#allocation261_spill] sm:$0xff]  ;;  %v18424_v52 = vld [vmem:[#allocation123_spill] sm:$0xff] }
 0x497   : > { %v5606_v36 = vmax.f32 %v14582_v17, %v5574_v0  ;;  %v5638_v32 = vadd.f32 %v14492_v38, %v18421_v1  ;;  %v5669_v49 = vmax.f32 %v5605_v10, %v5637_v4  ;;  %v5765_v30 = vadd.f32 %v14486_v37, %v18422_v14  ;;  %v18425_v29 = vld [vmem:[#allocation249_spill] sm:$0xff]  ;;  %v18426_v0 = vld [vmem:[#allocation182_spill] sm:$0xff] }
 0x498   : > { %v5825_v41 = vpack.c.bf16 %v5796_v21, %v5795_v6  ;;  %v5162_v8 = vmax.f32 %v18406_v23, %v5130_v25  ;;  %v5766_v26 = vadd.f32 %v14488_v40, %v18423_v28  ;;  %v5701_v2 = vadd.f32 %v14736_v7, %v18424_v52  ;;  %v18428_v14 = vld [vmem:[#allocation14_spill] sm:$0xff] }
 0x499   : > { %v5670_v58 = vmax.f32 %v5606_v36, %v5638_v32  ;;  %v5068_v19 = vrot.slane %v18425_v29, 1  ;;  %v5069_v43 = vrot.slane %v18426_v0, 1  ;;  %v5195_v10 = vrot.slane %v14702_v33, 7  ;;  %v14761_v32 = vpop.f32.mrf.mxu0 }
 0x49a   : > { %6882 = vmatprep.mubr.msk.bf16.mxu0 %vm420_vm1, %v5825_v41  ;;  %v5290_v4 = vmax.f32 %v5162_v8, %v5258_v46  ;;  %v16408_v6 = vrot.slane %v18425_v29, 7  ;;  %v5324_v21 = vrot.slane %v18425_v29, 2  ;;  %v5733_v25 = vmax.f32 %v5669_v49, %v5701_v2  ;;  %v18427_v41 = vld [vmem:[#allocation15_spill] sm:$0xff]  ;;  %v18429_v2 = vld [vmem:[#allocation53_spill] sm:$0xff] }
 0x49b   : > { %v5104_v39 = vsel %vm970_vm2, %v5068_v19, %v5069_v43  ;;  %v5105_v36 = vsel %vm970_vm2, %v5067_v24, %v5068_v19  ;;  %v16407_v1 = vrot.slane %v18426_v0, 2  ;;  %v5234_v24 = vsel %vm1291_vm3, %v5194_v18, %v5195_v10 }
 0x49c   : > { %v5418_v46 = vmax.f32 %v5290_v4, %v5386_v62  ;;  %v5131_v8 = vadd.f32 %v5105_v36, %v18427_v41  ;;  %v5132_v28 = vadd.f32 %v5104_v39, %v18428_v14  ;;  %v5233_v49 = vsel %vm1291_vm3, %v5195_v10, %v16408_v6  ;;  %v18430_v41 = vld [vmem:[#allocation52_spill] sm:$0xff] }
 0x49d   : > { %v5797_v52 = vmax.f32 %v5733_v25, %v5765_v30  ;;  %v5260_v19 = vadd.f32 %v5233_v49, %v18429_v2  ;;  %v5360_v62 = vsel %vm1548_vm4, %v5324_v21, %v16407_v1  ;;  %v5259_v30 = vadd.f32 %v5234_v24, %v18430_v41  ;;  %v18431_v14 = vld [vmem:[#allocation96_spill] sm:$0xff]  ;;  %v14788_v2 = vpop.f32.mrf.mxu0  ;;  %v18434_v24 = vld [vmem:[#allocation153_spill] sm:$0xff]  ;;  %v18437_v1 = vld [vmem:[#allocation202_spill] sm:$0xff] }
 0x49e   : > { %v14778_v4 = vmax.f32 %v5418_v46, %v5514_v63  ;;  %v5163_v39 = vmax.f32 %v14702_v33, %v5131_v8  ;;  %v5164_v36 = vmax.f32 %v18425_v29, %v5132_v28  ;;  %v5361_v25 = vsel %vm1548_vm4, %v5323_v59, %v5324_v21 }
 0x49f   : > { %v5388_v18 = vadd.f32 %v5360_v62, %v18431_v14  ;;  %v5451_v10 = vrot.slane %v14702_v33, 6  ;;  %v16406_v49 = vrot.slane %v18425_v29, 6  ;;  %v5387_v28 = vadd.f32 %v5361_v25, %v18433_v5  ;;  %v18435_v5 = vld [vmem:[#allocation130_spill] sm:$0xff] }
 0x4a0   : > { %v5702_v63 = vadd.f32 %v14778_v4, %v18432_v44  ;;  %v5291_v46 = vmax.f32 %v5163_v39, %v5259_v30  ;;  %v5292_v8 = vmax.f32 %v5164_v36, %v5260_v19  ;;  %v5575_v62 = vadd.f32 %v14736_v7, %v18434_v24  ;;  %v18436_v30 = vld [vmem:[#allocation127_spill] sm:$0xff] }
 0x4a1   : > { %v5489_v59 = vsel %vm1805_vm5, %v5451_v10, %v16406_v49  ;;  %v5490_v21 = vsel %vm1805_vm5, %v5450_v12, %v5451_v10  ;;  %v5576_v44 = vadd.f32 %v14778_v4, %v18370_v61  ;;  %v5639_v12 = vadd.f32 %v14569_v56, %v18437_v1  ;;  %v14811_v10 = vpop.f32.mrf.mxu0 }
 0x4a2   : > { %v5734_v39 = vmax.f32 %v5670_v58, %v5702_v63  ;;  %v5419_v19 = vmax.f32 %v5291_v46, %v5387_v28  ;;  %v5420_v36 = vmax.f32 %v5292_v8, %v5388_v18  ;;  %v5515_v41 = vadd.f32 %v5490_v21, %v18435_v5  ;;  %v18438_v58 = vld [vmem:[#allocation267_spill] sm:$0xff] }
 0x4a3   : > { %v5516_v25 = vadd.f32 %v5489_v59, %v18436_v30  ;;  %v5607_v14 = vmax.f32 %v14696_v31, %v5575_v62  ;;  %v5608_v49 = vmax.f32 %v14698_v9, %v5576_v44  ;;  %v5640_v61 = vadd.f32 %v14582_v17, %v18375_v22  ;;  %v18440_v62 = vld [vmem:[#allocation325_spill] sm:$0xff] }
 0x4a4   : > { %v5798_v24 = vmax.f32 %v5734_v39, %v5766_v26  ;;  %v14813_v6 = vmax.f32 %v5419_v19, %v5515_v41  ;;  %v5767_v18 = vadd.f32 %v14490_v45, %v18438_v58  ;;  %v5768_v8 = vadd.f32 %v14492_v38, %v18382_v50  ;;  %v18439_v26 = vld [vmem:[#allocation196_spill] sm:$0xff] }
 0x4a5   : > { %v14819_v63 = vmax.f32 %v5420_v36, %v5516_v25  ;;  %v5671_v46 = vmax.f32 %v5607_v14, %v5639_v12  ;;  %v4798_v1 = vpack.c.bf16 %v18406_v23, %v14616_v20  ;;  %v5672_v59 = vmax.f32 %v5608_v49, %v5640_v61  ;;  %v18441_v39 = vld [vmem:[#allocation140_spill] sm:$0xff]  ;;  %v14835_v20 = vpop.f32.mrf.mxu0  ;;  %v18443_v14 = vld [vmem:[#allocation17_spill] sm:$0xff] }
 0x4a6   : > { %v5826_v28 = vpack.c.bf16 %v5798_v24, %v5797_v52  ;;  %v5703_v21 = vadd.f32 %v14813_v6, %v18439_v26  ;;  %v4799_v22 = vpack.c.bf16 %v18425_v29, %v14702_v33  ;;  %v5070_v44 = vrot.slane %v18440_v62, 1  ;;  %v18444_v24 = vld [vmem:[#allocation16_spill] sm:$0xff] }
 0x4a7   : > { %v5704_v45 = vadd.f32 %v14819_v63, %v18380_v60  ;;  %6853 = vmatmul.mubr.msk.bf16.gmra.mxu1 %vm420_vm1, %v4798_v1  ;;  %v5071_v38 = vrot.slane %v18441_v39, 1  ;;  %v5197_v50 = vrot.slane %v18426_v0, 7  ;;  %v5198_v33 = vrot.slane %v18440_v62, 7  ;;  %v14852_v30 = vpop.f32.mrf.mxu0  ;;  %v18445_v1 = vld [vmem:[#allocation56_spill] sm:$0xff] }
 0x4a8   : > { %6883 = vmatmul.mubr.msk.bf16.gmra.mxu0 %vm420_vm1, %v5826_v28  ;;  %v5735_v23 = vmax.f32 %v5671_v46, %v5703_v21  ;;  %6856 = vmatprep.mubr.msk.bf16.mxu1 %vm420_vm1, %v4799_v22  ;;  %v5326_v52 = vrot.slane %v18440_v62, 2  ;;  %v5327_v60 = vrot.slane %v18441_v39, 2  ;;  %v5103_v36 = vsel %vm970_vm2, %v5069_v43, %v5070_v44 }
 0x4a9   : > { %v5736_v49 = vmax.f32 %v5672_v59, %v5704_v45  ;;  %v5102_v19 = vsel %vm970_vm2, %v5070_v44, %v5071_v38  ;;  %v18442_v5 = vrot.slane %v18425_v29, 7  ;;  %v5133_v12 = vadd.f32 %v5103_v36, %v18443_v14  ;;  %v18446_v59 = vld [vmem:[#allocation57_spill] sm:$0xff]  ;;  %v18448_v44 = vld [vmem:[#allocation98_spill] sm:$0xff] }
 0x4aa   : > { %v5799_v25 = vmax.f32 %v5735_v23, %v5767_v18  ;;  %v5134_v61 = vadd.f32 %v5102_v19, %v18444_v24  ;;  %v5231_v58 = vsel %vm1291_vm3, %v5197_v50, %v5198_v33  ;;  %v5358_v26 = vsel %vm1548_vm4, %v5326_v52, %v5327_v60 }
 0x4ab   : > { %v5232_v41 = vsel %vm1291_vm3, %v18442_v5, %v5197_v50  ;;  %v5800_v46 = vmax.f32 %v5736_v49, %v5768_v8  ;;  %v5262_v43 = vadd.f32 %v5231_v58, %v18446_v59  ;;  %v5165_v21 = vmax.f32 %v18426_v0, %v5133_v12  ;;  %v18449_v8 = vld [vmem:[#allocation95_spill] sm:$0xff]  ;;  %v14872_v5 = vpop.f32.mrf.mxu0 }
 0x4ac   : > { %v5261_v28 = vadd.f32 %v5232_v41, %v18445_v1  ;;  %v5166_v22 = vmax.f32 %v18440_v62, %v5134_v61  ;;  %v18447_v18 = vrot.slane %v18426_v0, 2  ;;  %v5390_v23 = vadd.f32 %v5358_v26, %v18448_v44  ;;  %18450 = vst [vmem:[#allocation59_spill] sm:$0xff] %v14872_v5  ;;  %v18451_v12 = vld [vmem:[#allocation47_spill] sm:$0xff]  ;;  %v18452_v61 = vld [vmem:[#allocation173_spill] sm:$0xff]  ;;  %v18566_v5 = vld [vmem:[#allocation206_spill] sm:$0xff] }
 0x4ad   : > { %v5827_v50 = vpack.c.bf16 %v5800_v46, %v5799_v25  ;;  %v5453_v19 = vrot.slane %v18426_v0, 6  ;;  %v5454_v36 = vrot.slane %v18440_v62, 6  ;;  %v5577_v24 = vadd.f32 %v14813_v6, %v18451_v12  ;;  %v18454_v1 = vld [vmem:[#allocation25_spill] sm:$0xff]  ;;  %v18458_v12 = vld [vmem:[#allocation151_spill] sm:$0xff] }
 0x4ae   : > { %v5359_v45 = vsel %vm1548_vm4, %v18447_v18, %v5326_v52  ;;  %v5293_v41 = vmax.f32 %v5165_v21, %v5261_v28  ;;  %v5294_v14 = vmax.f32 %v5166_v22, %v5262_v43  ;;  %v5578_v58 = vadd.f32 %v14819_v63, %v18452_v61  ;;  %v18453_v52 = vld [vmem:[#allocation104_spill] sm:$0xff] }
 0x4af   : > { %v5389_v49 = vadd.f32 %v5359_v45, %v18449_v8  ;;  %v14880_v59 = vadd.f32 %v18454_v1, %v18453_v52  ;;  %6886 = vmatprep.mubr.msk.bf16.mxu0 %vm420_vm1, %v5827_v50  ;;  %v5487_v25 = vsel %vm1805_vm5, %v5453_v19, %v5454_v36  ;;  %v18455_v46 = vrot.slane %v18425_v29, 6  ;;  %v18456_v22 = vld [vmem:[#allocation132_spill] sm:$0xff]  ;;  %v18457_v45 = vld [vmem:[#allocation129_spill] sm:$0xff] }
 0x4b0   : > { %v5641_v43 = vadd.f32 %v14696_v31, %v18378_v51  ;;  %v5422_v21 = vmax.f32 %v5294_v14, %v5390_v23  ;;  %v5518_v44 = vadd.f32 %v5487_v25, %v18457_v45  ;;  %v5609_v8 = vmax.f32 %v14736_v7, %v5577_v24  ;;  %v18460_v23 = vld [vmem:[#allocation312_spill] sm:$0xff]  ;;  %v18462_v14 = vld [vmem:[#allocation18_spill] sm:$0xff] }
 0x4b1   : > { %v5488_v28 = vsel %vm1805_vm5, %v18455_v46, %v5453_v19  ;;  %v5421_v26 = vmax.f32 %v5293_v41, %v5389_v49  ;;  %v5610_v50 = vmax.f32 %v14778_v4, %v5578_v58  ;;  %v5642_v61 = vadd.f32 %v14698_v9, %v18458_v12  ;;  %v14899_v19 = vpop.f32.mrf.mxu0  ;;  %v18463_v24 = vld [vmem:[#allocation332_spill] sm:$0xff]  ;;  %v18464_v46 = vld [vmem:[#allocation19_spill] sm:$0xff]  ;;  %v18468_v45 = vld [vmem:[#allocation266_spill] sm:$0xff] }
 0x4b2   : > { %v5517_v18 = vadd.f32 %v5488_v28, %v18456_v22  ;;  %v5769_v29 = vadd.f32 %v14569_v56, %v18385_v16  ;;  %18459 = vst [vmem:[#allocation63_spill] sm:$0xff] %v14899_v19  ;;  %v14903_v51 = vmax.f32 %v5422_v21, %v5518_v44  ;;  %v18461_v49 = vrot.slane %v18460_v23, 1  ;;  %v18467_v22 = vld [vmem:[#allocation253_spill] sm:$0xff]  ;;  %v14941_v19 = vpop.f32.mrf.mxu1 }
 0x4b3   : > { %v5136_v58 = vadd.f32 %v18463_v24, %v18462_v14  ;;  %v5673_v1 = vmax.f32 %v5609_v8, %v5641_v43  ;;  %v5674_v25 = vmax.f32 %v5610_v50, %v5642_v61  ;;  %v18465_v56 = vrot.slane %v18441_v39, 7  ;;  %v18469_v8 = vld [vmem:[#allocation60_spill] sm:$0xff]  ;;  %v18470_v12 = vld [vmem:[#allocation61_spill] sm:$0xff]  ;;  %v18471_v61 = vld [vmem:[#allocation22_spill] sm:$0xff]  ;;  %v14931_v14 = vpop.f32.mrf.mxu0 }
 0x4b4   : > { %v14901_v52 = vmax.f32 %v5421_v26, %v5517_v18  ;;  %v5101_v41 = vsel %vm970_vm2, %v5071_v38, %v18461_v49  ;;  %v18466_v26 = vld [vmem:[#allocation184_spill] sm:$0xff]  ;;  %v5706_v18 = vadd.f32 %v14903_v51, %v18467_v22  ;;  %v5770_v38 = vadd.f32 %v14582_v17, %v18468_v45  ;;  %18473 = vst [vmem:[#allocation145_spill] sm:$0xff] %v14931_v14  ;;  %v18475_v17 = vld [vmem:[#allocation29_spill] sm:$0xff] }
 0x4b5   : > { %v5135_v28 = vadd.f32 %v5101_v41, %v18464_v46  ;;  %v5230_v16 = vsel %vm1291_vm3, %v5198_v33, %v18465_v56  ;;  %v5168_v44 = vmax.f32 %v18460_v23, %v5136_v58  ;;  %v5264_v49 = vadd.f32 %v18471_v61, %v18470_v12  ;;  %v18474_v56 = vld [vmem:[#allocation100_spill] sm:$0xff]  ;;  %v18477_v45 = vld [vmem:[#allocation97_spill] sm:$0xff] }
 0x4b6   : > { %v5705_v21 = vadd.f32 %v14901_v52, %v18466_v26  ;;  %v5263_v50 = vadd.f32 %v5230_v16, %v18469_v8  ;;  %v18472_v33 = vrot.slane %v18460_v23, 2  ;;  %v5738_v46 = vmax.f32 %v5674_v25, %v5706_v18  ;;  %v18478_v12 = vld [vmem:[#allocation133_spill] sm:$0xff] }
 0x4b7   : > { %v5167_v43 = vmax.f32 %v18441_v39, %v5135_v28  ;;  %v5392_v26 = vadd.f32 %v18475_v17, %v18474_v56  ;;  %v18476_v58 = vrot.slane %v18441_v39, 6  ;;  %v5296_v22 = vmax.f32 %v5168_v44, %v5264_v49  ;;  %v18483_v44 = vld [vmem:[#allocation304_spill] sm:$0xff] }
 0x4b8   : > { %v5357_v41 = vsel %vm1548_vm4, %v5327_v60, %v18472_v33  ;;  %v5737_v24 = vmax.f32 %v5673_v1, %v5705_v21  ;;  %v14943_v60 = vpop.f32.mrf.mxu0  ;;  %v5802_v25 = vmax.f32 %v5738_v46, %v5770_v38  ;;  %v18480_v21 = vld [vmem:[#allocation158_spill] sm:$0xff]  ;;  %v18481_v33 = vld [vmem:[#allocation176_spill] sm:$0xff]  ;;  %v5643_v49 = vadd.f32 %v14736_v7, %v18404_v57 }
 0x4b9   : > { %v5486_v28 = vsel %vm1805_vm5, %v5454_v36, %v18476_v58  ;;  %v5295_v16 = vmax.f32 %v5167_v43, %v5263_v50  ;;  %v5391_v8 = vadd.f32 %v5357_v41, %v18477_v45  ;;  %18479 = vst [vmem:[#allocation197_spill] sm:$0xff] %v14943_v60  ;;  %v5579_v18 = vadd.f32 %v14901_v52, %v18480_v21  ;;  %v18482_v43 = vld [vmem:[#allocation131_spill] sm:$0xff]  ;;  %v18484_v38 = vld [vmem:[#allocation224_spill] sm:$0xff]  ;;  %v18488_v21 = vld [vmem:[#allocation218_spill] sm:$0xff] }
 0x4ba   : > { %v5519_v61 = vadd.f32 %v5486_v28, %v18478_v12  ;;  %v5801_v1 = vmax.f32 %v5737_v24, %v5769_v29  ;;  %v5580_v56 = vadd.f32 %v14903_v51, %v18481_v33  ;;  %v5424_v36 = vmax.f32 %v5296_v22, %v5392_v26  ;;  %v14965_v22 = vpop.f32.mrf.mxu1  ;;  %v14967_v57 = vpop.f32.mrf.mxu0  ;;  %v18491_v33 = vld [vmem:[#allocation65_spill] sm:$0xff] }
 0x4bb   : > { %v5423_v17 = vmax.f32 %v5295_v16, %v5391_v8  ;;  %v5520_v50 = vadd.f32 %v18483_v44, %v18482_v43  ;;  %v5611_v58 = vmax.f32 %v14813_v6, %v5579_v18  ;;  %v5644_v24 = vadd.f32 %v14778_v4, %v18484_v38  ;;  %18485 = vst [vmem:[#allocation329_spill] sm:$0xff] %v14967_v57  ;;  %v18495_v43 = vld [vmem:[#allocation27_spill] sm:$0xff]  ;;  %v18498_v38 = vld [vmem:[#allocation42_spill] sm:$0xff] }
 0x4bc   : > { %v5828_v41 = vpack.c.bf16 %v5802_v25, %v5801_v1  ;;  %v5612_v29 = vmax.f32 %v14819_v63, %v5580_v56  ;;  %v5771_v26 = vadd.f32 %v14696_v31, %v18405_v35  ;;  %v4800_v16 = vpack.c.bf16 %v18440_v62, %v18426_v0  ;;  %v18487_v1 = vld [vmem:[#allocation331_spill] sm:$0xff]  ;;  %v18489_v31 = vld [vmem:[#allocation290_spill] sm:$0xff]  ;;  %v18490_v62 = vld [vmem:[#allocation225_spill] sm:$0xff] }
 0x4bd   : > { %v14957_v46 = vmax.f32 %v5423_v17, %v5519_v61  ;;  %v14959_v28 = vmax.f32 %v5424_v36, %v5520_v50  ;;  %v5675_v45 = vmax.f32 %v5611_v58, %v5643_v49  ;;  %v4801_v12 = vpack.c.bf16 %v18460_v23, %v18441_v39  ;;  %v18486_v61 = vld [vmem:[#allocation20_spill] sm:$0xff]  ;;  %v18492_v56 = vld [vmem:[#allocation23_spill] sm:$0xff]  ;;  %v18493_v39 = vld [vmem:[#allocation137_spill] sm:$0xff] }
 0x4be   : > { %6887 = vmatmul.mubr.msk.bf16.gmra.mxu0 %vm420_vm1, %v5828_v41  ;;  %v5676_v8 = vmax.f32 %v5612_v29, %v5644_v24  ;;  %v5138_v25 = vadd.f32 %v18487_v1, %v18486_v61  ;;  %v5772_v18 = vadd.f32 %v14698_v9, %v18490_v62  ;;  %6857 = vmatmul.mubr.msk.bf16.gmra.mxu1 %vm420_vm1, %v4800_v16  ;;  %v18494_v36 = vld [vmem:[#allocation102_spill] sm:$0xff]  ;;  %v18496_v50 = vld [vmem:[#allocation280_spill] sm:$0xff]  ;;  %v18499_v24 = vld [vmem:[#allocation67_spill] sm:$0xff] }
 0x4bf   : > { %v5707_v35 = vadd.f32 %v14957_v46, %v18488_v21  ;;  %v5708_v0 = vadd.f32 %v14959_v28, %v18489_v31  ;;  %v5266_v17 = vadd.f32 %v18492_v56, %v18491_v33  ;;  %6860 = vmatprep.mubr.msk.bf16.mxu1 %vm420_vm1, %v4801_v12  ;;  %v5394_v44 = vadd.f32 %v18495_v43, %v18494_v36  ;;  %v18497_v41 = vld [vmem:[#allocation288_spill] sm:$0xff]  ;;  %v18500_v61 = vld [vmem:[#allocation255_spill] sm:$0xff]  ;;  %v14995_v12 = vpop.f32.mrf.mxu1  ;;  %v18505_v43 = vld [vmem:[#allocation269_spill] sm:$0xff] }
 0x4c0   : > { %v5170_v23 = vmax.f32 %v18493_v39, %v5138_v25  ;;  %v5581_v49 = vadd.f32 %v14957_v46, %v18496_v50  ;;  %v5582_v58 = vadd.f32 %v14959_v28, %v18497_v41  ;;  %v5522_v16 = vadd.f32 %v18499_v24, %v18498_v38  ;;  %v14997_v25 = vpop.f32.mrf.mxu0  ;;  %v18502_v33 = vld [vmem:[#allocation203_spill] sm:$0xff] }
 0x4c1   : > { %v5739_v29 = vmax.f32 %v5675_v45, %v5707_v35  ;;  %v5740_v9 = vmax.f32 %v5676_v8, %v5708_v0  ;;  %v5645_v1 = vadd.f32 %v14813_v6, %v18500_v61  ;;  %18501 = vst [vmem:[#allocation328_spill] sm:$0xff] %v14997_v25  ;;  %v5646_v56 = vadd.f32 %v14819_v63, %v18502_v33  ;;  %v18503_v35 = vld [vmem:[#allocation213_spill] sm:$0xff]  ;;  %v18506_v61 = vld [vmem:[#allocation323_spill] sm:$0xff]  ;;  %v18510_v33 = vld [vmem:[#allocation68_spill] sm:$0xff] }
 0x4c2   : > { %v5298_v21 = vmax.f32 %v5170_v23, %v5266_v17  ;;  %v5613_v31 = vmax.f32 %v14901_v52, %v5581_v49  ;;  %v5614_v62 = vmax.f32 %v14903_v51, %v5582_v58  ;;  %v18504_v0 = vld [vmem:[#allocation69_spill] sm:$0xff]  ;;  %v5773_v50 = vadd.f32 %v14736_v7, %v18505_v43  ;;  %v18508_v23 = vld [vmem:[#allocation300_spill] sm:$0xff] }
 0x4c3   : > { %v5803_v45 = vmax.f32 %v5739_v29, %v5771_v26  ;;  %v5804_v8 = vmax.f32 %v5740_v9, %v5772_v18  ;;  %v5709_v36 = vadd.f32 %v18504_v0, %v18503_v35  ;;  %v18507_v17 = vrot.slane %v18506_v61, 7  ;;  %v18517_v43 = vld [vmem:[#allocation21_spill] sm:$0xff] }
 0x4c4   : > { %v5426_v41 = vmax.f32 %v5298_v21, %v5394_v44  ;;  %v5677_v38 = vmax.f32 %v5613_v31, %v5645_v1  ;;  %v5678_v24 = vmax.f32 %v5614_v62, %v5646_v56  ;;  %v18509_v49 = vrot.slane %v18508_v23, 7  ;;  %v18513_v44 = vld [vmem:[#allocation174_spill] sm:$0xff]  ;;  %v15022_v1 = vpop.f32.mrf.mxu1  ;;  %v15024_v21 = vpop.f32.mrf.mxu0 }
 0x4c5   : > { %v5829_v25 = vpack.c.bf16 %v5804_v8, %v5803_v45  ;;  %v18511_v18 = vrot.slane %v18506_v61, 6  ;;  %v18512_v29 = vrot.slane %v18508_v23, 6  ;;  %v5583_v9 = vadd.f32 %v18504_v0, %v18513_v44  ;;  %18514 = vst [vmem:[#allocation321_spill] sm:$0xff] %v15024_v21  ;;  %v18515_v56 = vld [vmem:[#allocation278_spill] sm:$0xff]  ;;  %v18516_v8 = vld [vmem:[#allocation43_spill] sm:$0xff] }
 0x4c6   : > { %v5225_v58 = vsel %vm1291_vm3, %v18509_v49, %v18507_v17  ;;  %v15026_v31 = vmax.f32 %v5426_v41, %v5522_v16  ;;  %v5741_v62 = vmax.f32 %v5677_v38, %v5709_v36  ;;  %v5774_v45 = vadd.f32 %v14778_v4, %v18515_v56  ;;  %v15040_v36 = vpop.f32.mrf.mxu1  ;;  %v18521_v41 = vld [vmem:[#allocation219_spill] sm:$0xff] }
 0x4c7   : > { %v5268_v26 = vadd.f32 %v5225_v58, %v18510_v33  ;;  %v5481_v7 = vsel %vm1805_vm5, %v18512_v29, %v18511_v18  ;;  %6890 = vmatprep.mubr.msk.bf16.mxu0 %vm420_vm1, %v5829_v25  ;;  %v18518_v17 = vmax.f32 %v18506_v61, %v18517_v43  ;;  %v5615_v58 = vmax.f32 %v14957_v46, %v5583_v9  ;;  %v18519_v33 = vld [vmem:[#allocation231_spill] sm:$0xff] }
 0x4c8   : > { %v5524_v35 = vadd.f32 %v5481_v7, %v18516_v8  ;;  %v5647_v18 = vadd.f32 %v14901_v52, %v18519_v33  ;;  %v18520_v29 = vld [vmem:[#allocation207_spill] sm:$0xff]  ;;  %v5710_v4 = vadd.f32 %v15026_v31, %v18521_v41  ;;  %v5805_v38 = vmax.f32 %v5741_v62, %v5773_v50  ;;  %v15044_v7 = vpop.f32.mrf.mxu0  ;;  %v18528_v41 = vld [vmem:[#allocation265_spill] sm:$0xff] }
 0x4c9   : > { %v5300_v49 = vmax.f32 %v18518_v17, %v5268_v26  ;;  %v5648_v16 = vadd.f32 %v14903_v51, %v18520_v29  ;;  %18522 = vst [vmem:[#allocation216_spill] sm:$0xff] %v15044_v7  ;;  %v18523_v25 = vld [vmem:[#allocation195_spill] sm:$0xff]  ;;  %v18524_v26 = vld [vmem:[#allocation273_spill] sm:$0xff]  ;;  %v18526_v17 = vld [vmem:[#allocation198_spill] sm:$0xff]  ;;  %v4803_v62 = vpack.c.bf16 %v18506_v61, %v18508_v23  ;;  %v15074_v23 = vpop.f32.mrf.mxu1 }
 0x4ca   : > { %v5584_v44 = vadd.f32 %v15026_v31, %v18523_v25  ;;  %v18525_v56 = vld [vmem:[#allocation71_spill] sm:$0xff]  ;;  %v5679_v43 = vmax.f32 %v5615_v58, %v5647_v18  ;;  %v5775_v33 = vadd.f32 %v14813_v6, %v18526_v17  ;;  %v18527_v29 = vld [vmem:[#allocation141_spill] sm:$0xff]  ;;  %v5742_v57 = vmax.f32 %v5678_v24, %v5710_v4  ;;  %v18532_v6 = vld [vmem:[#allocation24_spill] sm:$0xff] }
 0x4cb   : > { %v5711_v9 = vadd.f32 %v18525_v56, %v18524_v26  ;;  %v5428_v8 = vmax.f32 %v5300_v49, %v14880_v59  ;;  %v4802_v21 = vpack.c.bf16 %v18493_v39, %v18527_v29  ;;  %v18529_v25 = vrot.slane %v18528_v41, 1  ;;  %v18530_v7 = vld [vmem:[#allocation143_spill] sm:$0xff] }
 0x4cc   : > { %v5616_v50 = vmax.f32 %v14959_v28, %v5584_v44  ;;  %v18531_v60 = vrot.slane %v18530_v7, 1  ;;  %v18533_v24 = vrot.slane %v18528_v41, 2  ;;  %v18534_v18 = vrot.slane %v18530_v7, 2  ;;  %v18535_v26 = vld [vmem:[#allocation303_spill] sm:$0xff] }
 0x4cd   : > { %v15064_v49 = vmax.f32 %v5428_v8, %v5524_v35  ;;  %v5743_v58 = vmax.f32 %v5679_v43, %v5711_v9  ;;  %6861 = vmatmul.mubr.msk.bf16.gmra.mxu1 %vm420_vm1, %v4802_v21  ;;  %v5806_v4 = vmax.f32 %v5742_v57, %v5774_v45  ;;  %v15078_v35 = vpop.f32.mrf.mxu0  ;;  %v18537_v21 = vld [vmem:[#allocation106_spill] sm:$0xff]  ;;  %v18538_v8 = vld [vmem:[#allocation120_spill] sm:$0xff]  ;;  %v18540_v45 = vld [vmem:[#allocation177_spill] sm:$0xff] }
 0x4ce   : > { %v5094_v59 = vsel %vm970_vm2, %v18531_v60, %v18529_v25  ;;  %v5350_v61 = vsel %vm1548_vm4, %v18534_v18, %v18533_v24  ;;  %v5680_v44 = vmax.f32 %v5616_v50, %v5648_v16  ;;  %v5776_v60 = vadd.f32 %v14819_v63, %v18535_v26  ;;  %18536 = vst [vmem:[#allocation292_spill] sm:$0xff] %v15078_v35  ;;  %v18539_v25 = vld [vmem:[#allocation294_spill] sm:$0xff]  ;;  %v18541_v63 = vld [vmem:[#allocation209_spill] sm:$0xff]  ;;  %v18543_v18 = vld [vmem:[#allocation103_spill] sm:$0xff] }
 0x4cf   : > { %v5142_v39 = vadd.f32 %v5094_v59, %v18532_v6  ;;  %6864 = vmatprep.mubr.msk.bf16.mxu1 %vm420_vm1, %v4803_v62  ;;  %v5398_v9 = vadd.f32 %v5350_v61, %v18537_v21  ;;  %v5712_v43 = vadd.f32 %v15064_v49, %v18538_v8  ;;  %v5807_v17 = vmax.f32 %v5743_v58, %v5775_v33  ;;  %v18542_v6 = vld [vmem:[#allocation302_spill] sm:$0xff]  ;;  %v18544_v26 = vld [vmem:[#allocation135_spill] sm:$0xff]  ;;  %v18545_v33 = vld [vmem:[#allocation324_spill] sm:$0xff]  ;;  %v15097_v21 = vpop.f32.mrf.mxu1 }
 0x4d0   : > { %v5585_v59 = vadd.f32 %v18525_v56, %v18539_v25  ;;  %v5830_v57 = vpack.c.bf16 %v5806_v4, %v5805_v38  ;;  %v5586_v16 = vadd.f32 %v15064_v49, %v18540_v45  ;;  %v5649_v50 = vadd.f32 %v14957_v46, %v18541_v63  ;;  %18546 = vst [vmem:[#allocation70_spill] sm:$0xff] %v15097_v21  ;;  %v15100_v38 = vpop.f32.mrf.mxu0  ;;  %v18548_v8 = vld [vmem:[#allocation221_spill] sm:$0xff]  ;;  %v18555_v35 = vld [vmem:[#allocation26_spill] sm:$0xff] }
 0x4d1   : > { %v5174_v29 = vmax.f32 %v18530_v7, %v5142_v39  ;;  %v5650_v62 = vadd.f32 %v14959_v28, %v18542_v6  ;;  %v5744_v24 = vmax.f32 %v5680_v44, %v5712_v43  ;;  %v5526_v58 = vadd.f32 %v18545_v33, %v18544_v26  ;;  %18547 = vst [vmem:[#allocation311_spill] sm:$0xff] %v15100_v38  ;;  %v18549_v25 = vld [vmem:[#allocation73_spill] sm:$0xff]  ;;  %v18551_v43 = vld [vmem:[#allocation307_spill] sm:$0xff]  ;;  %v18553_v6 = vld [vmem:[#allocation316_spill] sm:$0xff] }
 0x4d2   : > { %v5617_v39 = vmax.f32 %v18504_v0, %v5585_v59  ;;  %6891 = vmatmul.mubr.msk.bf16.gmra.mxu0 %vm420_vm1, %v5830_v57  ;;  %v5618_v4 = vmax.f32 %v15026_v31, %v5586_v16  ;;  %v5713_v45 = vadd.f32 %v18549_v25, %v18548_v8  ;;  %v18550_v63 = vld [vmem:[#allocation305_spill] sm:$0xff]  ;;  %v18556_v16 = vrot.slane %v18553_v6, 7 }
 0x4d3   : > { %v5302_v61 = vmax.f32 %v5174_v29, %v18543_v18  ;;  %v5777_v44 = vadd.f32 %v14901_v52, %v18550_v63  ;;  %v18552_v29 = vrot.slane %v18551_v43, 1  ;;  %v18554_v18 = vrot.slane %v18553_v6, 1 }
 0x4d4   : > { %v5808_v26 = vmax.f32 %v5744_v24, %v5776_v60  ;;  %v5681_v57 = vmax.f32 %v5617_v39, %v5649_v50  ;;  %v5682_v14 = vmax.f32 %v5618_v4, %v5650_v62  ;;  %v18557_v8 = vrot.slane %v18528_v41, 7  ;;  %v15135_v39 = vpop.f32.mrf.mxu1  ;;  %v15137_v4 = vpop.f32.mrf.mxu0 }
 0x4d5   : > { %v5092_v59 = vsel %vm970_vm2, %v18554_v18, %v18552_v29  ;;  %v5430_v33 = vmax.f32 %v5302_v61, %v5398_v9  ;;  %v18558_v63 = vrot.slane %v18551_v43, 2  ;;  %v18559_v21 = vrot.slane %v18553_v6, 2  ;;  %18562 = vst [vmem:[#allocation289_spill] sm:$0xff] %v15137_v4  ;;  %v18563_v18 = vld [vmem:[#allocation287_spill] sm:$0xff]  ;;  %v18575_v4 = vld [vmem:[#allocation276_spill] sm:$0xff] }
 0x4d6   : > { %v5144_v38 = vadd.f32 %v5092_v59, %v18555_v35  ;;  %v5221_v52 = vsel %vm1291_vm3, %v18557_v8, %v18556_v16  ;;  %v18560_v60 = vrot.slane %v18553_v6, 6  ;;  %v18561_v9 = vrot.slane %v18528_v41, 6  ;;  %v18564_v59 = vld [vmem:[#allocation72_spill] sm:$0xff] }
 0x4d7   : > { %v5348_v29 = vsel %vm1548_vm4, %v18559_v21, %v18558_v63  ;;  %v5831_v50 = vpack.c.bf16 %v5808_v26, %v5807_v17  ;;  %v15132_v62 = vmax.f32 %v5430_v33, %v5526_v58  ;;  %v5745_v24 = vmax.f32 %v5681_v57, %v5713_v45  ;;  %v18565_v8 = vld [vmem:[#allocation108_spill] sm:$0xff]  ;;  %v18567_v17 = vld [vmem:[#allocation233_spill] sm:$0xff]  ;;  %v18568_v45 = vld [vmem:[#allocation83_spill] sm:$0xff] }
 0x4d8   : > { %v5477_v35 = vsel %vm1805_vm5, %v18561_v9, %v18560_v60  ;;  %v5176_v61 = vmax.f32 %v18553_v6, %v5144_v38  ;;  %v5778_v21 = vadd.f32 %v14903_v51, %v18563_v18  ;;  %v5272_v16 = vadd.f32 %v5221_v52, %v18564_v59  ;;  %v18569_v33 = vld [vmem:[#allocation166_spill] sm:$0xff]  ;;  %v15156_v59 = vpop.f32.mrf.mxu1 }
 0x4d9   : > { %v5400_v63 = vadd.f32 %v5348_v29, %v18565_v8  ;;  %v5587_v60 = vadd.f32 %v18549_v25, %v18566_v5  ;;  %6894 = vmatprep.mubr.msk.bf16.mxu0 %vm420_vm1, %v5831_v50  ;;  %v5714_v58 = vadd.f32 %v15132_v62, %v18567_v17  ;;  %v5809_v38 = vmax.f32 %v5745_v24, %v5777_v44  ;;  %v18570_v9 = vld [vmem:[#allocation138_spill] sm:$0xff]  ;;  %v15158_v50 = vpop.f32.mrf.mxu0  ;;  %v18574_v17 = vld [vmem:[#allocation159_spill] sm:$0xff] }
 0x4da   : > { %v5588_v26 = vadd.f32 %v15132_v62, %v18568_v45  ;;  %v5651_v57 = vadd.f32 %v18504_v0, %v18569_v33  ;;  %v5304_v51 = vmax.f32 %v5176_v61, %v5272_v16  ;;  %v5528_v52 = vadd.f32 %v5477_v35, %v18570_v9  ;;  %v18571_v18 = vld [vmem:[#allocation170_spill] sm:$0xff]  ;;  %18572 = vst [vmem:[#allocation281_spill] sm:$0xff] %v15158_v50  ;;  %v18576_v16 = vld [vmem:[#allocation228_spill] sm:$0xff] }
 0x4db   : > { %v5619_v29 = vmax.f32 %v18525_v56, %v5587_v60  ;;  %v5652_v5 = vadd.f32 %v15026_v31, %v18571_v18  ;;  %v5746_v8 = vmax.f32 %v5682_v14, %v5714_v58  ;;  %v18573_v24 = vld [vmem:[#allocation230_spill] sm:$0xff]  ;;  %v5779_v0 = vadd.f32 %v14957_v46, %v18575_v4 }
 0x4dc   : > { %v5620_v44 = vmax.f32 %v15064_v49, %v5588_v26  ;;  %v5715_v45 = vadd.f32 %v18574_v17, %v18573_v24  ;;  %v5432_v61 = vmax.f32 %v5304_v51, %v5400_v63  ;;  %v4804_v60 = vpack.c.bf16 %v18530_v7, %v18576_v16  ;;  %v15186_v51 = vpop.f32.mrf.mxu1 }
 0x4dd   : > { %v5683_v35 = vmax.f32 %v5619_v29, %v5651_v57  ;;  %v4805_v33 = vpack.c.bf16 %v18553_v6, %v18528_v41  ;;  %v5810_v9 = vmax.f32 %v5746_v8, %v5778_v21  ;;  %v18577_v14 = vrot.slane %v13722_v34, 1  ;;  %v18581_v41 = vld [vmem:[#allocation28_spill] sm:$0xff]  ;;  %v18582_v21 = vld [vmem:[#allocation74_spill] sm:$0xff]  ;;  %v15188_v29 = vpop.f32.mrf.mxu0 }
 0x4de   : > { %v5684_v18 = vmax.f32 %v5620_v44, %v5652_v5  ;;  %v18578_v58 = vrot.slane %v13720_v42, 1  ;;  %v18579_v24 = vrot.slane %v13720_v42, 7  ;;  %v18580_v46 = vrot.slane %v18551_v43, 7  ;;  %6865 = vmatmul.mubr.msk.bf16.gmra.mxu1 %vm420_vm1, %v4804_v60  ;;  %18583 = vst [vmem:[#allocation277_spill] sm:$0xff] %v15188_v29 }
 0x4df   : > { %v15181_v7 = vmax.f32 %v5432_v61, %v5528_v52  ;;  %v5747_v63 = vmax.f32 %v5683_v35, %v5715_v45  ;;  %v5832_v5 = vpack.c.bf16 %v5810_v9, %v5809_v38  ;;  %6868 = vmatprep.mubr.msk.bf16.mxu1 %vm420_vm1, %v4805_v33  ;;  %v18584_v8 = vrot.slane %v13722_v34, 2  ;;  %v18586_v45 = vld [vmem:[#allocation238_spill] sm:$0xff]  ;;  %v18589_v33 = vld [vmem:[#allocation75_spill] sm:$0xff] }
 0x4e0   : > { %v5090_v26 = vsel %vm970_vm2, %v18578_v58, %v18577_v14  ;;  %v5219_v4 = vsel %vm1291_vm3, %v18580_v46, %v18579_v24  ;;  %v18585_v44 = vrot.slane %v13720_v42, 2  ;;  %v18587_v60 = vrot.slane %v13720_v42, 6  ;;  %v18590_v58 = vld [vmem:[#allocation181_spill] sm:$0xff]  ;;  %v18592_v46 = vld [vmem:[#allocation240_spill] sm:$0xff] }
 0x4e1   : > { %v5146_v6 = vadd.f32 %v5090_v26, %v18581_v41  ;;  %v5274_v57 = vadd.f32 %v5219_v4, %v18582_v21  ;;  %v5716_v61 = vadd.f32 %v15181_v7, %v18586_v45  ;;  %v5811_v35 = vmax.f32 %v5747_v63, %v5779_v0  ;;  %6895 = vmatmul.mubr.msk.bf16.gmra.mxu0 %vm420_vm1, %v5832_v5  ;;  %v18591_v24 = vld [vmem:[#allocation245_spill] sm:$0xff]  ;;  %v18593_v4 = vld [vmem:[#allocation99_spill] sm:$0xff]  ;;  %v18594_v21 = vld [vmem:[#allocation110_spill] sm:$0xff]  ;;  %v15218_v5 = vpop.f32.mrf.mxu1  ;;  %v15220_v45 = vpop.f32.mrf.mxu0 }
 0x4e2   : > { %v5346_v52 = vsel %vm1548_vm4, %v18585_v44, %v18584_v8  ;;  %v18588_v14 = vrot.slane %v18551_v43, 6  ;;  %v5780_v9 = vadd.f32 %v14959_v28, %v18589_v33  ;;  %v5590_v26 = vadd.f32 %v15181_v7, %v18590_v58  ;;  %18596 = vst [vmem:[#allocation226_spill] sm:$0xff] %v15220_v45  ;;  %v18597_v28 = vld [vmem:[#allocation146_spill] sm:$0xff] }
 0x4e3   : > { %v5178_v16 = vmax.f32 %v13720_v42, %v5146_v6  ;;  %v5654_v0 = vadd.f32 %v15064_v49, %v18591_v24  ;;  %v5591_v63 = vadd.f32 %v18593_v4, %v18592_v46  ;;  %v5748_v41 = vmax.f32 %v5684_v18, %v5716_v61  ;;  %v18598_v33 = vld [vmem:[#allocation270_spill] sm:$0xff]  ;;  %v18599_v61 = vld [vmem:[#allocation171_spill] sm:$0xff] }
 0x4e4   : > { %v5475_v38 = vsel %vm1805_vm5, %v18588_v14, %v18587_v60  ;;  %v5402_v8 = vadd.f32 %v5346_v52, %v18594_v21  ;;  %v5655_v44 = vadd.f32 %v18549_v25, %v18595_v48  ;;  %v5622_v14 = vmax.f32 %v15132_v62, %v5590_v26  ;;  %v18601_v45 = vld [vmem:[#allocation306_spill] sm:$0xff] }
 0x4e5   : > { %v5306_v6 = vmax.f32 %v5178_v16, %v5274_v57  ;;  %v5530_v60 = vadd.f32 %v5475_v38, %v18597_v28  ;;  %v5782_v58 = vadd.f32 %v15026_v31, %v18598_v33  ;;  %v5623_v24 = vmax.f32 %v18574_v17, %v5591_v63  ;;  %v18600_v16 = vld [vmem:[#allocation188_spill] sm:$0xff]  ;;  %v18602_v28 = vld [vmem:[#allocation319_spill] sm:$0xff]  ;;  %v18603_v63 = vld [vmem:[#allocation254_spill] sm:$0xff] }
 0x4e6   : > { %v5812_v18 = vmax.f32 %v5748_v41, %v5780_v9  ;;  %v5656_v52 = vadd.f32 %v15132_v62, %v18599_v61  ;;  %v5719_v46 = vadd.f32 %v14494_v55, %v18600_v16  ;;  %v5686_v21 = vmax.f32 %v5622_v14, %v5654_v0  ;;  %v18608_v33 = vld [vmem:[#allocation232_spill] sm:$0xff] }
 0x4e7   : > { %v5434_v57 = vmax.f32 %v5306_v6, %v5402_v8  ;;  %v5687_v48 = vmax.f32 %v5623_v24, %v5655_v44  ;;  %v5720_v38 = vadd.f32 %v14496_v53, %v18601_v45  ;;  %v5783_v26 = vadd.f32 %v18525_v56, %v18602_v28  ;;  %v15241_v6 = vpop.f32.mrf.mxu1  ;;  %v15243_v8 = vpop.f32.mrf.mxu0  ;;  %v18604_v45 = vld [vmem:[#allocation297_spill] sm:$0xff]  ;;  %v18609_v61 = vld [vmem:[#allocation256_spill] sm:$0xff]  ;;  %v18610_v28 = vld [vmem:[#allocation227_spill] sm:$0xff] }
 0x4e8   : > { %v5833_v29 = vpack.c.bf16 %v5812_v18, %v5811_v35  ;;  %v5784_v9 = vadd.f32 %v15064_v49, %v18603_v63  ;;  %v4806_v41 = vpack.c.bf16 %v13720_v42, %v18551_v43  ;;  %v4807_v44 = vpack.c.bf16 %v14235_v47, %v13722_v34  ;;  %v18605_v35 = vld [vmem:[#allocation168_spill] sm:$0xff]  ;;  %v18606_v49 = vld [vmem:[#allocation317_spill] sm:$0xff]  ;;  %v18607_v42 = vld [vmem:[#allocation178_spill] sm:$0xff] }
 0x4e9   : > { %v15235_v31 = vmax.f32 %v5434_v57, %v5530_v60  ;;  %v5751_v0 = vmax.f32 %v5687_v48, %v5719_v46  ;;  %v5593_v56 = vadd.f32 %v14494_v55, %v18604_v45  ;;  %v5594_v60 = vadd.f32 %v14496_v53, %v18605_v35  ;;  %v15259_v34 = vpop.f32.mrf.mxu1  ;;  %v15261_v47 = vpop.f32.mrf.mxu0 }
 0x4ea   : > { %6898 = vmatprep.mubr.msk.bf16.mxu0 %vm420_vm1, %v5833_v29  ;;  %6869 = vmatmul.mubr.msk.bf16.gmra.mxu1 %vm420_vm1, %v4806_v41  ;;  %v5657_v24 = vadd.f32 %v18574_v17, %v18608_v33  ;;  %v5658_v16 = vadd.f32 %v15181_v7, %v18609_v61  ;;  %v5721_v63 = vadd.f32 %v14498_v11, %v18610_v28  ;;  %v18611_v41 = vld [vmem:[#allocation183_spill] sm:$0xff]  ;;  %v18615_v61 = vld [vmem:[#allocation164_spill] sm:$0xff] }
 0x4eb   : > { %v5718_v14 = vadd.f32 %v15235_v31, %v18606_v49  ;;  %v5592_v43 = vadd.f32 %v15235_v31, %v18607_v42  ;;  %v5815_v18 = vmax.f32 %v5751_v0, %v5783_v26  ;;  %6872 = vmatprep.mubr.msk.bf16.mxu1 %vm420_vm1, %v4807_v44  ;;  %v5625_v29 = vmax.f32 %v18593_v4, %v5593_v56  ;;  %v15273_v35 = vpop.f32.mrf.mxu1  ;;  %v15275_v26 = vpop.f32.mrf.mxu0  ;;  %v18612_v56 = vld [vmem:[#allocation248_spill] sm:$0xff]  ;;  %v18613_v49 = vld [vmem:[#allocation241_spill] sm:$0xff] }
 0x4ec   : > { %v5626_v57 = vmax.f32 %v15235_v31, %v5594_v60  ;;  %v5722_v45 = vadd.f32 %v14500_v15, %v18611_v41  ;;  %v5785_v60 = vadd.f32 %v18549_v25, %v18612_v56  ;;  %v5596_v28 = vadd.f32 %v14500_v15, %v18615_v61 }
 0x4ed   : > { %v5750_v46 = vmax.f32 %v5686_v21, %v5718_v14  ;;  %v5624_v48 = vmax.f32 %v15181_v7, %v5592_v43  ;;  %v5689_v0 = vmax.f32 %v5625_v29, %v5657_v24  ;;  %v5786_v21 = vadd.f32 %v15132_v62, %v18613_v49  ;;  %v18614_v43 = vld [vmem:[#allocation211_spill] sm:$0xff]  ;;  %v15285_v41 = vpop.f32.mrf.mxu1  ;;  %v15287_v50 = vpop.f32.mrf.mxu0 }
 0x4ee   : > { %v5690_v44 = vmax.f32 %v5626_v57, %v5658_v16  ;;  %v5595_v33 = vadd.f32 %v14498_v11, %v18614_v43  ;;  %18616 = vst [vmem:[#allocation142_spill] sm:$0xff] %v15285_v41  ;;  %v18617_v57 = vld [vmem:[#allocation229_spill] sm:$0xff]  ;;  %v18618_v16 = vld [vmem:[#allocation200_spill] sm:$0xff]  ;;  %v5628_v56 = vmax.f32 %v14496_v53, %v5596_v28 }
 0x4ef   : > { %v5814_v14 = vmax.f32 %v5750_v46, %v5782_v58  ;;  %v5688_v42 = vmax.f32 %v5624_v48, %v5656_v52  ;;  %v5753_v24 = vmax.f32 %v5689_v0, %v5721_v63  ;;  %v5659_v25 = vadd.f32 %v18593_v4, %v18617_v57  ;;  %v18619_v58 = vld [vmem:[#allocation105_spill] sm:$0xff]  ;;  %v15296_v49 = vpop.f32.mrf.mxu1  ;;  %v3981_v43 = vpop.f32.mrf.mxu0  ;;  %v18620_v63 = vld [vmem:[#allocation260_spill] sm:$0xff] }
 0x4f0   : > { %v5754_v29 = vmax.f32 %v5690_v44, %v5722_v45  ;;  %v5660_v62 = vadd.f32 %v15235_v31, %v18618_v16  ;;  %v5627_v48 = vmax.f32 %v14494_v55, %v5595_v33  ;;  %v5723_v45 = vadd.f32 %v14482_v3, %v18620_v63  ;;  %v18621_v16 = vld [vmem:[#allocation234_spill] sm:$0xff]  ;;  %v18622_v33 = vld [vmem:[#allocation272_spill] sm:$0xff] }
 0x4f1   : > { %v5834_v52 = vpack.c.bf16 %v5814_v14, %v18619_v58  ;;  %v5752_v46 = vmax.f32 %v5688_v42, %v5720_v38  ;;  %v5817_v61 = vmax.f32 %v5753_v24, %v5785_v60  ;;  %v5724_v38 = vadd.f32 %v14484_v27, %v18621_v16  ;;  %v15303_v14 = vpop.f32.mrf.mxu1  ;;  %v18623_v58 = vld [vmem:[#allocation259_spill] sm:$0xff] }
 0x4f2   : > { %v5818_v41 = vmax.f32 %v5754_v29, %v5786_v21  ;;  %v5691_v44 = vmax.f32 %v5627_v48, %v5659_v25  ;;  %v5692_v57 = vmax.f32 %v5628_v56, %v5660_v62  ;;  %v5787_v28 = vadd.f32 %v18574_v17, %v18622_v33  ;;  %v18624_v25 = vld [vmem:[#allocation162_spill] sm:$0xff]  ;;  %v18627_v56 = vld [vmem:[#allocation156_spill] sm:$0xff]  ;;  %v18630_v33 = vld [vmem:[#allocation191_spill] sm:$0xff] }
 0x4f3   : > { %6899 = vmatmul.mubr.msk.bf16.gmra.mxu0 %vm420_vm1, %v5834_v52  ;;  %v5816_v0 = vmax.f32 %v5752_v46, %v5784_v9  ;;  %v5788_v60 = vadd.f32 %v15181_v7, %v18623_v58  ;;  %v4808_v21 = vpack.c.bf16 %v14238_v54, %v13724_v13  ;;  %v5597_v62 = vadd.f32 %v14482_v3, %v18624_v25  ;;  %v6836_v52 = vpop.f32.mrf.mxu0  ;;  %v15313_v46 = vpop.f32.mrf.mxu1  ;;  %v18626_v48 = vld [vmem:[#allocation194_spill] sm:$0xff]  ;;  %v18631_v58 = vld [vmem:[#allocation160_spill] sm:$0xff] }
 0x4f4   : > { %v5836_v42 = vpack.c.bf16 %v5818_v41, %v5817_v61  ;;  %v5755_v29 = vmax.f32 %v5691_v44, %v5723_v45  ;;  %v5756_v9 = vmax.f32 %v5692_v57, %v5724_v38  ;;  %v18625_v41 = vld [vmem:[#allocation180_spill] sm:$0xff]  ;;  %v5661_v7 = vadd.f32 %v14494_v55, %v18626_v48  ;;  %v18628_v44 = vld [vmem:[#allocation199_spill] sm:$0xff] }
 0x4f5   : > { %v5835_v24 = vpack.c.bf16 %v5816_v0, %v5815_v18  ;;  %6873 = vmatmul.mubr.msk.bf16.gmra.mxu1 %vm420_vm1, %v4808_v21  ;;  %v5598_v17 = vadd.f32 %v14484_v27, %v18625_v41  ;;  %v5662_v13 = vadd.f32 %v14496_v53, %v18627_v56  ;;  %v5629_v3 = vmax.f32 %v14498_v11, %v5597_v62  ;;  %v15324_v61 = vpop.f32.mrf.mxu1  ;;  %v18629_v57 = vld [vmem:[#allocation243_spill] sm:$0xff]  ;;  %v3994_v16 = vpop.f32.mrf.mxu0 }
 0x4f6   : > { %v5819_v54 = vmax.f32 %v5755_v29, %v5787_v28  ;;  %v5820_v18 = vmax.f32 %v5756_v9, %v5788_v60  ;;  %v5725_v27 = vadd.f32 %v14486_v37, %v18628_v44  ;;  %v5789_v55 = vadd.f32 %v18593_v4, %v18629_v57 }
 0x4f7   : > { %6902 = vmatprep.mubr.msk.bf16.mxu0 %vm420_vm1, %v5835_v24  ;;  %v5630_v63 = vmax.f32 %v14500_v15, %v5598_v17  ;;  %v5693_v0 = vmax.f32 %v5629_v3, %v5661_v7  ;;  %v3753_v53 = vpop.f32.mrf.mxu1  ;;  %v5726_v28 = vadd.f32 %v14488_v40, %v18630_v33  ;;  %v5790_v11 = vadd.f32 %v15235_v31, %v18631_v58  ;;  %v6837_v29 = vpop.f32.mrf.mxu0 }
 0x4f8   : > { %v5837_v45 = vpack.c.bf16 %v5820_v18, %v5819_v54  ;;  %v15337_v60 = vadd.f32 %v15243_v8, %v3753_v53  ;;  %v3907_v33 = vadd.f32 %v14761_v32, %v14941_v19  ;;  %v3899_v58 = vadd.f32 %v14788_v2, %v14965_v22  ;;  %v15384_v2 = vld [vmem:[%s15684_s6] ss:$0 sm:$0xff] }
 0x4f9   : > { %v5694_v38 = vmax.f32 %v5630_v63, %v5662_v13  ;;  %v5757_v15 = vmax.f32 %v5693_v0, %v5725_v27  ;;  %v6798_v21 = vpop.f32.mrf.mxu1  ;;  %v3997_v8 = vpop.f32.mrf.mxu0 }
 0x4fa   : > { %v15341_v4 = vadd.f32 %v15261_v47, %v6798_v21 }
 0x4fb   : > { %6903 = vmatmul.mubr.msk.bf16.gmra.mxu0 %vm420_vm1, %v5836_v42  ;;  %v5758_v37 = vmax.f32 %v5694_v38, %v5726_v28  ;;  %v5821_v24 = vmax.f32 %v5757_v15, %v5789_v55  ;;  %v3766_v9 = vpop.f32.mrf.mxu1  ;;  %v6840_v7 = vpop.f32.mrf.mxu0  ;;  %v3910_v15 = vadd.f32 %v14811_v10, %v14995_v12 }
 0x4fc   : > { %6906 = vmatprep.mubr.msk.bf16.mxu0 %vm420_vm1, %v5837_v45  ;;  %v15344_v25 = vadd.f32 %v15275_v26, %v3766_v9  ;;  %v3902_v9 = vadd.f32 %v14835_v20, %v15022_v1 }
 0x4fd   : > { %v5822_v40 = vmax.f32 %v5758_v37, %v5790_v11  ;;  %v6799_v31 = vpop.f32.mrf.mxu1  ;;  %v4010_v18 = vpop.f32.mrf.mxu0 }
 0x4fe   : > { %v15347_v62 = vadd.f32 %v15287_v50, %v6799_v31 }
 0x4ff   : > { %v5838_v42 = vpack.c.bf16 %v5822_v40, %v5821_v24  ;;  %v3769_v41 = vpop.f32.mrf.mxu1  ;;  %v15377_v24 = vld [vmem:[%s15683_s5] ss:$0 sm:$0xff] }
 0x500   : > { %v15349_v17 = vadd.f32 %v3981_v43, %v3769_v41  ;;  %v6841_v43 = vpop.f32.mrf.mxu0 }
 0x501   : > { %v6802_v47 = vpop.f32.mrf.mxu1 }
 0x502   : > { %v15352_v48 = vadd.f32 %v6836_v52, %v6802_v47  ;;  %v4013_v57 = vpop.f32.mrf.mxu0 }
 0x503   : > { %6907 = vmatmul.mubr.msk.bf16.gmra.mxu0 %vm420_vm1, %v5838_v42  ;;  %v3782_v56 = vpop.f32.mrf.mxu1 }
 0x504   : > { %v15354_v13 = vadd.f32 %v3994_v16, %v3782_v56 }
 0x505   : > { %v6803_v26 = vpop.f32.mrf.mxu1 }
 0x506   : > { %v15356_v54 = vadd.f32 %v6837_v29, %v6803_v26 }
 0x507   : > { %v3785_v3 = vpop.f32.mrf.mxu1 }
 0x508   : > { %v15358_v50 = vadd.f32 %v3997_v8, %v3785_v3 }
 0x509   : > { %v6806_v63 = vpop.f32.mrf.mxu1 }
 0x50a   : > { %v15360_v45 = vadd.f32 %v6840_v7, %v6806_v63 }
 0x50b   : > { %v3798_v0 = vpop.f32.mrf.mxu1 }
 0x50c   : > { %v15362_v44 = vadd.f32 %v4010_v18, %v3798_v0 }
 0x50d   : > { %v6807_v52 = vpop.f32.mrf.mxu1 }
 0x50e   : > { %v15364_v27 = vadd.f32 %v6841_v43, %v6807_v52 }
 0x50f   : > { %v3801_v55 = vpop.f32.mrf.mxu1 }
 0x510   : > { %v15366_v16 = vadd.f32 %v4013_v57, %v3801_v55 }
 0x511   : > { %v6846_v53 = vpop.f32.mrf.mxu1 }
 0x512   : > { %v5025_v11 = vadd.f32 %v6846_v53, %v3907_v33 }
 0x513   : > { %v4896_v38 = vpop.f32.mrf.mxu1 }
 0x514   : > { %v5023_v21 = vadd.f32 %v4896_v38, %v3899_v58 }
 0x515   : > { %v6847_v28 = vpop.f32.mrf.mxu1 }
 0x516   : > { %v5026_v19 = vadd.f32 %v6847_v28, %v3910_v15  ;;  %v3923_v15 = vadd.f32 %v14852_v30, %v15040_v36 }
 0x517   : > { %v4899_v29 = vpop.f32.mrf.mxu1 }
 0x518   : > { %v5024_v40 = vadd.f32 %v4899_v29, %v3902_v9 }
 0x546   : > { %v6850_v55 = vpop.f32.mrf.mxu1 }
 0x547   : > { %v6880_v37 = vpop.f32.mrf.mxu0  ;;  %v5029_v9 = vadd.f32 %v6850_v55, %v3923_v15 }
 0x548   : > { %v6055_v32 = vadd.f32 %v6880_v37, %v5025_v11  ;;  %v4912_v58 = vpop.f32.mrf.mxu1  ;;  %v18632_v37 = vld [vmem:[#allocation59_spill] sm:$0xff] }
 0x549   : > { %v5926_v22 = vpop.f32.mrf.mxu0  ;;  %v3915_v29 = vadd.f32 %v18632_v37, %v15074_v23 }
 0x54a   : > { %v6094_v10 = vmul.f32 %v15377_v24, %v6055_v32  ;;  %v6053_v12 = vadd.f32 %v5926_v22, %v5023_v21  ;;  %v6851_v32 = vpop.f32.mrf.mxu1  ;;  %v18634_v22 = vld [vmem:[#allocation63_spill] sm:$0xff] }
 0x54b   : > { %v6881_v31 = vpop.f32.mrf.mxu0 }
 0x54c   : > { %v6133_v42 = vadd.f32 %v15384_v2, %v6094_v10  ;;  %v6092_v8 = vmul.f32 %v15377_v24, %v6053_v12  ;;  %v6056_v41 = vadd.f32 %v6881_v31, %v5026_v19  ;;  %v18633_v19 = vld [vmem:[#allocation70_spill] sm:$0xff]  ;;  %v5027_v12 = vadd.f32 %v4912_v58, %v3915_v29 }
 0x54d   : > { %v5929_v47 = vpop.f32.mrf.mxu0  ;;  %v3926_v10 = vadd.f32 %v18634_v22, %v18633_v19 }
 0x54e   : > { %v6621_v20 = vmul.f32 -1.442695, %v6133_v42  ;;  %v6131_v1 = vadd.f32 %v15384_v2, %v6092_v8  ;;  %v6095_v7 = vmul.f32 %v15377_v24, %v6056_v41  ;;  %v6054_v56 = vadd.f32 %v5929_v47, %v5024_v40  ;;  %v4915_v41 = vpop.f32.mrf.mxu1  ;;  %v18635_v47 = vld [vmem:[#allocation145_spill] sm:$0xff] }
 0x54f   : > { %v5030_v8 = vadd.f32 %v6851_v32, %v3926_v10  ;;  %v3918_v30 = vadd.f32 %v18635_v47, %v15135_v39  ;;  %v18636_v10 = vld [vmem:[#allocation197_spill] sm:$0xff]  ;;  %v18638_v47 = vld [vmem:[#allocation328_spill] sm:$0xff] }
 0x550   : > { %7142 = vpow2.f32 %v6621_v20  ;;  %v6619_v26 = vmul.f32 -1.442695, %v6131_v1  ;;  %v6134_v18 = vadd.f32 %v15384_v2, %v6095_v7  ;;  %v6093_v3 = vmul.f32 %v15377_v24, %v6054_v56 }
 0x552   : > { %7144 = vpow2.f32 %v6619_v26  ;;  %v6622_v63 = vmul.f32 -1.442695, %v6134_v18  ;;  %v6132_v43 = vadd.f32 %v15384_v2, %v6093_v3  ;;  %v5028_v26 = vadd.f32 %v4915_v41, %v3918_v30 }
 0x553   : > { %v3942_v30 = vadd.f32 %v18638_v47, %v15218_v5 }
 0x554   : > { %7146 = vpow2.f32 %v6622_v63  ;;  %v6620_v0 = vmul.f32 -1.442695, %v6132_v43 }
 0x556   : > { %7148 = vpow2.f32 %v6620_v0 }
 0x55d   : > { %v7143_v52 = vpop.eup %7142 }
 0x55e   : > { %v6261_v57 = vadd.f32 1.0, %v7143_v52 }
 0x55f   : > { %v7145_v53 = vpop.eup %7144 }
 0x560   : > { %7150 = vrcp.f32 %v6261_v57  ;;  %v6259_v38 = vadd.f32 1.0, %v7145_v53 }
 0x561   : > { %v7147_v33 = vpop.eup %7146 }
 0x562   : > { %7152 = vrcp.f32 %v6259_v38  ;;  %v6262_v28 = vadd.f32 1.0, %v7147_v33 }
 0x563   : > { %v7149_v11 = vpop.eup %7148 }
 0x564   : > { %7154 = vrcp.f32 %v6262_v28  ;;  %v6260_v21 = vadd.f32 1.0, %v7149_v11 }
 0x566   : > { %7156 = vrcp.f32 %v6260_v21 }
 0x567   : > { %v6854_v52 = vpop.f32.mrf.mxu1 }
 0x568   : > { %v6884_v40 = vpop.f32.mrf.mxu0 }
 0x569   : > { %v6059_v31 = vadd.f32 %v6884_v40, %v5029_v9  ;;  %v18637_v40 = vld [vmem:[#allocation329_spill] sm:$0xff] }
 0x56a   : > { %v5942_v36 = vpop.f32.mrf.mxu0 }
 0x56b   : > { %v6098_v20 = vmul.f32 %v15377_v24, %v6059_v31  ;;  %v6057_v7 = vadd.f32 %v5942_v36, %v5027_v12  ;;  %v3939_v12 = vadd.f32 %v18636_v10, %v15156_v59  ;;  %v3931_v31 = vadd.f32 %v18637_v40, %v15186_v51 }
 0x56c   : > { %v6885_v56 = vpop.f32.mrf.mxu0 }
 0x56d   : > { %v7151_v23 = vpop.eup %7150  ;;  %v15410_v63 = vadd.f32 %v15384_v2, %v6098_v20  ;;  %v6096_v39 = vmul.f32 %v15377_v24, %v6057_v7  ;;  %v6060_v0 = vadd.f32 %v6885_v56, %v5030_v8  ;;  %v18639_v56 = vld [vmem:[#allocation321_spill] sm:$0xff] }
 0x56e   : > { %v6357_v3 = vmul.f32 %v7151_v23, %v6133_v42  ;;  %v5945_v55 = vpop.f32.mrf.mxu0 }
 0x56f   : > { %v7153_v57 = vpop.eup %7152  ;;  %v6625_v38 = vmul.f32 -1.442695, %v15410_v63  ;;  %v15417_v33 = vadd.f32 %v15384_v2, %v6096_v39  ;;  %v6099_v42 = vmul.f32 %v15377_v24, %v6060_v0  ;;  %v6058_v58 = vadd.f32 %v5945_v55, %v5028_v26 }
 0x570   : > { %6390 = vst.msk [vmem:[%s15407_s29 + $0x10] sm:$0xff] %vm6387_vm6, %v6357_v3  ;;  %v6355_v53 = vmul.f32 %v7153_v57, %v6131_v1  ;;  %v4928_v1 = vpop.f32.mrf.mxu1  ;;  %v3934_v26 = vadd.f32 %v18639_v56, %v15241_v6 }
 0x571   : > { %v7155_v28 = vpop.eup %7154  ;;  %7158 = vpow2.f32 %v6625_v38  ;;  %v6623_v15 = vmul.f32 -1.442695, %v15417_v33  ;;  %v15424_v21 = vadd.f32 %v15384_v2, %v6099_v42  ;;  %v6097_v29 = vmul.f32 %v15377_v24, %v6058_v58 }
 0x572   : > { %6388 = vst.msk [vmem:[%s15407_s29] sm:$0xff] %vm6387_vm6, %v6355_v53  ;;  %v6358_v11 = vmul.f32 %v7155_v28, %v6134_v18  ;;  %v6855_v18 = vpop.f32.mrf.mxu1  ;;  %v5031_v41 = vadd.f32 %v4928_v1, %v3931_v31 }
 0x573   : > { %v7157_v37 = vpop.eup %7156  ;;  %7160 = vpow2.f32 %v6623_v15  ;;  %v6626_v32 = vmul.f32 -1.442695, %v15424_v21  ;;  %v15431_v19 = vadd.f32 %v15384_v2, %v6097_v29  ;;  %v5034_v39 = vadd.f32 %v6855_v18, %v3942_v30 }
 0x574   : > { %6391 = vst.msk [vmem:[%s15407_s29 + $0x18] sm:$0xff] %vm6387_vm6, %v6358_v11  ;;  %v6356_v9 = vmul.f32 %v7157_v37, %v6132_v43  ;;  %v5033_v43 = vadd.f32 %v6854_v52, %v3939_v12  ;;  %v4931_v8 = vpop.f32.mrf.mxu1 }
 0x575   : > { %7162 = vpow2.f32 %v6626_v32  ;;  %v6624_v22 = vmul.f32 -1.442695, %v15431_v19  ;;  %v5032_v53 = vadd.f32 %v4931_v8, %v3934_v26  ;;  %v18640_v8 = vld [vmem:[#allocation216_spill] sm:$0xff]  ;;  %v18642_v26 = vld [vmem:[#allocation142_spill] sm:$0xff] }
 0x576   : > { %6389 = vst.msk [vmem:[%s15407_s29 + $0x8] sm:$0xff] %vm6387_vm6, %v6356_v9 }
 0x577   : > { %7164 = vpow2.f32 %v6624_v22 }
 0x57e   : > { %v6888_v36 = vpop.f32.mrf.mxu0  ;;  %v6858_v7 = vpop.f32.mrf.mxu1 }
 0x57f   : > { %v6063_v20 = vadd.f32 %v6888_v36, %v5033_v43  ;;  %v7159_v23 = vpop.eup %7158  ;;  %v18641_v36 = vld [vmem:[#allocation292_spill] sm:$0xff] }
 0x580   : > { %v5958_v3 = vpop.f32.mrf.mxu0  ;;  %v6265_v59 = vadd.f32 1.0, %v7159_v23  ;;  %v4944_v51 = vpop.f32.mrf.mxu1 }
 0x581   : > { %v6102_v0 = vmul.f32 %v15377_v24, %v6063_v20  ;;  %v6061_v57 = vadd.f32 %v5958_v3, %v5031_v41  ;;  %v7161_v52 = vpop.eup %7160  ;;  %v3955_v41 = vadd.f32 %v18640_v8, %v15259_v34  ;;  %v3947_v20 = vadd.f32 %v18641_v36, %v15273_v35  ;;  %v18643_v3 = vld [vmem:[#allocation311_spill] sm:$0xff] }
 0x582   : > { %v6889_v55 = vpop.f32.mrf.mxu0  ;;  %7166 = vrcp.f32 %v6265_v59  ;;  %v6263_v38 = vadd.f32 1.0, %v7161_v52  ;;  %v6859_v28 = vpop.f32.mrf.mxu1 }
 0x583   : > { %v15446_v5 = vadd.f32 %v15384_v2, %v6102_v0  ;;  %v6100_v42 = vmul.f32 %v15377_v24, %v6061_v57  ;;  %v7163_v58 = vpop.eup %7162  ;;  %v6064_v6 = vadd.f32 %v6889_v55, %v5034_v39  ;;  %v5037_v23 = vadd.f32 %v6858_v7, %v3955_v41  ;;  %v18645_v41 = vld [vmem:[#allocation281_spill] sm:$0xff] }
 0x584   : > { %v5961_v11 = vpop.f32.mrf.mxu0  ;;  %7168 = vrcp.f32 %v6263_v38  ;;  %v6266_v15 = vadd.f32 1.0, %v7163_v58  ;;  %v7165_v32 = vpop.eup %7164  ;;  %v3958_v39 = vadd.f32 %v18643_v3, %v18642_v26  ;;  %v5035_v59 = vadd.f32 %v4944_v51, %v3947_v20  ;;  %v18644_v38 = vld [vmem:[#allocation289_spill] sm:$0xff] }
 0x585   : > { %v6629_v1 = vmul.f32 -1.442695, %v15446_v5  ;;  %v15451_v37 = vadd.f32 %v15384_v2, %v6100_v42  ;;  %v6103_v29 = vmul.f32 %v15377_v24, %v6064_v6  ;;  %v6062_v9 = vadd.f32 %v5961_v11, %v5032_v53  ;;  %v4947_v22 = vpop.f32.mrf.mxu1  ;;  %v18646_v26 = vld [vmem:[#allocation277_spill] sm:$0xff] }
 0x586   : > { %7170 = vrcp.f32 %v6266_v15  ;;  %v6264_v10 = vadd.f32 1.0, %v7165_v32  ;;  %v5038_v55 = vadd.f32 %v6859_v28, %v3958_v39  ;;  %v3950_v42 = vadd.f32 %v18644_v38, %v15296_v49 }
 0x587   : > { %v6627_v18 = vmul.f32 -1.442695, %v15451_v37  ;;  %7172 = vpow2.f32 %v6629_v1  ;;  %v15456_v12 = vadd.f32 %v15384_v2, %v6103_v29  ;;  %v6101_v40 = vmul.f32 %v15377_v24, %v6062_v9 }
 0x588   : > { %v5036_v1 = vadd.f32 %v4947_v22, %v3950_v42  ;;  %v3963_v3 = vadd.f32 %v18646_v26, %v15313_v46 }
 0x589   : > { %7174 = vpow2.f32 %v6627_v18  ;;  %v6630_v31 = vmul.f32 -1.442695, %v15456_v12  ;;  %v15461_v43 = vadd.f32 %v15384_v2, %v6101_v40 }
 0x58a   : > { %7176 = vrcp.f32 %v6264_v10 }
 0x58b   : > { %7178 = vpow2.f32 %v6630_v31  ;;  %v6628_v30 = vmul.f32 -1.442695, %v15461_v43 }
 0x58d   : > { %v6862_v47 = vpop.f32.mrf.mxu1  ;;  %7180 = vpow2.f32 %v6628_v30  ;;  %v3971_v30 = vadd.f32 %v18645_v41, %v15303_v14 }
 0x58f   : > { %v4960_v56 = vpop.f32.mrf.mxu1  ;;  %v7167_v0 = vpop.eup %7166 }
 0x590   : > { %v6361_v34 = vmul.f32 %v7167_v0, %v15410_v63  ;;  %v5039_v42 = vadd.f32 %v4960_v56, %v3963_v3 }
 0x591   : > { %v7169_v53 = vpop.eup %7168  ;;  %v6863_v35 = vpop.f32.mrf.mxu1 }
 0x592   : > { %v6892_v57 = vpop.f32.mrf.mxu0  ;;  %6394 = vst.msk [vmem:[%s15407_s29 + $0x30] sm:$0xff] %vm6387_vm6, %v6361_v34  ;;  %v6359_v7 = vmul.f32 %v7169_v53, %v15417_v33 }
 0x593   : > { %v6067_v52 = vadd.f32 %v6892_v57, %v5037_v23  ;;  %v7171_v11 = vpop.eup %7170  ;;  %v4963_v10 = vpop.f32.mrf.mxu1  ;;  %v5041_v57 = vadd.f32 %v6862_v47, %v3971_v30 }
 0x594   : > { %v5974_v58 = vpop.f32.mrf.mxu0  ;;  %v7173_v63 = vpop.eup %7172  ;;  %6392 = vst.msk [vmem:[%s15407_s29 + $0x20] sm:$0xff] %vm6387_vm6, %v6359_v7  ;;  %v6362_v28 = vmul.f32 %v7171_v11, %v15424_v21 }
 0x595   : > { %v6106_v6 = vmul.f32 %v15377_v24, %v6067_v52  ;;  %v6065_v51 = vadd.f32 %v5974_v58, %v5035_v59  ;;  %v6269_v33 = vadd.f32 1.0, %v7173_v63  ;;  %v18647_v52 = vld [vmem:[#allocation226_spill] sm:$0xff]  ;;  %v5040_v63 = vadd.f32 %v4963_v10, %v15337_v60 }
 0x596   : > { %v6893_v15 = vpop.f32.mrf.mxu0  ;;  %v7175_v32 = vpop.eup %7174  ;;  %6395 = vst.msk [vmem:[%s15407_s29 + $0x38] sm:$0xff] %vm6387_vm6, %v6362_v28 }
 0x597   : > { %v15481_v49 = vadd.f32 %v15384_v2, %v6106_v6  ;;  %v6104_v29 = vmul.f32 %v15377_v24, %v6065_v51  ;;  %v6068_v9 = vadd.f32 %v6893_v15, %v5038_v55  ;;  %v7177_v40 = vpop.eup %7176  ;;  %v6267_v22 = vadd.f32 1.0, %v7175_v32 }
 0x598   : > { %v5977_v18 = vpop.f32.mrf.mxu0  ;;  %v6360_v36 = vmul.f32 %v7177_v40, %v15431_v19  ;;  %7182 = vrcp.f32 %v6269_v33  ;;  %v7179_v23 = vpop.eup %7178  ;;  %v3974_v55 = vadd.f32 %v18647_v52, %v15324_v61 }
 0x599   : > { %v6633_v31 = vmul.f32 -1.442695, %v15481_v49  ;;  %v15488_v8 = vadd.f32 %v15384_v2, %v6104_v29  ;;  %v6107_v21 = vmul.f32 %v15377_v24, %v6068_v9  ;;  %v6066_v20 = vadd.f32 %v5977_v18, %v5036_v1 }
 0x59a   : > { %7184 = vrcp.f32 %v6267_v22  ;;  %6393 = vst.msk [vmem:[%s15407_s29 + $0x28] sm:$0xff] %vm6387_vm6, %v6360_v36  ;;  %v6270_v0 = vadd.f32 1.0, %v7179_v23  ;;  %v7181_v34 = vpop.eup %7180  ;;  %v5042_v51 = vadd.f32 %v6863_v35, %v3974_v55 }
 0x59b   : > { %v6631_v39 = vmul.f32 -1.442695, %v15488_v8  ;;  %v15498_v59 = vadd.f32 %v15384_v2, %v6107_v21  ;;  %7186 = vpow2.f32 %v6633_v31  ;;  %v6105_v14 = vmul.f32 %v15377_v24, %v6066_v20 }
 0x59c   : > { %v6268_v53 = vadd.f32 1.0, %v7181_v34 }
 0x59d   : > { %7188 = vpow2.f32 %v6631_v39  ;;  %v6634_v46 = vmul.f32 -1.442695, %v15498_v59  ;;  %v15507_v38 = vadd.f32 %v15384_v2, %v6105_v14 }
 0x59e   : > { %v6866_v19 = vpop.f32.mrf.mxu1  ;;  %7190 = vrcp.f32 %v6270_v0 }
 0x59f   : > { %7192 = vpow2.f32 %v6634_v46  ;;  %v6632_v47 = vmul.f32 -1.442695, %v15507_v38  ;;  %v5045_v34 = vadd.f32 %v6866_v19, %v15341_v4 }
 0x5a0   : > { %v4976_v58 = vpop.f32.mrf.mxu1  ;;  %7194 = vrcp.f32 %v6268_v53 }
 0x5a1   : > { %v6896_v7 = vpop.f32.mrf.mxu0  ;;  %7196 = vpow2.f32 %v6632_v47 }
 0x5a2   : > { %v6071_v6 = vadd.f32 %v6896_v7, %v5041_v57  ;;  %v6867_v11 = vpop.f32.mrf.mxu1  ;;  %v5043_v7 = vadd.f32 %v4976_v58, %v15344_v25 }
 0x5a3   : > { %v5990_v15 = vpop.f32.mrf.mxu0 }
 0x5a4   : > { %v6110_v61 = vmul.f32 %v15377_v24, %v6071_v6  ;;  %v6069_v1 = vadd.f32 %v5990_v15, %v5039_v42  ;;  %v4979_v28 = vpop.f32.mrf.mxu1 }
 0x5a5   : > { %v6897_v29 = vpop.f32.mrf.mxu0  ;;  %v7183_v60 = vpop.eup %7182  ;;  %v5044_v58 = vadd.f32 %v4979_v28, %v15349_v17 }
 0x5a6   : > { %v15513_v56 = vadd.f32 %v15384_v2, %v6110_v61  ;;  %v6108_v9 = vmul.f32 %v15377_v24, %v6069_v1  ;;  %v6072_v32 = vadd.f32 %v6897_v29, %v5042_v51  ;;  %v6365_v21 = vmul.f32 %v7183_v60, %v15446_v5 }
 0x5a7   : > { %v5993_v33 = vpop.f32.mrf.mxu0  ;;  %v7185_v10 = vpop.eup %7184 }
 0x5a8   : > { %v6637_v18 = vmul.f32 -1.442695, %v15513_v56  ;;  %v15518_v35 = vadd.f32 %v15384_v2, %v6108_v9  ;;  %v6111_v40 = vmul.f32 %v15377_v24, %v6072_v32  ;;  %v6070_v22 = vadd.f32 %v5993_v33, %v5040_v63  ;;  %v7187_v20 = vpop.eup %7186  ;;  %6398 = vst.msk [vmem:[%s15407_s29 + $0x50] sm:$0xff] %vm6387_vm6, %v6365_v21 }
 0x5a9   : > { %v6363_v23 = vmul.f32 %v7185_v10, %v15451_v37  ;;  %v6273_v39 = vadd.f32 1.0, %v7187_v20 }
 0x5aa   : > { %v6870_v31 = vpop.f32.mrf.mxu1  ;;  %7198 = vpow2.f32 %v6637_v18  ;;  %v6635_v41 = vmul.f32 -1.442695, %v15518_v35  ;;  %v15524_v30 = vadd.f32 %v15384_v2, %v6111_v40  ;;  %v6109_v26 = vmul.f32 %v15377_v24, %v6070_v22  ;;  %v7189_v3 = vpop.eup %7188 }
 0x5ab   : > { %v7191_v0 = vpop.eup %7190  ;;  %6396 = vst.msk [vmem:[%s15407_s29 + $0x40] sm:$0xff] %vm6387_vm6, %v6363_v23  ;;  %v6271_v14 = vadd.f32 1.0, %v7189_v3  ;;  %v5049_v32 = vadd.f32 %v6870_v31, %v15352_v48 }
 0x5ac   : > { %v4992_v36 = vpop.f32.mrf.mxu1  ;;  %7200 = vpow2.f32 %v6635_v41  ;;  %v6638_v5 = vmul.f32 -1.442695, %v15524_v30  ;;  %v15534_v57 = vadd.f32 %v15384_v2, %v6109_v26  ;;  %v7193_v52 = vpop.eup %7192  ;;  %v6366_v55 = vmul.f32 %v7191_v0, %v15456_v12 }
 0x5ad   : > { %7202 = vrcp.f32 %v6273_v39  ;;  %v7195_v46 = vpop.eup %7194  ;;  %v6274_v53 = vadd.f32 1.0, %v7193_v52  ;;  %v5046_v12 = vadd.f32 %v6867_v11, %v15347_v62  ;;  %v5047_v33 = vadd.f32 %v4992_v36, %v15354_v13 }
 0x5ae   : > { %v6871_v37 = vpop.f32.mrf.mxu1  ;;  %7204 = vrcp.f32 %v6271_v14  ;;  %v6636_v42 = vmul.f32 -1.442695, %v15534_v57  ;;  %6399 = vst.msk [vmem:[%s15407_s29 + $0x58] sm:$0xff] %vm6387_vm6, %v6366_v55  ;;  %v6364_v47 = vmul.f32 %v7195_v46, %v15461_v43  ;;  %v7197_v4 = vpop.eup %7196 }
 0x5af   : > { %7206 = vpow2.f32 %v6638_v5  ;;  %v6272_v15 = vadd.f32 1.0, %v7197_v4  ;;  %v5050_v21 = vadd.f32 %v6871_v37, %v15356_v54 }
 0x5b0   : > { %7208 = vrcp.f32 %v6274_v53  ;;  %v4995_v51 = vpop.f32.mrf.mxu1  ;;  %6397 = vst.msk [vmem:[%s15407_s29 + $0x48] sm:$0xff] %vm6387_vm6, %v6364_v47 }
 0x5b1   : > { %7210 = vpow2.f32 %v6636_v42  ;;  %v5048_v3 = vadd.f32 %v4995_v51, %v15358_v50 }
 0x5b2   : > { %7212 = vrcp.f32 %v6272_v15 }
 0x5b3   : > { %v6900_v6 = vpop.f32.mrf.mxu0 }
 0x5b4   : > { %v6075_v19 = vadd.f32 %v6900_v6, %v5045_v34 }
 0x5b5   : > { %v6006_v61 = vpop.f32.mrf.mxu0  ;;  %v6874_v62 = vpop.f32.mrf.mxu1 }
 0x5b6   : > { %v6114_v1 = vmul.f32 %v15377_v24, %v6075_v19  ;;  %v6073_v25 = vadd.f32 %v6006_v61, %v5043_v7  ;;  %v5053_v55 = vadd.f32 %v6874_v62, %v15360_v45 }
 0x5b7   : > { %v6901_v43 = vpop.f32.mrf.mxu0  ;;  %v7199_v18 = vpop.eup %7198 }
 0x5b8   : > { %v15549_v63 = vadd.f32 %v15384_v2, %v6114_v1  ;;  %v6112_v29 = vmul.f32 %v15377_v24, %v6073_v25  ;;  %v6076_v9 = vadd.f32 %v6901_v43, %v5046_v12  ;;  %v6277_v60 = vadd.f32 1.0, %v7199_v18  ;;  %v5008_v31 = vpop.f32.mrf.mxu1 }
 0x5b9   : > { %v6009_v11 = vpop.f32.mrf.mxu0  ;;  %v7201_v41 = vpop.eup %7200  ;;  %v5051_v45 = vadd.f32 %v5008_v31, %v15362_v44 }
 0x5ba   : > { %v6641_v40 = vmul.f32 -1.442695, %v15549_v63  ;;  %v15556_v22 = vadd.f32 %v15384_v2, %v6112_v29  ;;  %v6115_v17 = vmul.f32 %v15377_v24, %v6076_v9  ;;  %v6074_v28 = vadd.f32 %v6009_v11, %v5044_v58  ;;  %v7203_v39 = vpop.eup %7202  ;;  %v6875_v7 = vpop.f32.mrf.mxu1 }
 0x5bb   : > { %v6904_v10 = vpop.f32.mrf.mxu0  ;;  %v6275_v36 = vadd.f32 1.0, %v7201_v41  ;;  %v7205_v14 = vpop.eup %7204  ;;  %v6369_v34 = vmul.f32 %v7203_v39, %v15481_v49  ;;  %v5054_v9 = vadd.f32 %v6875_v7, %v15364_v27 }
 0x5bc   : > { %7214 = vpow2.f32 %v6641_v40  ;;  %v6639_v20 = vmul.f32 -1.442695, %v15556_v22  ;;  %v15562_v48 = vadd.f32 %v15384_v2, %v6115_v17  ;;  %v6113_v13 = vmul.f32 %v15377_v24, %v6074_v28  ;;  %v7207_v50 = vpop.eup %7206  ;;  %v5011_v62 = vpop.f32.mrf.mxu1 }
 0x5bd   : > { %7216 = vrcp.f32 %v6277_v60  ;;  %v6079_v23 = vadd.f32 %v6904_v10, %v5049_v32  ;;  %v6022_v26 = vpop.f32.mrf.mxu0  ;;  %v6367_v46 = vmul.f32 %v7205_v14, %v15488_v8  ;;  %v7209_v47 = vpop.eup %7208  ;;  %6402 = vst.msk [vmem:[%s15407_s29 + $0x70] sm:$0xff] %vm6387_vm6, %v6369_v34  ;;  %v6278_v49 = vadd.f32 1.0, %v7207_v50 }
 0x5be   : > { %7218 = vpow2.f32 %v6639_v20  ;;  %v6642_v54 = vmul.f32 -1.442695, %v15562_v48  ;;  %v15568_v5 = vadd.f32 %v15384_v2, %v6113_v13  ;;  %v6077_v0 = vadd.f32 %v6022_v26, %v5047_v33  ;;  %v7211_v12 = vpop.eup %7210 }
 0x5bf   : > { %7220 = vrcp.f32 %v6275_v36  ;;  %v6118_v37 = vmul.f32 %v15377_v24, %v6079_v23  ;;  %v6905_v52 = vpop.f32.mrf.mxu0  ;;  %6400 = vst.msk [vmem:[%s15407_s29 + $0x60] sm:$0xff] %vm6387_vm6, %v6367_v46  ;;  %v6370_v8 = vmul.f32 %v7209_v47, %v15498_v59  ;;  %v6276_v61 = vadd.f32 1.0, %v7211_v12  ;;  %v7213_v43 = vpop.eup %7212 }
 0x5c0   : > { %7222 = vpow2.f32 %v6642_v54  ;;  %v6640_v53 = vmul.f32 -1.442695, %v15568_v5  ;;  %v6116_v42 = vmul.f32 %v15377_v24, %v6077_v0  ;;  %v6080_v4 = vadd.f32 %v6905_v52, %v5050_v21 }
 0x5c1   : > { %v15579_v6 = vadd.f32 %v15384_v2, %v6118_v37  ;;  %v6025_v19 = vpop.f32.mrf.mxu0  ;;  %6403 = vst.msk [vmem:[%s15407_s29 + $0x78] sm:$0xff] %vm6387_vm6, %v6370_v8  ;;  %v6368_v11 = vmul.f32 %v7213_v43, %v15507_v38  ;;  %v5052_v38 = vadd.f32 %v5011_v62, %v15366_v16 }
 0x5c2   : > { %7224 = vpow2.f32 %v6640_v53  ;;  %v15586_v51 = vadd.f32 %v15384_v2, %v6116_v42  ;;  %v6078_v15 = vadd.f32 %v6025_v19, %v5048_v3  ;;  %v6119_v25 = vmul.f32 %v15377_v24, %v6080_v4 }
 0x5c3   : > { %7226 = vrcp.f32 %v6278_v49  ;;  %v6645_v1 = vmul.f32 -1.442695, %v15579_v6  ;;  %v6908_v58 = vpop.f32.mrf.mxu0  ;;  %6401 = vst.msk [vmem:[%s15407_s29 + $0x68] sm:$0xff] %vm6387_vm6, %v6368_v11 }
 0x5c4   : > { %v6643_v44 = vmul.f32 -1.442695, %v15586_v51  ;;  %v6117_v59 = vmul.f32 %v15377_v24, %v6078_v15  ;;  %v6083_v29 = vadd.f32 %v6908_v58, %v5053_v55  ;;  %7228 = vrcp.f32 %v6276_v61 }
 0x5c5   : > { %v15597_v32 = vadd.f32 %v15384_v2, %v6119_v25  ;;  %v6038_v33 = vpop.f32.mrf.mxu0  ;;  %7230 = vpow2.f32 %v6645_v1 }
 0x5c6   : > { %v15600_v18 = vadd.f32 %v15384_v2, %v6117_v59  ;;  %v6122_v40 = vmul.f32 %v15377_v24, %v6083_v29  ;;  %v6081_v17 = vadd.f32 %v6038_v33, %v5051_v45  ;;  %7232 = vpow2.f32 %v6643_v44 }
 0x5c7   : > { %v6646_v27 = vmul.f32 -1.442695, %v15597_v32  ;;  %v6909_v28 = vpop.f32.mrf.mxu0 }
 0x5c8   : > { %v6644_v60 = vmul.f32 -1.442695, %v15600_v18  ;;  %v15609_v10 = vadd.f32 %v15384_v2, %v6122_v40  ;;  %v6120_v21 = vmul.f32 %v15377_v24, %v6081_v17  ;;  %v6084_v41 = vadd.f32 %v6909_v28, %v5054_v9 }
 0x5c9   : > { %v7215_v20 = vpop.eup %7214  ;;  %7234 = vpow2.f32 %v6646_v27  ;;  %v6041_v13 = vpop.f32.mrf.mxu0 }
 0x5ca   : > { %v7217_v31 = vpop.eup %7216  ;;  %v6281_v36 = vadd.f32 1.0, %v7215_v20  ;;  %7236 = vpow2.f32 %v6644_v60  ;;  %v6649_v23 = vmul.f32 -1.442695, %v15609_v10  ;;  %v15614_v26 = vadd.f32 %v15384_v2, %v6120_v21 }
 0x5cb   : > { %v7219_v16 = vpop.eup %7218  ;;  %v6373_v3 = vmul.f32 %v7217_v31, %v15513_v56  ;;  %v6123_v39 = vmul.f32 %v15377_v24, %v6084_v41  ;;  %v6082_v54 = vadd.f32 %v6041_v13, %v5052_v38 }
 0x5cc   : > { %v7221_v0 = vpop.eup %7220  ;;  %7238 = vrcp.f32 %v6281_v36  ;;  %v6279_v14 = vadd.f32 1.0, %v7219_v16  ;;  %v6647_v34 = vmul.f32 -1.442695, %v15614_v26 }
 0x5cd   : > { %v7223_v37 = vpop.eup %7222  ;;  %6406 = vst.msk [vmem:[%s15407_s29 + $0x90] sm:$0xff] %vm6387_vm6, %v6373_v3  ;;  %v6371_v52 = vmul.f32 %v7221_v0, %v15518_v35  ;;  %7240 = vpow2.f32 %v6649_v23  ;;  %v15623_v55 = vadd.f32 %v15384_v2, %v6123_v39  ;;  %v6121_v56 = vmul.f32 %v15377_v24, %v6082_v54 }
 0x5ce   : > { %7242 = vrcp.f32 %v6279_v14  ;;  %v6282_v50 = vadd.f32 1.0, %v7223_v37 }
 0x5cf   : > { %v7225_v46 = vpop.eup %7224  ;;  %6404 = vst.msk [vmem:[%s15407_s29 + $0x80] sm:$0xff] %vm6387_vm6, %v6371_v52  ;;  %7244 = vpow2.f32 %v6647_v34  ;;  %v6650_v53 = vmul.f32 -1.442695, %v15623_v55  ;;  %v15630_v42 = vadd.f32 %v15384_v2, %v6121_v56 }
 0x5d0   : > { %v7227_v35 = vpop.eup %7226  ;;  %7246 = vrcp.f32 %v6282_v50  ;;  %v6280_v7 = vadd.f32 1.0, %v7225_v46 }
 0x5d1   : > { %v6374_v47 = vmul.f32 %v7227_v35, %v15524_v30  ;;  %7248 = vpow2.f32 %v6650_v53  ;;  %v6648_v24 = vmul.f32 -1.442695, %v15630_v42  ;;  %v7229_v49 = vpop.eup %7228 }
 0x5d2   : > { %7250 = vrcp.f32 %v6280_v7  ;;  %v7231_v4 = vpop.eup %7230  ;;  %v6372_v19 = vmul.f32 %v7229_v49, %v15534_v57 }
 0x5d3   : > { %6407 = vst.msk [vmem:[%s15407_s29 + $0x98] sm:$0xff] %vm6387_vm6, %v6374_v47  ;;  %7252 = vpow2.f32 %v6648_v24  ;;  %v7233_v45 = vpop.eup %7232  ;;  %v6285_v12 = vadd.f32 1.0, %v7231_v4 }
 0x5d4   : > { %6405 = vst.msk [vmem:[%s15407_s29 + $0x88] sm:$0xff] %vm6387_vm6, %v6372_v19  ;;  %v6283_v2 = vadd.f32 1.0, %v7233_v45 }
 0x5d5   : > { %7254 = vrcp.f32 %v6285_v12 }
 0x5d6   : > { %v7235_v8 = vpop.eup %7234  ;;  %7256 = vrcp.f32 %v6283_v2 }
 0x5d7   : > { %v7237_v30 = vpop.eup %7236  ;;  %v6286_v15 = vadd.f32 1.0, %v7235_v8 }
 0x5d8   : > { %v6284_v61 = vadd.f32 1.0, %v7237_v30 }
 0x5d9   : > { %v7239_v1 = vpop.eup %7238  ;;  %7258 = vrcp.f32 %v6286_v15 }
 0x5da   : > { %v7241_v25 = vpop.eup %7240  ;;  %v6377_v58 = vmul.f32 %v7239_v1, %v15549_v63  ;;  %7260 = vrcp.f32 %v6284_v61 }
 0x5db   : > { %v7243_v57 = vpop.eup %7242  ;;  %v6289_v43 = vadd.f32 1.0, %v7241_v25 }
 0x5dc   : > { %v7245_v44 = vpop.eup %7244  ;;  %6410 = vst.msk [vmem:[%s15407_s29 + $0xb0] sm:$0xff] %vm6387_vm6, %v6377_v58  ;;  %v6375_v59 = vmul.f32 %v7243_v57, %v15556_v22 }
 0x5dd   : > { %v7247_v29 = vpop.eup %7246  ;;  %7262 = vrcp.f32 %v6289_v43  ;;  %v6287_v9 = vadd.f32 1.0, %v7245_v44 }
 0x5de   : > { %v7249_v62 = vpop.eup %7248  ;;  %6408 = vst.msk [vmem:[%s15407_s29 + $0xa0] sm:$0xff] %vm6387_vm6, %v6375_v59  ;;  %v6378_v11 = vmul.f32 %v7247_v29, %v15562_v48 }
 0x5df   : > { %v7251_v63 = vpop.eup %7250  ;;  %7264 = vrcp.f32 %v6287_v9  ;;  %v6290_v33 = vadd.f32 1.0, %v7249_v62 }
 0x5e0   : > { %v7253_v40 = vpop.eup %7252  ;;  %6411 = vst.msk [vmem:[%s15407_s29 + $0xb8] sm:$0xff] %vm6387_vm6, %v6378_v11  ;;  %v6376_v17 = vmul.f32 %v7251_v63, %v15568_v5 }
 0x5e1   : > { %7266 = vrcp.f32 %v6290_v33  ;;  %v6288_v22 = vadd.f32 1.0, %v7253_v40 }
 0x5e2   : > { %6409 = vst.msk [vmem:[%s15407_s29 + $0xa8] sm:$0xff] %vm6387_vm6, %v6376_v17  ;;  %v7255_v27 = vpop.eup %7254 }
 0x5e3   : > { %7268 = vrcp.f32 %v6288_v22  ;;  %v7257_v48 = vpop.eup %7256  ;;  %v6381_v28 = vmul.f32 %v7255_v27, %v15579_v6 }
 0x5e4   : > { %v6379_v38 = vmul.f32 %v7257_v48, %v15586_v51 }
 0x5e5   : > { %6414 = vst.msk [vmem:[%s15407_s29 + $0xd0] sm:$0xff] %vm6387_vm6, %v6381_v28 }
 0x5e6   : > { %v7259_v60 = vpop.eup %7258  ;;  %6412 = vst.msk [vmem:[%s15407_s29 + $0xc0] sm:$0xff] %vm6387_vm6, %v6379_v38 }
 0x5e7   : > { %v7261_v21 = vpop.eup %7260  ;;  %v6382_v5 = vmul.f32 %v7259_v60, %v15597_v32 }
 0x5e8   : > { %v6380_v41 = vmul.f32 %v7261_v21, %v15600_v18 }
 0x5e9   : > { %6415 = vst.msk [vmem:[%s15407_s29 + $0xd8] sm:$0xff] %vm6387_vm6, %v6382_v5 }
 0x5ea   : > { %v7263_v20 = vpop.eup %7262  ;;  %6413 = vst.msk [vmem:[%s15407_s29 + $0xc8] sm:$0xff] %vm6387_vm6, %v6380_v41 }
 0x5eb   : > { %v6385_v6 = vmul.f32 %v7263_v20, %v15609_v10 }
 0x5ec   : > { %v7265_v51 = vpop.eup %7264 }
 0x5ed   : > { %6418 = vst.msk [vmem:[%s15407_s29 + $0xf0] sm:$0xff] %vm6387_vm6, %v6385_v6  ;;  %v6383_v13 = vmul.f32 %v7265_v51, %v15614_v26 }
 0x5ee   : > { %v7267_v31 = vpop.eup %7266 }
 0x5ef   : > { %6416 = vst.msk [vmem:[%s15407_s29 + $0xe0] sm:$0xff] %vm6387_vm6, %v6383_v13  ;;  %v6386_v36 = vmul.f32 %v7267_v31, %v15623_v55 }
 0x5f0   : > { %v7269_v32 = vpop.eup %7268 }
 0x5f1   : > { %6419 = vst.msk [vmem:[%s15407_s29 + $0xf8] sm:$0xff] %vm6387_vm6, %v6386_v36  ;;  %v6384_v18 = vmul.f32 %v7269_v32, %v15630_v42 }
 0x5f3   : > { %6417 = vst.msk [vmem:[%s15407_s29 + $0xe8] sm:$0xff] %vm6387_vm6, %v6384_v18 }
 0x5f4 PF: > { %s18_s27 = sadd.s32 1, %s7321_s27  }
 0x5f5   : > { %p15_p4 = scmp.ge.s32.totalorder %s18_s27, 4  }
 0x5f7   :  { %17 = sbr.rel (!%p15_p4) target bundleno = 1 (0x1), region = 85 }

</bundles_post_ra>
